<compile_context>
chip_gen: v7x
topology: tpu7x:2x2x1
jax: 0.10.0
libtpu: 0.0.40
codegen_flags: <defaults>
</compile_context>

<pallas_src>
import jax
import jax.numpy as jnp
from jax import lax
from jax.experimental import pallas as pl
from jax.experimental.pallas import tpu as pltpu

KSIZE = 3          # kernel_size=3, padding=1 (shape preserving)
_MXU_MIN_HALF = 8  # use the implicit-GEMM MXU path once half*27 is non-trivial


def _make_tap_masks(D, H, W):
    """(27, 1, D*H*W) f32 validity masks per 3x3x3 tap (zero-padding boundary)."""
    d = jnp.arange(D)[:, None, None]
    h = jnp.arange(H)[None, :, None]
    w = jnp.arange(W)[None, None, :]
    rows = []
    for kd in range(KSIZE):
        for kh in range(KSIZE):
            for kw in range(KSIZE):
                od, oh, ow = kd - 1, kh - 1, kw - 1
                m = ((d + od >= 0) & (d + od < D) &
                     (h + oh >= 0) & (h + oh < H) &
                     (w + ow >= 0) & (w + ow < W))
                rows.append(m.reshape(1, D * H * W))
    return jnp.stack(rows, axis=0).astype(jnp.float32)


def iconv3d_forward(x, wf, bf, wg, bg):
    """Fused reversible block forward, NCDHW in / NCDHW out.

    wf, wg: (half, half, 3, 3, 3) in PyTorch OIDHW order; bf, bg: (half,).
    """
    N, C, D, H, W = x.shape
    assert C % 2 == 0
    half = C // 2
    assert wf.shape == (half, half, KSIZE, KSIZE, KSIZE)
    assert wg.shape == (half, half, KSIZE, KSIZE, KSIZE)
    S = D * H * W
    HW = H * W

    # PyTorch OIDHW -> (tap, co, ci) matrices for the per-tap channel mix.
    def prep_w(w):
        return (jnp.transpose(w, (2, 3, 4, 0, 1))
                .reshape(KSIZE ** 3, half, half).astype(jnp.float32))

    wf_t, wg_t = prep_w(wf), prep_w(wg)
    bf_c = bf.reshape(half, 1).astype(jnp.float32)
    bg_c = bg.reshape(half, 1).astype(jnp.float32)
    masks = _make_tap_masks(D, H, W)          # (27, 1, S), fetched into VMEM once
    x_flat = x.reshape(N, C, S)               # lane axis = flattened spatial (layout plumbing)

    def kernel(x_ref, wf_ref, bf_ref, wg_ref, bg_ref, mask_ref, o_ref):
        xv = x_ref[...].astype(jnp.float32)   # (C, S)
        x1 = xv[:half]
        x2 = xv[half:]

        def conv3x3x3(z, w_ref, b_ref, residual):
            # residual + bias + Conv3d(z), all (half, S) f32, z kept in vregs/VMEM.
            acc = residual + b_ref[...]                       # (half,S) + (half,1)
            for kd in range(KSIZE):
                for kh in range(KSIZE):
                    for kw in range(KSIZE):
                        tap = (kd * KSIZE + kh) * KSIZE + kw
                        delta = (kd - 1) * HW + (kh - 1) * W + (kw - 1)
                        if (kd, kh, kw) == (1, 1, 1):
                            patch = z                         # center tap: no shift/mask
                        else:
                            # XLU lane rotate (free-ish slot) + boundary mask multiply;
                            # rolled[s] == z[s + delta] wherever the mask is 1.
                            rolled = pltpu.roll(z, (-delta) % S, 1)
                            patch = rolled * mask_ref[tap]    # (half,S) * (1,S)
                        w_tap = w_ref[tap]                    # (co, ci)
                        if half >= _MXU_MIN_HALF:
                            # Implicit-GEMM MXU path: (co,ci) @ (ci,S), f32 accumulate.
                            acc = acc + jnp.dot(
                                w_tap, patch,
                                preferred_element_type=jnp.float32,
                                precision=lax.Precision.HIGHEST)
                        else:
                            # Tiny-channel VPU path: vectorized over co (sublanes)
                            # and S (lanes); no scalar weight splats.
                            for ci in range(half):
                                acc = acc + w_tap[:, ci:ci + 1] * patch[ci:ci + 1, :]
            return acc

        # y1 = x1 + f(x2): store its channel rows immediately, keep it live for g.
        y1 = conv3x3x3(x2, wf_ref, bf_ref, x1)
        o_ref[:half] = y1.astype(o_ref.dtype)
        # y2 = x2 + g(y1)
        y2 = conv3x3x3(y1, wg_ref, bg_ref, x2)
        o_ref[half:] = y2.astype(o_ref.dtype)

    out_flat = pl.pallas_call(
        kernel,
        out_shape=jax.ShapeDtypeStruct((N, C, S), x.dtype),
        grid_spec=pltpu.PrefetchScalarGridSpec(
            num_scalar_prefetch=0,
            grid=(N,),
            in_specs=[
                pl.BlockSpec((pl.Squeezed(), C, S), lambda n: (n, 0, 0)),   # x
                pl.BlockSpec((KSIZE ** 3, half, half), lambda n: (0, 0, 0)),  # Wf
                pl.BlockSpec((half, 1), lambda n: (0, 0)),                    # bf
                pl.BlockSpec((KSIZE ** 3, half, half), lambda n: (0, 0, 0)),  # Wg
                pl.BlockSpec((half, 1), lambda n: (0, 0)),                    # bg
                pl.BlockSpec((KSIZE ** 3, 1, S), lambda n: (0, 0, 0)),        # masks
            ],
            out_specs=pl.BlockSpec((pl.Squeezed(), C, S), lambda n: (n, 0, 0)),
        ),
        compiler_params=pltpu.CompilerParams(
            dimension_semantics=("parallel",)),
    )(x_flat, wf_t, bf_c, wg_t, bg_c, masks)

    return out_flat.reshape(N, C, D, H, W)


class IConv3dPallas:
    """Pallas equivalent of IConv3d(in_c, out_c, kernel_size=3, padding=1, invert=True)."""

    def __init__(self, in_channels, out_channels, key, invert=True):
        if not invert:
            # TODO(synk): invert=False path is a plain Conv3d; not needed here.
            raise NotImplementedError("non-invert path is a plain Conv3d")
        if in_channels != out_channels or in_channels % 2 != 0:
            raise Exception(
                f"Cannot inverse convolution with in_channels {in_channels} "
                f"and out_channels {out_channels}")
        self.half = in_channels // 2
        kf, kg = jax.random.split(key)
        fan_in = self.half * KSIZE ** 3
        bound = 1.0 / float(fan_in) ** 0.5

        def init(k):
            kw_, kb = jax.random.split(k)
            # PyTorch Conv3d weight layout: (out_ch, in_ch, kd, kh, kw).
            w = jax.random.uniform(
                kw_, (self.half, self.half, KSIZE, KSIZE, KSIZE),
                jnp.float32, -bound, bound)
            b = jax.random.uniform(kb, (self.half,), jnp.float32, -bound, bound)
            return w, b

        self.wf, self.bf = init(kf)   # f_conv params
        self.wg, self.bg = init(kg)   # g_conv params

    def __call__(self, x_ncdhw):
        return iconv3d_forward(x_ncdhw, self.wf, self.bf, self.wg, self.bg)


# ---------------------------------------------------------------------------
# Pure-JAX reference (for correctness check).
# ---------------------------------------------------------------------------
def _conv3d_ref(x, w, b):
    out = lax.conv_general_dilated(
        x, w, window_strides=(1, 1, 1),
        padding=((1, 1), (1, 1), (1, 1)),
        dimension_numbers=("NCDHW", "OIDHW", "NCDHW"),
        precision=lax.Precision.HIGHEST)
    return out + b.reshape(1, -1, 1, 1, 1)


def _iconv3d_ref(model, x):
    half = model.half
    x1, x2 = x[:, :half], x[:, half:]
    y1 = x1 + _conv3d_ref(x2, model.wf, model.bf)
    y2 = x2 + _conv3d_ref(y1, model.wg, model.bg)
    return jnp.concatenate([y1, y2], axis=1)


if __name__ == "__main__":
    key = jax.random.PRNGKey(0)
    k_x, k_p = jax.random.split(key)

    N, C, D, H, W = 2, 4, 8, 8, 8      # NCDHW, C even; S = D*H*W = 512 (lane-dense)
    x = jax.random.normal(k_x, (N, C, D, H, W), jnp.float32)

    model = IConv3dPallas(C, C, k_p, invert=True)

    y = jax.block_until_ready(model(x))
    y_ref = jax.block_until_ready(_iconv3d_ref(model, x))

    assert y.shape == (N, C, D, H, W)
    assert jnp.allclose(y, y_ref, atol=1e-3, rtol=1e-3), "mismatch vs JAX reference"

    print("KERNEL_OK")
</pallas_src>

<mosaic_0001>
module attributes {stable_mosaic.version = 11 : i64} {
  func.func @kernel(%arg0: i32, %arg1: memref<1x4x512xf32, #tpu.memory_space<vmem>>, %arg2: memref<27x2x2xf32, #tpu.memory_space<vmem>>, %arg3: memref<2x1xf32, #tpu.memory_space<vmem>>, %arg4: memref<27x2x2xf32, #tpu.memory_space<vmem>>, %arg5: memref<2x1xf32, #tpu.memory_space<vmem>>, %arg6: memref<27x1x512xf32, #tpu.memory_space<vmem>>, %arg7: memref<1x4x512xf32, #tpu.memory_space<vmem>>) attributes {dimension_semantics = [#tpu.dimension_semantics<parallel>], iteration_bounds = array<i64: 2>, scalar_prefetch = 0 : i64, scratch_operands = 0 : i64, tpu.core_type = #tpu.core_type<tc>, window_params = [{transform_indices = @transform_0, window_bounds = array<i64: 1, 4, 512>}, {pipeline_mode = #tpu.pipeline_mode<synchronous>, transform_indices = @transform_1, window_bounds = array<i64: 27, 2, 2>}, {pipeline_mode = #tpu.pipeline_mode<synchronous>, transform_indices = @transform_2, window_bounds = array<i64: 2, 1>}, {pipeline_mode = #tpu.pipeline_mode<synchronous>, transform_indices = @transform_3, window_bounds = array<i64: 27, 2, 2>}, {pipeline_mode = #tpu.pipeline_mode<synchronous>, transform_indices = @transform_4, window_bounds = array<i64: 2, 1>}, {pipeline_mode = #tpu.pipeline_mode<synchronous>, transform_indices = @transform_5, window_bounds = array<i64: 27, 1, 512>}, {transform_indices = @transform_6, window_bounds = array<i64: 1, 4, 512>}]} {
    %c0 = arith.constant 0 : index
    %c0_0 = arith.constant 0 : index
    %c0_1 = arith.constant 0 : index
    %0 = vector.load %arg1[%c0, %c0_0, %c0_1] : memref<1x4x512xf32, #tpu.memory_space<vmem>>, vector<1x4x512xf32>
    %1 = vector.shape_cast %0 : vector<1x4x512xf32> to vector<4x512xf32>
    %2 = vector.extract_strided_slice %1 {offsets = [0, 0], sizes = [2, 512], strides = [1, 1]} : vector<4x512xf32> to vector<2x512xf32>
    %3 = vector.extract_strided_slice %1 {offsets = [2, 0], sizes = [2, 512], strides = [1, 1]} : vector<4x512xf32> to vector<2x512xf32>
    %c0_2 = arith.constant 0 : index
    %c0_3 = arith.constant 0 : index
    %4 = vector.load %arg3[%c0_2, %c0_3] : memref<2x1xf32, #tpu.memory_space<vmem>>, vector<2x1xf32>
    %5 = vector.broadcast %4 : vector<2x1xf32> to vector<2x512xf32>
    %6 = arith.addf %2, %5 : vector<2x512xf32>
    %c73_i32 = arith.constant 73 : i32
    %7 = tpu.dynamic_rotate %3 by %c73_i32 dim 1 : vector<2x512xf32>, i32 -> vector<2x512xf32>
    %c0_4 = arith.constant 0 : index
    %c0_5 = arith.constant 0 : index
    %c0_6 = arith.constant 0 : index
    %8 = vector.load %arg6[%c0_4, %c0_5, %c0_6] : memref<27x1x512xf32, #tpu.memory_space<vmem>>, vector<1x1x512xf32>
    %9 = vector.shape_cast %8 : vector<1x1x512xf32> to vector<1x512xf32>
    %10 = vector.broadcast %9 : vector<1x512xf32> to vector<2x512xf32>
    %11 = arith.mulf %7, %10 : vector<2x512xf32>
    %c0_7 = arith.constant 0 : index
    %c0_8 = arith.constant 0 : index
    %c0_9 = arith.constant 0 : index
    %12 = vector.load %arg2[%c0_7, %c0_8, %c0_9] : memref<27x2x2xf32, #tpu.memory_space<vmem>>, vector<1x2x2xf32>
    %13 = vector.shape_cast %12 : vector<1x2x2xf32> to vector<2x2xf32>
    %14 = vector.extract_strided_slice %13 {offsets = [0, 0], sizes = [2, 1], strides = [1, 1]} : vector<2x2xf32> to vector<2x1xf32>
    %15 = vector.extract_strided_slice %11 {offsets = [0, 0], sizes = [1, 512], strides = [1, 1]} : vector<2x512xf32> to vector<1x512xf32>
    %16 = vector.broadcast %14 : vector<2x1xf32> to vector<2x512xf32>
    %17 = vector.broadcast %15 : vector<1x512xf32> to vector<2x512xf32>
    %18 = arith.mulf %16, %17 : vector<2x512xf32>
    %19 = arith.addf %6, %18 : vector<2x512xf32>
    %20 = vector.extract_strided_slice %13 {offsets = [0, 1], sizes = [2, 1], strides = [1, 1]} : vector<2x2xf32> to vector<2x1xf32>
    %21 = vector.extract_strided_slice %11 {offsets = [1, 0], sizes = [1, 512], strides = [1, 1]} : vector<2x512xf32> to vector<1x512xf32>
    %22 = vector.broadcast %20 : vector<2x1xf32> to vector<2x512xf32>
    %23 = vector.broadcast %21 : vector<1x512xf32> to vector<2x512xf32>
    %24 = arith.mulf %22, %23 : vector<2x512xf32>
    %25 = arith.addf %19, %24 : vector<2x512xf32>
    %c72_i32 = arith.constant 72 : i32
    %26 = tpu.dynamic_rotate %3 by %c72_i32 dim 1 : vector<2x512xf32>, i32 -> vector<2x512xf32>
    %c1 = arith.constant 1 : index
    %c0_10 = arith.constant 0 : index
    %c0_11 = arith.constant 0 : index
    %27 = vector.load %arg6[%c1, %c0_10, %c0_11] : memref<27x1x512xf32, #tpu.memory_space<vmem>>, vector<1x1x512xf32>
    %28 = vector.shape_cast %27 : vector<1x1x512xf32> to vector<1x512xf32>
    %29 = vector.broadcast %28 : vector<1x512xf32> to vector<2x512xf32>
    %30 = arith.mulf %26, %29 : vector<2x512xf32>
    %c1_12 = arith.constant 1 : index
    %c0_13 = arith.constant 0 : index
    %c0_14 = arith.constant 0 : index
    %31 = vector.load %arg2[%c1_12, %c0_13, %c0_14] : memref<27x2x2xf32, #tpu.memory_space<vmem>>, vector<1x2x2xf32>
    %32 = vector.shape_cast %31 : vector<1x2x2xf32> to vector<2x2xf32>
    %33 = vector.extract_strided_slice %32 {offsets = [0, 0], sizes = [2, 1], strides = [1, 1]} : vector<2x2xf32> to vector<2x1xf32>
    %34 = vector.extract_strided_slice %30 {offsets = [0, 0], sizes = [1, 512], strides = [1, 1]} : vector<2x512xf32> to vector<1x512xf32>
    %35 = vector.broadcast %33 : vector<2x1xf32> to vector<2x512xf32>
    %36 = vector.broadcast %34 : vector<1x512xf32> to vector<2x512xf32>
    %37 = arith.mulf %35, %36 : vector<2x512xf32>
    %38 = arith.addf %25, %37 : vector<2x512xf32>
    %39 = vector.extract_strided_slice %32 {offsets = [0, 1], sizes = [2, 1], strides = [1, 1]} : vector<2x2xf32> to vector<2x1xf32>
    %40 = vector.extract_strided_slice %30 {offsets = [1, 0], sizes = [1, 512], strides = [1, 1]} : vector<2x512xf32> to vector<1x512xf32>
    %41 = vector.broadcast %39 : vector<2x1xf32> to vector<2x512xf32>
    %42 = vector.broadcast %40 : vector<1x512xf32> to vector<2x512xf32>
    %43 = arith.mulf %41, %42 : vector<2x512xf32>
    %44 = arith.addf %38, %43 : vector<2x512xf32>
    %c71_i32 = arith.constant 71 : i32
    %45 = tpu.dynamic_rotate %3 by %c71_i32 dim 1 : vector<2x512xf32>, i32 -> vector<2x512xf32>
    %c2 = arith.constant 2 : index
    %c0_15 = arith.constant 0 : index
    %c0_16 = arith.constant 0 : index
    %46 = vector.load %arg6[%c2, %c0_15, %c0_16] : memref<27x1x512xf32, #tpu.memory_space<vmem>>, vector<1x1x512xf32>
    %47 = vector.shape_cast %46 : vector<1x1x512xf32> to vector<1x512xf32>
    %48 = vector.broadcast %47 : vector<1x512xf32> to vector<2x512xf32>
    %49 = arith.mulf %45, %48 : vector<2x512xf32>
    %c2_17 = arith.constant 2 : index
    %c0_18 = arith.constant 0 : index
    %c0_19 = arith.constant 0 : index
    %50 = vector.load %arg2[%c2_17, %c0_18, %c0_19] : memref<27x2x2xf32, #tpu.memory_space<vmem>>, vector<1x2x2xf32>
    %51 = vector.shape_cast %50 : vector<1x2x2xf32> to vector<2x2xf32>
    %52 = vector.extract_strided_slice %51 {offsets = [0, 0], sizes = [2, 1], strides = [1, 1]} : vector<2x2xf32> to vector<2x1xf32>
    %53 = vector.extract_strided_slice %49 {offsets = [0, 0], sizes = [1, 512], strides = [1, 1]} : vector<2x512xf32> to vector<1x512xf32>
    %54 = vector.broadcast %52 : vector<2x1xf32> to vector<2x512xf32>
    %55 = vector.broadcast %53 : vector<1x512xf32> to vector<2x512xf32>
    %56 = arith.mulf %54, %55 : vector<2x512xf32>
    %57 = arith.addf %44, %56 : vector<2x512xf32>
    %58 = vector.extract_strided_slice %51 {offsets = [0, 1], sizes = [2, 1], strides = [1, 1]} : vector<2x2xf32> to vector<2x1xf32>
    %59 = vector.extract_strided_slice %49 {offsets = [1, 0], sizes = [1, 512], strides = [1, 1]} : vector<2x512xf32> to vector<1x512xf32>
    %60 = vector.broadcast %58 : vector<2x1xf32> to vector<2x512xf32>
    %61 = vector.broadcast %59 : vector<1x512xf32> to vector<2x512xf32>
    %62 = arith.mulf %60, %61 : vector<2x512xf32>
    %63 = arith.addf %57, %62 : vector<2x512xf32>
    %c65_i32 = arith.constant 65 : i32
    %64 = tpu.dynamic_rotate %3 by %c65_i32 dim 1 : vector<2x512xf32>, i32 -> vector<2x512xf32>
    %c3 = arith.constant 3 : index
    %c0_20 = arith.constant 0 : index
    %c0_21 = arith.constant 0 : index
    %65 = vector.load %arg6[%c3, %c0_20, %c0_21] : memref<27x1x512xf32, #tpu.memory_space<vmem>>, vector<1x1x512xf32>
    %66 = vector.shape_cast %65 : vector<1x1x512xf32> to vector<1x512xf32>
    %67 = vector.broadcast %66 : vector<1x512xf32> to vector<2x512xf32>
    %68 = arith.mulf %64, %67 : vector<2x512xf32>
    %c3_22 = arith.constant 3 : index
    %c0_23 = arith.constant 0 : index
    %c0_24 = arith.constant 0 : index
    %69 = vector.load %arg2[%c3_22, %c0_23, %c0_24] : memref<27x2x2xf32, #tpu.memory_space<vmem>>, vector<1x2x2xf32>
    %70 = vector.shape_cast %69 : vector<1x2x2xf32> to vector<2x2xf32>
    %71 = vector.extract_strided_slice %70 {offsets = [0, 0], sizes = [2, 1], strides = [1, 1]} : vector<2x2xf32> to vector<2x1xf32>
    %72 = vector.extract_strided_slice %68 {offsets = [0, 0], sizes = [1, 512], strides = [1, 1]} : vector<2x512xf32> to vector<1x512xf32>
    %73 = vector.broadcast %71 : vector<2x1xf32> to vector<2x512xf32>
    %74 = vector.broadcast %72 : vector<1x512xf32> to vector<2x512xf32>
    %75 = arith.mulf %73, %74 : vector<2x512xf32>
    %76 = arith.addf %63, %75 : vector<2x512xf32>
    %77 = vector.extract_strided_slice %70 {offsets = [0, 1], sizes = [2, 1], strides = [1, 1]} : vector<2x2xf32> to vector<2x1xf32>
    %78 = vector.extract_strided_slice %68 {offsets = [1, 0], sizes = [1, 512], strides = [1, 1]} : vector<2x512xf32> to vector<1x512xf32>
    %79 = vector.broadcast %77 : vector<2x1xf32> to vector<2x512xf32>
    %80 = vector.broadcast %78 : vector<1x512xf32> to vector<2x512xf32>
    %81 = arith.mulf %79, %80 : vector<2x512xf32>
    %82 = arith.addf %76, %81 : vector<2x512xf32>
    %c64_i32 = arith.constant 64 : i32
    %83 = tpu.dynamic_rotate %3 by %c64_i32 dim 1 : vector<2x512xf32>, i32 -> vector<2x512xf32>
    %c4 = arith.constant 4 : index
    %c0_25 = arith.constant 0 : index
    %c0_26 = arith.constant 0 : index
    %84 = vector.load %arg6[%c4, %c0_25, %c0_26] : memref<27x1x512xf32, #tpu.memory_space<vmem>>, vector<1x1x512xf32>
    %85 = vector.shape_cast %84 : vector<1x1x512xf32> to vector<1x512xf32>
    %86 = vector.broadcast %85 : vector<1x512xf32> to vector<2x512xf32>
    %87 = arith.mulf %83, %86 : vector<2x512xf32>
    %c4_27 = arith.constant 4 : index
    %c0_28 = arith.constant 0 : index
    %c0_29 = arith.constant 0 : index
    %88 = vector.load %arg2[%c4_27, %c0_28, %c0_29] : memref<27x2x2xf32, #tpu.memory_space<vmem>>, vector<1x2x2xf32>
    %89 = vector.shape_cast %88 : vector<1x2x2xf32> to vector<2x2xf32>
    %90 = vector.extract_strided_slice %89 {offsets = [0, 0], sizes = [2, 1], strides = [1, 1]} : vector<2x2xf32> to vector<2x1xf32>
    %91 = vector.extract_strided_slice %87 {offsets = [0, 0], sizes = [1, 512], strides = [1, 1]} : vector<2x512xf32> to vector<1x512xf32>
    %92 = vector.broadcast %90 : vector<2x1xf32> to vector<2x512xf32>
    %93 = vector.broadcast %91 : vector<1x512xf32> to vector<2x512xf32>
    %94 = arith.mulf %92, %93 : vector<2x512xf32>
    %95 = arith.addf %82, %94 : vector<2x512xf32>
    %96 = vector.extract_strided_slice %89 {offsets = [0, 1], sizes = [2, 1], strides = [1, 1]} : vector<2x2xf32> to vector<2x1xf32>
    %97 = vector.extract_strided_slice %87 {offsets = [1, 0], sizes = [1, 512], strides = [1, 1]} : vector<2x512xf32> to vector<1x512xf32>
    %98 = vector.broadcast %96 : vector<2x1xf32> to vector<2x512xf32>
    %99 = vector.broadcast %97 : vector<1x512xf32> to vector<2x512xf32>
    %100 = arith.mulf %98, %99 : vector<2x512xf32>
    %101 = arith.addf %95, %100 : vector<2x512xf32>
    %c63_i32 = arith.constant 63 : i32
    %102 = tpu.dynamic_rotate %3 by %c63_i32 dim 1 : vector<2x512xf32>, i32 -> vector<2x512xf32>
    %c5 = arith.constant 5 : index
    %c0_30 = arith.constant 0 : index
    %c0_31 = arith.constant 0 : index
    %103 = vector.load %arg6[%c5, %c0_30, %c0_31] : memref<27x1x512xf32, #tpu.memory_space<vmem>>, vector<1x1x512xf32>
    %104 = vector.shape_cast %103 : vector<1x1x512xf32> to vector<1x512xf32>
    %105 = vector.broadcast %104 : vector<1x512xf32> to vector<2x512xf32>
    %106 = arith.mulf %102, %105 : vector<2x512xf32>
    %c5_32 = arith.constant 5 : index
    %c0_33 = arith.constant 0 : index
    %c0_34 = arith.constant 0 : index
    %107 = vector.load %arg2[%c5_32, %c0_33, %c0_34] : memref<27x2x2xf32, #tpu.memory_space<vmem>>, vector<1x2x2xf32>
    %108 = vector.shape_cast %107 : vector<1x2x2xf32> to vector<2x2xf32>
    %109 = vector.extract_strided_slice %108 {offsets = [0, 0], sizes = [2, 1], strides = [1, 1]} : vector<2x2xf32> to vector<2x1xf32>
    %110 = vector.extract_strided_slice %106 {offsets = [0, 0], sizes = [1, 512], strides = [1, 1]} : vector<2x512xf32> to vector<1x512xf32>
    %111 = vector.broadcast %109 : vector<2x1xf32> to vector<2x512xf32>
    %112 = vector.broadcast %110 : vector<1x512xf32> to vector<2x512xf32>
    %113 = arith.mulf %111, %112 : vector<2x512xf32>
    %114 = arith.addf %101, %113 : vector<2x512xf32>
    %115 = vector.extract_strided_slice %108 {offsets = [0, 1], sizes = [2, 1], strides = [1, 1]} : vector<2x2xf32> to vector<2x1xf32>
    %116 = vector.extract_strided_slice %106 {offsets = [1, 0], sizes = [1, 512], strides = [1, 1]} : vector<2x512xf32> to vector<1x512xf32>
    %117 = vector.broadcast %115 : vector<2x1xf32> to vector<2x512xf32>
    %118 = vector.broadcast %116 : vector<1x512xf32> to vector<2x512xf32>
    %119 = arith.mulf %117, %118 : vector<2x512xf32>
    %120 = arith.addf %114, %119 : vector<2x512xf32>
    %c57_i32 = arith.constant 57 : i32
    %121 = tpu.dynamic_rotate %3 by %c57_i32 dim 1 : vector<2x512xf32>, i32 -> vector<2x512xf32>
    %c6 = arith.constant 6 : index
    %c0_35 = arith.constant 0 : index
    %c0_36 = arith.constant 0 : index
    %122 = vector.load %arg6[%c6, %c0_35, %c0_36] : memref<27x1x512xf32, #tpu.memory_space<vmem>>, vector<1x1x512xf32>
    %123 = vector.shape_cast %122 : vector<1x1x512xf32> to vector<1x512xf32>
    %124 = vector.broadcast %123 : vector<1x512xf32> to vector<2x512xf32>
    %125 = arith.mulf %121, %124 : vector<2x512xf32>
    %c6_37 = arith.constant 6 : index
    %c0_38 = arith.constant 0 : index
    %c0_39 = arith.constant 0 : index
    %126 = vector.load %arg2[%c6_37, %c0_38, %c0_39] : memref<27x2x2xf32, #tpu.memory_space<vmem>>, vector<1x2x2xf32>
    %127 = vector.shape_cast %126 : vector<1x2x2xf32> to vector<2x2xf32>
    %128 = vector.extract_strided_slice %127 {offsets = [0, 0], sizes = [2, 1], strides = [1, 1]} : vector<2x2xf32> to vector<2x1xf32>
    %129 = vector.extract_strided_slice %125 {offsets = [0, 0], sizes = [1, 512], strides = [1, 1]} : vector<2x512xf32> to vector<1x512xf32>
    %130 = vector.broadcast %128 : vector<2x1xf32> to vector<2x512xf32>
    %131 = vector.broadcast %129 : vector<1x512xf32> to vector<2x512xf32>
    %132 = arith.mulf %130, %131 : vector<2x512xf32>
    %133 = arith.addf %120, %132 : vector<2x512xf32>
    %134 = vector.extract_strided_slice %127 {offsets = [0, 1], sizes = [2, 1], strides = [1, 1]} : vector<2x2xf32> to vector<2x1xf32>
    %135 = vector.extract_strided_slice %125 {offsets = [1, 0], sizes = [1, 512], strides = [1, 1]} : vector<2x512xf32> to vector<1x512xf32>
    %136 = vector.broadcast %134 : vector<2x1xf32> to vector<2x512xf32>
    %137 = vector.broadcast %135 : vector<1x512xf32> to vector<2x512xf32>
    %138 = arith.mulf %136, %137 : vector<2x512xf32>
    %139 = arith.addf %133, %138 : vector<2x512xf32>
    %c56_i32 = arith.constant 56 : i32
    %140 = tpu.dynamic_rotate %3 by %c56_i32 dim 1 : vector<2x512xf32>, i32 -> vector<2x512xf32>
    %c7 = arith.constant 7 : index
    %c0_40 = arith.constant 0 : index
    %c0_41 = arith.constant 0 : index
    %141 = vector.load %arg6[%c7, %c0_40, %c0_41] : memref<27x1x512xf32, #tpu.memory_space<vmem>>, vector<1x1x512xf32>
    %142 = vector.shape_cast %141 : vector<1x1x512xf32> to vector<1x512xf32>
    %143 = vector.broadcast %142 : vector<1x512xf32> to vector<2x512xf32>
    %144 = arith.mulf %140, %143 : vector<2x512xf32>
    %c7_42 = arith.constant 7 : index
    %c0_43 = arith.constant 0 : index
    %c0_44 = arith.constant 0 : index
    %145 = vector.load %arg2[%c7_42, %c0_43, %c0_44] : memref<27x2x2xf32, #tpu.memory_space<vmem>>, vector<1x2x2xf32>
    %146 = vector.shape_cast %145 : vector<1x2x2xf32> to vector<2x2xf32>
    %147 = vector.extract_strided_slice %146 {offsets = [0, 0], sizes = [2, 1], strides = [1, 1]} : vector<2x2xf32> to vector<2x1xf32>
    %148 = vector.extract_strided_slice %144 {offsets = [0, 0], sizes = [1, 512], strides = [1, 1]} : vector<2x512xf32> to vector<1x512xf32>
    %149 = vector.broadcast %147 : vector<2x1xf32> to vector<2x512xf32>
    %150 = vector.broadcast %148 : vector<1x512xf32> to vector<2x512xf32>
    %151 = arith.mulf %149, %150 : vector<2x512xf32>
    %152 = arith.addf %139, %151 : vector<2x512xf32>
    %153 = vector.extract_strided_slice %146 {offsets = [0, 1], sizes = [2, 1], strides = [1, 1]} : vector<2x2xf32> to vector<2x1xf32>
    %154 = vector.extract_strided_slice %144 {offsets = [1, 0], sizes = [1, 512], strides = [1, 1]} : vector<2x512xf32> to vector<1x512xf32>
    %155 = vector.broadcast %153 : vector<2x1xf32> to vector<2x512xf32>
    %156 = vector.broadcast %154 : vector<1x512xf32> to vector<2x512xf32>
    %157 = arith.mulf %155, %156 : vector<2x512xf32>
    %158 = arith.addf %152, %157 : vector<2x512xf32>
    %c55_i32 = arith.constant 55 : i32
    %159 = tpu.dynamic_rotate %3 by %c55_i32 dim 1 : vector<2x512xf32>, i32 -> vector<2x512xf32>
    %c8 = arith.constant 8 : index
    %c0_45 = arith.constant 0 : index
    %c0_46 = arith.constant 0 : index
    %160 = vector.load %arg6[%c8, %c0_45, %c0_46] : memref<27x1x512xf32, #tpu.memory_space<vmem>>, vector<1x1x512xf32>
    %161 = vector.shape_cast %160 : vector<1x1x512xf32> to vector<1x512xf32>
    %162 = vector.broadcast %161 : vector<1x512xf32> to vector<2x512xf32>
    %163 = arith.mulf %159, %162 : vector<2x512xf32>
    %c8_47 = arith.constant 8 : index
    %c0_48 = arith.constant 0 : index
    %c0_49 = arith.constant 0 : index
    %164 = vector.load %arg2[%c8_47, %c0_48, %c0_49] : memref<27x2x2xf32, #tpu.memory_space<vmem>>, vector<1x2x2xf32>
    %165 = vector.shape_cast %164 : vector<1x2x2xf32> to vector<2x2xf32>
    %166 = vector.extract_strided_slice %165 {offsets = [0, 0], sizes = [2, 1], strides = [1, 1]} : vector<2x2xf32> to vector<2x1xf32>
    %167 = vector.extract_strided_slice %163 {offsets = [0, 0], sizes = [1, 512], strides = [1, 1]} : vector<2x512xf32> to vector<1x512xf32>
    %168 = vector.broadcast %166 : vector<2x1xf32> to vector<2x512xf32>
    %169 = vector.broadcast %167 : vector<1x512xf32> to vector<2x512xf32>
    %170 = arith.mulf %168, %169 : vector<2x512xf32>
    %171 = arith.addf %158, %170 : vector<2x512xf32>
    %172 = vector.extract_strided_slice %165 {offsets = [0, 1], sizes = [2, 1], strides = [1, 1]} : vector<2x2xf32> to vector<2x1xf32>
    %173 = vector.extract_strided_slice %163 {offsets = [1, 0], sizes = [1, 512], strides = [1, 1]} : vector<2x512xf32> to vector<1x512xf32>
    %174 = vector.broadcast %172 : vector<2x1xf32> to vector<2x512xf32>
    %175 = vector.broadcast %173 : vector<1x512xf32> to vector<2x512xf32>
    %176 = arith.mulf %174, %175 : vector<2x512xf32>
    %177 = arith.addf %171, %176 : vector<2x512xf32>
    %c9_i32 = arith.constant 9 : i32
    %178 = tpu.dynamic_rotate %3 by %c9_i32 dim 1 : vector<2x512xf32>, i32 -> vector<2x512xf32>
    %c9 = arith.constant 9 : index
    %c0_50 = arith.constant 0 : index
    %c0_51 = arith.constant 0 : index
    %179 = vector.load %arg6[%c9, %c0_50, %c0_51] : memref<27x1x512xf32, #tpu.memory_space<vmem>>, vector<1x1x512xf32>
    %180 = vector.shape_cast %179 : vector<1x1x512xf32> to vector<1x512xf32>
    %181 = vector.broadcast %180 : vector<1x512xf32> to vector<2x512xf32>
    %182 = arith.mulf %178, %181 : vector<2x512xf32>
    %c9_52 = arith.constant 9 : index
    %c0_53 = arith.constant 0 : index
    %c0_54 = arith.constant 0 : index
    %183 = vector.load %arg2[%c9_52, %c0_53, %c0_54] : memref<27x2x2xf32, #tpu.memory_space<vmem>>, vector<1x2x2xf32>
    %184 = vector.shape_cast %183 : vector<1x2x2xf32> to vector<2x2xf32>
    %185 = vector.extract_strided_slice %184 {offsets = [0, 0], sizes = [2, 1], strides = [1, 1]} : vector<2x2xf32> to vector<2x1xf32>
    %186 = vector.extract_strided_slice %182 {offsets = [0, 0], sizes = [1, 512], strides = [1, 1]} : vector<2x512xf32> to vector<1x512xf32>
    %187 = vector.broadcast %185 : vector<2x1xf32> to vector<2x512xf32>
    %188 = vector.broadcast %186 : vector<1x512xf32> to vector<2x512xf32>
    %189 = arith.mulf %187, %188 : vector<2x512xf32>
    %190 = arith.addf %177, %189 : vector<2x512xf32>
    %191 = vector.extract_strided_slice %184 {offsets = [0, 1], sizes = [2, 1], strides = [1, 1]} : vector<2x2xf32> to vector<2x1xf32>
    %192 = vector.extract_strided_slice %182 {offsets = [1, 0], sizes = [1, 512], strides = [1, 1]} : vector<2x512xf32> to vector<1x512xf32>
    %193 = vector.broadcast %191 : vector<2x1xf32> to vector<2x512xf32>
    %194 = vector.broadcast %192 : vector<1x512xf32> to vector<2x512xf32>
    %195 = arith.mulf %193, %194 : vector<2x512xf32>
    %196 = arith.addf %190, %195 : vector<2x512xf32>
    %c8_i32 = arith.constant 8 : i32
    %197 = tpu.dynamic_rotate %3 by %c8_i32 dim 1 : vector<2x512xf32>, i32 -> vector<2x512xf32>
    %c10 = arith.constant 10 : index
    %c0_55 = arith.constant 0 : index
    %c0_56 = arith.constant 0 : index
    %198 = vector.load %arg6[%c10, %c0_55, %c0_56] : memref<27x1x512xf32, #tpu.memory_space<vmem>>, vector<1x1x512xf32>
    %199 = vector.shape_cast %198 : vector<1x1x512xf32> to vector<1x512xf32>
    %200 = vector.broadcast %199 : vector<1x512xf32> to vector<2x512xf32>
    %201 = arith.mulf %197, %200 : vector<2x512xf32>
    %c10_57 = arith.constant 10 : index
    %c0_58 = arith.constant 0 : index
    %c0_59 = arith.constant 0 : index
    %202 = vector.load %arg2[%c10_57, %c0_58, %c0_59] : memref<27x2x2xf32, #tpu.memory_space<vmem>>, vector<1x2x2xf32>
    %203 = vector.shape_cast %202 : vector<1x2x2xf32> to vector<2x2xf32>
    %204 = vector.extract_strided_slice %203 {offsets = [0, 0], sizes = [2, 1], strides = [1, 1]} : vector<2x2xf32> to vector<2x1xf32>
    %205 = vector.extract_strided_slice %201 {offsets = [0, 0], sizes = [1, 512], strides = [1, 1]} : vector<2x512xf32> to vector<1x512xf32>
    %206 = vector.broadcast %204 : vector<2x1xf32> to vector<2x512xf32>
    %207 = vector.broadcast %205 : vector<1x512xf32> to vector<2x512xf32>
    %208 = arith.mulf %206, %207 : vector<2x512xf32>
    %209 = arith.addf %196, %208 : vector<2x512xf32>
    %210 = vector.extract_strided_slice %203 {offsets = [0, 1], sizes = [2, 1], strides = [1, 1]} : vector<2x2xf32> to vector<2x1xf32>
    %211 = vector.extract_strided_slice %201 {offsets = [1, 0], sizes = [1, 512], strides = [1, 1]} : vector<2x512xf32> to vector<1x512xf32>
    %212 = vector.broadcast %210 : vector<2x1xf32> to vector<2x512xf32>
    %213 = vector.broadcast %211 : vector<1x512xf32> to vector<2x512xf32>
    %214 = arith.mulf %212, %213 : vector<2x512xf32>
    %215 = arith.addf %209, %214 : vector<2x512xf32>
    %c7_i32 = arith.constant 7 : i32
    %216 = tpu.dynamic_rotate %3 by %c7_i32 dim 1 : vector<2x512xf32>, i32 -> vector<2x512xf32>
    %c11 = arith.constant 11 : index
    %c0_60 = arith.constant 0 : index
    %c0_61 = arith.constant 0 : index
    %217 = vector.load %arg6[%c11, %c0_60, %c0_61] : memref<27x1x512xf32, #tpu.memory_space<vmem>>, vector<1x1x512xf32>
    %218 = vector.shape_cast %217 : vector<1x1x512xf32> to vector<1x512xf32>
    %219 = vector.broadcast %218 : vector<1x512xf32> to vector<2x512xf32>
    %220 = arith.mulf %216, %219 : vector<2x512xf32>
    %c11_62 = arith.constant 11 : index
    %c0_63 = arith.constant 0 : index
    %c0_64 = arith.constant 0 : index
    %221 = vector.load %arg2[%c11_62, %c0_63, %c0_64] : memref<27x2x2xf32, #tpu.memory_space<vmem>>, vector<1x2x2xf32>
    %222 = vector.shape_cast %221 : vector<1x2x2xf32> to vector<2x2xf32>
    %223 = vector.extract_strided_slice %222 {offsets = [0, 0], sizes = [2, 1], strides = [1, 1]} : vector<2x2xf32> to vector<2x1xf32>
    %224 = vector.extract_strided_slice %220 {offsets = [0, 0], sizes = [1, 512], strides = [1, 1]} : vector<2x512xf32> to vector<1x512xf32>
    %225 = vector.broadcast %223 : vector<2x1xf32> to vector<2x512xf32>
    %226 = vector.broadcast %224 : vector<1x512xf32> to vector<2x512xf32>
    %227 = arith.mulf %225, %226 : vector<2x512xf32>
    %228 = arith.addf %215, %227 : vector<2x512xf32>
    %229 = vector.extract_strided_slice %222 {offsets = [0, 1], sizes = [2, 1], strides = [1, 1]} : vector<2x2xf32> to vector<2x1xf32>
    %230 = vector.extract_strided_slice %220 {offsets = [1, 0], sizes = [1, 512], strides = [1, 1]} : vector<2x512xf32> to vector<1x512xf32>
    %231 = vector.broadcast %229 : vector<2x1xf32> to vector<2x512xf32>
    %232 = vector.broadcast %230 : vector<1x512xf32> to vector<2x512xf32>
    %233 = arith.mulf %231, %232 : vector<2x512xf32>
    %234 = arith.addf %228, %233 : vector<2x512xf32>
    %c1_i32 = arith.constant 1 : i32
    %235 = tpu.dynamic_rotate %3 by %c1_i32 dim 1 : vector<2x512xf32>, i32 -> vector<2x512xf32>
    %c12 = arith.constant 12 : index
    %c0_65 = arith.constant 0 : index
    %c0_66 = arith.constant 0 : index
    %236 = vector.load %arg6[%c12, %c0_65, %c0_66] : memref<27x1x512xf32, #tpu.memory_space<vmem>>, vector<1x1x512xf32>
    %237 = vector.shape_cast %236 : vector<1x1x512xf32> to vector<1x512xf32>
    %238 = vector.broadcast %237 : vector<1x512xf32> to vector<2x512xf32>
    %239 = arith.mulf %235, %238 : vector<2x512xf32>
    %c12_67 = arith.constant 12 : index
    %c0_68 = arith.constant 0 : index
    %c0_69 = arith.constant 0 : index
    %240 = vector.load %arg2[%c12_67, %c0_68, %c0_69] : memref<27x2x2xf32, #tpu.memory_space<vmem>>, vector<1x2x2xf32>
    %241 = vector.shape_cast %240 : vector<1x2x2xf32> to vector<2x2xf32>
    %242 = vector.extract_strided_slice %241 {offsets = [0, 0], sizes = [2, 1], strides = [1, 1]} : vector<2x2xf32> to vector<2x1xf32>
    %243 = vector.extract_strided_slice %239 {offsets = [0, 0], sizes = [1, 512], strides = [1, 1]} : vector<2x512xf32> to vector<1x512xf32>
    %244 = vector.broadcast %242 : vector<2x1xf32> to vector<2x512xf32>
    %245 = vector.broadcast %243 : vector<1x512xf32> to vector<2x512xf32>
    %246 = arith.mulf %244, %245 : vector<2x512xf32>
    %247 = arith.addf %234, %246 : vector<2x512xf32>
    %248 = vector.extract_strided_slice %241 {offsets = [0, 1], sizes = [2, 1], strides = [1, 1]} : vector<2x2xf32> to vector<2x1xf32>
    %249 = vector.extract_strided_slice %239 {offsets = [1, 0], sizes = [1, 512], strides = [1, 1]} : vector<2x512xf32> to vector<1x512xf32>
    %250 = vector.broadcast %248 : vector<2x1xf32> to vector<2x512xf32>
    %251 = vector.broadcast %249 : vector<1x512xf32> to vector<2x512xf32>
    %252 = arith.mulf %250, %251 : vector<2x512xf32>
    %253 = arith.addf %247, %252 : vector<2x512xf32>
    %c13 = arith.constant 13 : index
    %c0_70 = arith.constant 0 : index
    %c0_71 = arith.constant 0 : index
    %254 = vector.load %arg2[%c13, %c0_70, %c0_71] : memref<27x2x2xf32, #tpu.memory_space<vmem>>, vector<1x2x2xf32>
    %255 = vector.shape_cast %254 : vector<1x2x2xf32> to vector<2x2xf32>
    %256 = vector.extract_strided_slice %255 {offsets = [0, 0], sizes = [2, 1], strides = [1, 1]} : vector<2x2xf32> to vector<2x1xf32>
    %257 = vector.extract_strided_slice %3 {offsets = [0, 0], sizes = [1, 512], strides = [1, 1]} : vector<2x512xf32> to vector<1x512xf32>
    %258 = vector.broadcast %256 : vector<2x1xf32> to vector<2x512xf32>
    %259 = vector.broadcast %257 : vector<1x512xf32> to vector<2x512xf32>
    %260 = arith.mulf %258, %259 : vector<2x512xf32>
    %261 = arith.addf %253, %260 : vector<2x512xf32>
    %262 = vector.extract_strided_slice %255 {offsets = [0, 1], sizes = [2, 1], strides = [1, 1]} : vector<2x2xf32> to vector<2x1xf32>
    %263 = vector.extract_strided_slice %3 {offsets = [1, 0], sizes = [1, 512], strides = [1, 1]} : vector<2x512xf32> to vector<1x512xf32>
    %264 = vector.broadcast %262 : vector<2x1xf32> to vector<2x512xf32>
    %265 = vector.broadcast %263 : vector<1x512xf32> to vector<2x512xf32>
    %266 = arith.mulf %264, %265 : vector<2x512xf32>
    %267 = arith.addf %261, %266 : vector<2x512xf32>
    %c511_i32 = arith.constant 511 : i32
    %268 = tpu.dynamic_rotate %3 by %c511_i32 dim 1 : vector<2x512xf32>, i32 -> vector<2x512xf32>
    %c14 = arith.constant 14 : index
    %c0_72 = arith.constant 0 : index
    %c0_73 = arith.constant 0 : index
    %269 = vector.load %arg6[%c14, %c0_72, %c0_73] : memref<27x1x512xf32, #tpu.memory_space<vmem>>, vector<1x1x512xf32>
    %270 = vector.shape_cast %269 : vector<1x1x512xf32> to vector<1x512xf32>
    %271 = vector.broadcast %270 : vector<1x512xf32> to vector<2x512xf32>
    %272 = arith.mulf %268, %271 : vector<2x512xf32>
    %c14_74 = arith.constant 14 : index
    %c0_75 = arith.constant 0 : index
    %c0_76 = arith.constant 0 : index
    %273 = vector.load %arg2[%c14_74, %c0_75, %c0_76] : memref<27x2x2xf32, #tpu.memory_space<vmem>>, vector<1x2x2xf32>
    %274 = vector.shape_cast %273 : vector<1x2x2xf32> to vector<2x2xf32>
    %275 = vector.extract_strided_slice %274 {offsets = [0, 0], sizes = [2, 1], strides = [1, 1]} : vector<2x2xf32> to vector<2x1xf32>
    %276 = vector.extract_strided_slice %272 {offsets = [0, 0], sizes = [1, 512], strides = [1, 1]} : vector<2x512xf32> to vector<1x512xf32>
    %277 = vector.broadcast %275 : vector<2x1xf32> to vector<2x512xf32>
    %278 = vector.broadcast %276 : vector<1x512xf32> to vector<2x512xf32>
    %279 = arith.mulf %277, %278 : vector<2x512xf32>
    %280 = arith.addf %267, %279 : vector<2x512xf32>
    %281 = vector.extract_strided_slice %274 {offsets = [0, 1], sizes = [2, 1], strides = [1, 1]} : vector<2x2xf32> to vector<2x1xf32>
    %282 = vector.extract_strided_slice %272 {offsets = [1, 0], sizes = [1, 512], strides = [1, 1]} : vector<2x512xf32> to vector<1x512xf32>
    %283 = vector.broadcast %281 : vector<2x1xf32> to vector<2x512xf32>
    %284 = vector.broadcast %282 : vector<1x512xf32> to vector<2x512xf32>
    %285 = arith.mulf %283, %284 : vector<2x512xf32>
    %286 = arith.addf %280, %285 : vector<2x512xf32>
    %c505_i32 = arith.constant 505 : i32
    %287 = tpu.dynamic_rotate %3 by %c505_i32 dim 1 : vector<2x512xf32>, i32 -> vector<2x512xf32>
    %c15 = arith.constant 15 : index
    %c0_77 = arith.constant 0 : index
    %c0_78 = arith.constant 0 : index
    %288 = vector.load %arg6[%c15, %c0_77, %c0_78] : memref<27x1x512xf32, #tpu.memory_space<vmem>>, vector<1x1x512xf32>
    %289 = vector.shape_cast %288 : vector<1x1x512xf32> to vector<1x512xf32>
    %290 = vector.broadcast %289 : vector<1x512xf32> to vector<2x512xf32>
    %291 = arith.mulf %287, %290 : vector<2x512xf32>
    %c15_79 = arith.constant 15 : index
    %c0_80 = arith.constant 0 : index
    %c0_81 = arith.constant 0 : index
    %292 = vector.load %arg2[%c15_79, %c0_80, %c0_81] : memref<27x2x2xf32, #tpu.memory_space<vmem>>, vector<1x2x2xf32>
    %293 = vector.shape_cast %292 : vector<1x2x2xf32> to vector<2x2xf32>
    %294 = vector.extract_strided_slice %293 {offsets = [0, 0], sizes = [2, 1], strides = [1, 1]} : vector<2x2xf32> to vector<2x1xf32>
    %295 = vector.extract_strided_slice %291 {offsets = [0, 0], sizes = [1, 512], strides = [1, 1]} : vector<2x512xf32> to vector<1x512xf32>
    %296 = vector.broadcast %294 : vector<2x1xf32> to vector<2x512xf32>
    %297 = vector.broadcast %295 : vector<1x512xf32> to vector<2x512xf32>
    %298 = arith.mulf %296, %297 : vector<2x512xf32>
    %299 = arith.addf %286, %298 : vector<2x512xf32>
    %300 = vector.extract_strided_slice %293 {offsets = [0, 1], sizes = [2, 1], strides = [1, 1]} : vector<2x2xf32> to vector<2x1xf32>
    %301 = vector.extract_strided_slice %291 {offsets = [1, 0], sizes = [1, 512], strides = [1, 1]} : vector<2x512xf32> to vector<1x512xf32>
    %302 = vector.broadcast %300 : vector<2x1xf32> to vector<2x512xf32>
    %303 = vector.broadcast %301 : vector<1x512xf32> to vector<2x512xf32>
    %304 = arith.mulf %302, %303 : vector<2x512xf32>
    %305 = arith.addf %299, %304 : vector<2x512xf32>
    %c504_i32 = arith.constant 504 : i32
    %306 = tpu.dynamic_rotate %3 by %c504_i32 dim 1 : vector<2x512xf32>, i32 -> vector<2x512xf32>
    %c16 = arith.constant 16 : index
    %c0_82 = arith.constant 0 : index
    %c0_83 = arith.constant 0 : index
    %307 = vector.load %arg6[%c16, %c0_82, %c0_83] : memref<27x1x512xf32, #tpu.memory_space<vmem>>, vector<1x1x512xf32>
    %308 = vector.shape_cast %307 : vector<1x1x512xf32> to vector<1x512xf32>
    %309 = vector.broadcast %308 : vector<1x512xf32> to vector<2x512xf32>
    %310 = arith.mulf %306, %309 : vector<2x512xf32>
    %c16_84 = arith.constant 16 : index
    %c0_85 = arith.constant 0 : index
    %c0_86 = arith.constant 0 : index
    %311 = vector.load %arg2[%c16_84, %c0_85, %c0_86] : memref<27x2x2xf32, #tpu.memory_space<vmem>>, vector<1x2x2xf32>
    %312 = vector.shape_cast %311 : vector<1x2x2xf32> to vector<2x2xf32>
    %313 = vector.extract_strided_slice %312 {offsets = [0, 0], sizes = [2, 1], strides = [1, 1]} : vector<2x2xf32> to vector<2x1xf32>
    %314 = vector.extract_strided_slice %310 {offsets = [0, 0], sizes = [1, 512], strides = [1, 1]} : vector<2x512xf32> to vector<1x512xf32>
    %315 = vector.broadcast %313 : vector<2x1xf32> to vector<2x512xf32>
    %316 = vector.broadcast %314 : vector<1x512xf32> to vector<2x512xf32>
    %317 = arith.mulf %315, %316 : vector<2x512xf32>
    %318 = arith.addf %305, %317 : vector<2x512xf32>
    %319 = vector.extract_strided_slice %312 {offsets = [0, 1], sizes = [2, 1], strides = [1, 1]} : vector<2x2xf32> to vector<2x1xf32>
    %320 = vector.extract_strided_slice %310 {offsets = [1, 0], sizes = [1, 512], strides = [1, 1]} : vector<2x512xf32> to vector<1x512xf32>
    %321 = vector.broadcast %319 : vector<2x1xf32> to vector<2x512xf32>
    %322 = vector.broadcast %320 : vector<1x512xf32> to vector<2x512xf32>
    %323 = arith.mulf %321, %322 : vector<2x512xf32>
    %324 = arith.addf %318, %323 : vector<2x512xf32>
    %c503_i32 = arith.constant 503 : i32
    %325 = tpu.dynamic_rotate %3 by %c503_i32 dim 1 : vector<2x512xf32>, i32 -> vector<2x512xf32>
    %c17 = arith.constant 17 : index
    %c0_87 = arith.constant 0 : index
    %c0_88 = arith.constant 0 : index
    %326 = vector.load %arg6[%c17, %c0_87, %c0_88] : memref<27x1x512xf32, #tpu.memory_space<vmem>>, vector<1x1x512xf32>
    %327 = vector.shape_cast %326 : vector<1x1x512xf32> to vector<1x512xf32>
    %328 = vector.broadcast %327 : vector<1x512xf32> to vector<2x512xf32>
    %329 = arith.mulf %325, %328 : vector<2x512xf32>
    %c17_89 = arith.constant 17 : index
    %c0_90 = arith.constant 0 : index
    %c0_91 = arith.constant 0 : index
    %330 = vector.load %arg2[%c17_89, %c0_90, %c0_91] : memref<27x2x2xf32, #tpu.memory_space<vmem>>, vector<1x2x2xf32>
    %331 = vector.shape_cast %330 : vector<1x2x2xf32> to vector<2x2xf32>
    %332 = vector.extract_strided_slice %331 {offsets = [0, 0], sizes = [2, 1], strides = [1, 1]} : vector<2x2xf32> to vector<2x1xf32>
    %333 = vector.extract_strided_slice %329 {offsets = [0, 0], sizes = [1, 512], strides = [1, 1]} : vector<2x512xf32> to vector<1x512xf32>
    %334 = vector.broadcast %332 : vector<2x1xf32> to vector<2x512xf32>
    %335 = vector.broadcast %333 : vector<1x512xf32> to vector<2x512xf32>
    %336 = arith.mulf %334, %335 : vector<2x512xf32>
    %337 = arith.addf %324, %336 : vector<2x512xf32>
    %338 = vector.extract_strided_slice %331 {offsets = [0, 1], sizes = [2, 1], strides = [1, 1]} : vector<2x2xf32> to vector<2x1xf32>
    %339 = vector.extract_strided_slice %329 {offsets = [1, 0], sizes = [1, 512], strides = [1, 1]} : vector<2x512xf32> to vector<1x512xf32>
    %340 = vector.broadcast %338 : vector<2x1xf32> to vector<2x512xf32>
    %341 = vector.broadcast %339 : vector<1x512xf32> to vector<2x512xf32>
    %342 = arith.mulf %340, %341 : vector<2x512xf32>
    %343 = arith.addf %337, %342 : vector<2x512xf32>
    %c457_i32 = arith.constant 457 : i32
    %344 = tpu.dynamic_rotate %3 by %c457_i32 dim 1 : vector<2x512xf32>, i32 -> vector<2x512xf32>
    %c18 = arith.constant 18 : index
    %c0_92 = arith.constant 0 : index
    %c0_93 = arith.constant 0 : index
    %345 = vector.load %arg6[%c18, %c0_92, %c0_93] : memref<27x1x512xf32, #tpu.memory_space<vmem>>, vector<1x1x512xf32>
    %346 = vector.shape_cast %345 : vector<1x1x512xf32> to vector<1x512xf32>
    %347 = vector.broadcast %346 : vector<1x512xf32> to vector<2x512xf32>
    %348 = arith.mulf %344, %347 : vector<2x512xf32>
    %c18_94 = arith.constant 18 : index
    %c0_95 = arith.constant 0 : index
    %c0_96 = arith.constant 0 : index
    %349 = vector.load %arg2[%c18_94, %c0_95, %c0_96] : memref<27x2x2xf32, #tpu.memory_space<vmem>>, vector<1x2x2xf32>
    %350 = vector.shape_cast %349 : vector<1x2x2xf32> to vector<2x2xf32>
    %351 = vector.extract_strided_slice %350 {offsets = [0, 0], sizes = [2, 1], strides = [1, 1]} : vector<2x2xf32> to vector<2x1xf32>
    %352 = vector.extract_strided_slice %348 {offsets = [0, 0], sizes = [1, 512], strides = [1, 1]} : vector<2x512xf32> to vector<1x512xf32>
    %353 = vector.broadcast %351 : vector<2x1xf32> to vector<2x512xf32>
    %354 = vector.broadcast %352 : vector<1x512xf32> to vector<2x512xf32>
    %355 = arith.mulf %353, %354 : vector<2x512xf32>
    %356 = arith.addf %343, %355 : vector<2x512xf32>
    %357 = vector.extract_strided_slice %350 {offsets = [0, 1], sizes = [2, 1], strides = [1, 1]} : vector<2x2xf32> to vector<2x1xf32>
    %358 = vector.extract_strided_slice %348 {offsets = [1, 0], sizes = [1, 512], strides = [1, 1]} : vector<2x512xf32> to vector<1x512xf32>
    %359 = vector.broadcast %357 : vector<2x1xf32> to vector<2x512xf32>
    %360 = vector.broadcast %358 : vector<1x512xf32> to vector<2x512xf32>
    %361 = arith.mulf %359, %360 : vector<2x512xf32>
    %362 = arith.addf %356, %361 : vector<2x512xf32>
    %c456_i32 = arith.constant 456 : i32
    %363 = tpu.dynamic_rotate %3 by %c456_i32 dim 1 : vector<2x512xf32>, i32 -> vector<2x512xf32>
    %c19 = arith.constant 19 : index
    %c0_97 = arith.constant 0 : index
    %c0_98 = arith.constant 0 : index
    %364 = vector.load %arg6[%c19, %c0_97, %c0_98] : memref<27x1x512xf32, #tpu.memory_space<vmem>>, vector<1x1x512xf32>
    %365 = vector.shape_cast %364 : vector<1x1x512xf32> to vector<1x512xf32>
    %366 = vector.broadcast %365 : vector<1x512xf32> to vector<2x512xf32>
    %367 = arith.mulf %363, %366 : vector<2x512xf32>
    %c19_99 = arith.constant 19 : index
    %c0_100 = arith.constant 0 : index
    %c0_101 = arith.constant 0 : index
    %368 = vector.load %arg2[%c19_99, %c0_100, %c0_101] : memref<27x2x2xf32, #tpu.memory_space<vmem>>, vector<1x2x2xf32>
    %369 = vector.shape_cast %368 : vector<1x2x2xf32> to vector<2x2xf32>
    %370 = vector.extract_strided_slice %369 {offsets = [0, 0], sizes = [2, 1], strides = [1, 1]} : vector<2x2xf32> to vector<2x1xf32>
    %371 = vector.extract_strided_slice %367 {offsets = [0, 0], sizes = [1, 512], strides = [1, 1]} : vector<2x512xf32> to vector<1x512xf32>
    %372 = vector.broadcast %370 : vector<2x1xf32> to vector<2x512xf32>
    %373 = vector.broadcast %371 : vector<1x512xf32> to vector<2x512xf32>
    %374 = arith.mulf %372, %373 : vector<2x512xf32>
    %375 = arith.addf %362, %374 : vector<2x512xf32>
    %376 = vector.extract_strided_slice %369 {offsets = [0, 1], sizes = [2, 1], strides = [1, 1]} : vector<2x2xf32> to vector<2x1xf32>
    %377 = vector.extract_strided_slice %367 {offsets = [1, 0], sizes = [1, 512], strides = [1, 1]} : vector<2x512xf32> to vector<1x512xf32>
    %378 = vector.broadcast %376 : vector<2x1xf32> to vector<2x512xf32>
    %379 = vector.broadcast %377 : vector<1x512xf32> to vector<2x512xf32>
    %380 = arith.mulf %378, %379 : vector<2x512xf32>
    %381 = arith.addf %375, %380 : vector<2x512xf32>
    %c455_i32 = arith.constant 455 : i32
    %382 = tpu.dynamic_rotate %3 by %c455_i32 dim 1 : vector<2x512xf32>, i32 -> vector<2x512xf32>
    %c20 = arith.constant 20 : index
    %c0_102 = arith.constant 0 : index
    %c0_103 = arith.constant 0 : index
    %383 = vector.load %arg6[%c20, %c0_102, %c0_103] : memref<27x1x512xf32, #tpu.memory_space<vmem>>, vector<1x1x512xf32>
    %384 = vector.shape_cast %383 : vector<1x1x512xf32> to vector<1x512xf32>
    %385 = vector.broadcast %384 : vector<1x512xf32> to vector<2x512xf32>
    %386 = arith.mulf %382, %385 : vector<2x512xf32>
    %c20_104 = arith.constant 20 : index
    %c0_105 = arith.constant 0 : index
    %c0_106 = arith.constant 0 : index
    %387 = vector.load %arg2[%c20_104, %c0_105, %c0_106] : memref<27x2x2xf32, #tpu.memory_space<vmem>>, vector<1x2x2xf32>
    %388 = vector.shape_cast %387 : vector<1x2x2xf32> to vector<2x2xf32>
    %389 = vector.extract_strided_slice %388 {offsets = [0, 0], sizes = [2, 1], strides = [1, 1]} : vector<2x2xf32> to vector<2x1xf32>
    %390 = vector.extract_strided_slice %386 {offsets = [0, 0], sizes = [1, 512], strides = [1, 1]} : vector<2x512xf32> to vector<1x512xf32>
    %391 = vector.broadcast %389 : vector<2x1xf32> to vector<2x512xf32>
    %392 = vector.broadcast %390 : vector<1x512xf32> to vector<2x512xf32>
    %393 = arith.mulf %391, %392 : vector<2x512xf32>
    %394 = arith.addf %381, %393 : vector<2x512xf32>
    %395 = vector.extract_strided_slice %388 {offsets = [0, 1], sizes = [2, 1], strides = [1, 1]} : vector<2x2xf32> to vector<2x1xf32>
    %396 = vector.extract_strided_slice %386 {offsets = [1, 0], sizes = [1, 512], strides = [1, 1]} : vector<2x512xf32> to vector<1x512xf32>
    %397 = vector.broadcast %395 : vector<2x1xf32> to vector<2x512xf32>
    %398 = vector.broadcast %396 : vector<1x512xf32> to vector<2x512xf32>
    %399 = arith.mulf %397, %398 : vector<2x512xf32>
    %400 = arith.addf %394, %399 : vector<2x512xf32>
    %c449_i32 = arith.constant 449 : i32
    %401 = tpu.dynamic_rotate %3 by %c449_i32 dim 1 : vector<2x512xf32>, i32 -> vector<2x512xf32>
    %c21 = arith.constant 21 : index
    %c0_107 = arith.constant 0 : index
    %c0_108 = arith.constant 0 : index
    %402 = vector.load %arg6[%c21, %c0_107, %c0_108] : memref<27x1x512xf32, #tpu.memory_space<vmem>>, vector<1x1x512xf32>
    %403 = vector.shape_cast %402 : vector<1x1x512xf32> to vector<1x512xf32>
    %404 = vector.broadcast %403 : vector<1x512xf32> to vector<2x512xf32>
    %405 = arith.mulf %401, %404 : vector<2x512xf32>
    %c21_109 = arith.constant 21 : index
    %c0_110 = arith.constant 0 : index
    %c0_111 = arith.constant 0 : index
    %406 = vector.load %arg2[%c21_109, %c0_110, %c0_111] : memref<27x2x2xf32, #tpu.memory_space<vmem>>, vector<1x2x2xf32>
    %407 = vector.shape_cast %406 : vector<1x2x2xf32> to vector<2x2xf32>
    %408 = vector.extract_strided_slice %407 {offsets = [0, 0], sizes = [2, 1], strides = [1, 1]} : vector<2x2xf32> to vector<2x1xf32>
    %409 = vector.extract_strided_slice %405 {offsets = [0, 0], sizes = [1, 512], strides = [1, 1]} : vector<2x512xf32> to vector<1x512xf32>
    %410 = vector.broadcast %408 : vector<2x1xf32> to vector<2x512xf32>
    %411 = vector.broadcast %409 : vector<1x512xf32> to vector<2x512xf32>
    %412 = arith.mulf %410, %411 : vector<2x512xf32>
    %413 = arith.addf %400, %412 : vector<2x512xf32>
    %414 = vector.extract_strided_slice %407 {offsets = [0, 1], sizes = [2, 1], strides = [1, 1]} : vector<2x2xf32> to vector<2x1xf32>
    %415 = vector.extract_strided_slice %405 {offsets = [1, 0], sizes = [1, 512], strides = [1, 1]} : vector<2x512xf32> to vector<1x512xf32>
    %416 = vector.broadcast %414 : vector<2x1xf32> to vector<2x512xf32>
    %417 = vector.broadcast %415 : vector<1x512xf32> to vector<2x512xf32>
    %418 = arith.mulf %416, %417 : vector<2x512xf32>
    %419 = arith.addf %413, %418 : vector<2x512xf32>
    %c448_i32 = arith.constant 448 : i32
    %420 = tpu.dynamic_rotate %3 by %c448_i32 dim 1 : vector<2x512xf32>, i32 -> vector<2x512xf32>
    %c22 = arith.constant 22 : index
    %c0_112 = arith.constant 0 : index
    %c0_113 = arith.constant 0 : index
    %421 = vector.load %arg6[%c22, %c0_112, %c0_113] : memref<27x1x512xf32, #tpu.memory_space<vmem>>, vector<1x1x512xf32>
    %422 = vector.shape_cast %421 : vector<1x1x512xf32> to vector<1x512xf32>
    %423 = vector.broadcast %422 : vector<1x512xf32> to vector<2x512xf32>
    %424 = arith.mulf %420, %423 : vector<2x512xf32>
    %c22_114 = arith.constant 22 : index
    %c0_115 = arith.constant 0 : index
    %c0_116 = arith.constant 0 : index
    %425 = vector.load %arg2[%c22_114, %c0_115, %c0_116] : memref<27x2x2xf32, #tpu.memory_space<vmem>>, vector<1x2x2xf32>
    %426 = vector.shape_cast %425 : vector<1x2x2xf32> to vector<2x2xf32>
    %427 = vector.extract_strided_slice %426 {offsets = [0, 0], sizes = [2, 1], strides = [1, 1]} : vector<2x2xf32> to vector<2x1xf32>
    %428 = vector.extract_strided_slice %424 {offsets = [0, 0], sizes = [1, 512], strides = [1, 1]} : vector<2x512xf32> to vector<1x512xf32>
    %429 = vector.broadcast %427 : vector<2x1xf32> to vector<2x512xf32>
    %430 = vector.broadcast %428 : vector<1x512xf32> to vector<2x512xf32>
    %431 = arith.mulf %429, %430 : vector<2x512xf32>
    %432 = arith.addf %419, %431 : vector<2x512xf32>
    %433 = vector.extract_strided_slice %426 {offsets = [0, 1], sizes = [2, 1], strides = [1, 1]} : vector<2x2xf32> to vector<2x1xf32>
    %434 = vector.extract_strided_slice %424 {offsets = [1, 0], sizes = [1, 512], strides = [1, 1]} : vector<2x512xf32> to vector<1x512xf32>
    %435 = vector.broadcast %433 : vector<2x1xf32> to vector<2x512xf32>
    %436 = vector.broadcast %434 : vector<1x512xf32> to vector<2x512xf32>
    %437 = arith.mulf %435, %436 : vector<2x512xf32>
    %438 = arith.addf %432, %437 : vector<2x512xf32>
    %c447_i32 = arith.constant 447 : i32
    %439 = tpu.dynamic_rotate %3 by %c447_i32 dim 1 : vector<2x512xf32>, i32 -> vector<2x512xf32>
    %c23 = arith.constant 23 : index
    %c0_117 = arith.constant 0 : index
    %c0_118 = arith.constant 0 : index
    %440 = vector.load %arg6[%c23, %c0_117, %c0_118] : memref<27x1x512xf32, #tpu.memory_space<vmem>>, vector<1x1x512xf32>
    %441 = vector.shape_cast %440 : vector<1x1x512xf32> to vector<1x512xf32>
    %442 = vector.broadcast %441 : vector<1x512xf32> to vector<2x512xf32>
    %443 = arith.mulf %439, %442 : vector<2x512xf32>
    %c23_119 = arith.constant 23 : index
    %c0_120 = arith.constant 0 : index
    %c0_121 = arith.constant 0 : index
    %444 = vector.load %arg2[%c23_119, %c0_120, %c0_121] : memref<27x2x2xf32, #tpu.memory_space<vmem>>, vector<1x2x2xf32>
    %445 = vector.shape_cast %444 : vector<1x2x2xf32> to vector<2x2xf32>
    %446 = vector.extract_strided_slice %445 {offsets = [0, 0], sizes = [2, 1], strides = [1, 1]} : vector<2x2xf32> to vector<2x1xf32>
    %447 = vector.extract_strided_slice %443 {offsets = [0, 0], sizes = [1, 512], strides = [1, 1]} : vector<2x512xf32> to vector<1x512xf32>
    %448 = vector.broadcast %446 : vector<2x1xf32> to vector<2x512xf32>
    %449 = vector.broadcast %447 : vector<1x512xf32> to vector<2x512xf32>
    %450 = arith.mulf %448, %449 : vector<2x512xf32>
    %451 = arith.addf %438, %450 : vector<2x512xf32>
    %452 = vector.extract_strided_slice %445 {offsets = [0, 1], sizes = [2, 1], strides = [1, 1]} : vector<2x2xf32> to vector<2x1xf32>
    %453 = vector.extract_strided_slice %443 {offsets = [1, 0], sizes = [1, 512], strides = [1, 1]} : vector<2x512xf32> to vector<1x512xf32>
    %454 = vector.broadcast %452 : vector<2x1xf32> to vector<2x512xf32>
    %455 = vector.broadcast %453 : vector<1x512xf32> to vector<2x512xf32>
    %456 = arith.mulf %454, %455 : vector<2x512xf32>
    %457 = arith.addf %451, %456 : vector<2x512xf32>
    %c441_i32 = arith.constant 441 : i32
    %458 = tpu.dynamic_rotate %3 by %c441_i32 dim 1 : vector<2x512xf32>, i32 -> vector<2x512xf32>
    %c24 = arith.constant 24 : index
    %c0_122 = arith.constant 0 : index
    %c0_123 = arith.constant 0 : index
    %459 = vector.load %arg6[%c24, %c0_122, %c0_123] : memref<27x1x512xf32, #tpu.memory_space<vmem>>, vector<1x1x512xf32>
    %460 = vector.shape_cast %459 : vector<1x1x512xf32> to vector<1x512xf32>
    %461 = vector.broadcast %460 : vector<1x512xf32> to vector<2x512xf32>
    %462 = arith.mulf %458, %461 : vector<2x512xf32>
    %c24_124 = arith.constant 24 : index
    %c0_125 = arith.constant 0 : index
    %c0_126 = arith.constant 0 : index
    %463 = vector.load %arg2[%c24_124, %c0_125, %c0_126] : memref<27x2x2xf32, #tpu.memory_space<vmem>>, vector<1x2x2xf32>
    %464 = vector.shape_cast %463 : vector<1x2x2xf32> to vector<2x2xf32>
    %465 = vector.extract_strided_slice %464 {offsets = [0, 0], sizes = [2, 1], strides = [1, 1]} : vector<2x2xf32> to vector<2x1xf32>
    %466 = vector.extract_strided_slice %462 {offsets = [0, 0], sizes = [1, 512], strides = [1, 1]} : vector<2x512xf32> to vector<1x512xf32>
    %467 = vector.broadcast %465 : vector<2x1xf32> to vector<2x512xf32>
    %468 = vector.broadcast %466 : vector<1x512xf32> to vector<2x512xf32>
    %469 = arith.mulf %467, %468 : vector<2x512xf32>
    %470 = arith.addf %457, %469 : vector<2x512xf32>
    %471 = vector.extract_strided_slice %464 {offsets = [0, 1], sizes = [2, 1], strides = [1, 1]} : vector<2x2xf32> to vector<2x1xf32>
    %472 = vector.extract_strided_slice %462 {offsets = [1, 0], sizes = [1, 512], strides = [1, 1]} : vector<2x512xf32> to vector<1x512xf32>
    %473 = vector.broadcast %471 : vector<2x1xf32> to vector<2x512xf32>
    %474 = vector.broadcast %472 : vector<1x512xf32> to vector<2x512xf32>
    %475 = arith.mulf %473, %474 : vector<2x512xf32>
    %476 = arith.addf %470, %475 : vector<2x512xf32>
    %c440_i32 = arith.constant 440 : i32
    %477 = tpu.dynamic_rotate %3 by %c440_i32 dim 1 : vector<2x512xf32>, i32 -> vector<2x512xf32>
    %c25 = arith.constant 25 : index
    %c0_127 = arith.constant 0 : index
    %c0_128 = arith.constant 0 : index
    %478 = vector.load %arg6[%c25, %c0_127, %c0_128] : memref<27x1x512xf32, #tpu.memory_space<vmem>>, vector<1x1x512xf32>
    %479 = vector.shape_cast %478 : vector<1x1x512xf32> to vector<1x512xf32>
    %480 = vector.broadcast %479 : vector<1x512xf32> to vector<2x512xf32>
    %481 = arith.mulf %477, %480 : vector<2x512xf32>
    %c25_129 = arith.constant 25 : index
    %c0_130 = arith.constant 0 : index
    %c0_131 = arith.constant 0 : index
    %482 = vector.load %arg2[%c25_129, %c0_130, %c0_131] : memref<27x2x2xf32, #tpu.memory_space<vmem>>, vector<1x2x2xf32>
    %483 = vector.shape_cast %482 : vector<1x2x2xf32> to vector<2x2xf32>
    %484 = vector.extract_strided_slice %483 {offsets = [0, 0], sizes = [2, 1], strides = [1, 1]} : vector<2x2xf32> to vector<2x1xf32>
    %485 = vector.extract_strided_slice %481 {offsets = [0, 0], sizes = [1, 512], strides = [1, 1]} : vector<2x512xf32> to vector<1x512xf32>
    %486 = vector.broadcast %484 : vector<2x1xf32> to vector<2x512xf32>
    %487 = vector.broadcast %485 : vector<1x512xf32> to vector<2x512xf32>
    %488 = arith.mulf %486, %487 : vector<2x512xf32>
    %489 = arith.addf %476, %488 : vector<2x512xf32>
    %490 = vector.extract_strided_slice %483 {offsets = [0, 1], sizes = [2, 1], strides = [1, 1]} : vector<2x2xf32> to vector<2x1xf32>
    %491 = vector.extract_strided_slice %481 {offsets = [1, 0], sizes = [1, 512], strides = [1, 1]} : vector<2x512xf32> to vector<1x512xf32>
    %492 = vector.broadcast %490 : vector<2x1xf32> to vector<2x512xf32>
    %493 = vector.broadcast %491 : vector<1x512xf32> to vector<2x512xf32>
    %494 = arith.mulf %492, %493 : vector<2x512xf32>
    %495 = arith.addf %489, %494 : vector<2x512xf32>
    %c439_i32 = arith.constant 439 : i32
    %496 = tpu.dynamic_rotate %3 by %c439_i32 dim 1 : vector<2x512xf32>, i32 -> vector<2x512xf32>
    %c26 = arith.constant 26 : index
    %c0_132 = arith.constant 0 : index
    %c0_133 = arith.constant 0 : index
    %497 = vector.load %arg6[%c26, %c0_132, %c0_133] : memref<27x1x512xf32, #tpu.memory_space<vmem>>, vector<1x1x512xf32>
    %498 = vector.shape_cast %497 : vector<1x1x512xf32> to vector<1x512xf32>
    %499 = vector.broadcast %498 : vector<1x512xf32> to vector<2x512xf32>
    %500 = arith.mulf %496, %499 : vector<2x512xf32>
    %c26_134 = arith.constant 26 : index
    %c0_135 = arith.constant 0 : index
    %c0_136 = arith.constant 0 : index
    %501 = vector.load %arg2[%c26_134, %c0_135, %c0_136] : memref<27x2x2xf32, #tpu.memory_space<vmem>>, vector<1x2x2xf32>
    %502 = vector.shape_cast %501 : vector<1x2x2xf32> to vector<2x2xf32>
    %503 = vector.extract_strided_slice %502 {offsets = [0, 0], sizes = [2, 1], strides = [1, 1]} : vector<2x2xf32> to vector<2x1xf32>
    %504 = vector.extract_strided_slice %500 {offsets = [0, 0], sizes = [1, 512], strides = [1, 1]} : vector<2x512xf32> to vector<1x512xf32>
    %505 = vector.broadcast %503 : vector<2x1xf32> to vector<2x512xf32>
    %506 = vector.broadcast %504 : vector<1x512xf32> to vector<2x512xf32>
    %507 = arith.mulf %505, %506 : vector<2x512xf32>
    %508 = arith.addf %495, %507 : vector<2x512xf32>
    %509 = vector.extract_strided_slice %502 {offsets = [0, 1], sizes = [2, 1], strides = [1, 1]} : vector<2x2xf32> to vector<2x1xf32>
    %510 = vector.extract_strided_slice %500 {offsets = [1, 0], sizes = [1, 512], strides = [1, 1]} : vector<2x512xf32> to vector<1x512xf32>
    %511 = vector.broadcast %509 : vector<2x1xf32> to vector<2x512xf32>
    %512 = vector.broadcast %510 : vector<1x512xf32> to vector<2x512xf32>
    %513 = arith.mulf %511, %512 : vector<2x512xf32>
    %514 = arith.addf %508, %513 : vector<2x512xf32>
    %c0_137 = arith.constant 0 : index
    %c0_138 = arith.constant 0 : index
    %c0_139 = arith.constant 0 : index
    %515 = vector.load %arg7[%c0_137, %c0_138, %c0_139] : memref<1x4x512xf32, #tpu.memory_space<vmem>>, vector<1x2x512xf32>
    %516 = vector.shape_cast %515 : vector<1x2x512xf32> to vector<2x512xf32>
    %517 = vector.shape_cast %514 : vector<2x512xf32> to vector<1x2x512xf32>
    tpu.vector_store %arg7[%c0_137, %c0_138, %c0_139], %517 {strides = array<i32>} : memref<1x4x512xf32, #tpu.memory_space<vmem>>, vector<1x2x512xf32>,
    %c0_140 = arith.constant 0 : index
    %c0_141 = arith.constant 0 : index
    %518 = vector.load %arg5[%c0_140, %c0_141] : memref<2x1xf32, #tpu.memory_space<vmem>>, vector<2x1xf32>
    %519 = vector.broadcast %518 : vector<2x1xf32> to vector<2x512xf32>
    %520 = arith.addf %3, %519 : vector<2x512xf32>
    %c73_i32_142 = arith.constant 73 : i32
    %521 = tpu.dynamic_rotate %514 by %c73_i32_142 dim 1 : vector<2x512xf32>, i32 -> vector<2x512xf32>
    %c0_143 = arith.constant 0 : index
    %c0_144 = arith.constant 0 : index
    %c0_145 = arith.constant 0 : index
    %522 = vector.load %arg6[%c0_143, %c0_144, %c0_145] : memref<27x1x512xf32, #tpu.memory_space<vmem>>, vector<1x1x512xf32>
    %523 = vector.shape_cast %522 : vector<1x1x512xf32> to vector<1x512xf32>
    %524 = vector.broadcast %523 : vector<1x512xf32> to vector<2x512xf32>
    %525 = arith.mulf %521, %524 : vector<2x512xf32>
    %c0_146 = arith.constant 0 : index
    %c0_147 = arith.constant 0 : index
    %c0_148 = arith.constant 0 : index
    %526 = vector.load %arg4[%c0_146, %c0_147, %c0_148] : memref<27x2x2xf32, #tpu.memory_space<vmem>>, vector<1x2x2xf32>
    %527 = vector.shape_cast %526 : vector<1x2x2xf32> to vector<2x2xf32>
    %528 = vector.extract_strided_slice %527 {offsets = [0, 0], sizes = [2, 1], strides = [1, 1]} : vector<2x2xf32> to vector<2x1xf32>
    %529 = vector.extract_strided_slice %525 {offsets = [0, 0], sizes = [1, 512], strides = [1, 1]} : vector<2x512xf32> to vector<1x512xf32>
    %530 = vector.broadcast %528 : vector<2x1xf32> to vector<2x512xf32>
    %531 = vector.broadcast %529 : vector<1x512xf32> to vector<2x512xf32>
    %532 = arith.mulf %530, %531 : vector<2x512xf32>
    %533 = arith.addf %520, %532 : vector<2x512xf32>
    %534 = vector.extract_strided_slice %527 {offsets = [0, 1], sizes = [2, 1], strides = [1, 1]} : vector<2x2xf32> to vector<2x1xf32>
    %535 = vector.extract_strided_slice %525 {offsets = [1, 0], sizes = [1, 512], strides = [1, 1]} : vector<2x512xf32> to vector<1x512xf32>
    %536 = vector.broadcast %534 : vector<2x1xf32> to vector<2x512xf32>
    %537 = vector.broadcast %535 : vector<1x512xf32> to vector<2x512xf32>
    %538 = arith.mulf %536, %537 : vector<2x512xf32>
    %539 = arith.addf %533, %538 : vector<2x512xf32>
    %c72_i32_149 = arith.constant 72 : i32
    %540 = tpu.dynamic_rotate %514 by %c72_i32_149 dim 1 : vector<2x512xf32>, i32 -> vector<2x512xf32>
    %c1_150 = arith.constant 1 : index
    %c0_151 = arith.constant 0 : index
    %c0_152 = arith.constant 0 : index
    %541 = vector.load %arg6[%c1_150, %c0_151, %c0_152] : memref<27x1x512xf32, #tpu.memory_space<vmem>>, vector<1x1x512xf32>
    %542 = vector.shape_cast %541 : vector<1x1x512xf32> to vector<1x512xf32>
    %543 = vector.broadcast %542 : vector<1x512xf32> to vector<2x512xf32>
    %544 = arith.mulf %540, %543 : vector<2x512xf32>
    %c1_153 = arith.constant 1 : index
    %c0_154 = arith.constant 0 : index
    %c0_155 = arith.constant 0 : index
    %545 = vector.load %arg4[%c1_153, %c0_154, %c0_155] : memref<27x2x2xf32, #tpu.memory_space<vmem>>, vector<1x2x2xf32>
    %546 = vector.shape_cast %545 : vector<1x2x2xf32> to vector<2x2xf32>
    %547 = vector.extract_strided_slice %546 {offsets = [0, 0], sizes = [2, 1], strides = [1, 1]} : vector<2x2xf32> to vector<2x1xf32>
    %548 = vector.extract_strided_slice %544 {offsets = [0, 0], sizes = [1, 512], strides = [1, 1]} : vector<2x512xf32> to vector<1x512xf32>
    %549 = vector.broadcast %547 : vector<2x1xf32> to vector<2x512xf32>
    %550 = vector.broadcast %548 : vector<1x512xf32> to vector<2x512xf32>
    %551 = arith.mulf %549, %550 : vector<2x512xf32>
    %552 = arith.addf %539, %551 : vector<2x512xf32>
    %553 = vector.extract_strided_slice %546 {offsets = [0, 1], sizes = [2, 1], strides = [1, 1]} : vector<2x2xf32> to vector<2x1xf32>
    %554 = vector.extract_strided_slice %544 {offsets = [1, 0], sizes = [1, 512], strides = [1, 1]} : vector<2x512xf32> to vector<1x512xf32>
    %555 = vector.broadcast %553 : vector<2x1xf32> to vector<2x512xf32>
    %556 = vector.broadcast %554 : vector<1x512xf32> to vector<2x512xf32>
    %557 = arith.mulf %555, %556 : vector<2x512xf32>
    %558 = arith.addf %552, %557 : vector<2x512xf32>
    %c71_i32_156 = arith.constant 71 : i32
    %559 = tpu.dynamic_rotate %514 by %c71_i32_156 dim 1 : vector<2x512xf32>, i32 -> vector<2x512xf32>
    %c2_157 = arith.constant 2 : index
    %c0_158 = arith.constant 0 : index
    %c0_159 = arith.constant 0 : index
    %560 = vector.load %arg6[%c2_157, %c0_158, %c0_159] : memref<27x1x512xf32, #tpu.memory_space<vmem>>, vector<1x1x512xf32>
    %561 = vector.shape_cast %560 : vector<1x1x512xf32> to vector<1x512xf32>
    %562 = vector.broadcast %561 : vector<1x512xf32> to vector<2x512xf32>
    %563 = arith.mulf %559, %562 : vector<2x512xf32>
    %c2_160 = arith.constant 2 : index
    %c0_161 = arith.constant 0 : index
    %c0_162 = arith.constant 0 : index
    %564 = vector.load %arg4[%c2_160, %c0_161, %c0_162] : memref<27x2x2xf32, #tpu.memory_space<vmem>>, vector<1x2x2xf32>
    %565 = vector.shape_cast %564 : vector<1x2x2xf32> to vector<2x2xf32>
    %566 = vector.extract_strided_slice %565 {offsets = [0, 0], sizes = [2, 1], strides = [1, 1]} : vector<2x2xf32> to vector<2x1xf32>
    %567 = vector.extract_strided_slice %563 {offsets = [0, 0], sizes = [1, 512], strides = [1, 1]} : vector<2x512xf32> to vector<1x512xf32>
    %568 = vector.broadcast %566 : vector<2x1xf32> to vector<2x512xf32>
    %569 = vector.broadcast %567 : vector<1x512xf32> to vector<2x512xf32>
    %570 = arith.mulf %568, %569 : vector<2x512xf32>
    %571 = arith.addf %558, %570 : vector<2x512xf32>
    %572 = vector.extract_strided_slice %565 {offsets = [0, 1], sizes = [2, 1], strides = [1, 1]} : vector<2x2xf32> to vector<2x1xf32>
    %573 = vector.extract_strided_slice %563 {offsets = [1, 0], sizes = [1, 512], strides = [1, 1]} : vector<2x512xf32> to vector<1x512xf32>
    %574 = vector.broadcast %572 : vector<2x1xf32> to vector<2x512xf32>
    %575 = vector.broadcast %573 : vector<1x512xf32> to vector<2x512xf32>
    %576 = arith.mulf %574, %575 : vector<2x512xf32>
    %577 = arith.addf %571, %576 : vector<2x512xf32>
    %c65_i32_163 = arith.constant 65 : i32
    %578 = tpu.dynamic_rotate %514 by %c65_i32_163 dim 1 : vector<2x512xf32>, i32 -> vector<2x512xf32>
    %c3_164 = arith.constant 3 : index
    %c0_165 = arith.constant 0 : index
    %c0_166 = arith.constant 0 : index
    %579 = vector.load %arg6[%c3_164, %c0_165, %c0_166] : memref<27x1x512xf32, #tpu.memory_space<vmem>>, vector<1x1x512xf32>
    %580 = vector.shape_cast %579 : vector<1x1x512xf32> to vector<1x512xf32>
    %581 = vector.broadcast %580 : vector<1x512xf32> to vector<2x512xf32>
    %582 = arith.mulf %578, %581 : vector<2x512xf32>
    %c3_167 = arith.constant 3 : index
    %c0_168 = arith.constant 0 : index
    %c0_169 = arith.constant 0 : index
    %583 = vector.load %arg4[%c3_167, %c0_168, %c0_169] : memref<27x2x2xf32, #tpu.memory_space<vmem>>, vector<1x2x2xf32>
    %584 = vector.shape_cast %583 : vector<1x2x2xf32> to vector<2x2xf32>
    %585 = vector.extract_strided_slice %584 {offsets = [0, 0], sizes = [2, 1], strides = [1, 1]} : vector<2x2xf32> to vector<2x1xf32>
    %586 = vector.extract_strided_slice %582 {offsets = [0, 0], sizes = [1, 512], strides = [1, 1]} : vector<2x512xf32> to vector<1x512xf32>
    %587 = vector.broadcast %585 : vector<2x1xf32> to vector<2x512xf32>
    %588 = vector.broadcast %586 : vector<1x512xf32> to vector<2x512xf32>
    %589 = arith.mulf %587, %588 : vector<2x512xf32>
    %590 = arith.addf %577, %589 : vector<2x512xf32>
    %591 = vector.extract_strided_slice %584 {offsets = [0, 1], sizes = [2, 1], strides = [1, 1]} : vector<2x2xf32> to vector<2x1xf32>
    %592 = vector.extract_strided_slice %582 {offsets = [1, 0], sizes = [1, 512], strides = [1, 1]} : vector<2x512xf32> to vector<1x512xf32>
    %593 = vector.broadcast %591 : vector<2x1xf32> to vector<2x512xf32>
    %594 = vector.broadcast %592 : vector<1x512xf32> to vector<2x512xf32>
    %595 = arith.mulf %593, %594 : vector<2x512xf32>
    %596 = arith.addf %590, %595 : vector<2x512xf32>
    %c64_i32_170 = arith.constant 64 : i32
    %597 = tpu.dynamic_rotate %514 by %c64_i32_170 dim 1 : vector<2x512xf32>, i32 -> vector<2x512xf32>
    %c4_171 = arith.constant 4 : index
    %c0_172 = arith.constant 0 : index
    %c0_173 = arith.constant 0 : index
    %598 = vector.load %arg6[%c4_171, %c0_172, %c0_173] : memref<27x1x512xf32, #tpu.memory_space<vmem>>, vector<1x1x512xf32>
    %599 = vector.shape_cast %598 : vector<1x1x512xf32> to vector<1x512xf32>
    %600 = vector.broadcast %599 : vector<1x512xf32> to vector<2x512xf32>
    %601 = arith.mulf %597, %600 : vector<2x512xf32>
    %c4_174 = arith.constant 4 : index
    %c0_175 = arith.constant 0 : index
    %c0_176 = arith.constant 0 : index
    %602 = vector.load %arg4[%c4_174, %c0_175, %c0_176] : memref<27x2x2xf32, #tpu.memory_space<vmem>>, vector<1x2x2xf32>
    %603 = vector.shape_cast %602 : vector<1x2x2xf32> to vector<2x2xf32>
    %604 = vector.extract_strided_slice %603 {offsets = [0, 0], sizes = [2, 1], strides = [1, 1]} : vector<2x2xf32> to vector<2x1xf32>
    %605 = vector.extract_strided_slice %601 {offsets = [0, 0], sizes = [1, 512], strides = [1, 1]} : vector<2x512xf32> to vector<1x512xf32>
    %606 = vector.broadcast %604 : vector<2x1xf32> to vector<2x512xf32>
    %607 = vector.broadcast %605 : vector<1x512xf32> to vector<2x512xf32>
    %608 = arith.mulf %606, %607 : vector<2x512xf32>
    %609 = arith.addf %596, %608 : vector<2x512xf32>
    %610 = vector.extract_strided_slice %603 {offsets = [0, 1], sizes = [2, 1], strides = [1, 1]} : vector<2x2xf32> to vector<2x1xf32>
    %611 = vector.extract_strided_slice %601 {offsets = [1, 0], sizes = [1, 512], strides = [1, 1]} : vector<2x512xf32> to vector<1x512xf32>
    %612 = vector.broadcast %610 : vector<2x1xf32> to vector<2x512xf32>
    %613 = vector.broadcast %611 : vector<1x512xf32> to vector<2x512xf32>
    %614 = arith.mulf %612, %613 : vector<2x512xf32>
    %615 = arith.addf %609, %614 : vector<2x512xf32>
    %c63_i32_177 = arith.constant 63 : i32
    %616 = tpu.dynamic_rotate %514 by %c63_i32_177 dim 1 : vector<2x512xf32>, i32 -> vector<2x512xf32>
    %c5_178 = arith.constant 5 : index
    %c0_179 = arith.constant 0 : index
    %c0_180 = arith.constant 0 : index
    %617 = vector.load %arg6[%c5_178, %c0_179, %c0_180] : memref<27x1x512xf32, #tpu.memory_space<vmem>>, vector<1x1x512xf32>
    %618 = vector.shape_cast %617 : vector<1x1x512xf32> to vector<1x512xf32>
    %619 = vector.broadcast %618 : vector<1x512xf32> to vector<2x512xf32>
    %620 = arith.mulf %616, %619 : vector<2x512xf32>
    %c5_181 = arith.constant 5 : index
    %c0_182 = arith.constant 0 : index
    %c0_183 = arith.constant 0 : index
    %621 = vector.load %arg4[%c5_181, %c0_182, %c0_183] : memref<27x2x2xf32, #tpu.memory_space<vmem>>, vector<1x2x2xf32>
    %622 = vector.shape_cast %621 : vector<1x2x2xf32> to vector<2x2xf32>
    %623 = vector.extract_strided_slice %622 {offsets = [0, 0], sizes = [2, 1], strides = [1, 1]} : vector<2x2xf32> to vector<2x1xf32>
    %624 = vector.extract_strided_slice %620 {offsets = [0, 0], sizes = [1, 512], strides = [1, 1]} : vector<2x512xf32> to vector<1x512xf32>
    %625 = vector.broadcast %623 : vector<2x1xf32> to vector<2x512xf32>
    %626 = vector.broadcast %624 : vector<1x512xf32> to vector<2x512xf32>
    %627 = arith.mulf %625, %626 : vector<2x512xf32>
    %628 = arith.addf %615, %627 : vector<2x512xf32>
    %629 = vector.extract_strided_slice %622 {offsets = [0, 1], sizes = [2, 1], strides = [1, 1]} : vector<2x2xf32> to vector<2x1xf32>
    %630 = vector.extract_strided_slice %620 {offsets = [1, 0], sizes = [1, 512], strides = [1, 1]} : vector<2x512xf32> to vector<1x512xf32>
    %631 = vector.broadcast %629 : vector<2x1xf32> to vector<2x512xf32>
    %632 = vector.broadcast %630 : vector<1x512xf32> to vector<2x512xf32>
    %633 = arith.mulf %631, %632 : vector<2x512xf32>
    %634 = arith.addf %628, %633 : vector<2x512xf32>
    %c57_i32_184 = arith.constant 57 : i32
    %635 = tpu.dynamic_rotate %514 by %c57_i32_184 dim 1 : vector<2x512xf32>, i32 -> vector<2x512xf32>
    %c6_185 = arith.constant 6 : index
    %c0_186 = arith.constant 0 : index
    %c0_187 = arith.constant 0 : index
    %636 = vector.load %arg6[%c6_185, %c0_186, %c0_187] : memref<27x1x512xf32, #tpu.memory_space<vmem>>, vector<1x1x512xf32>
    %637 = vector.shape_cast %636 : vector<1x1x512xf32> to vector<1x512xf32>
    %638 = vector.broadcast %637 : vector<1x512xf32> to vector<2x512xf32>
    %639 = arith.mulf %635, %638 : vector<2x512xf32>
    %c6_188 = arith.constant 6 : index
    %c0_189 = arith.constant 0 : index
    %c0_190 = arith.constant 0 : index
    %640 = vector.load %arg4[%c6_188, %c0_189, %c0_190] : memref<27x2x2xf32, #tpu.memory_space<vmem>>, vector<1x2x2xf32>
    %641 = vector.shape_cast %640 : vector<1x2x2xf32> to vector<2x2xf32>
    %642 = vector.extract_strided_slice %641 {offsets = [0, 0], sizes = [2, 1], strides = [1, 1]} : vector<2x2xf32> to vector<2x1xf32>
    %643 = vector.extract_strided_slice %639 {offsets = [0, 0], sizes = [1, 512], strides = [1, 1]} : vector<2x512xf32> to vector<1x512xf32>
    %644 = vector.broadcast %642 : vector<2x1xf32> to vector<2x512xf32>
    %645 = vector.broadcast %643 : vector<1x512xf32> to vector<2x512xf32>
    %646 = arith.mulf %644, %645 : vector<2x512xf32>
    %647 = arith.addf %634, %646 : vector<2x512xf32>
    %648 = vector.extract_strided_slice %641 {offsets = [0, 1], sizes = [2, 1], strides = [1, 1]} : vector<2x2xf32> to vector<2x1xf32>
    %649 = vector.extract_strided_slice %639 {offsets = [1, 0], sizes = [1, 512], strides = [1, 1]} : vector<2x512xf32> to vector<1x512xf32>
    %650 = vector.broadcast %648 : vector<2x1xf32> to vector<2x512xf32>
    %651 = vector.broadcast %649 : vector<1x512xf32> to vector<2x512xf32>
    %652 = arith.mulf %650, %651 : vector<2x512xf32>
    %653 = arith.addf %647, %652 : vector<2x512xf32>
    %c56_i32_191 = arith.constant 56 : i32
    %654 = tpu.dynamic_rotate %514 by %c56_i32_191 dim 1 : vector<2x512xf32>, i32 -> vector<2x512xf32>
    %c7_192 = arith.constant 7 : index
    %c0_193 = arith.constant 0 : index
    %c0_194 = arith.constant 0 : index
    %655 = vector.load %arg6[%c7_192, %c0_193, %c0_194] : memref<27x1x512xf32, #tpu.memory_space<vmem>>, vector<1x1x512xf32>
    %656 = vector.shape_cast %655 : vector<1x1x512xf32> to vector<1x512xf32>
    %657 = vector.broadcast %656 : vector<1x512xf32> to vector<2x512xf32>
    %658 = arith.mulf %654, %657 : vector<2x512xf32>
    %c7_195 = arith.constant 7 : index
    %c0_196 = arith.constant 0 : index
    %c0_197 = arith.constant 0 : index
    %659 = vector.load %arg4[%c7_195, %c0_196, %c0_197] : memref<27x2x2xf32, #tpu.memory_space<vmem>>, vector<1x2x2xf32>
    %660 = vector.shape_cast %659 : vector<1x2x2xf32> to vector<2x2xf32>
    %661 = vector.extract_strided_slice %660 {offsets = [0, 0], sizes = [2, 1], strides = [1, 1]} : vector<2x2xf32> to vector<2x1xf32>
    %662 = vector.extract_strided_slice %658 {offsets = [0, 0], sizes = [1, 512], strides = [1, 1]} : vector<2x512xf32> to vector<1x512xf32>
    %663 = vector.broadcast %661 : vector<2x1xf32> to vector<2x512xf32>
    %664 = vector.broadcast %662 : vector<1x512xf32> to vector<2x512xf32>
    %665 = arith.mulf %663, %664 : vector<2x512xf32>
    %666 = arith.addf %653, %665 : vector<2x512xf32>
    %667 = vector.extract_strided_slice %660 {offsets = [0, 1], sizes = [2, 1], strides = [1, 1]} : vector<2x2xf32> to vector<2x1xf32>
    %668 = vector.extract_strided_slice %658 {offsets = [1, 0], sizes = [1, 512], strides = [1, 1]} : vector<2x512xf32> to vector<1x512xf32>
    %669 = vector.broadcast %667 : vector<2x1xf32> to vector<2x512xf32>
    %670 = vector.broadcast %668 : vector<1x512xf32> to vector<2x512xf32>
    %671 = arith.mulf %669, %670 : vector<2x512xf32>
    %672 = arith.addf %666, %671 : vector<2x512xf32>
    %c55_i32_198 = arith.constant 55 : i32
    %673 = tpu.dynamic_rotate %514 by %c55_i32_198 dim 1 : vector<2x512xf32>, i32 -> vector<2x512xf32>
    %c8_199 = arith.constant 8 : index
    %c0_200 = arith.constant 0 : index
    %c0_201 = arith.constant 0 : index
    %674 = vector.load %arg6[%c8_199, %c0_200, %c0_201] : memref<27x1x512xf32, #tpu.memory_space<vmem>>, vector<1x1x512xf32>
    %675 = vector.shape_cast %674 : vector<1x1x512xf32> to vector<1x512xf32>
    %676 = vector.broadcast %675 : vector<1x512xf32> to vector<2x512xf32>
    %677 = arith.mulf %673, %676 : vector<2x512xf32>
    %c8_202 = arith.constant 8 : index
    %c0_203 = arith.constant 0 : index
    %c0_204 = arith.constant 0 : index
    %678 = vector.load %arg4[%c8_202, %c0_203, %c0_204] : memref<27x2x2xf32, #tpu.memory_space<vmem>>, vector<1x2x2xf32>
    %679 = vector.shape_cast %678 : vector<1x2x2xf32> to vector<2x2xf32>
    %680 = vector.extract_strided_slice %679 {offsets = [0, 0], sizes = [2, 1], strides = [1, 1]} : vector<2x2xf32> to vector<2x1xf32>
    %681 = vector.extract_strided_slice %677 {offsets = [0, 0], sizes = [1, 512], strides = [1, 1]} : vector<2x512xf32> to vector<1x512xf32>
    %682 = vector.broadcast %680 : vector<2x1xf32> to vector<2x512xf32>
    %683 = vector.broadcast %681 : vector<1x512xf32> to vector<2x512xf32>
    %684 = arith.mulf %682, %683 : vector<2x512xf32>
    %685 = arith.addf %672, %684 : vector<2x512xf32>
    %686 = vector.extract_strided_slice %679 {offsets = [0, 1], sizes = [2, 1], strides = [1, 1]} : vector<2x2xf32> to vector<2x1xf32>
    %687 = vector.extract_strided_slice %677 {offsets = [1, 0], sizes = [1, 512], strides = [1, 1]} : vector<2x512xf32> to vector<1x512xf32>
    %688 = vector.broadcast %686 : vector<2x1xf32> to vector<2x512xf32>
    %689 = vector.broadcast %687 : vector<1x512xf32> to vector<2x512xf32>
    %690 = arith.mulf %688, %689 : vector<2x512xf32>
    %691 = arith.addf %685, %690 : vector<2x512xf32>
    %c9_i32_205 = arith.constant 9 : i32
    %692 = tpu.dynamic_rotate %514 by %c9_i32_205 dim 1 : vector<2x512xf32>, i32 -> vector<2x512xf32>
    %c9_206 = arith.constant 9 : index
    %c0_207 = arith.constant 0 : index
    %c0_208 = arith.constant 0 : index
    %693 = vector.load %arg6[%c9_206, %c0_207, %c0_208] : memref<27x1x512xf32, #tpu.memory_space<vmem>>, vector<1x1x512xf32>
    %694 = vector.shape_cast %693 : vector<1x1x512xf32> to vector<1x512xf32>
    %695 = vector.broadcast %694 : vector<1x512xf32> to vector<2x512xf32>
    %696 = arith.mulf %692, %695 : vector<2x512xf32>
    %c9_209 = arith.constant 9 : index
    %c0_210 = arith.constant 0 : index
    %c0_211 = arith.constant 0 : index
    %697 = vector.load %arg4[%c9_209, %c0_210, %c0_211] : memref<27x2x2xf32, #tpu.memory_space<vmem>>, vector<1x2x2xf32>
    %698 = vector.shape_cast %697 : vector<1x2x2xf32> to vector<2x2xf32>
    %699 = vector.extract_strided_slice %698 {offsets = [0, 0], sizes = [2, 1], strides = [1, 1]} : vector<2x2xf32> to vector<2x1xf32>
    %700 = vector.extract_strided_slice %696 {offsets = [0, 0], sizes = [1, 512], strides = [1, 1]} : vector<2x512xf32> to vector<1x512xf32>
    %701 = vector.broadcast %699 : vector<2x1xf32> to vector<2x512xf32>
    %702 = vector.broadcast %700 : vector<1x512xf32> to vector<2x512xf32>
    %703 = arith.mulf %701, %702 : vector<2x512xf32>
    %704 = arith.addf %691, %703 : vector<2x512xf32>
    %705 = vector.extract_strided_slice %698 {offsets = [0, 1], sizes = [2, 1], strides = [1, 1]} : vector<2x2xf32> to vector<2x1xf32>
    %706 = vector.extract_strided_slice %696 {offsets = [1, 0], sizes = [1, 512], strides = [1, 1]} : vector<2x512xf32> to vector<1x512xf32>
    %707 = vector.broadcast %705 : vector<2x1xf32> to vector<2x512xf32>
    %708 = vector.broadcast %706 : vector<1x512xf32> to vector<2x512xf32>
    %709 = arith.mulf %707, %708 : vector<2x512xf32>
    %710 = arith.addf %704, %709 : vector<2x512xf32>
    %c8_i32_212 = arith.constant 8 : i32
    %711 = tpu.dynamic_rotate %514 by %c8_i32_212 dim 1 : vector<2x512xf32>, i32 -> vector<2x512xf32>
    %c10_213 = arith.constant 10 : index
    %c0_214 = arith.constant 0 : index
    %c0_215 = arith.constant 0 : index
    %712 = vector.load %arg6[%c10_213, %c0_214, %c0_215] : memref<27x1x512xf32, #tpu.memory_space<vmem>>, vector<1x1x512xf32>
    %713 = vector.shape_cast %712 : vector<1x1x512xf32> to vector<1x512xf32>
    %714 = vector.broadcast %713 : vector<1x512xf32> to vector<2x512xf32>
    %715 = arith.mulf %711, %714 : vector<2x512xf32>
    %c10_216 = arith.constant 10 : index
    %c0_217 = arith.constant 0 : index
    %c0_218 = arith.constant 0 : index
    %716 = vector.load %arg4[%c10_216, %c0_217, %c0_218] : memref<27x2x2xf32, #tpu.memory_space<vmem>>, vector<1x2x2xf32>
    %717 = vector.shape_cast %716 : vector<1x2x2xf32> to vector<2x2xf32>
    %718 = vector.extract_strided_slice %717 {offsets = [0, 0], sizes = [2, 1], strides = [1, 1]} : vector<2x2xf32> to vector<2x1xf32>
    %719 = vector.extract_strided_slice %715 {offsets = [0, 0], sizes = [1, 512], strides = [1, 1]} : vector<2x512xf32> to vector<1x512xf32>
    %720 = vector.broadcast %718 : vector<2x1xf32> to vector<2x512xf32>
    %721 = vector.broadcast %719 : vector<1x512xf32> to vector<2x512xf32>
    %722 = arith.mulf %720, %721 : vector<2x512xf32>
    %723 = arith.addf %710, %722 : vector<2x512xf32>
    %724 = vector.extract_strided_slice %717 {offsets = [0, 1], sizes = [2, 1], strides = [1, 1]} : vector<2x2xf32> to vector<2x1xf32>
    %725 = vector.extract_strided_slice %715 {offsets = [1, 0], sizes = [1, 512], strides = [1, 1]} : vector<2x512xf32> to vector<1x512xf32>
    %726 = vector.broadcast %724 : vector<2x1xf32> to vector<2x512xf32>
    %727 = vector.broadcast %725 : vector<1x512xf32> to vector<2x512xf32>
    %728 = arith.mulf %726, %727 : vector<2x512xf32>
    %729 = arith.addf %723, %728 : vector<2x512xf32>
    %c7_i32_219 = arith.constant 7 : i32
    %730 = tpu.dynamic_rotate %514 by %c7_i32_219 dim 1 : vector<2x512xf32>, i32 -> vector<2x512xf32>
    %c11_220 = arith.constant 11 : index
    %c0_221 = arith.constant 0 : index
    %c0_222 = arith.constant 0 : index
    %731 = vector.load %arg6[%c11_220, %c0_221, %c0_222] : memref<27x1x512xf32, #tpu.memory_space<vmem>>, vector<1x1x512xf32>
    %732 = vector.shape_cast %731 : vector<1x1x512xf32> to vector<1x512xf32>
    %733 = vector.broadcast %732 : vector<1x512xf32> to vector<2x512xf32>
    %734 = arith.mulf %730, %733 : vector<2x512xf32>
    %c11_223 = arith.constant 11 : index
    %c0_224 = arith.constant 0 : index
    %c0_225 = arith.constant 0 : index
    %735 = vector.load %arg4[%c11_223, %c0_224, %c0_225] : memref<27x2x2xf32, #tpu.memory_space<vmem>>, vector<1x2x2xf32>
    %736 = vector.shape_cast %735 : vector<1x2x2xf32> to vector<2x2xf32>
    %737 = vector.extract_strided_slice %736 {offsets = [0, 0], sizes = [2, 1], strides = [1, 1]} : vector<2x2xf32> to vector<2x1xf32>
    %738 = vector.extract_strided_slice %734 {offsets = [0, 0], sizes = [1, 512], strides = [1, 1]} : vector<2x512xf32> to vector<1x512xf32>
    %739 = vector.broadcast %737 : vector<2x1xf32> to vector<2x512xf32>
    %740 = vector.broadcast %738 : vector<1x512xf32> to vector<2x512xf32>
    %741 = arith.mulf %739, %740 : vector<2x512xf32>
    %742 = arith.addf %729, %741 : vector<2x512xf32>
    %743 = vector.extract_strided_slice %736 {offsets = [0, 1], sizes = [2, 1], strides = [1, 1]} : vector<2x2xf32> to vector<2x1xf32>
    %744 = vector.extract_strided_slice %734 {offsets = [1, 0], sizes = [1, 512], strides = [1, 1]} : vector<2x512xf32> to vector<1x512xf32>
    %745 = vector.broadcast %743 : vector<2x1xf32> to vector<2x512xf32>
    %746 = vector.broadcast %744 : vector<1x512xf32> to vector<2x512xf32>
    %747 = arith.mulf %745, %746 : vector<2x512xf32>
    %748 = arith.addf %742, %747 : vector<2x512xf32>
    %c1_i32_226 = arith.constant 1 : i32
    %749 = tpu.dynamic_rotate %514 by %c1_i32_226 dim 1 : vector<2x512xf32>, i32 -> vector<2x512xf32>
    %c12_227 = arith.constant 12 : index
    %c0_228 = arith.constant 0 : index
    %c0_229 = arith.constant 0 : index
    %750 = vector.load %arg6[%c12_227, %c0_228, %c0_229] : memref<27x1x512xf32, #tpu.memory_space<vmem>>, vector<1x1x512xf32>
    %751 = vector.shape_cast %750 : vector<1x1x512xf32> to vector<1x512xf32>
    %752 = vector.broadcast %751 : vector<1x512xf32> to vector<2x512xf32>
    %753 = arith.mulf %749, %752 : vector<2x512xf32>
    %c12_230 = arith.constant 12 : index
    %c0_231 = arith.constant 0 : index
    %c0_232 = arith.constant 0 : index
    %754 = vector.load %arg4[%c12_230, %c0_231, %c0_232] : memref<27x2x2xf32, #tpu.memory_space<vmem>>, vector<1x2x2xf32>
    %755 = vector.shape_cast %754 : vector<1x2x2xf32> to vector<2x2xf32>
    %756 = vector.extract_strided_slice %755 {offsets = [0, 0], sizes = [2, 1], strides = [1, 1]} : vector<2x2xf32> to vector<2x1xf32>
    %757 = vector.extract_strided_slice %753 {offsets = [0, 0], sizes = [1, 512], strides = [1, 1]} : vector<2x512xf32> to vector<1x512xf32>
    %758 = vector.broadcast %756 : vector<2x1xf32> to vector<2x512xf32>
    %759 = vector.broadcast %757 : vector<1x512xf32> to vector<2x512xf32>
    %760 = arith.mulf %758, %759 : vector<2x512xf32>
    %761 = arith.addf %748, %760 : vector<2x512xf32>
    %762 = vector.extract_strided_slice %755 {offsets = [0, 1], sizes = [2, 1], strides = [1, 1]} : vector<2x2xf32> to vector<2x1xf32>
    %763 = vector.extract_strided_slice %753 {offsets = [1, 0], sizes = [1, 512], strides = [1, 1]} : vector<2x512xf32> to vector<1x512xf32>
    %764 = vector.broadcast %762 : vector<2x1xf32> to vector<2x512xf32>
    %765 = vector.broadcast %763 : vector<1x512xf32> to vector<2x512xf32>
    %766 = arith.mulf %764, %765 : vector<2x512xf32>
    %767 = arith.addf %761, %766 : vector<2x512xf32>
    %c13_233 = arith.constant 13 : index
    %c0_234 = arith.constant 0 : index
    %c0_235 = arith.constant 0 : index
    %768 = vector.load %arg4[%c13_233, %c0_234, %c0_235] : memref<27x2x2xf32, #tpu.memory_space<vmem>>, vector<1x2x2xf32>
    %769 = vector.shape_cast %768 : vector<1x2x2xf32> to vector<2x2xf32>
    %770 = vector.extract_strided_slice %769 {offsets = [0, 0], sizes = [2, 1], strides = [1, 1]} : vector<2x2xf32> to vector<2x1xf32>
    %771 = vector.extract_strided_slice %514 {offsets = [0, 0], sizes = [1, 512], strides = [1, 1]} : vector<2x512xf32> to vector<1x512xf32>
    %772 = vector.broadcast %770 : vector<2x1xf32> to vector<2x512xf32>
    %773 = vector.broadcast %771 : vector<1x512xf32> to vector<2x512xf32>
    %774 = arith.mulf %772, %773 : vector<2x512xf32>
    %775 = arith.addf %767, %774 : vector<2x512xf32>
    %776 = vector.extract_strided_slice %769 {offsets = [0, 1], sizes = [2, 1], strides = [1, 1]} : vector<2x2xf32> to vector<2x1xf32>
    %777 = vector.extract_strided_slice %514 {offsets = [1, 0], sizes = [1, 512], strides = [1, 1]} : vector<2x512xf32> to vector<1x512xf32>
    %778 = vector.broadcast %776 : vector<2x1xf32> to vector<2x512xf32>
    %779 = vector.broadcast %777 : vector<1x512xf32> to vector<2x512xf32>
    %780 = arith.mulf %778, %779 : vector<2x512xf32>
    %781 = arith.addf %775, %780 : vector<2x512xf32>
    %c511_i32_236 = arith.constant 511 : i32
    %782 = tpu.dynamic_rotate %514 by %c511_i32_236 dim 1 : vector<2x512xf32>, i32 -> vector<2x512xf32>
    %c14_237 = arith.constant 14 : index
    %c0_238 = arith.constant 0 : index
    %c0_239 = arith.constant 0 : index
    %783 = vector.load %arg6[%c14_237, %c0_238, %c0_239] : memref<27x1x512xf32, #tpu.memory_space<vmem>>, vector<1x1x512xf32>
    %784 = vector.shape_cast %783 : vector<1x1x512xf32> to vector<1x512xf32>
    %785 = vector.broadcast %784 : vector<1x512xf32> to vector<2x512xf32>
    %786 = arith.mulf %782, %785 : vector<2x512xf32>
    %c14_240 = arith.constant 14 : index
    %c0_241 = arith.constant 0 : index
    %c0_242 = arith.constant 0 : index
    %787 = vector.load %arg4[%c14_240, %c0_241, %c0_242] : memref<27x2x2xf32, #tpu.memory_space<vmem>>, vector<1x2x2xf32>
    %788 = vector.shape_cast %787 : vector<1x2x2xf32> to vector<2x2xf32>
    %789 = vector.extract_strided_slice %788 {offsets = [0, 0], sizes = [2, 1], strides = [1, 1]} : vector<2x2xf32> to vector<2x1xf32>
    %790 = vector.extract_strided_slice %786 {offsets = [0, 0], sizes = [1, 512], strides = [1, 1]} : vector<2x512xf32> to vector<1x512xf32>
    %791 = vector.broadcast %789 : vector<2x1xf32> to vector<2x512xf32>
    %792 = vector.broadcast %790 : vector<1x512xf32> to vector<2x512xf32>
    %793 = arith.mulf %791, %792 : vector<2x512xf32>
    %794 = arith.addf %781, %793 : vector<2x512xf32>
    %795 = vector.extract_strided_slice %788 {offsets = [0, 1], sizes = [2, 1], strides = [1, 1]} : vector<2x2xf32> to vector<2x1xf32>
    %796 = vector.extract_strided_slice %786 {offsets = [1, 0], sizes = [1, 512], strides = [1, 1]} : vector<2x512xf32> to vector<1x512xf32>
    %797 = vector.broadcast %795 : vector<2x1xf32> to vector<2x512xf32>
    %798 = vector.broadcast %796 : vector<1x512xf32> to vector<2x512xf32>
    %799 = arith.mulf %797, %798 : vector<2x512xf32>
    %800 = arith.addf %794, %799 : vector<2x512xf32>
    %c505_i32_243 = arith.constant 505 : i32
    %801 = tpu.dynamic_rotate %514 by %c505_i32_243 dim 1 : vector<2x512xf32>, i32 -> vector<2x512xf32>
    %c15_244 = arith.constant 15 : index
    %c0_245 = arith.constant 0 : index
    %c0_246 = arith.constant 0 : index
    %802 = vector.load %arg6[%c15_244, %c0_245, %c0_246] : memref<27x1x512xf32, #tpu.memory_space<vmem>>, vector<1x1x512xf32>
    %803 = vector.shape_cast %802 : vector<1x1x512xf32> to vector<1x512xf32>
    %804 = vector.broadcast %803 : vector<1x512xf32> to vector<2x512xf32>
    %805 = arith.mulf %801, %804 : vector<2x512xf32>
    %c15_247 = arith.constant 15 : index
    %c0_248 = arith.constant 0 : index
    %c0_249 = arith.constant 0 : index
    %806 = vector.load %arg4[%c15_247, %c0_248, %c0_249] : memref<27x2x2xf32, #tpu.memory_space<vmem>>, vector<1x2x2xf32>
    %807 = vector.shape_cast %806 : vector<1x2x2xf32> to vector<2x2xf32>
    %808 = vector.extract_strided_slice %807 {offsets = [0, 0], sizes = [2, 1], strides = [1, 1]} : vector<2x2xf32> to vector<2x1xf32>
    %809 = vector.extract_strided_slice %805 {offsets = [0, 0], sizes = [1, 512], strides = [1, 1]} : vector<2x512xf32> to vector<1x512xf32>
    %810 = vector.broadcast %808 : vector<2x1xf32> to vector<2x512xf32>
    %811 = vector.broadcast %809 : vector<1x512xf32> to vector<2x512xf32>
    %812 = arith.mulf %810, %811 : vector<2x512xf32>
    %813 = arith.addf %800, %812 : vector<2x512xf32>
    %814 = vector.extract_strided_slice %807 {offsets = [0, 1], sizes = [2, 1], strides = [1, 1]} : vector<2x2xf32> to vector<2x1xf32>
    %815 = vector.extract_strided_slice %805 {offsets = [1, 0], sizes = [1, 512], strides = [1, 1]} : vector<2x512xf32> to vector<1x512xf32>
    %816 = vector.broadcast %814 : vector<2x1xf32> to vector<2x512xf32>
    %817 = vector.broadcast %815 : vector<1x512xf32> to vector<2x512xf32>
    %818 = arith.mulf %816, %817 : vector<2x512xf32>
    %819 = arith.addf %813, %818 : vector<2x512xf32>
    %c504_i32_250 = arith.constant 504 : i32
    %820 = tpu.dynamic_rotate %514 by %c504_i32_250 dim 1 : vector<2x512xf32>, i32 -> vector<2x512xf32>
    %c16_251 = arith.constant 16 : index
    %c0_252 = arith.constant 0 : index
    %c0_253 = arith.constant 0 : index
    %821 = vector.load %arg6[%c16_251, %c0_252, %c0_253] : memref<27x1x512xf32, #tpu.memory_space<vmem>>, vector<1x1x512xf32>
    %822 = vector.shape_cast %821 : vector<1x1x512xf32> to vector<1x512xf32>
    %823 = vector.broadcast %822 : vector<1x512xf32> to vector<2x512xf32>
    %824 = arith.mulf %820, %823 : vector<2x512xf32>
    %c16_254 = arith.constant 16 : index
    %c0_255 = arith.constant 0 : index
    %c0_256 = arith.constant 0 : index
    %825 = vector.load %arg4[%c16_254, %c0_255, %c0_256] : memref<27x2x2xf32, #tpu.memory_space<vmem>>, vector<1x2x2xf32>
    %826 = vector.shape_cast %825 : vector<1x2x2xf32> to vector<2x2xf32>
    %827 = vector.extract_strided_slice %826 {offsets = [0, 0], sizes = [2, 1], strides = [1, 1]} : vector<2x2xf32> to vector<2x1xf32>
    %828 = vector.extract_strided_slice %824 {offsets = [0, 0], sizes = [1, 512], strides = [1, 1]} : vector<2x512xf32> to vector<1x512xf32>
    %829 = vector.broadcast %827 : vector<2x1xf32> to vector<2x512xf32>
    %830 = vector.broadcast %828 : vector<1x512xf32> to vector<2x512xf32>
    %831 = arith.mulf %829, %830 : vector<2x512xf32>
    %832 = arith.addf %819, %831 : vector<2x512xf32>
    %833 = vector.extract_strided_slice %826 {offsets = [0, 1], sizes = [2, 1], strides = [1, 1]} : vector<2x2xf32> to vector<2x1xf32>
    %834 = vector.extract_strided_slice %824 {offsets = [1, 0], sizes = [1, 512], strides = [1, 1]} : vector<2x512xf32> to vector<1x512xf32>
    %835 = vector.broadcast %833 : vector<2x1xf32> to vector<2x512xf32>
    %836 = vector.broadcast %834 : vector<1x512xf32> to vector<2x512xf32>
    %837 = arith.mulf %835, %836 : vector<2x512xf32>
    %838 = arith.addf %832, %837 : vector<2x512xf32>
    %c503_i32_257 = arith.constant 503 : i32
    %839 = tpu.dynamic_rotate %514 by %c503_i32_257 dim 1 : vector<2x512xf32>, i32 -> vector<2x512xf32>
    %c17_258 = arith.constant 17 : index
    %c0_259 = arith.constant 0 : index
    %c0_260 = arith.constant 0 : index
    %840 = vector.load %arg6[%c17_258, %c0_259, %c0_260] : memref<27x1x512xf32, #tpu.memory_space<vmem>>, vector<1x1x512xf32>
    %841 = vector.shape_cast %840 : vector<1x1x512xf32> to vector<1x512xf32>
    %842 = vector.broadcast %841 : vector<1x512xf32> to vector<2x512xf32>
    %843 = arith.mulf %839, %842 : vector<2x512xf32>
    %c17_261 = arith.constant 17 : index
    %c0_262 = arith.constant 0 : index
    %c0_263 = arith.constant 0 : index
    %844 = vector.load %arg4[%c17_261, %c0_262, %c0_263] : memref<27x2x2xf32, #tpu.memory_space<vmem>>, vector<1x2x2xf32>
    %845 = vector.shape_cast %844 : vector<1x2x2xf32> to vector<2x2xf32>
    %846 = vector.extract_strided_slice %845 {offsets = [0, 0], sizes = [2, 1], strides = [1, 1]} : vector<2x2xf32> to vector<2x1xf32>
    %847 = vector.extract_strided_slice %843 {offsets = [0, 0], sizes = [1, 512], strides = [1, 1]} : vector<2x512xf32> to vector<1x512xf32>
    %848 = vector.broadcast %846 : vector<2x1xf32> to vector<2x512xf32>
    %849 = vector.broadcast %847 : vector<1x512xf32> to vector<2x512xf32>
    %850 = arith.mulf %848, %849 : vector<2x512xf32>
    %851 = arith.addf %838, %850 : vector<2x512xf32>
    %852 = vector.extract_strided_slice %845 {offsets = [0, 1], sizes = [2, 1], strides = [1, 1]} : vector<2x2xf32> to vector<2x1xf32>
    %853 = vector.extract_strided_slice %843 {offsets = [1, 0], sizes = [1, 512], strides = [1, 1]} : vector<2x512xf32> to vector<1x512xf32>
    %854 = vector.broadcast %852 : vector<2x1xf32> to vector<2x512xf32>
    %855 = vector.broadcast %853 : vector<1x512xf32> to vector<2x512xf32>
    %856 = arith.mulf %854, %855 : vector<2x512xf32>
    %857 = arith.addf %851, %856 : vector<2x512xf32>
    %c457_i32_264 = arith.constant 457 : i32
    %858 = tpu.dynamic_rotate %514 by %c457_i32_264 dim 1 : vector<2x512xf32>, i32 -> vector<2x512xf32>
    %c18_265 = arith.constant 18 : index
    %c0_266 = arith.constant 0 : index
    %c0_267 = arith.constant 0 : index
    %859 = vector.load %arg6[%c18_265, %c0_266, %c0_267] : memref<27x1x512xf32, #tpu.memory_space<vmem>>, vector<1x1x512xf32>
    %860 = vector.shape_cast %859 : vector<1x1x512xf32> to vector<1x512xf32>
    %861 = vector.broadcast %860 : vector<1x512xf32> to vector<2x512xf32>
    %862 = arith.mulf %858, %861 : vector<2x512xf32>
    %c18_268 = arith.constant 18 : index
    %c0_269 = arith.constant 0 : index
    %c0_270 = arith.constant 0 : index
    %863 = vector.load %arg4[%c18_268, %c0_269, %c0_270] : memref<27x2x2xf32, #tpu.memory_space<vmem>>, vector<1x2x2xf32>
    %864 = vector.shape_cast %863 : vector<1x2x2xf32> to vector<2x2xf32>
    %865 = vector.extract_strided_slice %864 {offsets = [0, 0], sizes = [2, 1], strides = [1, 1]} : vector<2x2xf32> to vector<2x1xf32>
    %866 = vector.extract_strided_slice %862 {offsets = [0, 0], sizes = [1, 512], strides = [1, 1]} : vector<2x512xf32> to vector<1x512xf32>
    %867 = vector.broadcast %865 : vector<2x1xf32> to vector<2x512xf32>
    %868 = vector.broadcast %866 : vector<1x512xf32> to vector<2x512xf32>
    %869 = arith.mulf %867, %868 : vector<2x512xf32>
    %870 = arith.addf %857, %869 : vector<2x512xf32>
    %871 = vector.extract_strided_slice %864 {offsets = [0, 1], sizes = [2, 1], strides = [1, 1]} : vector<2x2xf32> to vector<2x1xf32>
    %872 = vector.extract_strided_slice %862 {offsets = [1, 0], sizes = [1, 512], strides = [1, 1]} : vector<2x512xf32> to vector<1x512xf32>
    %873 = vector.broadcast %871 : vector<2x1xf32> to vector<2x512xf32>
    %874 = vector.broadcast %872 : vector<1x512xf32> to vector<2x512xf32>
    %875 = arith.mulf %873, %874 : vector<2x512xf32>
    %876 = arith.addf %870, %875 : vector<2x512xf32>
    %c456_i32_271 = arith.constant 456 : i32
    %877 = tpu.dynamic_rotate %514 by %c456_i32_271 dim 1 : vector<2x512xf32>, i32 -> vector<2x512xf32>
    %c19_272 = arith.constant 19 : index
    %c0_273 = arith.constant 0 : index
    %c0_274 = arith.constant 0 : index
    %878 = vector.load %arg6[%c19_272, %c0_273, %c0_274] : memref<27x1x512xf32, #tpu.memory_space<vmem>>, vector<1x1x512xf32>
    %879 = vector.shape_cast %878 : vector<1x1x512xf32> to vector<1x512xf32>
    %880 = vector.broadcast %879 : vector<1x512xf32> to vector<2x512xf32>
    %881 = arith.mulf %877, %880 : vector<2x512xf32>
    %c19_275 = arith.constant 19 : index
    %c0_276 = arith.constant 0 : index
    %c0_277 = arith.constant 0 : index
    %882 = vector.load %arg4[%c19_275, %c0_276, %c0_277] : memref<27x2x2xf32, #tpu.memory_space<vmem>>, vector<1x2x2xf32>
    %883 = vector.shape_cast %882 : vector<1x2x2xf32> to vector<2x2xf32>
    %884 = vector.extract_strided_slice %883 {offsets = [0, 0], sizes = [2, 1], strides = [1, 1]} : vector<2x2xf32> to vector<2x1xf32>
    %885 = vector.extract_strided_slice %881 {offsets = [0, 0], sizes = [1, 512], strides = [1, 1]} : vector<2x512xf32> to vector<1x512xf32>
    %886 = vector.broadcast %884 : vector<2x1xf32> to vector<2x512xf32>
    %887 = vector.broadcast %885 : vector<1x512xf32> to vector<2x512xf32>
    %888 = arith.mulf %886, %887 : vector<2x512xf32>
    %889 = arith.addf %876, %888 : vector<2x512xf32>
    %890 = vector.extract_strided_slice %883 {offsets = [0, 1], sizes = [2, 1], strides = [1, 1]} : vector<2x2xf32> to vector<2x1xf32>
    %891 = vector.extract_strided_slice %881 {offsets = [1, 0], sizes = [1, 512], strides = [1, 1]} : vector<2x512xf32> to vector<1x512xf32>
    %892 = vector.broadcast %890 : vector<2x1xf32> to vector<2x512xf32>
    %893 = vector.broadcast %891 : vector<1x512xf32> to vector<2x512xf32>
    %894 = arith.mulf %892, %893 : vector<2x512xf32>
    %895 = arith.addf %889, %894 : vector<2x512xf32>
    %c455_i32_278 = arith.constant 455 : i32
    %896 = tpu.dynamic_rotate %514 by %c455_i32_278 dim 1 : vector<2x512xf32>, i32 -> vector<2x512xf32>
    %c20_279 = arith.constant 20 : index
    %c0_280 = arith.constant 0 : index
    %c0_281 = arith.constant 0 : index
    %897 = vector.load %arg6[%c20_279, %c0_280, %c0_281] : memref<27x1x512xf32, #tpu.memory_space<vmem>>, vector<1x1x512xf32>
    %898 = vector.shape_cast %897 : vector<1x1x512xf32> to vector<1x512xf32>
    %899 = vector.broadcast %898 : vector<1x512xf32> to vector<2x512xf32>
    %900 = arith.mulf %896, %899 : vector<2x512xf32>
    %c20_282 = arith.constant 20 : index
    %c0_283 = arith.constant 0 : index
    %c0_284 = arith.constant 0 : index
    %901 = vector.load %arg4[%c20_282, %c0_283, %c0_284] : memref<27x2x2xf32, #tpu.memory_space<vmem>>, vector<1x2x2xf32>
    %902 = vector.shape_cast %901 : vector<1x2x2xf32> to vector<2x2xf32>
    %903 = vector.extract_strided_slice %902 {offsets = [0, 0], sizes = [2, 1], strides = [1, 1]} : vector<2x2xf32> to vector<2x1xf32>
    %904 = vector.extract_strided_slice %900 {offsets = [0, 0], sizes = [1, 512], strides = [1, 1]} : vector<2x512xf32> to vector<1x512xf32>
    %905 = vector.broadcast %903 : vector<2x1xf32> to vector<2x512xf32>
    %906 = vector.broadcast %904 : vector<1x512xf32> to vector<2x512xf32>
    %907 = arith.mulf %905, %906 : vector<2x512xf32>
    %908 = arith.addf %895, %907 : vector<2x512xf32>
    %909 = vector.extract_strided_slice %902 {offsets = [0, 1], sizes = [2, 1], strides = [1, 1]} : vector<2x2xf32> to vector<2x1xf32>
    %910 = vector.extract_strided_slice %900 {offsets = [1, 0], sizes = [1, 512], strides = [1, 1]} : vector<2x512xf32> to vector<1x512xf32>
    %911 = vector.broadcast %909 : vector<2x1xf32> to vector<2x512xf32>
    %912 = vector.broadcast %910 : vector<1x512xf32> to vector<2x512xf32>
    %913 = arith.mulf %911, %912 : vector<2x512xf32>
    %914 = arith.addf %908, %913 : vector<2x512xf32>
    %c449_i32_285 = arith.constant 449 : i32
    %915 = tpu.dynamic_rotate %514 by %c449_i32_285 dim 1 : vector<2x512xf32>, i32 -> vector<2x512xf32>
    %c21_286 = arith.constant 21 : index
    %c0_287 = arith.constant 0 : index
    %c0_288 = arith.constant 0 : index
    %916 = vector.load %arg6[%c21_286, %c0_287, %c0_288] : memref<27x1x512xf32, #tpu.memory_space<vmem>>, vector<1x1x512xf32>
    %917 = vector.shape_cast %916 : vector<1x1x512xf32> to vector<1x512xf32>
    %918 = vector.broadcast %917 : vector<1x512xf32> to vector<2x512xf32>
    %919 = arith.mulf %915, %918 : vector<2x512xf32>
    %c21_289 = arith.constant 21 : index
    %c0_290 = arith.constant 0 : index
    %c0_291 = arith.constant 0 : index
    %920 = vector.load %arg4[%c21_289, %c0_290, %c0_291] : memref<27x2x2xf32, #tpu.memory_space<vmem>>, vector<1x2x2xf32>
    %921 = vector.shape_cast %920 : vector<1x2x2xf32> to vector<2x2xf32>
    %922 = vector.extract_strided_slice %921 {offsets = [0, 0], sizes = [2, 1], strides = [1, 1]} : vector<2x2xf32> to vector<2x1xf32>
    %923 = vector.extract_strided_slice %919 {offsets = [0, 0], sizes = [1, 512], strides = [1, 1]} : vector<2x512xf32> to vector<1x512xf32>
    %924 = vector.broadcast %922 : vector<2x1xf32> to vector<2x512xf32>
    %925 = vector.broadcast %923 : vector<1x512xf32> to vector<2x512xf32>
    %926 = arith.mulf %924, %925 : vector<2x512xf32>
    %927 = arith.addf %914, %926 : vector<2x512xf32>
    %928 = vector.extract_strided_slice %921 {offsets = [0, 1], sizes = [2, 1], strides = [1, 1]} : vector<2x2xf32> to vector<2x1xf32>
    %929 = vector.extract_strided_slice %919 {offsets = [1, 0], sizes = [1, 512], strides = [1, 1]} : vector<2x512xf32> to vector<1x512xf32>
    %930 = vector.broadcast %928 : vector<2x1xf32> to vector<2x512xf32>
    %931 = vector.broadcast %929 : vector<1x512xf32> to vector<2x512xf32>
    %932 = arith.mulf %930, %931 : vector<2x512xf32>
    %933 = arith.addf %927, %932 : vector<2x512xf32>
    %c448_i32_292 = arith.constant 448 : i32
    %934 = tpu.dynamic_rotate %514 by %c448_i32_292 dim 1 : vector<2x512xf32>, i32 -> vector<2x512xf32>
    %c22_293 = arith.constant 22 : index
    %c0_294 = arith.constant 0 : index
    %c0_295 = arith.constant 0 : index
    %935 = vector.load %arg6[%c22_293, %c0_294, %c0_295] : memref<27x1x512xf32, #tpu.memory_space<vmem>>, vector<1x1x512xf32>
    %936 = vector.shape_cast %935 : vector<1x1x512xf32> to vector<1x512xf32>
    %937 = vector.broadcast %936 : vector<1x512xf32> to vector<2x512xf32>
    %938 = arith.mulf %934, %937 : vector<2x512xf32>
    %c22_296 = arith.constant 22 : index
    %c0_297 = arith.constant 0 : index
    %c0_298 = arith.constant 0 : index
    %939 = vector.load %arg4[%c22_296, %c0_297, %c0_298] : memref<27x2x2xf32, #tpu.memory_space<vmem>>, vector<1x2x2xf32>
    %940 = vector.shape_cast %939 : vector<1x2x2xf32> to vector<2x2xf32>
    %941 = vector.extract_strided_slice %940 {offsets = [0, 0], sizes = [2, 1], strides = [1, 1]} : vector<2x2xf32> to vector<2x1xf32>
    %942 = vector.extract_strided_slice %938 {offsets = [0, 0], sizes = [1, 512], strides = [1, 1]} : vector<2x512xf32> to vector<1x512xf32>
    %943 = vector.broadcast %941 : vector<2x1xf32> to vector<2x512xf32>
    %944 = vector.broadcast %942 : vector<1x512xf32> to vector<2x512xf32>
    %945 = arith.mulf %943, %944 : vector<2x512xf32>
    %946 = arith.addf %933, %945 : vector<2x512xf32>
    %947 = vector.extract_strided_slice %940 {offsets = [0, 1], sizes = [2, 1], strides = [1, 1]} : vector<2x2xf32> to vector<2x1xf32>
    %948 = vector.extract_strided_slice %938 {offsets = [1, 0], sizes = [1, 512], strides = [1, 1]} : vector<2x512xf32> to vector<1x512xf32>
    %949 = vector.broadcast %947 : vector<2x1xf32> to vector<2x512xf32>
    %950 = vector.broadcast %948 : vector<1x512xf32> to vector<2x512xf32>
    %951 = arith.mulf %949, %950 : vector<2x512xf32>
    %952 = arith.addf %946, %951 : vector<2x512xf32>
    %c447_i32_299 = arith.constant 447 : i32
    %953 = tpu.dynamic_rotate %514 by %c447_i32_299 dim 1 : vector<2x512xf32>, i32 -> vector<2x512xf32>
    %c23_300 = arith.constant 23 : index
    %c0_301 = arith.constant 0 : index
    %c0_302 = arith.constant 0 : index
    %954 = vector.load %arg6[%c23_300, %c0_301, %c0_302] : memref<27x1x512xf32, #tpu.memory_space<vmem>>, vector<1x1x512xf32>
    %955 = vector.shape_cast %954 : vector<1x1x512xf32> to vector<1x512xf32>
    %956 = vector.broadcast %955 : vector<1x512xf32> to vector<2x512xf32>
    %957 = arith.mulf %953, %956 : vector<2x512xf32>
    %c23_303 = arith.constant 23 : index
    %c0_304 = arith.constant 0 : index
    %c0_305 = arith.constant 0 : index
    %958 = vector.load %arg4[%c23_303, %c0_304, %c0_305] : memref<27x2x2xf32, #tpu.memory_space<vmem>>, vector<1x2x2xf32>
    %959 = vector.shape_cast %958 : vector<1x2x2xf32> to vector<2x2xf32>
    %960 = vector.extract_strided_slice %959 {offsets = [0, 0], sizes = [2, 1], strides = [1, 1]} : vector<2x2xf32> to vector<2x1xf32>
    %961 = vector.extract_strided_slice %957 {offsets = [0, 0], sizes = [1, 512], strides = [1, 1]} : vector<2x512xf32> to vector<1x512xf32>
    %962 = vector.broadcast %960 : vector<2x1xf32> to vector<2x512xf32>
    %963 = vector.broadcast %961 : vector<1x512xf32> to vector<2x512xf32>
    %964 = arith.mulf %962, %963 : vector<2x512xf32>
    %965 = arith.addf %952, %964 : vector<2x512xf32>
    %966 = vector.extract_strided_slice %959 {offsets = [0, 1], sizes = [2, 1], strides = [1, 1]} : vector<2x2xf32> to vector<2x1xf32>
    %967 = vector.extract_strided_slice %957 {offsets = [1, 0], sizes = [1, 512], strides = [1, 1]} : vector<2x512xf32> to vector<1x512xf32>
    %968 = vector.broadcast %966 : vector<2x1xf32> to vector<2x512xf32>
    %969 = vector.broadcast %967 : vector<1x512xf32> to vector<2x512xf32>
    %970 = arith.mulf %968, %969 : vector<2x512xf32>
    %971 = arith.addf %965, %970 : vector<2x512xf32>
    %c441_i32_306 = arith.constant 441 : i32
    %972 = tpu.dynamic_rotate %514 by %c441_i32_306 dim 1 : vector<2x512xf32>, i32 -> vector<2x512xf32>
    %c24_307 = arith.constant 24 : index
    %c0_308 = arith.constant 0 : index
    %c0_309 = arith.constant 0 : index
    %973 = vector.load %arg6[%c24_307, %c0_308, %c0_309] : memref<27x1x512xf32, #tpu.memory_space<vmem>>, vector<1x1x512xf32>
    %974 = vector.shape_cast %973 : vector<1x1x512xf32> to vector<1x512xf32>
    %975 = vector.broadcast %974 : vector<1x512xf32> to vector<2x512xf32>
    %976 = arith.mulf %972, %975 : vector<2x512xf32>
    %c24_310 = arith.constant 24 : index
    %c0_311 = arith.constant 0 : index
    %c0_312 = arith.constant 0 : index
    %977 = vector.load %arg4[%c24_310, %c0_311, %c0_312] : memref<27x2x2xf32, #tpu.memory_space<vmem>>, vector<1x2x2xf32>
    %978 = vector.shape_cast %977 : vector<1x2x2xf32> to vector<2x2xf32>
    %979 = vector.extract_strided_slice %978 {offsets = [0, 0], sizes = [2, 1], strides = [1, 1]} : vector<2x2xf32> to vector<2x1xf32>
    %980 = vector.extract_strided_slice %976 {offsets = [0, 0], sizes = [1, 512], strides = [1, 1]} : vector<2x512xf32> to vector<1x512xf32>
    %981 = vector.broadcast %979 : vector<2x1xf32> to vector<2x512xf32>
    %982 = vector.broadcast %980 : vector<1x512xf32> to vector<2x512xf32>
    %983 = arith.mulf %981, %982 : vector<2x512xf32>
    %984 = arith.addf %971, %983 : vector<2x512xf32>
    %985 = vector.extract_strided_slice %978 {offsets = [0, 1], sizes = [2, 1], strides = [1, 1]} : vector<2x2xf32> to vector<2x1xf32>
    %986 = vector.extract_strided_slice %976 {offsets = [1, 0], sizes = [1, 512], strides = [1, 1]} : vector<2x512xf32> to vector<1x512xf32>
    %987 = vector.broadcast %985 : vector<2x1xf32> to vector<2x512xf32>
    %988 = vector.broadcast %986 : vector<1x512xf32> to vector<2x512xf32>
    %989 = arith.mulf %987, %988 : vector<2x512xf32>
    %990 = arith.addf %984, %989 : vector<2x512xf32>
    %c440_i32_313 = arith.constant 440 : i32
    %991 = tpu.dynamic_rotate %514 by %c440_i32_313 dim 1 : vector<2x512xf32>, i32 -> vector<2x512xf32>
    %c25_314 = arith.constant 25 : index
    %c0_315 = arith.constant 0 : index
    %c0_316 = arith.constant 0 : index
    %992 = vector.load %arg6[%c25_314, %c0_315, %c0_316] : memref<27x1x512xf32, #tpu.memory_space<vmem>>, vector<1x1x512xf32>
    %993 = vector.shape_cast %992 : vector<1x1x512xf32> to vector<1x512xf32>
    %994 = vector.broadcast %993 : vector<1x512xf32> to vector<2x512xf32>
    %995 = arith.mulf %991, %994 : vector<2x512xf32>
    %c25_317 = arith.constant 25 : index
    %c0_318 = arith.constant 0 : index
    %c0_319 = arith.constant 0 : index
    %996 = vector.load %arg4[%c25_317, %c0_318, %c0_319] : memref<27x2x2xf32, #tpu.memory_space<vmem>>, vector<1x2x2xf32>
    %997 = vector.shape_cast %996 : vector<1x2x2xf32> to vector<2x2xf32>
    %998 = vector.extract_strided_slice %997 {offsets = [0, 0], sizes = [2, 1], strides = [1, 1]} : vector<2x2xf32> to vector<2x1xf32>
    %999 = vector.extract_strided_slice %995 {offsets = [0, 0], sizes = [1, 512], strides = [1, 1]} : vector<2x512xf32> to vector<1x512xf32>
    %1000 = vector.broadcast %998 : vector<2x1xf32> to vector<2x512xf32>
    %1001 = vector.broadcast %999 : vector<1x512xf32> to vector<2x512xf32>
    %1002 = arith.mulf %1000, %1001 : vector<2x512xf32>
    %1003 = arith.addf %990, %1002 : vector<2x512xf32>
    %1004 = vector.extract_strided_slice %997 {offsets = [0, 1], sizes = [2, 1], strides = [1, 1]} : vector<2x2xf32> to vector<2x1xf32>
    %1005 = vector.extract_strided_slice %995 {offsets = [1, 0], sizes = [1, 512], strides = [1, 1]} : vector<2x512xf32> to vector<1x512xf32>
    %1006 = vector.broadcast %1004 : vector<2x1xf32> to vector<2x512xf32>
    %1007 = vector.broadcast %1005 : vector<1x512xf32> to vector<2x512xf32>
    %1008 = arith.mulf %1006, %1007 : vector<2x512xf32>
    %1009 = arith.addf %1003, %1008 : vector<2x512xf32>
    %c439_i32_320 = arith.constant 439 : i32
    %1010 = tpu.dynamic_rotate %514 by %c439_i32_320 dim 1 : vector<2x512xf32>, i32 -> vector<2x512xf32>
    %c26_321 = arith.constant 26 : index
    %c0_322 = arith.constant 0 : index
    %c0_323 = arith.constant 0 : index
    %1011 = vector.load %arg6[%c26_321, %c0_322, %c0_323] : memref<27x1x512xf32, #tpu.memory_space<vmem>>, vector<1x1x512xf32>
    %1012 = vector.shape_cast %1011 : vector<1x1x512xf32> to vector<1x512xf32>
    %1013 = vector.broadcast %1012 : vector<1x512xf32> to vector<2x512xf32>
    %1014 = arith.mulf %1010, %1013 : vector<2x512xf32>
    %c26_324 = arith.constant 26 : index
    %c0_325 = arith.constant 0 : index
    %c0_326 = arith.constant 0 : index
    %1015 = vector.load %arg4[%c26_324, %c0_325, %c0_326] : memref<27x2x2xf32, #tpu.memory_space<vmem>>, vector<1x2x2xf32>
    %1016 = vector.shape_cast %1015 : vector<1x2x2xf32> to vector<2x2xf32>
    %1017 = vector.extract_strided_slice %1016 {offsets = [0, 0], sizes = [2, 1], strides = [1, 1]} : vector<2x2xf32> to vector<2x1xf32>
    %1018 = vector.extract_strided_slice %1014 {offsets = [0, 0], sizes = [1, 512], strides = [1, 1]} : vector<2x512xf32> to vector<1x512xf32>
    %1019 = vector.broadcast %1017 : vector<2x1xf32> to vector<2x512xf32>
    %1020 = vector.broadcast %1018 : vector<1x512xf32> to vector<2x512xf32>
    %1021 = arith.mulf %1019, %1020 : vector<2x512xf32>
    %1022 = arith.addf %1009, %1021 : vector<2x512xf32>
    %1023 = vector.extract_strided_slice %1016 {offsets = [0, 1], sizes = [2, 1], strides = [1, 1]} : vector<2x2xf32> to vector<2x1xf32>
    %1024 = vector.extract_strided_slice %1014 {offsets = [1, 0], sizes = [1, 512], strides = [1, 1]} : vector<2x512xf32> to vector<1x512xf32>
    %1025 = vector.broadcast %1023 : vector<2x1xf32> to vector<2x512xf32>
    %1026 = vector.broadcast %1024 : vector<1x512xf32> to vector<2x512xf32>
    %1027 = arith.mulf %1025, %1026 : vector<2x512xf32>
    %1028 = arith.addf %1022, %1027 : vector<2x512xf32>
    %c0_327 = arith.constant 0 : index
    %c2_328 = arith.constant 2 : index
    %c0_329 = arith.constant 0 : index
    %1029 = vector.load %arg7[%c0_327, %c2_328, %c0_329] : memref<1x4x512xf32, #tpu.memory_space<vmem>>, vector<1x2x512xf32>
    %1030 = vector.shape_cast %1029 : vector<1x2x512xf32> to vector<2x512xf32>
    %1031 = vector.shape_cast %1028 : vector<2x512xf32> to vector<1x2x512xf32>
    tpu.vector_store %arg7[%c0_327, %c2_328, %c0_329], %1031 {strides = array<i32>} : memref<1x4x512xf32, #tpu.memory_space<vmem>>, vector<1x2x512xf32>,
    return
  }
  func.func @transform_0(%arg0: i32) -> (i32, i32, i32) {
    %c0_i32 = arith.constant 0 : i32
    %c0_i32_0 = arith.constant 0 : i32
    %c0_i32_1 = arith.constant 0 : i32
    return %arg0, %c0_i32, %c0_i32_0 : i32, i32, i32
  }
  func.func @transform_1(%arg0: i32) -> (i32, i32, i32) {
    %c0_i32 = arith.constant 0 : i32
    %c0_i32_0 = arith.constant 0 : i32
    %c0_i32_1 = arith.constant 0 : i32
    %c0_i32_2 = arith.constant 0 : i32
    return %c0_i32, %c0_i32_0, %c0_i32_1 : i32, i32, i32
  }
  func.func @transform_2(%arg0: i32) -> (i32, i32) {
    %c0_i32 = arith.constant 0 : i32
    %c0_i32_0 = arith.constant 0 : i32
    %c0_i32_1 = arith.constant 0 : i32
    return %c0_i32, %c0_i32_0 : i32, i32
  }
  func.func @transform_3(%arg0: i32) -> (i32, i32, i32) {
    %c0_i32 = arith.constant 0 : i32
    %c0_i32_0 = arith.constant 0 : i32
    %c0_i32_1 = arith.constant 0 : i32
    %c0_i32_2 = arith.constant 0 : i32
    return %c0_i32, %c0_i32_0, %c0_i32_1 : i32, i32, i32
  }
  func.func @transform_4(%arg0: i32) -> (i32, i32) {
    %c0_i32 = arith.constant 0 : i32
    %c0_i32_0 = arith.constant 0 : i32
    %c0_i32_1 = arith.constant 0 : i32
    return %c0_i32, %c0_i32_0 : i32, i32
  }
  func.func @transform_5(%arg0: i32) -> (i32, i32, i32) {
    %c0_i32 = arith.constant 0 : i32
    %c0_i32_0 = arith.constant 0 : i32
    %c0_i32_1 = arith.constant 0 : i32
    %c0_i32_2 = arith.constant 0 : i32
    return %c0_i32, %c0_i32_0, %c0_i32_1 : i32, i32, i32
  }
  func.func @transform_6(%arg0: i32) -> (i32, i32, i32) {
    %c0_i32 = arith.constant 0 : i32
    %c0_i32_0 = arith.constant 0 : i32
    %c0_i32_1 = arith.constant 0 : i32
    return %arg0, %c0_i32, %c0_i32_0 : i32, i32, i32
  }
}

</mosaic_0001>

<bundles_post_ra>
// kernel: tpu_custom_call.1
= control target key start
LH: loop header
LB: loop body
LE: loop exit
PB: predicated region body
PF: predicated region fallthrough
CT: control target
= control target key end

     0   :  { %11 = vsyncpa [#allocation3], 0  ;;  %s11201_s0 = inlined_call_operand.vmem [shape: f32[2,4,512], index: 0, kind: input, shape index: {}]   ;;  %s11202_s1 = inlined_call_operand.vmem [shape: f32[27,2,2], index: 1, kind: input, shape index: {}]   ;;  %s11203_s2 = inlined_call_operand.vmem [shape: f32[2,1], index: 2, kind: input, shape index: {}]   ;;  %s11204_s3 = inlined_call_operand.vmem [shape: f32[27,2,2], index: 3, kind: input, shape index: {}]   ;;  %s11205_s4 = inlined_call_operand.vmem [shape: f32[2,1], index: 4, kind: input, shape index: {}]   ;;  %s11206_s5 = inlined_call_operand.vmem [shape: f32[27,1,512], index: 5, kind: input, shape index: {}]   ;;  %s11207_s6 = inlined_call_operand.hbm [shape: f32[2,4,512], index: 6, kind: output, shape index: {}]  }
   0x1   :  { %13 = vsyncpa [#allocation3 + $0x1], 0  ;;  %s6530_s21 = smov 0   ;;  %s6532_s22 = smov 0  }
   0x2   :  { %s6534_s23 = smov 0   ;;  %s6536_s24 = smov 0  }
   0x3 LB: > { %s6551_s25 = sadd.s32 4294967295, %s6472_s24   ;;  %s6203_s26 = sadd.s32 4294967294, %s6472_s24   ;;  %s6472_s24 = sphi %s6536_s24, %s12245_s24   ;;  %s6468_s23 = sphi %s6534_s23, %s12244_s23   ;;  %s6464_s22 = sphi %s6532_s22, %s12243_s22   ;;  %s6460_s21 = sphi %s6530_s21, %s12242_s21  }
   0x4   : > { %s6555_s27 = sadd.s32 1, %s6472_s24   ;;  %s157_s28 = sadd.s32 1, %s6468_s23 }
   0x5   : > { %s154_s29 = ssub.s32 %s6472_s24, %s6555_s27  ;;  %p167_p0 = scmp.ne.s32.totalorder %s6468_s23, %s6464_s22 }
   0x6   : > { %p155_p1 = scmp.eq.s32.totalorder %s154_s29, 0  ;;  %p168_p2 = scmp.eq.s32.totalorder %s6551_s25, 1 }
   0x7   : > { %p173_p3 = scmp.ne.s32.totalorder %s6464_s22, %s6460_s21  ;;  %p174_p4 = scmp.eq.s32.totalorder %s6203_s26, 1 }
   0x8   : > { %s6566_s30 = scalar_select %p155_p1, %s6468_s23, %s157_s28  }
   0x9   : > { %p6568_p5 = por %p168_p2, %p167_p0  ;;  %p6572_p6 = por %p174_p4, %p173_p3 }
   0xa   : > { %p6206_p7 = scmp.ge.s32.totalorder %s6472_s24, 1  ;;  %p215_p8 = scmp.lt.s32.totalorder %s6472_s24, 3 }
   0xc   : > { %p216_p9 = pnand %p6206_p7, %p215_p8 }
   0xe   : > { %219 = sbr.rel (%p216_p9) target bundleno = 904 (0x388), region = 44 }
  0x15   : > { %v6581_v0 = vld [vmem:[%s11202_s1] sm:$0x3]  ;;  %p245_p10 = scmp.lt.s32.totalorder %s6551_s25, 1  ;;  %v11228_v2 = vmov 0   ;;  %v11231_v5 = vmov 1   ;;  %s6476_s18 = smov 73   ;;  %v260_v48 = vlaneseq }
  0x16   : > { %v252_v1 = vld [vmem:[%s11203_s2] sm:$0x3]  ;;  %6379 = vset.pattern.permute.xlu1 %v11228_v2  ;;  %6378 = vset.pattern.permute.xlu0 %v11228_v2  ;;  %s11224_s19 = smov 72   ;;  %v6211_v12 = vld [vmem:[%s11202_s1 + $0x2] sm:$0x3]  ;;  %s11222_s28 = smov 71  }
  0x17   : > { %323 = vperm.xlu1 %6379, %v6581_v0   ;;  %255 = vperm.xlu0 %6378, %v252_v1   ;;  %s246_s13 = scalar_select %p245_p10, %s6551_s25, 1  ;;  %v6215_v13 = vld [vmem:[%s11202_s1 + $0x6] sm:$0x3]  ;;  %v6653_v14 = vld [vmem:[%s11202_s1 + $0x4] sm:$0x3]  ;;  %v6866_v51 = vshrl.u32 %v260_v48, 7 }
  0x18   : > { %s11216_s29 = smov 65   ;;  %v6219_v15 = vld [vmem:[%s11202_s1 + $0xa] sm:$0x3]  ;;  %s11214_s20 = smov 57   ;;  %v6223_v16 = vld [vmem:[%s11202_s1 + $0xe] sm:$0x3] }
  0x19   : > { %s6317_s14 = sshll.u32 %s246_s13, 4  ;;  %s11210_s13 = smov 64   ;;  %v6689_v17 = vld [vmem:[%s11202_s1 + $0x8] sm:$0x3]  ;;  %v6227_v18 = vld [vmem:[%s11202_s1 + $0x12] sm:$0x3] }
  0x1a   : > { %s6594_s17 = scalar_lea.vmem %s11201_s0, %s6317_s14  ;;  %s11208_s14 = smov 63   ;;  %v6720_v19 = vld [vmem:[%s11202_s1 + $0xc] sm:$0x3]  ;;  %v6728_v20 = vld [vmem:[%s11202_s1 + $0x16] sm:$0x3]  ;;  %11475 = vst [vmem:[#allocation6_spill] sm:$0xff] %v6866_v51 }
  0x1b   : > { %v6597_v3 = vld [vmem:[%s6594_s17 + $0x8] sm:$0xff]  ;;  %v6600_v4 = vld [vmem:[%s6594_s17] sm:$0xff]  ;;  %6380 = vset.pattern.permute.xlu1 %v11231_v5  ;;  %s11212_s26 = smov 56   ;;  %s11220_s15 = smov 55   ;;  %v6751_v21 = vld [vmem:[%s11202_s1 + $0x1c] sm:$0x3] }
  0x1c   : > { %v6604_v6 = vrot.slane %v6597_v3, 2  ;;  %v6607_v7 = vrot.slane %v6600_v4, 2  ;;  %v270_v8 = vcombine.high %v6597_v3, %v6597_v3  ;;  %v269_v9 = vcombine.high %v6600_v4, %v6600_v4  ;;  %s11218_s16 = smov 9   ;;  %s6486_s11 = smov 8   ;;  %v6760_v22 = vld [vmem:[%s11202_s1 + $0x10] sm:$0x3] }
  0x1d   : > { %s6487_s10 = smov 7   ;;  %s11226_s12 = smov 1   ;;  %v6785_v27 = vld [vmem:[%s11202_s1 + $0x20] sm:$0x3]  ;;  %v6809_v33 = vld [vmem:[%s11202_s1 + $0x26] sm:$0x3] }
  0x1e   : > { %283 = vrot.lane.b32.xlu1 %v6604_v6, %s6476_s18  ;;  %279 = vrot.lane.b32.xlu0 %v6607_v7, %s6476_s18  ;;  %v6617_v10 = vrot.slane %v270_v8, 2  ;;  %v6619_v11 = vrot.slane %v269_v9, 2  ;;  %s6492_s9 = smov 119   ;;  %11474 = vst [vmem:[#allocation5_spill] sm:$0xff] %v6809_v33  ;;  %v6252_v35 = vld [vmem:[%s11202_s1 + $0x2c] sm:$0x3] }
  0x1f   : > { %v6229_v36 = vld [vmem:[%s11202_s1 + $0x14] sm:$0x3]  ;;  %v6258_v39 = vld [vmem:[%s11202_s1 + $0x32] sm:$0x3]  ;;  %v6493_v54 = vmov 839922192  }
  0x20   : > { %v258_v55 = vunpack.c.l.s4 %v6493_v54  ;;  %v6233_v56 = vld [vmem:[%s11202_s1 + $0x18] sm:$0x3]  ;;  %v6878_v57 = vand.u32 127, %v260_v48  ;;  %v6881_v58 = vsub.s32 0, %v6866_v51  ;;  %v6888_v62 = vsub.s32 2, %v6866_v51 }
  0x21   : > { %v6891_v63 = vsub.s32 3, %v6866_v51  ;;  %v6899_v1 = vsub.s32 1, %v6866_v51  ;;  %v6904_v8 = vld [vmem:[%s11206_s5 + $0x48] sm:$0xf]  ;;  %v6234_v9 = vld [vmem:[%s11202_s1 + $0x1a] sm:$0x3] }
  0x22   : > { %285 = vrot.lane.b32.xlu0 %v6617_v10, %s6476_s18  ;;  %281 = vrot.lane.b32.xlu1 %v6619_v11, %s6476_s18  ;;  %v259_v61 = vunpack.c.0.s8 %v258_v55  ;;  %11478 = vst [vmem:[#allocation9_spill] sm:$0xff] %v6904_v8  ;;  %vm289_vm0 = vcmp.lt.s32.totalorder %v6878_v57, 73  ;;  %v6946_v48 = vld [vmem:[%s11206_s5 + $0x8] sm:$0xf]  ;;  %v6951_v54 = vld [vmem:[%s11206_s5 + $0x50] sm:$0xf] }
  0x23   : > { %vm398_vm1 = vcmp.lt.s32.totalorder %v6878_v57, 72  ;;  %vm509_vm2 = vcmp.lt.s32.totalorder %v6878_v57, 71  ;;  %vm620_vm3 = vcmp.lt.s32.totalorder %v6878_v57, 65  ;;  %vm731_vm4 = vcmp.lt.s32.totalorder %v6878_v57, 64 }
  0x24   : > { %vm842_vm5 = vcmp.lt.s32.totalorder %v6878_v57, 63  ;;  %vm953_vm6 = vcmp.lt.s32.totalorder %v6878_v57, 57  ;;  %vm1064_vm7 = vcmp.lt.s32.totalorder %v6878_v57, 56  ;;  %vm1175_vm8 = vcmp.lt.s32.totalorder %v6878_v57, 55 }
  0x25   : > { %vm1286_vm9 = vcmp.lt.s32.totalorder %v6878_v57, 9  ;;  %vm1397_vm10 = vcmp.lt.s32.totalorder %v6878_v57, 8  ;;  %vm1508_vm11 = vcmp.lt.s32.totalorder %v6878_v57, 7  ;;  %vm1619_vm12 = vcmp.lt.s32.totalorder %v6878_v57, 1 }
  0x26   : > { %394 = vrot.lane.b32.xlu0 %v6604_v6, %s11224_s19  ;;  %390 = vrot.lane.b32.xlu1 %v6607_v7, %s11224_s19  ;;  %vm1841_vm13 = vcmp.lt.s32.totalorder %v6878_v57, 127  ;;  %vm11415_vm14 = vcmp.lt.s32.totalorder %v6878_v57, 121  ;;  %vm2063_vm15 = vcmp.lt.s32.totalorder %v6878_v57, 120 }
  0x2a   : > { %434 = vperm.xlu0 %6378, %v6211_v12   ;;  %392 = vrot.lane.b32.xlu1 %v6619_v11, %s11224_s19 }
  0x2e   : > { %503 = vrot.lane.b32.xlu0 %v6619_v11, %s11222_s28  ;;  %396 = vrot.lane.b32.xlu1 %v6617_v10, %s11224_s19 }
  0x32   : > { %507 = vrot.lane.b32.xlu0 %v6617_v10, %s11222_s28  ;;  %468 = vperm.xlu1 %6380, %v6211_v12  }
  0x36   : > { %616 = vrot.lane.b32.xlu0 %v6604_v6, %s11216_s29  ;;  %501 = vrot.lane.b32.xlu1 %v6607_v7, %s11222_s28 }
  0x37   : > { %6381 = vset.pattern.permute.xlu1 %v11228_v2 }
  0x3a   : > { %656 = vperm.xlu0 %6378, %v6215_v13   ;;  %505 = vrot.lane.b32.xlu1 %v6604_v6, %s11222_s28  ;;  %s11416_s28 = sand.u32 1, %s6464_s22  }
  0x3e   : > { %725 = vrot.lane.b32.xlu0 %v6619_v11, %s11210_s13  ;;  %545 = vperm.xlu1 %6381, %v6653_v14  }
  0x42   : > { %729 = vrot.lane.b32.xlu0 %v6617_v10, %s11210_s13  ;;  %612 = vrot.lane.b32.xlu1 %v6607_v7, %s11216_s29 }
  0x43   : > { %6382 = vset.pattern.permute.xlu1 %v11231_v5 }
  0x46   : > { %838 = vrot.lane.b32.xlu0 %v6604_v6, %s11208_s14  ;;  %614 = vrot.lane.b32.xlu1 %v6619_v11, %s11216_s29 }
  0x4a   : > { %878 = vperm.xlu0 %6378, %v6219_v15   ;;  %618 = vrot.lane.b32.xlu1 %v6617_v10, %s11216_s29  ;;  %s6490_s29 = smov 121  }
  0x4e   : > { %947 = vrot.lane.b32.xlu0 %v6619_v11, %s11214_s20  ;;  %690 = vperm.xlu1 %6382, %v6215_v13   ;;  %v6915_v13 = vld [vmem:[%s11206_s5 + $0x4] sm:$0xf] }
  0x52   : > { %951 = vrot.lane.b32.xlu0 %v6617_v10, %s11214_s20  ;;  %723 = vrot.lane.b32.xlu1 %v6607_v7, %s11210_s13 }
  0x53   : > { %6383 = vset.pattern.permute.xlu1 %v11228_v2 }
  0x56   : > { %1060 = vrot.lane.b32.xlu0 %v6604_v6, %s11212_s26  ;;  %727 = vrot.lane.b32.xlu1 %v6604_v6, %s11210_s13  ;;  %s6489_s13 = smov 127  }
  0x5a   : > { %1100 = vperm.xlu0 %6378, %v6223_v16   ;;  %767 = vperm.xlu1 %6383, %v6689_v17  }
  0x5e   : > { %1169 = vrot.lane.b32.xlu0 %v6619_v11, %s11220_s15  ;;  %834 = vrot.lane.b32.xlu1 %v6607_v7, %s11208_s14 }
  0x5f   : > { %6384 = vset.pattern.permute.xlu1 %v11231_v5 }
  0x62   : > { %1173 = vrot.lane.b32.xlu0 %v6617_v10, %s11220_s15  ;;  %836 = vrot.lane.b32.xlu1 %v6619_v11, %s11208_s14 }
  0x66   : > { %1282 = vrot.lane.b32.xlu0 %v6604_v6, %s11218_s16  ;;  %840 = vrot.lane.b32.xlu1 %v6617_v10, %s11208_s14  ;;  %s11988_s14 = smov 72  }
  0x6a   : > { %1322 = vperm.xlu0 %6378, %v6227_v18   ;;  %912 = vperm.xlu1 %6384, %v6219_v15  }
  0x6e   : > { %1391 = vrot.lane.b32.xlu0 %v6619_v11, %s6486_s11  ;;  %945 = vrot.lane.b32.xlu1 %v6607_v7, %s11214_s20 }
  0x6f   : > { %6385 = vset.pattern.permute.xlu1 %v11228_v2 }
  0x72   : > { %1395 = vrot.lane.b32.xlu0 %v6617_v10, %s6486_s11  ;;  %949 = vrot.lane.b32.xlu1 %v6604_v6, %s11214_s20  ;;  %s6491_s20 = smov 120  }
  0x76   : > { %1504 = vrot.lane.b32.xlu0 %v6604_v6, %s6487_s10  ;;  %989 = vperm.xlu1 %6385, %v6720_v19  }
  0x7a   : > { %1544 = vperm.xlu0 %6378, %v6728_v20   ;;  %1056 = vrot.lane.b32.xlu1 %v6607_v7, %s11212_s26 }
  0x7b   : > { %6386 = vset.pattern.permute.xlu1 %v11231_v5 }
  0x7e   : > { %1613 = vrot.lane.b32.xlu0 %v6619_v11, %s11226_s12  ;;  %1058 = vrot.lane.b32.xlu1 %v6619_v11, %s11212_s26 }
  0x82   : > { %1617 = vrot.lane.b32.xlu0 %v6617_v10, %s11226_s12  ;;  %1062 = vrot.lane.b32.xlu1 %v6617_v10, %s11212_s26  ;;  %s12241_s26 = sand.u32 1, %s6464_s22  }
  0x86   : > { %1833 = vrot.lane.b32.xlu0 %v6607_v7, %s6489_s13  ;;  %1134 = vperm.xlu1 %6386, %v6223_v16  }
  0x8a   : > { %1837 = vrot.lane.b32.xlu0 %v6604_v6, %s6489_s13  ;;  %1167 = vrot.lane.b32.xlu1 %v6607_v7, %s11220_s15 }
  0x8b   : > { %6387 = vset.pattern.permute.xlu1 %v11228_v2 }
  0x8e   : > { %1877 = vperm.xlu0 %6378, %v6751_v21   ;;  %1171 = vrot.lane.b32.xlu1 %v6604_v6, %s11220_s15  ;;  %s6207_s15 = sshll.u32 %s11416_s28, 4  ;;  %s6494_s28 = smov [#allocation2]  }
  0x92   : > { %1946 = vrot.lane.b32.xlu0 %v6619_v11, %s6490_s29  ;;  %1211 = vperm.xlu1 %6387, %v6760_v22  }
  0x96   : > { %v6765_v23 = vpop.permute.xlu1 %323  ;;  %v6767_v24 = vpop.permute.xlu0 %255  ;;  %1950 = vrot.lane.b32.xlu0 %v6617_v10, %s6490_s29  ;;  %1278 = vrot.lane.b32.xlu1 %v6607_v7, %s11218_s16 }
  0x97   : > { %6388 = vset.pattern.permute.xlu1 %v11231_v5 }
  0x9a   : > { %v6774_v25 = vpop.permute.xlu1 %283  ;;  %v6776_v26 = vpop.permute.xlu0 %279  ;;  %2059 = vrot.lane.b32.xlu0 %v6604_v6, %s6491_s20  ;;  %1280 = vrot.lane.b32.xlu1 %v6619_v11, %s11218_s16 }
  0x9e   : > { %2099 = vperm.xlu0 %6378, %v6785_v27   ;;  %1284 = vrot.lane.b32.xlu1 %v6617_v10, %s11218_s16  ;;  %v6790_v28 = vpop.permute.xlu1 %281  ;;  %v6792_v29 = vpop.permute.xlu0 %285  ;;  %s9208_s16 = scalar_lea.vmem [#allocation2], %s6207_s15  ;;  %s12012_s15 = smov 1  }
  0x9f   : > { %v7048_v12 = vsel %vm289_vm0, %v6774_v25, %v6792_v29  ;;  %v7060_v55 = vsel %vm289_vm0, %v6776_v26, %v6790_v28 }
  0xa0   : > { %11490 = vst [vmem:[#allocation21_spill] sm:$0xff] %v7060_v55 }
  0xa2   : > { %2168 = vrot.lane.b32.xlu0 %v6619_v11, %s6492_s9  ;;  %v6796_v30 = vpop.permute.xlu1 %390  ;;  %1356 = vperm.xlu1 %6388, %v6227_v18   ;;  %v6798_v31 = vpop.permute.xlu0 %394  ;;  %v6994_v18 = vld [vmem:[%s11206_s5 + $0x10] sm:$0xf] }
  0xa3   : > { %11483 = vst [vmem:[#allocation14_spill] sm:$0xff] %v6994_v18 }
  0xa6   : > { %2172 = vrot.lane.b32.xlu0 %v6617_v10, %s6492_s9  ;;  %1389 = vrot.lane.b32.xlu1 %v6607_v7, %s6486_s11  ;;  %v6804_v32 = vpop.permute.xlu1 %392 }
  0xa7   : > { %6389 = vset.pattern.permute.xlu1 %v11228_v2 }
  0xa9   : > { %v6812_v34 = vpop.permute.xlu0 %434 }
  0xaa   : > { %2406 = vperm.xlu0 %6378, %v6809_v33   ;;  %1393 = vrot.lane.b32.xlu1 %v6604_v6, %s6486_s11  ;;  %v6823_v37 = vpop.permute.xlu1 %396 }
  0xad   : > { %v6825_v38 = vpop.permute.xlu0 %503 }
  0xae   : > { %2700 = vperm.xlu0 %6378, %v6252_v35   ;;  %1433 = vperm.xlu1 %6389, %v6229_v36  }
  0xb1   : > { %v6830_v40 = vpop.permute.xlu0 %507  ;;  %v6832_v41 = vpop.permute.xlu1 %468 }
  0xb2   : > { %2994 = vperm.xlu0 %6378, %v6258_v39   ;;  %1500 = vrot.lane.b32.xlu1 %v6607_v7, %s6487_s10  ;;  %v6972_v39 = vld [vmem:[%s11206_s5 + $0xc] sm:$0xf] }
  0xb3   : > { %6390 = vset.pattern.permute.xlu1 %v11231_v5 }
  0xb5   : > { %v6837_v42 = vpop.permute.xlu0 %616  ;;  %v6839_v43 = vpop.permute.xlu1 %501 }
  0xb6   : > { %6401 = vset.pattern.permute.xlu0 %v11231_v5  ;;  %1502 = vrot.lane.b32.xlu1 %v6619_v11, %s6487_s10 }
  0xb7   : > { %357 = vperm.xlu0 %6401, %v6581_v0   ;;  %v6896_v0 = vld [vmem:[%s11206_s5] sm:$0xf] }
  0xb8   : > { %v307_v35 = vrot.slane %v6896_v0, %v6888_v62 }
  0xb9   : > { %v6845_v44 = vpop.permute.xlu0 %656  ;;  %v6847_v45 = vpop.permute.xlu1 %505 }
  0xba   : > { %1506 = vrot.lane.b32.xlu1 %v6617_v10, %s6487_s10 }
  0xbb   : > { %579 = vperm.xlu0 %6401, %v6653_v14   ;;  %v6920_v14 = vld [vmem:[%s11206_s5 + $0x4c] sm:$0xf] }
  0xbd   : > { %v6852_v46 = vpop.permute.xlu0 %725  ;;  %v6854_v47 = vpop.permute.xlu1 %545 }
  0xbe   : > { %1578 = vperm.xlu1 %6390, %v6728_v20   ;;  %v7007_v20 = vld [vmem:[%s11206_s5 + $0x58] sm:$0xf] }
  0xbf   : > { %801 = vperm.xlu0 %6401, %v6689_v17   ;;  %v6927_v17 = vsub.s32 %v259_v61, %v6866_v51  ;;  %11484 = vst [vmem:[#allocation15_spill] sm:$0xff] %v7007_v20  ;;  %v7225_v51 = vld [vmem:[%s11202_s1 + $0x34] sm:$0x3] }
  0xc0   : > { %11508 = vst [vmem:[#allocation37_spill] sm:$0xff] %v7225_v51 }
  0xc1   : > { %v6858_v49 = vpop.permute.xlu0 %729  ;;  %v6860_v50 = vpop.permute.xlu1 %612  ;;  %11481 = vst [vmem:[#allocation12_spill] sm:$0xff] %v6927_v17 }
  0xc2   : > { %1611 = vrot.lane.b32.xlu1 %v6607_v7, %s11226_s12 }
  0xc3   : > { %1023 = vperm.xlu0 %6401, %v6720_v19   ;;  %6391 = vset.pattern.permute.xlu1 %v11228_v2  ;;  %v7021_v2 = vsel %vm289_vm0, %v6792_v29, %v6776_v26  ;;  %v7054_v19 = vsel %vm289_vm0, %v6790_v28, %v6774_v25  ;;  %v7067_v29 = vld [vmem:[%s11206_s5 + $0x5c] sm:$0xf]  ;;  %v11492_v28 = vrot.slane %v6896_v0, %v6881_v58  ;;  %v7093_v26 = vld [vmem:[%s11206_s5 + $0x18] sm:$0xf] }
  0xc4   : > { %11485 = vst [vmem:[#allocation16_spill] sm:$0xff] %v7021_v2  ;;  %11489 = vst [vmem:[#allocation20_spill] sm:$0xff] %v7054_v19 }
  0xc5   : > { %v6868_v52 = vpop.permute.xlu0 %838  ;;  %v6870_v53 = vpop.permute.xlu1 %614  ;;  %11491 = vst [vmem:[#allocation22_spill] sm:$0xff] %v7067_v29  ;;  %11493 = vst [vmem:[#allocation23_spill] sm:$0xff] %v7093_v26  ;;  %v7175_v26 = vld [vmem:[%s11202_s1 + $0x2e] sm:$0x3]  ;;  %v263_v29 = vrot.slane %v6767_v24, %v6927_v17  ;;  %v11509_v24 = vrot.slane %v6915_v13, %v6899_v1 }
  0xc6   : > { %11476 = vst [vmem:[#allocation7_spill] sm:$0xff] %v6868_v52  ;;  %1615 = vrot.lane.b32.xlu1 %v6604_v6, %s11226_s12  ;;  %11505 = vst [vmem:[#allocation34_spill] sm:$0xff] %v7175_v26  ;;  %s6130_s12 = scalar_lea.sflag [#allocation3], %s12241_s26 }
  0xc7   : > { %1245 = vperm.xlu0 %6401, %v6760_v22   ;;  %v303_v22 = vrot.slane %v6896_v0, %v6899_v1 }
  0xc9   : > { %v6883_v59 = vpop.permute.xlu0 %878  ;;  %v6885_v60 = vpop.permute.xlu1 %618  ;;  %v7102_v52 = vmul.f32 %v303_v22, %v7060_v55  ;;  %v7123_v22 = vld [vmem:[%s11206_s5 + $0x1c] sm:$0xf] }
  0xca   : > { %11477 = vst [vmem:[#allocation8_spill] sm:$0xff] %v6883_v59  ;;  %1655 = vperm.xlu1 %6391, %v6233_v56   ;;  %v7042_v59 = vld [vmem:[%s11206_s5 + $0x14] sm:$0xf]  ;;  %11500 = vst [vmem:[#allocation29_spill] sm:$0xff] %v7123_v22 }
  0xcb   : > { %1467 = vperm.xlu0 %6401, %v6229_v36   ;;  %v6981_v36 = vld [vmem:[%s11202_s1 + $0x1e] sm:$0x3]  ;;  %11488 = vst [vmem:[#allocation19_spill] sm:$0xff] %v7042_v59 }
  0xcd   : > { %v6922_v15 = vpop.permute.xlu0 %947  ;;  %v6924_v16 = vpop.permute.xlu1 %690 }
  0xce   : > { %11479 = vst [vmem:[#allocation10_spill] sm:$0xff] %v6922_v15  ;;  %11480 = vst [vmem:[#allocation11_spill] sm:$0xff] %v6924_v16  ;;  %1726 = vperm.xlu1 %6391, %v6234_v9  }
  0xcf   : > { %1689 = vperm.xlu0 %6401, %v6233_v56  }
  0xd1   : > { %v6974_v61 = vpop.permute.xlu0 %951  ;;  %v6976_v56 = vpop.permute.xlu1 %723 }
  0xd2   : > { %11482 = vst [vmem:[#allocation13_spill] sm:$0xff] %v6974_v61  ;;  %6392 = vset.pattern.permute.xlu1 %v11231_v5  ;;  %v7037_v5 = vld [vmem:[%s11202_s1 + $0x22] sm:$0x3] }
  0xd3   : > { %2022 = vperm.xlu0 %6401, %v6981_v36   ;;  %1780 = vperm.xlu1 %6392, %v6234_v9   ;;  %11487 = vst [vmem:[#allocation18_spill] sm:$0xff] %v7037_v5 }
  0xd5   : > { %v7030_v33 = vpop.permute.xlu0 %1060  ;;  %v7032_v9 = vpop.permute.xlu1 %727 }
  0xd6   : > { %11486 = vst [vmem:[#allocation17_spill] sm:$0xff] %v7030_v33  ;;  %v7081_v33 = vmul.f32 %v11492_v28, %v7021_v2  ;;  %v11494_v28 = vrot.slane %v6896_v0, %v6891_v63  ;;  %v7105_v2 = vmul.f32 %v307_v35, %v7054_v19  ;;  %v7136_v0 = vld [vmem:[%s11206_s5 + $0x64] sm:$0xf] }
  0xd7   : > { %2244 = vperm.xlu0 %6401, %v7037_v5   ;;  %1835 = vrot.lane.b32.xlu1 %v6619_v11, %s6489_s13  ;;  %v7116_v5 = vld [vmem:[%s11202_s1 + $0x28] sm:$0x3]  ;;  %11501 = vst [vmem:[#allocation30_spill] sm:$0xff] %v7136_v0 }
  0xd8   : > { %v7099_v25 = vmul.f32 %v11494_v28, %v7048_v12  ;;  %11496 = vst [vmem:[#allocation25_spill] sm:$0xff] %v7105_v2  ;;  %11499 = vst [vmem:[#allocation28_spill] sm:$0xff] %v7116_v5  ;;  %v329_v55 = vrot.slane %v7081_v33, %v6881_v58  ;;  %v7158_v28 = vld [vmem:[%s11206_s5 + $0x20] sm:$0xf]  ;;  %v337_v59 = vrot.slane %v7105_v2, %v6881_v58 }
  0xd9   : > { %v7109_v15 = vpop.permute.xlu0 %1100  ;;  %v7111_v61 = vpop.permute.xlu1 %767  ;;  %11502 = vst [vmem:[#allocation31_spill] sm:$0xff] %v7158_v28 }
  0xda   : > { %11495 = vst [vmem:[#allocation24_spill] sm:$0xff] %v7099_v25  ;;  %11497 = vst [vmem:[#allocation26_spill] sm:$0xff] %v7109_v15  ;;  %v341_v19 = vrot.slane %v7099_v25, %v6881_v58  ;;  %v344_v20 = vmul.f32 %v337_v59, %v6765_v23  ;;  %v11519_v59 = vmov 0  }
  0xdb   : > { %11498 = vst [vmem:[#allocation27_spill] sm:$0xff] %v7111_v61  ;;  %2538 = vperm.xlu0 %6401, %v7116_v5   ;;  %v333_v5 = vrot.slane %v7102_v52, %v6881_v58  ;;  %1839 = vrot.lane.b32.xlu1 %v6617_v10, %s6489_s13  ;;  %v7182_v61 = vld [vmem:[%s11206_s5 + $0x68] sm:$0xf] }
  0xdc   : > { %11506 = vst [vmem:[#allocation35_spill] sm:$0xff] %v7182_v61  ;;  %v345_v16 = vmul.f32 %v341_v19, %v6765_v23  ;;  %v265_v19 = vadd.f32 %v263_v29, %v6600_v4 }
  0xdd   : > { %v7168_v15 = vpop.permute.xlu0 %1169  ;;  %v7170_v35 = vpop.permute.xlu1 %834  ;;  %v343_v18 = vmul.f32 %v333_v5, %v6765_v23  ;;  %v7230_v5 = vld [vmem:[%s11206_s5 + $0x24] sm:$0xf] }
  0xde   : > { %11503 = vst [vmem:[#allocation32_spill] sm:$0xff] %v7168_v15  ;;  %11504 = vst [vmem:[#allocation33_spill] sm:$0xff] %v7170_v35  ;;  %v342_v15 = vmul.f32 %v329_v55, %v6765_v23  ;;  %v401_v35 = vsel %vm398_vm1, %v6796_v30, %v6804_v32  ;;  %v402_v55 = vsel %vm398_vm1, %v6823_v37, %v6796_v30 }
  0xdf   : > { %2832 = vperm.xlu0 %6401, %v7175_v26   ;;  %1911 = vperm.xlu1 %6392, %v6751_v21   ;;  %v400_v23 = vsel %vm398_vm1, %v6804_v32, %v6798_v31  ;;  %v399_v21 = vsel %vm398_vm1, %v6798_v31, %v6823_v37  ;;  %v266_v37 = vadd.f32 %v263_v29, %v6597_v3 }
  0xe0   : > { %v11510_v30 = vrot.slane %v6915_v13, %v6881_v58  ;;  %v350_v28 = vcombine.low %v342_v15, %v343_v18  ;;  %v351_v22 = vcombine.low %v344_v20, %v345_v16  ;;  %v11511_v32 = vrot.slane %v6915_v13, %v6888_v62  ;;  %v7277_v15 = vld [vmem:[%s11206_s5 + $0x28] sm:$0xf] }
  0xe1   : > { %v7218_v17 = vpop.permute.xlu0 %1173  ;;  %v7220_v26 = vpop.permute.xlu1 %836  ;;  %v11512_v29 = vrot.slane %v6915_v13, %v6891_v63  ;;  %v11513_v13 = vrot.slane %v6904_v8, %v6888_v62  ;;  %v11515_v20 = vrot.slane %v6920_v14, %v6881_v58 }
  0xe2   : > { %11507 = vst [vmem:[#allocation36_spill] sm:$0xff] %v7218_v17  ;;  %v427_v17 = vmul.f32 %v11509_v24, %v401_v35  ;;  %v426_v0 = vmul.f32 %v11510_v30, %v402_v55  ;;  %v428_v31 = vmul.f32 %v11511_v32, %v400_v23  ;;  %v7313_v16 = vadd.f32 %v350_v28, %v265_v19 }
  0xe3   : > { %3126 = vperm.xlu0 %6401, %v7225_v51   ;;  %v429_v61 = vmul.f32 %v11512_v29, %v399_v21  ;;  %1944 = vrot.lane.b32.xlu1 %v6607_v7, %s6490_s29  ;;  %v7285_v18 = vmul.f32 %v11513_v13, %v7048_v12  ;;  %v7290_v32 = vmul.f32 %v11515_v20, %v401_v35 }
  0xe4   : > { %v11517_v29 = vrot.slane %v6920_v14, %v6899_v1  ;;  %6393 = vset.pattern.permute.xlu1 %v11519_v59  ;;  %v444_v13 = vrot.slane %v427_v17, %v6881_v58  ;;  %v440_v35 = vrot.slane %v426_v0, %v6881_v58  ;;  %11520 = vst [vmem:[#allocation41_spill] sm:$0xff] %v7313_v16 }
  0xe5   : > { %v7270_v30 = vpop.permute.xlu0 %1282  ;;  %v7272_v51 = vpop.permute.xlu1 %840  ;;  %11514 = vst [vmem:[#allocation38_spill] sm:$0xff] %v7285_v18  ;;  %11516 = vst [vmem:[#allocation39_spill] sm:$0xff] %v7290_v32  ;;  %v7315_v8 = vadd.f32 %v351_v22, %v266_v37  ;;  %v448_v12 = vrot.slane %v428_v31, %v6881_v58  ;;  %v452_v18 = vrot.slane %v429_v61, %v6881_v58 }
  0xe6   : > { %v7295_v24 = vmul.f32 %v11517_v29, %v400_v23  ;;  %v478_v20 = vrot.slane %v427_v17, %v6899_v1  ;;  %v482_v2 = vrot.slane %v428_v31, %v6899_v1  ;;  %v7332_v19 = vmul.f32 %v444_v13, %v6812_v34 }
  0xe7   : > { %11521 = vst [vmem:[#allocation42_spill] sm:$0xff] %v7315_v8  ;;  %1948 = vrot.lane.b32.xlu1 %v6604_v6, %s6490_s29  ;;  %v474_v37 = vrot.slane %v426_v0, %v6899_v1  ;;  %v11523_v29 = vrot.slane %v6920_v14, %v6888_v62  ;;  %v11525_v17 = vrot.slane %v6920_v14, %v6891_v63 }
  0xe8   : > { %11518 = vst [vmem:[#allocation40_spill] sm:$0xff] %v7295_v24  ;;  %11522 = vst [vmem:[#allocation43_spill] sm:$0xff] %v7332_v19  ;;  %v7346_v28 = vmul.f32 %v440_v35, %v6812_v34  ;;  %v486_v22 = vrot.slane %v429_v61, %v6899_v1  ;;  %v510_v0 = vsel %vm509_vm2, %v6847_v45, %v6830_v40 }
  0xe9   : > { %v7321_v25 = vpop.permute.xlu0 %1322  ;;  %v7323_v23 = vpop.permute.xlu1 %912  ;;  %v7338_v8 = vmul.f32 %v11523_v29, %v399_v21  ;;  %v7343_v31 = vmul.f32 %v11525_v17, %v402_v55  ;;  %v511_v21 = vsel %vm509_vm2, %v6825_v38, %v6847_v45  ;;  %v7358_v13 = vmul.f32 %v452_v18, %v6812_v34 }
  0xea   : > { %11527 = vst [vmem:[#allocation46_spill] sm:$0xff] %v7346_v28  ;;  %v7361_v14 = vmul.f32 %v474_v37, %v6832_v41  ;;  %v7364_v55 = vmul.f32 %v478_v20, %v6832_v41  ;;  %v513_v61 = vsel %vm509_vm2, %v6830_v40, %v6839_v43  ;;  %v7376_v45 = vmul.f32 %v448_v12, %v6812_v34 }
  0xeb   : > { %11524 = vst [vmem:[#allocation44_spill] sm:$0xff] %v7338_v8  ;;  %11526 = vst [vmem:[#allocation45_spill] sm:$0xff] %v7343_v31  ;;  %1988 = vperm.xlu1 %6393, %v6981_v36   ;;  %v7379_v18 = vmul.f32 %v482_v2, %v6832_v41  ;;  %v7382_v20 = vmul.f32 %v486_v22, %v6832_v41  ;;  %v512_v40 = vsel %vm509_vm2, %v6839_v43, %v6825_v38  ;;  %v11543_v2 = vmov 1  }
  0xec   : > { %11528 = vst [vmem:[#allocation47_spill] sm:$0xff] %v7358_v13  ;;  %11529 = vst [vmem:[#allocation48_spill] sm:$0xff] %v7361_v14  ;;  %v11534_v36 = vrot.slane %v6946_v48, %v6888_v62  ;;  %v11535_v34 = vrot.slane %v6946_v48, %v6891_v63  ;;  %v11536_v43 = vrot.slane %v6946_v48, %v6881_v58 }
  0xed   : > { %11530 = vst [vmem:[#allocation49_spill] sm:$0xff] %v7364_v55  ;;  %v7371_v35 = vpop.permute.xlu0 %1391  ;;  %v7373_v29 = vpop.permute.xlu1 %945  ;;  %11531 = vst [vmem:[#allocation50_spill] sm:$0xff] %v7376_v45  ;;  %v11538_v38 = vrot.slane %v6946_v48, %v6899_v1  ;;  %v11539_v48 = vrot.slane %v6951_v54, %v6881_v58  ;;  %v7446_v41 = vsel %vm620_vm3, %v6870_v53, %v6837_v42 }
  0xee   : > { %11532 = vst [vmem:[#allocation51_spill] sm:$0xff] %v7379_v18  ;;  %11533 = vst [vmem:[#allocation52_spill] sm:$0xff] %v7382_v20  ;;  %v7391_v37 = vmul.f32 %v11534_v36, %v511_v21  ;;  %v7396_v12 = vmul.f32 %v11535_v34, %v510_v0  ;;  %v7409_v17 = vmul.f32 %v11536_v43, %v513_v61  ;;  %v7433_v34 = vld [vmem:[%s11206_s5 + $0x2c] sm:$0xf] }
  0xef   : > { %v7422_v22 = vmul.f32 %v11538_v38, %v512_v40  ;;  %2055 = vrot.lane.b32.xlu1 %v6607_v7, %s6491_s20  ;;  %v7440_v38 = vmul.f32 %v11539_v48, %v512_v40  ;;  %11541 = vst [vmem:[#allocation55_spill] sm:$0xff] %v7446_v41  ;;  %v7452_v55 = vsel %vm620_vm3, %v6860_v50, %v6870_v53 }
  0xf0   : > { %11537 = vst [vmem:[#allocation53_spill] sm:$0xff] %v7409_v17  ;;  %11542 = vst [vmem:[#allocation56_spill] sm:$0xff] %v7452_v55  ;;  %6394 = vset.pattern.permute.xlu1 %v11543_v2  ;;  %v559_v40 = vrot.slane %v7391_v37, %v6881_v58  ;;  %v563_v48 = vrot.slane %v7396_v12, %v6881_v58  ;;  %v7464_v20 = vsel %vm620_vm3, %v6837_v42, %v6885_v60 }
  0xf1   : > { %v7426_v43 = vpop.permute.xlu0 %1395  ;;  %v7428_v36 = vpop.permute.xlu1 %949  ;;  %11540 = vst [vmem:[#allocation54_spill] sm:$0xff] %v7440_v38  ;;  %11544 = vst [vmem:[#allocation57_spill] sm:$0xff] %v7464_v20  ;;  %v7470_v53 = vsel %vm620_vm3, %v6885_v60, %v6860_v50  ;;  %v551_v18 = vrot.slane %v7409_v17, %v6881_v58  ;;  %v11546_v14 = vrot.slane %v6951_v54, %v6891_v63 }
  0xf2   : > { %11545 = vst [vmem:[#allocation58_spill] sm:$0xff] %v7470_v53  ;;  %v555_v19 = vrot.slane %v7422_v22, %v6881_v58  ;;  %v11548_v60 = vrot.slane %v6972_v39, %v6899_v1  ;;  %v11551_v50 = vrot.slane %v6951_v54, %v6899_v1 }
  0xf3   : > { %v7477_v13 = vmul.f32 %v11546_v14, %v513_v61  ;;  %v11549_v14 = vrot.slane %v6972_v39, %v6888_v62  ;;  %2057 = vrot.lane.b32.xlu1 %v6619_v11, %s6491_s20  ;;  %v11556_v11 = vrot.slane %v6972_v39, %v6891_v63 }
  0xf4   : > { %v649_v28 = vmul.f32 %v11548_v60, %v7452_v55  ;;  %v7504_v17 = vmul.f32 %v11551_v50, %v511_v21  ;;  %v11553_v60 = vrot.slane %v6951_v54, %v6888_v62  ;;  %v7523_v21 = vmul.f32 %v555_v19, %v6854_v47 }
  0xf5   : > { %11547 = vst [vmem:[#allocation59_spill] sm:$0xff] %v7477_v13  ;;  %v650_v61 = vmul.f32 %v11549_v14, %v7446_v41  ;;  %v7497_v42 = vpop.permute.xlu0 %1504  ;;  %v7499_v45 = vpop.permute.xlu1 %989  ;;  %v11555_v14 = vrot.slane %v6972_v39, %v6881_v58  ;;  %v651_v16 = vmul.f32 %v11556_v11, %v7464_v20  ;;  %v7526_v54 = vmul.f32 %v559_v40, %v6854_v47  ;;  %v7554_v39 = vld [vmem:[%s11206_s5 + $0x30] sm:$0xf] }
  0xf6   : > { %11550 = vst [vmem:[#allocation60_spill] sm:$0xff] %v7497_v42  ;;  %11552 = vst [vmem:[#allocation61_spill] sm:$0xff] %v7504_v17  ;;  %v7509_v55 = vmul.f32 %v11553_v60, %v510_v0  ;;  %v7520_v42 = vmul.f32 %v551_v18, %v6854_v47  ;;  %v7529_v0 = vmul.f32 %v563_v48, %v6854_v47  ;;  %v11568_v17 = vld [vmem:[#allocation11_spill] sm:$0xff] }
  0xf7   : > { %v648_v41 = vmul.f32 %v11555_v14, %v7470_v53  ;;  %11558 = vst [vmem:[#allocation64_spill] sm:$0xff] %v7523_v21  ;;  %11559 = vst [vmem:[#allocation65_spill] sm:$0xff] %v7526_v54  ;;  %v666_v40 = vrot.slane %v649_v28, %v6881_v58  ;;  %v670_v47 = vrot.slane %v650_v61, %v6881_v58  ;;  %2061 = vrot.lane.b32.xlu1 %v6617_v10, %s6491_s20 }
  0xf8   : > { %11554 = vst [vmem:[#allocation62_spill] sm:$0xff] %v7509_v55  ;;  %11557 = vst [vmem:[#allocation63_spill] sm:$0xff] %v7520_v42  ;;  %v674_v19 = vrot.slane %v651_v16, %v6881_v58  ;;  %v700_v60 = vrot.slane %v649_v28, %v6899_v1  ;;  %v708_v13 = vrot.slane %v651_v16, %v6899_v1  ;;  %v11661_v42 = vld [vmem:[#allocation28_spill] sm:$0xff] }
  0xf9   : > { %11560 = vst [vmem:[#allocation66_spill] sm:$0xff] %v7529_v0  ;;  %v7545_v48 = vpop.permute.xlu0 %1544  ;;  %v7547_v14 = vpop.permute.xlu1 %1056  ;;  %11562 = vst [vmem:[#allocation68_spill] sm:$0xff] %v7554_v39  ;;  %v662_v10 = vrot.slane %v648_v41, %v6881_v58  ;;  %v696_v20 = vrot.slane %v648_v41, %v6899_v1  ;;  %v7576_v50 = vmul.f32 %v666_v40, %v6845_v44 }
  0xfa   : > { %11561 = vst [vmem:[#allocation67_spill] sm:$0xff] %v7545_v48  ;;  %v7579_v11 = vmul.f32 %v670_v47, %v6845_v44  ;;  %v704_v53 = vrot.slane %v650_v61, %v6899_v1  ;;  %v734_v28 = vsel %vm731_vm4, %v6976_v56, %v6852_v46  ;;  %v7596_v47 = vmul.f32 %v674_v19, %v6845_v44  ;;  %v11571_v19 = vld [vmem:[#allocation6_spill] sm:$0xff]  ;;  %v11577_v48 = vld [vmem:[#allocation15_spill] sm:$0xff] }
  0xfb   : > { %11563 = vst [vmem:[#allocation69_spill] sm:$0xff] %v7576_v50  ;;  %2133 = vperm.xlu1 %6394, %v6785_v27   ;;  %v7593_v40 = vmul.f32 %v662_v10, %v6845_v44  ;;  %v732_v61 = vsel %vm731_vm4, %v7032_v9, %v6858_v49  ;;  %v733_v27 = vsel %vm731_vm4, %v6852_v46, %v7032_v9  ;;  %v1735_v10 = vsub.s32 6, %v11571_v19  ;;  %v11574_v46 = vld [vmem:[#allocation14_spill] sm:$0xff] }
  0xfc   : > { %11564 = vst [vmem:[#allocation70_spill] sm:$0xff] %v7579_v11  ;;  %11567 = vst [vmem:[#allocation73_spill] sm:$0xff] %v7596_v47  ;;  %v7607_v18 = vmul.f32 %v696_v20, %v11568_v17  ;;  %v7610_v55 = vmul.f32 %v700_v60, %v11568_v17  ;;  %v735_v44 = vsel %vm731_vm4, %v6858_v49, %v6976_v56  ;;  %v11598_v47 = vld [vmem:[#allocation27_spill] sm:$0xff] }
  0xfd   : > { %v7588_v16 = vpop.permute.xlu0 %1613  ;;  %v7590_v41 = vpop.permute.xlu1 %1058  ;;  %11566 = vst [vmem:[#allocation72_spill] sm:$0xff] %v7593_v40  ;;  %v7618_v38 = vmul.f32 %v704_v53, %v11568_v17  ;;  %v11575_v9 = vrot.slane %v11574_v46, %v6899_v1  ;;  %v11578_v0 = vrot.slane %v11577_v48, %v6881_v58  ;;  %v11580_v56 = vrot.slane %v11574_v46, %v6888_v62 }
  0xfe   : > { %11565 = vst [vmem:[#allocation71_spill] sm:$0xff] %v7588_v16  ;;  %11569 = vst [vmem:[#allocation11_spill] sm:$0xff] %v7607_v18  ;;  %v7621_v16 = vmul.f32 %v708_v13, %v11568_v17  ;;  %v11582_v13 = vrot.slane %v11574_v46, %v6891_v63  ;;  %v7682_v39 = vrot.slane %v6597_v3, %v1735_v10 }
  0xff   : > { %11570 = vst [vmem:[#allocation74_spill] sm:$0xff] %v7610_v55  ;;  %11572 = vst [vmem:[#allocation75_spill] sm:$0xff] %v7618_v38  ;;  %v7626_v20 = vmul.f32 %v11575_v9, %v734_v28  ;;  %v7633_v49 = vmul.f32 %v11578_v0, %v734_v28  ;;  %v7638_v53 = vmul.f32 %v11580_v56, %v733_v27  ;;  %2166 = vrot.lane.b32.xlu1 %v6607_v7, %s6492_s9  ;;  %v11604_v28 = vld [vmem:[#allocation7_spill] sm:$0xff] }
 0x100   : > { %11573 = vst [vmem:[#allocation76_spill] sm:$0xff] %v7621_v16  ;;  %v7643_v17 = vmul.f32 %v11582_v13, %v732_v61  ;;  %v11585_v56 = vrot.slane %v11574_v46, %v6881_v58  ;;  %v11587_v13 = vrot.slane %v11577_v48, %v6891_v63  ;;  %6395 = vset.pattern.permute.xlu1 %v11519_v59  ;;  %11590 = vst [vmem:[#allocation83_spill] sm:$0xff] %v7682_v39  ;;  %v7768_v39 = vld [vmem:[%s11206_s5 + $0x38] sm:$0xf] }
 0x101   : > { %11576 = vst [vmem:[#allocation14_spill] sm:$0xff] %v7626_v20  ;;  %11579 = vst [vmem:[#allocation15_spill] sm:$0xff] %v7633_v49  ;;  %v7647_v9 = vpop.permute.xlu0 %1617  ;;  %v7649_v60 = vpop.permute.xlu1 %1062  ;;  %v1732_v7 = vrot.slane %v6600_v4, %v6888_v62  ;;  %v7673_v46 = vrot.slane %v6600_v4, %v1735_v10  ;;  %v1789_v0 = vsub.s32 7, %v11571_v19  ;;  %v781_v55 = vrot.slane %v7638_v53, %v6881_v58 }
 0x102   : > { %11581 = vst [vmem:[#allocation77_spill] sm:$0xff] %v7638_v53  ;;  %11583 = vst [vmem:[#allocation78_spill] sm:$0xff] %v7643_v17  ;;  %v7658_v54 = vmul.f32 %v11585_v56, %v735_v44  ;;  %v7663_v21 = vmul.f32 %v11587_v13, %v735_v44  ;;  %v1740_v56 = vrot.slane %v6597_v3, %v6888_v62 }
 0x103   : > { %11584 = vst [vmem:[#allocation79_spill] sm:$0xff] %v7647_v9  ;;  %11589 = vst [vmem:[#allocation82_spill] sm:$0xff] %v7673_v46  ;;  %v777_v13 = vrot.slane %v7626_v20, %v6881_v58  ;;  %v785_v44 = vrot.slane %v7643_v17, %v6881_v58  ;;  %2170 = vrot.lane.b32.xlu1 %v6604_v6, %s6492_s9  ;;  %v11592_v19 = vrot.slane %v11577_v48, %v6899_v1 }
 0x104   : > { %11586 = vst [vmem:[#allocation80_spill] sm:$0xff] %v7658_v54  ;;  %11588 = vst [vmem:[#allocation81_spill] sm:$0xff] %v7663_v21  ;;  %v773_v10 = vrot.slane %v7658_v54, %v6881_v58  ;;  %v11594_v6 = vrot.slane %v11577_v48, %v6888_v62  ;;  %v7717_v18 = vrot.slane %v1732_v7, %v6888_v62  ;;  %v11601_v48 = vld [vmem:[#allocation33_spill] sm:$0xff]  ;;  %v11613_v54 = vld [vmem:[#allocation22_spill] sm:$0xff] }
 0x105   : > { %v7695_v16 = vpop.permute.xlu0 %1833  ;;  %v7697_v3 = vpop.permute.xlu1 %1134  ;;  %v7708_v38 = vmul.f32 %v11592_v19, %v733_v27  ;;  %v7722_v9 = vrot.slane %v1740_v56, %v6888_v62  ;;  %v7728_v19 = vmul.f32 %v777_v13, %v11598_v47  ;;  %v7740_v56 = vmul.f32 %v785_v44, %v11598_v47  ;;  %v6244_v44 = vld [vmem:[%s11202_s1 + $0x24] sm:$0x3]  ;;  %11608 = vst [vmem:[#allocation91_spill] sm:$0xff] %v7768_v39 }
 0x106   : > { %11591 = vst [vmem:[#allocation84_spill] sm:$0xff] %v7695_v16  ;;  %v7713_v16 = vmul.f32 %v11594_v6, %v732_v61  ;;  %11596 = vst [vmem:[#allocation87_spill] sm:$0xff] %v7717_v18  ;;  %v7725_v27 = vmul.f32 %v773_v10, %v11598_v47  ;;  %v845_v61 = vsel %vm842_vm5, %v11601_v48, %v7220_v26  ;;  %v11605_v10 = vld [vmem:[#allocation18_spill] sm:$0xff]  ;;  %v11609_v18 = vld [vmem:[#allocation19_spill] sm:$0xff] }
 0x107   : > { %11593 = vst [vmem:[#allocation85_spill] sm:$0xff] %v7708_v38  ;;  %11597 = vst [vmem:[#allocation88_spill] sm:$0xff] %v7722_v9  ;;  %v7737_v6 = vmul.f32 %v781_v55, %v11598_v47  ;;  %v844_v13 = vsel %vm842_vm5, %v7220_v26, %v11604_v28  ;;  %2210 = vperm.xlu1 %6395, %v11605_v10   ;;  %v1786_v7 = vrot.slane %v6600_v4, %v6891_v63  ;;  %v6405_v10 = vld [vmem:[%s6594_s17 + $0x8] sm:$0xff] }
 0x108   : > { %11595 = vst [vmem:[#allocation86_spill] sm:$0xff] %v7713_v16  ;;  %11599 = vst [vmem:[#allocation27_spill] sm:$0xff] %v7725_v27  ;;  %v7761_v26 = vrot.slane %v6600_v4, %v1789_v0  ;;  %v11610_v55 = vrot.slane %v11609_v18, %v6899_v1  ;;  %v843_v47 = vsel %vm842_vm5, %v11604_v28, %v7272_v51 }
 0x109   : > { %11600 = vst [vmem:[#allocation89_spill] sm:$0xff] %v7728_v19  ;;  %11602 = vst [vmem:[#allocation33_spill] sm:$0xff] %v7737_v6  ;;  %v7747_v9 = vpop.permute.xlu0 %1837  ;;  %v7749_v46 = vpop.permute.xlu1 %1167  ;;  %v846_v4 = vsel %vm842_vm5, %v7272_v51, %v11601_v48  ;;  %v7783_v50 = vrot.slane %v6405_v10, %v1789_v0  ;;  %v11612_v53 = vrot.slane %v11609_v18, %v6888_v62 }
 0x10a   : > { %11603 = vst [vmem:[#allocation90_spill] sm:$0xff] %v7740_v56  ;;  %11606 = vst [vmem:[#allocation7_spill] sm:$0xff] %v7747_v9  ;;  %v1794_v9 = vrot.slane %v6405_v10, %v6891_v63  ;;  %v7773_v11 = vmul.f32 %v11610_v55, %v845_v61  ;;  %v11614_v51 = vrot.slane %v11613_v54, %v6881_v58 }
 0x10b   : > { %11607 = vst [vmem:[#allocation18_spill] sm:$0xff] %v7761_v26  ;;  %11611 = vst [vmem:[#allocation19_spill] sm:$0xff] %v7783_v50  ;;  %v872_v28 = vmul.f32 %v11612_v53, %v844_v13  ;;  %2308 = vperm.xlu1 %6395, %v6244_v44   ;;  %v7806_v17 = vrot.slane %v1786_v7, %v6891_v63  ;;  %v11618_v53 = vrot.slane %v11609_v18, %v6881_v58 }
 0x10c   : > { %v7799_v0 = vmul.f32 %v11614_v51, %v845_v61  ;;  %v11619_v40 = vrot.slane %v11609_v18, %v6891_v63  ;;  %v888_v7 = vrot.slane %v7773_v11, %v6881_v58  ;;  %v11621_v55 = vrot.slane %v11613_v54, %v6899_v1 }
 0x10d   : > { %v7801_v48 = vpop.permute.xlu0 %1877  ;;  %v7803_v10 = vpop.permute.xlu1 %1171  ;;  %11617 = vst [vmem:[#allocation93_spill] sm:$0xff] %v7806_v17  ;;  %v870_v20 = vmul.f32 %v11618_v53, %v846_v4  ;;  %v892_v53 = vrot.slane %v872_v28, %v6881_v58  ;;  %v11623_v18 = vrot.slane %v11613_v54, %v6888_v62  ;;  %v11625_v50 = vrot.slane %v11613_v54, %v6891_v63 }
 0x10e   : > { %11615 = vst [vmem:[#allocation22_spill] sm:$0xff] %v7799_v0  ;;  %11616 = vst [vmem:[#allocation92_spill] sm:$0xff] %v7801_v48  ;;  %v873_v61 = vmul.f32 %v11619_v40, %v843_v47  ;;  %v7820_v48 = vrot.slane %v1794_v9, %v6891_v63  ;;  %v7827_v17 = vmul.f32 %v11621_v55, %v844_v13 }
 0x10f   : > { %v922_v9 = vrot.slane %v7773_v11, %v6899_v1  ;;  %v926_v13 = vrot.slane %v872_v28, %v6899_v1  ;;  %v7846_v40 = vmul.f32 %v11623_v18, %v843_v47  ;;  %v7851_v11 = vmul.f32 %v11625_v50, %v846_v4  ;;  %6396 = vset.pattern.permute.xlu1 %v11543_v2  ;;  %v7861_v28 = vld [vmem:[%s11206_s5 + $0x3c] sm:$0xf]  ;;  %v11629_v18 = vld [vmem:[#allocation10_spill] sm:$0xff]  ;;  %v11631_v50 = vld [vmem:[#allocation13_spill] sm:$0xff] }
 0x110   : > { %11620 = vst [vmem:[#allocation94_spill] sm:$0xff] %v7820_v48  ;;  %11622 = vst [vmem:[#allocation95_spill] sm:$0xff] %v7827_v17  ;;  %v884_v55 = vrot.slane %v870_v20, %v6881_v58  ;;  %v896_v47 = vrot.slane %v873_v61, %v6881_v58  ;;  %v7869_v54 = vsel %vm953_vm6, %v7373_v29, %v11629_v18  ;;  %2342 = vperm.xlu1 %6396, %v6244_v44  }
 0x111   : > { %11624 = vst [vmem:[#allocation96_spill] sm:$0xff] %v7846_v40  ;;  %11626 = vst [vmem:[#allocation97_spill] sm:$0xff] %v7851_v11  ;;  %v7854_v51 = vpop.permute.xlu0 %1946  ;;  %v7856_v48 = vpop.permute.xlu1 %1211  ;;  %v7875_v4 = vsel %vm953_vm6, %v11631_v50, %v7373_v29  ;;  %v918_v0 = vrot.slane %v870_v20, %v6899_v1  ;;  %v7887_v56 = vsel %vm953_vm6, %v11629_v18, %v7428_v36  ;;  %v11638_v18 = vld [vmem:[#allocation23_spill] sm:$0xff] }
 0x112   : > { %11627 = vst [vmem:[#allocation98_spill] sm:$0xff] %v7854_v51  ;;  %11628 = vst [vmem:[#allocation99_spill] sm:$0xff] %v7861_v28  ;;  %v11633_v51 = vld [vmem:[#allocation8_spill] sm:$0xff]  ;;  %v930_v29 = vrot.slane %v873_v61, %v6899_v1  ;;  %v7897_v44 = vsel %vm953_vm6, %v7428_v36, %v11631_v50  ;;  %v11639_v39 = vrot.slane %v11638_v18, %v6881_v58 }
 0x113   : > { %11630 = vst [vmem:[#allocation10_spill] sm:$0xff] %v7869_v54  ;;  %11632 = vst [vmem:[#allocation13_spill] sm:$0xff] %v7875_v4  ;;  %v7878_v26 = vmul.f32 %v888_v7, %v11633_v51  ;;  %v7890_v6 = vmul.f32 %v892_v53, %v11633_v51  ;;  %v11640_v61 = vrot.slane %v11638_v18, %v6899_v1 }
 0x114   : > { %11635 = vst [vmem:[#allocation100_spill] sm:$0xff] %v7887_v56  ;;  %11637 = vst [vmem:[#allocation102_spill] sm:$0xff] %v7897_v44  ;;  %v7907_v53 = vmul.f32 %v11639_v39, %v7875_v4  ;;  %v7922_v7 = vmul.f32 %v884_v55, %v11633_v51  ;;  %v7925_v40 = vmul.f32 %v896_v47, %v11633_v51  ;;  %v11651_v47 = vld [vmem:[#allocation17_spill] sm:$0xff] }
 0x115   : > { %11634 = vst [vmem:[#allocation8_spill] sm:$0xff] %v7878_v26  ;;  %11636 = vst [vmem:[#allocation101_spill] sm:$0xff] %v7890_v6  ;;  %v7913_v17 = vmul.f32 %v11640_v61, %v7869_v54  ;;  %v7915_v36 = vpop.permute.xlu0 %1950  ;;  %v7917_v50 = vpop.permute.xlu1 %1278  ;;  %v11645_v61 = vrot.slane %v11638_v18, %v6888_v62  ;;  %v11647_v54 = vld [vmem:[#allocation5_spill] sm:$0xff]  ;;  %v7938_v20 = vmul.f32 %v918_v0, %v7323_v23 }
 0x116   : > { %11642 = vst [vmem:[#allocation103_spill] sm:$0xff] %v7915_v36  ;;  %11643 = vst [vmem:[#allocation104_spill] sm:$0xff] %v7922_v7  ;;  %2440 = vperm.xlu1 %6396, %v11647_v54   ;;  %v11649_v51 = vrot.slane %v11638_v18, %v6891_v63  ;;  %v1065_v39 = vsel %vm1064_vm7, %v11651_v47, %v7649_v60  ;;  %v7955_v54 = vmul.f32 %v922_v9, %v7323_v23 }
 0x117   : > { %11641 = vst [vmem:[#allocation23_spill] sm:$0xff] %v7913_v17  ;;  %11644 = vst [vmem:[#allocation105_spill] sm:$0xff] %v7925_v40  ;;  %v7933_v4 = vmul.f32 %v11645_v61, %v7887_v56  ;;  %v1068_v61 = vsel %vm1064_vm7, %v7649_v60, %v7547_v14  ;;  %v7958_v0 = vmul.f32 %v926_v13, %v7323_v23  ;;  %v11674_v40 = vld [vmem:[#allocation26_spill] sm:$0xff] }
 0x118   : > { %11648 = vst [vmem:[#allocation5_spill] sm:$0xff] %v7938_v20  ;;  %v7944_v55 = vmul.f32 %v11649_v51, %v7897_v44  ;;  %11652 = vst [vmem:[#allocation17_spill] sm:$0xff] %v7955_v54  ;;  %v7961_v18 = vmul.f32 %v930_v29, %v7323_v23  ;;  %v995_v44 = vrot.slane %v7907_v53, %v6881_v58  ;;  %v11656_v51 = vld [vmem:[#allocation29_spill] sm:$0xff] }
 0x119   : > { %11646 = vst [vmem:[#allocation106_spill] sm:$0xff] %v7933_v4  ;;  %11653 = vst [vmem:[#allocation108_spill] sm:$0xff] %v7958_v0  ;;  %v999_v56 = vrot.slane %v7913_v17, %v6881_v58  ;;  %v1066_v60 = vsel %vm1064_vm7, %v7590_v41, %v11651_v47  ;;  %v1067_v23 = vsel %vm1064_vm7, %v7547_v14, %v7590_v41  ;;  %v7977_v9 = vpop.permute.xlu0 %2059  ;;  %v7979_v13 = vpop.permute.xlu1 %1280  ;;  %v11665_v0 = vld [vmem:[#allocation30_spill] sm:$0xff] }
 0x11a   : > { %11650 = vst [vmem:[#allocation107_spill] sm:$0xff] %v7944_v55  ;;  %11654 = vst [vmem:[#allocation109_spill] sm:$0xff] %v7961_v18  ;;  %v1003_v29 = vrot.slane %v7933_v4, %v6881_v58  ;;  %v11657_v36 = vrot.slane %v11656_v51, %v6881_v58  ;;  %v11658_v19 = vrot.slane %v11656_v51, %v6891_v63  ;;  %6397 = vset.pattern.permute.xlu1 %v11519_v59 }
 0x11b   : > { %11655 = vst [vmem:[#allocation110_spill] sm:$0xff] %v7977_v9  ;;  %v1007_v9 = vrot.slane %v7944_v55, %v6881_v58  ;;  %v7997_v27 = vmul.f32 %v995_v44, %v7499_v45  ;;  %2504 = vperm.xlu1 %6397, %v11661_v42   ;;  %v11662_v41 = vrot.slane %v11656_v51, %v6899_v1 }
 0x11c   : > { %v1092_v11 = vmul.f32 %v11657_v36, %v1068_v61  ;;  %v1095_v47 = vmul.f32 %v11658_v19, %v1065_v39  ;;  %v8000_v36 = vmul.f32 %v999_v56, %v7499_v45  ;;  %v11663_v26 = vrot.slane %v11656_v51, %v6888_v62  ;;  %v6250_v56 = vld [vmem:[%s11202_s1 + $0x2a] sm:$0x3] }
 0x11d   : > { %11659 = vst [vmem:[#allocation29_spill] sm:$0xff] %v7997_v27  ;;  %v1093_v28 = vmul.f32 %v11662_v41, %v1067_v23  ;;  %v8024_v54 = vpop.permute.xlu0 %2099  ;;  %v8026_v51 = vpop.permute.xlu1 %1284  ;;  %v8031_v20 = vmul.f32 %v1003_v29, %v7499_v45  ;;  %v8037_v14 = vmul.f32 %v1007_v9, %v7499_v45  ;;  %v11666_v55 = vrot.slane %v11665_v0, %v6881_v58  ;;  %v11672_v27 = vld [vmem:[#allocation32_spill] sm:$0xff] }
 0x11e   : > { %11660 = vst [vmem:[#allocation111_spill] sm:$0xff] %v8000_v36  ;;  %v1094_v44 = vmul.f32 %v11663_v26, %v1066_v60  ;;  %11664 = vst [vmem:[#allocation28_spill] sm:$0xff] %v8024_v54  ;;  %v1106_v42 = vrot.slane %v1092_v11, %v6881_v58  ;;  %v1118_v19 = vrot.slane %v1095_v47, %v6881_v58 }
 0x11f   : > { %v1140_v54 = vrot.slane %v1092_v11, %v6899_v1  ;;  %v1152_v18 = vrot.slane %v1095_v47, %v6899_v1  ;;  %2602 = vperm.xlu1 %6397, %v6250_v56   ;;  %v1110_v29 = vrot.slane %v1093_v28, %v6881_v58  ;;  %v8048_v4 = vmul.f32 %v11666_v55, %v1067_v23 }
 0x120   : > { %v1114_v26 = vrot.slane %v1094_v44, %v6881_v58  ;;  %v11668_v45 = vrot.slane %v11665_v0, %v6899_v1  ;;  %v1144_v41 = vrot.slane %v1093_v28, %v6899_v1  ;;  %v1148_v11 = vrot.slane %v1094_v44, %v6899_v1 }
 0x121   : > { %11667 = vst [vmem:[#allocation30_spill] sm:$0xff] %v8048_v4  ;;  %v11670_v47 = vrot.slane %v11665_v0, %v6888_v62  ;;  %v1178_v55 = vsel %vm1175_vm8, %v7749_v46, %v11672_v27  ;;  %v8066_v23 = vpop.permute.xlu0 %2168  ;;  %v8069_v6 = vmul.f32 %v1106_v42, %v11674_v40  ;;  %v11676_v28 = vrot.slane %v11665_v0, %v6891_v63 }
 0x122   : > { %v8053_v9 = vmul.f32 %v11668_v45, %v1066_v60  ;;  %11673 = vst [vmem:[#allocation32_spill] sm:$0xff] %v8066_v23  ;;  %v8072_v60 = vmul.f32 %v1118_v19, %v11674_v40  ;;  %v8086_v23 = vmul.f32 %v1140_v54, %v7697_v3  ;;  %v8089_v42 = vmul.f32 %v1144_v41, %v7697_v3  ;;  %v11685_v41 = vld [vmem:[#allocation35_spill] sm:$0xff] }
 0x123   : > { %v8060_v36 = vmul.f32 %v11670_v47, %v1065_v39  ;;  %v8077_v44 = vmul.f32 %v11676_v28, %v1068_v61  ;;  %v11678_v39 = vld [vmem:[#allocation36_spill] sm:$0xff]  ;;  %v8083_v47 = vpop.permute.xlu1 %1356  ;;  %v8092_v19 = vmul.f32 %v1148_v11, %v7697_v3  ;;  %v8095_v0 = vmul.f32 %v1152_v18, %v7697_v3  ;;  %6398 = vset.pattern.permute.xlu1 %v11543_v2  ;;  %v11683_v28 = vld [vmem:[#allocation31_spill] sm:$0xff] }
 0x124   : > { %11669 = vst [vmem:[#allocation112_spill] sm:$0xff] %v8053_v9  ;;  %11675 = vst [vmem:[#allocation26_spill] sm:$0xff] %v8072_v60  ;;  %v1179_v45 = vsel %vm1175_vm8, %v11678_v39, %v7749_v46  ;;  %v8099_v61 = vmul.f32 %v1110_v29, %v11674_v40  ;;  %v8102_v46 = vmul.f32 %v1114_v26, %v11674_v40  ;;  %2636 = vperm.xlu1 %6398, %v6250_v56  }
 0x125   : > { %11671 = vst [vmem:[#allocation113_spill] sm:$0xff] %v8060_v36  ;;  %11677 = vst [vmem:[#allocation114_spill] sm:$0xff] %v8077_v44  ;;  %v11684_v54 = vrot.slane %v11683_v28, %v6899_v1  ;;  %v11686_v11 = vrot.slane %v11685_v41, %v6881_v58  ;;  %v11688_v26 = vrot.slane %v11683_v28, %v6881_v58 }
 0x126   : > { %11679 = vst [vmem:[#allocation36_spill] sm:$0xff] %v8086_v23  ;;  %11680 = vst [vmem:[#allocation115_spill] sm:$0xff] %v8089_v42  ;;  %v1177_v56 = vsel %vm1175_vm8, %v11672_v27, %v7803_v10 }
 0x127   : > { %11681 = vst [vmem:[#allocation116_spill] sm:$0xff] %v8092_v19  ;;  %11682 = vst [vmem:[#allocation117_spill] sm:$0xff] %v8095_v0  ;;  %v8107_v7 = vmul.f32 %v11684_v54, %v1178_v55  ;;  %v8112_v17 = vmul.f32 %v11686_v11, %v1178_v55  ;;  %v8123_v29 = vmul.f32 %v11688_v26, %v1179_v45  ;;  %v8125_v54 = vpop.permute.xlu0 %2172  ;;  %v8135_v40 = vpop.permute.xlu1 %1389 }
 0x128   : > { %11689 = vst [vmem:[#allocation35_spill] sm:$0xff] %v8125_v54  ;;  %v3008_v11 = vrot.slane %v8060_v36, %v6881_v58  ;;  %v1176_v55 = vsel %vm1175_vm8, %v7803_v10, %v11678_v39  ;;  %v11690_v26 = vrot.slane %v11685_v41, %v6891_v63  ;;  %v6406_v39 = vld [vmem:[%s11202_s1 + $0x2c] sm:$0x3]  ;;  %v1287_v0 = vsel %vm1286_vm9, %v7270_v30, %v8026_v51 }
 0x129   : > { %11687 = vst [vmem:[#allocation31_spill] sm:$0xff] %v8112_v17  ;;  %v1221_v3 = vrot.slane %v8107_v7, %v6881_v58  ;;  %2734 = vperm.xlu1 %6398, %v6406_v39   ;;  %v1217_v27 = vrot.slane %v8123_v29, %v6881_v58  ;;  %v11692_v39 = vrot.slane %v11683_v28, %v6888_v62 }
 0x12a   : > { %v8156_v18 = vmul.f32 %v11690_v26, %v1179_v45  ;;  %v1288_v45 = vsel %vm1286_vm9, %v7979_v13, %v7270_v30  ;;  %v1289_v26 = vsel %vm1286_vm9, %v7917_v50, %v7979_v13  ;;  %v11693_v17 = vrot.slane %v11683_v28, %v6891_v63 }
 0x12b   : > { %v2407_v54 = vpop.permute.xlu0 %2406  ;;  %v8178_v36 = vmul.f32 %v11692_v39, %v1177_v56  ;;  %v1290_v13 = vsel %vm1286_vm9, %v8026_v51, %v7917_v50  ;;  %v8194_v19 = vpop.permute.xlu1 %1393  ;;  %v11694_v39 = vrot.slane %v7290_v32, %v6881_v58  ;;  %v11698_v30 = vrot.slane %v7338_v8, %v6881_v58 }
 0x12c   : > { %11691 = vst [vmem:[#allocation118_spill] sm:$0xff] %v8156_v18  ;;  %v8183_v10 = vmul.f32 %v11693_v17, %v1176_v55  ;;  %v11696_v17 = vrot.slane %v7295_v24, %v6881_v58  ;;  %v11700_v50 = vrot.slane %v7343_v31, %v6881_v58  ;;  %v11707_v32 = vrot.slane %v7230_v5, %v6891_v63  ;;  %v11758_v18 = vld [vmem:[#allocation37_spill] sm:$0xff] }
 0x12d   : > { %v8199_v28 = vmul.f32 %v11694_v39, %v2407_v54  ;;  %v8209_v23 = vmul.f32 %v11698_v30, %v2407_v54  ;;  %v11702_v39 = vrot.slane %v11685_v41, %v6899_v1  ;;  %v11705_v30 = vrot.slane %v7230_v5, %v6888_v62  ;;  %6399 = vset.pattern.permute.xlu1 %v11519_v59 }
 0x12e   : > { %v8204_v42 = vmul.f32 %v11696_v17, %v2407_v54  ;;  %v8214_v51 = vmul.f32 %v11700_v50, %v2407_v54  ;;  %v11704_v17 = vrot.slane %v7230_v5, %v6899_v1  ;;  %v11706_v54 = vrot.slane %v7230_v5, %v6881_v58 }
 0x12f   : > { %11695 = vst [vmem:[#allocation119_spill] sm:$0xff] %v8199_v28  ;;  %11699 = vst [vmem:[#allocation121_spill] sm:$0xff] %v8209_v23  ;;  %v8221_v60 = vmul.f32 %v11702_v39, %v1177_v56  ;;  %v1316_v8 = vmul.f32 %v11705_v30, %v1288_v45  ;;  %v1317_v31 = vmul.f32 %v11707_v32, %v1287_v0  ;;  %v11708_v39 = vld [vmem:[#allocation34_spill] sm:$0xff] }
 0x130   : > { %11697 = vst [vmem:[#allocation120_spill] sm:$0xff] %v8204_v42  ;;  %11701 = vst [vmem:[#allocation122_spill] sm:$0xff] %v8214_v51  ;;  %v1315_v24 = vmul.f32 %v11704_v17, %v1289_v26  ;;  %v1314_v50 = vmul.f32 %v11706_v54, %v1290_v13  ;;  %2798 = vperm.xlu1 %6399, %v11708_v39   ;;  %v2701_v17 = vpop.permute.xlu0 %2700  ;;  %v11709_v45 = vrot.slane %v7633_v49, %v6881_v58  ;;  %v8261_v26 = vpop.permute.xlu1 %1433  ;;  %v11753_v28 = vld [vmem:[#allocation50_spill] sm:$0xff] }
 0x131   : > { %11703 = vst [vmem:[#allocation123_spill] sm:$0xff] %v8221_v60  ;;  %v11711_v13 = vrot.slane %v7708_v38, %v6881_v58  ;;  %v11713_v5 = vrot.slane %v7713_v16, %v6881_v58  ;;  %v11715_v0 = vrot.slane %v7663_v21, %v6881_v58  ;;  %v1229_v56 = vrot.slane %v8183_v10, %v6881_v58 }
 0x132   : > { %v8244_v30 = vmul.f32 %v11709_v45, %v2701_v17  ;;  %v6256_v45 = vld [vmem:[%s11202_s1 + $0x30] sm:$0x3]  ;;  %v11717_v21 = vrot.slane %v11685_v41, %v6888_v62  ;;  %v8286_v51 = vmul.f32 %v1217_v27, %v7856_v48  ;;  %v1328_v41 = vrot.slane %v1314_v50, %v6881_v58 }
 0x133   : > { %v8249_v54 = vmul.f32 %v11711_v13, %v2701_v17  ;;  %v8254_v32 = vmul.f32 %v11713_v5, %v2701_v17  ;;  %v8259_v39 = vmul.f32 %v11715_v0, %v2701_v17  ;;  %v1225_v13 = vrot.slane %v8178_v36, %v6881_v58 }
 0x134   : > { %11710 = vst [vmem:[#allocation34_spill] sm:$0xff] %v8244_v30  ;;  %v8275_v17 = vmul.f32 %v11717_v21, %v1176_v55  ;;  %v1332_v5 = vrot.slane %v1315_v24, %v6881_v58  ;;  %v1336_v21 = vrot.slane %v1316_v8, %v6881_v58  ;;  %2896 = vperm.xlu1 %6399, %v6256_v45   ;;  %v2995_v55 = vpop.permute.xlu0 %2994 }
 0x135   : > { %11712 = vst [vmem:[#allocation124_spill] sm:$0xff] %v8249_v54  ;;  %11714 = vst [vmem:[#allocation125_spill] sm:$0xff] %v8254_v32  ;;  %v1340_v0 = vrot.slane %v1317_v31, %v6881_v58  ;;  %v11719_v16 = vrot.slane %v8048_v4, %v6881_v58  ;;  %v11721_v49 = vrot.slane %v8053_v9, %v6881_v58  ;;  %v8304_v32 = vpop.permute.xlu1 %1500 }
 0x136   : > { %11716 = vst [vmem:[#allocation126_spill] sm:$0xff] %v8259_v39  ;;  %11718 = vst [vmem:[#allocation127_spill] sm:$0xff] %v8275_v17  ;;  %v8302_v39 = vmul.f32 %v3008_v11, %v2995_v55  ;;  %v8308_v54 = vmul.f32 %v1221_v3, %v7856_v48  ;;  %v1362_v30 = vrot.slane %v1314_v50, %v6899_v1  ;;  %v11740_v3 = vld [vmem:[#allocation24_spill] sm:$0xff] }
 0x137   : > { %v8295_v38 = vmul.f32 %v11719_v16, %v2995_v55  ;;  %v8300_v27 = vmul.f32 %v11721_v49, %v2995_v55  ;;  %v1374_v4 = vrot.slane %v1317_v31, %v6899_v1  ;;  %v11724_v16 = vrot.slane %v8077_v44, %v6881_v58 }
 0x138   : > { %11723 = vst [vmem:[#allocation130_spill] sm:$0xff] %v8302_v39  ;;  %v8318_v49 = vmul.f32 %v1225_v13, %v7856_v48  ;;  %v8321_v11 = vmul.f32 %v1229_v56, %v7856_v48  ;;  %v1366_v9 = vrot.slane %v1315_v24, %v6899_v1  ;;  %v1370_v50 = vrot.slane %v1316_v8, %v6899_v1  ;;  %v11743_v39 = vld [vmem:[#allocation60_spill] sm:$0xff] }
 0x139   : > { %11720 = vst [vmem:[#allocation128_spill] sm:$0xff] %v8295_v38  ;;  %11722 = vst [vmem:[#allocation129_spill] sm:$0xff] %v8300_v27  ;;  %v8315_v23 = vmul.f32 %v11724_v16, %v2995_v55  ;;  %v1400_v31 = vsel %vm1397_vm10, %v8135_v40, %v7371_v35  ;;  %v1401_v13 = vsel %vm1397_vm10, %v7426_v43, %v8135_v40  ;;  %6400 = vset.pattern.permute.xlu1 %v11543_v2  ;;  %v1503_v16 = vpop.permute.xlu1 %1502 }
 0x13a   : > { %v8339_v24 = vmul.f32 %v1332_v5, %v7321_v25  ;;  %v8342_v8 = vmul.f32 %v1336_v21, %v7321_v25  ;;  %v8345_v56 = vmul.f32 %v1328_v41, %v7321_v25  ;;  %v8348_v55 = vmul.f32 %v1340_v0, %v7321_v25  ;;  %2930 = vperm.xlu1 %6400, %v6256_v45   ;;  %v358_v21 = vpop.permute.xlu0 %357 }
 0x13b   : > { %11725 = vst [vmem:[#allocation131_spill] sm:$0xff] %v8315_v23  ;;  %v8351_v40 = vmul.f32 %v1362_v30, %v8083_v47  ;;  %v8354_v48 = vmul.f32 %v1366_v9, %v8083_v47  ;;  %v8357_v2 = vmul.f32 %v1370_v50, %v8083_v47  ;;  %v8360_v5 = vmul.f32 %v1374_v4, %v8083_v47 }
 0x13c   : > { %11726 = vst [vmem:[#allocation132_spill] sm:$0xff] %v8339_v24  ;;  %11727 = vst [vmem:[#allocation133_spill] sm:$0xff] %v8342_v8  ;;  %v11734_v41 = vrot.slane %v7277_v15, %v6881_v58  ;;  %v11735_v45 = vrot.slane %v7277_v15, %v6899_v1  ;;  %v11736_v9 = vrot.slane %v7081_v33, %v6899_v1  ;;  %v11801_v24 = vld [vmem:[#allocation33_spill] sm:$0xff] }
 0x13d   : > { %11728 = vst [vmem:[#allocation134_spill] sm:$0xff] %v8345_v56  ;;  %11729 = vst [vmem:[#allocation135_spill] sm:$0xff] %v8348_v55  ;;  %v11737_v50 = vrot.slane %v7102_v52, %v6899_v1  ;;  %v11741_v33 = vrot.slane %v11740_v3, %v6899_v1  ;;  %v11742_v3 = vrot.slane %v7277_v15, %v6888_v62  ;;  %v11799_v55 = vld [vmem:[#allocation89_spill] sm:$0xff]  ;;  %v11802_v56 = vld [vmem:[#allocation90_spill] sm:$0xff] }
 0x13e   : > { %11730 = vst [vmem:[#allocation136_spill] sm:$0xff] %v8351_v40  ;;  %11731 = vst [vmem:[#allocation137_spill] sm:$0xff] %v8354_v48  ;;  %v8365_v25 = vmul.f32 %v11734_v41, %v1401_v13  ;;  %v8370_v30 = vmul.f32 %v11735_v45, %v1400_v31  ;;  %v376_v0 = vmul.f32 %v11736_v9, %v358_v21  ;;  %v11738_v41 = vld [vmem:[#allocation25_spill] sm:$0xff]  ;;  %v580_v47 = vpop.permute.xlu0 %579  ;;  %v11798_v40 = vld [vmem:[#allocation27_spill] sm:$0xff] }
 0x13f   : > { %11732 = vst [vmem:[#allocation138_spill] sm:$0xff] %v8357_v2  ;;  %11733 = vst [vmem:[#allocation139_spill] sm:$0xff] %v8360_v5  ;;  %v377_v4 = vmul.f32 %v11737_v50, %v358_v21  ;;  %v1399_v13 = vsel %vm1397_vm10, %v7371_v35, %v8194_v19  ;;  %v11739_v31 = vrot.slane %v11738_v41, %v6899_v1  ;;  %v6407_v41 = vld [vmem:[%s11202_s1 + $0x32] sm:$0x3] }
 0x140   : > { %v379_v9 = vmul.f32 %v11741_v33, %v358_v21  ;;  %3028 = vperm.xlu1 %6400, %v6407_v41   ;;  %v1439_v52 = vrot.slane %v8365_v25, %v6881_v58  ;;  %v1443_v41 = vrot.slane %v8370_v30, %v6881_v58  ;;  %v8416_v23 = vmul.f32 %v11742_v3, %v1399_v13  ;;  %v11747_v3 = vld [vmem:[#allocation53_spill] sm:$0xff] }
 0x141   : > { %v378_v45 = vmul.f32 %v11739_v31, %v358_v21  ;;  %v1507_v31 = vpop.permute.xlu1 %1506  ;;  %v1398_v21 = vsel %vm1397_vm10, %v8194_v19, %v7426_v43  ;;  %v384_v33 = vcombine.low %v376_v0, %v377_v4  ;;  %v1510_v43 = vsel %vm1508_vm11, %v1503_v16, %v11743_v39  ;;  %v11744_v0 = vld [vmem:[#allocation41_spill] sm:$0xff] }
 0x142   : > { %v1511_v19 = vsel %vm1508_vm11, %v8304_v32, %v1503_v16  ;;  %v11746_v27 = vrot.slane %v7277_v15, %v6891_v63  ;;  %v11748_v38 = vrot.slane %v11747_v3, %v6899_v1  ;;  %v11749_v42 = vrot.slane %v7422_v22, %v6899_v1  ;;  %v11754_v15 = vld [vmem:[#allocation47_spill] sm:$0xff] }
 0x143   : > { %v385_v50 = vcombine.low %v378_v45, %v379_v9  ;;  %v388_v4 = vadd.f32 %v384_v33, %v11744_v0  ;;  %v11745_v45 = vld [vmem:[#allocation42_spill] sm:$0xff]  ;;  %v11751_v0 = vld [vmem:[#allocation43_spill] sm:$0xff]  ;;  %v11756_v3 = vrot.slane %v7391_v37, %v6899_v1  ;;  %v11757_v22 = vrot.slane %v7396_v12, %v6899_v1  ;;  %v3161_v12 = vld [vmem:[%s11205_s4] sm:$0x3] }
 0x144   : > { %v8431_v13 = vmul.f32 %v11746_v27, %v1398_v21  ;;  %v598_v44 = vmul.f32 %v11748_v38, %v580_v47  ;;  %v599_v16 = vmul.f32 %v11749_v42, %v580_v47  ;;  %6402 = vset.pattern.permute.xlu1 %v11519_v59  ;;  %v11755_v27 = vcombine.low %v11753_v28, %v11754_v15  ;;  %v802_v59 = vpop.permute.xlu0 %801 }
 0x145   : > { %v389_v9 = vadd.f32 %v385_v50, %v11745_v45  ;;  %v8440_v33 = vpop.permute.xlu1 %1578  ;;  %v11750_v50 = vld [vmem:[#allocation46_spill] sm:$0xff]  ;;  %v600_v38 = vmul.f32 %v11756_v3, %v580_v47  ;;  %v601_v42 = vmul.f32 %v11757_v22, %v580_v47  ;;  %3092 = vperm.xlu1 %6402, %v11758_v18   ;;  %v11759_v28 = vrot.slane %v7433_v34, %v6899_v1  ;;  %v11765_v3 = vld [vmem:[#allocation52_spill] sm:$0xff] }
 0x146   : > { %v11752_v45 = vcombine.low %v11750_v50, %v11751_v0  ;;  %v11760_v37 = vrot.slane %v7433_v34, %v6888_v62  ;;  %v1509_v18 = vsel %vm1508_vm11, %v11743_v39, %v1507_v31  ;;  %v1512_v47 = vsel %vm1508_vm11, %v1507_v31, %v8304_v32  ;;  %v11761_v0 = vld [vmem:[#allocation48_spill] sm:$0xff] }
 0x147   : > { %v466_v21 = vadd.f32 %v11755_v27, %v389_v9  ;;  %v1537_v9 = vmul.f32 %v11759_v28, %v1511_v19  ;;  %v11764_v27 = vld [vmem:[#allocation51_spill] sm:$0xff]  ;;  %v1451_v28 = vrot.slane %v8431_v13, %v6881_v58  ;;  %v8487_v39 = vmul.f32 %v1439_v52, %v8261_v26  ;;  %v11770_v31 = vld [vmem:[#allocation64_spill] sm:$0xff] }
 0x148   : > { %v465_v35 = vadd.f32 %v11752_v45, %v388_v4  ;;  %v1447_v4 = vrot.slane %v8416_v23, %v6881_v58  ;;  %v8465_v50 = vmul.f32 %v11760_v37, %v1510_v43  ;;  %v11762_v45 = vld [vmem:[#allocation49_spill] sm:$0xff]  ;;  %v11766_v43 = vcombine.low %v11764_v27, %v11765_v3  ;;  %v1024_v37 = vpop.permute.xlu0 %1023 }
 0x149   : > { %v11763_v19 = vcombine.low %v11761_v0, %v11762_v45  ;;  %11767 = vst [vmem:[#allocation25_spill] sm:$0xff] %v8487_v39  ;;  %v8490_v17 = vmul.f32 %v1443_v41, %v8261_v26  ;;  %v1612_v32 = vpop.permute.xlu1 %1611  ;;  %v607_v60 = vcombine.low %v600_v38, %v601_v42  ;;  %3164 = vperm.xlu1 %6402, %v3161_v12   ;;  %v11777_v42 = vld [vmem:[#allocation80_spill] sm:$0xff] }
 0x14a   : > { %v500_v22 = vadd.f32 %v11766_v43, %v466_v21  ;;  %v11772_v21 = vld [vmem:[#allocation65_spill] sm:$0xff]  ;;  %v606_v43 = vcombine.low %v598_v44, %v599_v16  ;;  %v8502_v41 = vmul.f32 %v1447_v4, %v8261_v26  ;;  %v11775_v5 = vrot.slane %v7433_v34, %v6881_v58 }
 0x14b   : > { %v499_v15 = vadd.f32 %v11763_v19, %v465_v35  ;;  %11768 = vst [vmem:[#allocation24_spill] sm:$0xff] %v8490_v17  ;;  %v11769_v35 = vld [vmem:[#allocation63_spill] sm:$0xff]  ;;  %v11773_v19 = vld [vmem:[#allocation66_spill] sm:$0xff]  ;;  %v1558_v44 = vrot.slane %v8465_v50, %v6881_v58  ;;  %v11778_v12 = vrot.slane %v11777_v42, %v6899_v1  ;;  %v1588_v48 = vrot.slane %v1537_v9, %v6899_v1 }
 0x14c   : > { %v11771_v0 = vcombine.low %v11769_v35, %v11770_v31  ;;  %v11774_v27 = vcombine.low %v11772_v21, %v11773_v19  ;;  %v1536_v2 = vmul.f32 %v11775_v5, %v1512_v47  ;;  %v11779_v31 = vld [vmem:[#allocation14_spill] sm:$0xff]  ;;  %v11781_v5 = vld [vmem:[#allocation77_spill] sm:$0xff]  ;;  %v11800_v8 = vcombine.low %v11798_v40, %v11799_v55 }
 0x14d   : > { %v820_v4 = vmul.f32 %v11778_v12, %v802_v59  ;;  %v11782_v47 = vrot.slane %v11781_v5, %v6899_v1 }
 0x14e   : > { %v576_v45 = vadd.f32 %v11771_v0, %v499_v15  ;;  %v577_v3 = vadd.f32 %v11774_v27, %v500_v22  ;;  %v11776_v15 = vrot.slane %v7433_v34, %v6891_v63  ;;  %v1554_v22 = vrot.slane %v1537_v9, %v6881_v58 }
 0x14f   : > { %v11780_v0 = vrot.slane %v11779_v31, %v6899_v1  ;;  %v822_v34 = vmul.f32 %v11782_v47, %v802_v59  ;;  %v11788_v31 = vld [vmem:[#allocation70_spill] sm:$0xff]  ;;  %v1246_v47 = vpop.permute.xlu0 %1245 }
 0x150   : > { %v1539_v35 = vmul.f32 %v11776_v15, %v1509_v18  ;;  %v610_v16 = vadd.f32 %v606_v43, %v576_v45  ;;  %v611_v38 = vadd.f32 %v607_v60, %v577_v3  ;;  %v11783_v18 = vld [vmem:[#allocation78_spill] sm:$0xff]  ;;  %v1616_v15 = vpop.permute.xlu1 %1615  ;;  %v8526_v45 = vmul.f32 %v1451_v28, %v8261_v26  ;;  %v11785_v3 = vld [vmem:[#allocation72_spill] sm:$0xff]  ;;  %v11786_v43 = vld [vmem:[#allocation69_spill] sm:$0xff] }
 0x151   : > { %v821_v21 = vmul.f32 %v11780_v0, %v802_v59  ;;  %v11784_v19 = vrot.slane %v11783_v18, %v6899_v1  ;;  %v11787_v42 = vcombine.low %v11785_v3, %v11786_v43  ;;  %v11789_v0 = vld [vmem:[#allocation73_spill] sm:$0xff]  ;;  %v1584_v26 = vrot.slane %v1536_v2, %v6899_v1  ;;  %v11791_v28 = vld [vmem:[#allocation67_spill] sm:$0xff]  ;;  %v11793_v43 = vld [vmem:[#allocation74_spill] sm:$0xff] }
 0x152   : > { %v11790_v52 = vcombine.low %v11788_v31, %v11789_v0  ;;  %v1562_v18 = vrot.slane %v1539_v35, %v6881_v58  ;;  %v1592_v3 = vrot.slane %v8465_v50, %v6899_v1  ;;  %v8552_v60 = vmul.f32 %v1558_v44, %v11791_v28 }
 0x153   : > { %v823_v27 = vmul.f32 %v11784_v19, %v802_v59  ;;  %v687_v12 = vadd.f32 %v11787_v42, %v610_v16  ;;  %v1550_v59 = vrot.slane %v1536_v2, %v6881_v58  ;;  %v8541_v19 = vmul.f32 %v1554_v22, %v11791_v28  ;;  %v11792_v16 = vld [vmem:[#allocation11_spill] sm:$0xff] }
 0x154   : > { %v688_v5 = vadd.f32 %v11790_v52, %v611_v38  ;;  %v11794_v42 = vcombine.low %v11792_v16, %v11793_v43  ;;  %v11795_v52 = vld [vmem:[#allocation75_spill] sm:$0xff]  ;;  %v11796_v38 = vld [vmem:[#allocation76_spill] sm:$0xff]  ;;  %v1596_v17 = vrot.slane %v1539_v35, %v6899_v1  ;;  %v828_v2 = vcombine.low %v820_v4, %v821_v21  ;;  %v1656_v22 = vpop.permute.xlu1 %1655  ;;  %v8567_v35 = vpop.permute.xlu0 %1467 }
 0x155   : > { %v11797_v0 = vcombine.low %v11795_v52, %v11796_v38  ;;  %v829_v39 = vcombine.low %v822_v34, %v823_v27  ;;  %v11803_v16 = vcombine.low %v11801_v24, %v11802_v56  ;;  %v11804_v43 = vld [vmem:[#allocation79_spill] sm:$0xff]  ;;  %v8570_v4 = vmul.f32 %v1550_v59, %v11791_v28 }
 0x156   : > { %v721_v31 = vadd.f32 %v11794_v42, %v687_v12  ;;  %v11805_v42 = vld [vmem:[#allocation71_spill] sm:$0xff]  ;;  %v8573_v55 = vmul.f32 %v1562_v18, %v11791_v28  ;;  %v8579_v24 = vmul.f32 %v1588_v48, %v8440_v33  ;;  %v1623_v34 = vsel %vm1619_vm12, %v11804_v43, %v1612_v32  ;;  %v11809_v48 = vld [vmem:[#allocation68_spill] sm:$0xff] }
 0x157   : > { %v722_v9 = vadd.f32 %v11797_v0, %v688_v5  ;;  %v1620_v5 = vsel %vm1619_vm12, %v1616_v15, %v11804_v43  ;;  %v1621_v44 = vsel %vm1619_vm12, %v11805_v42, %v1616_v15  ;;  %v1622_v21 = vsel %vm1619_vm12, %v1612_v32, %v11805_v42  ;;  %v11807_v59 = vld [vmem:[#allocation23_spill] sm:$0xff]  ;;  %v11812_v32 = vld [vmem:[#allocation104_spill] sm:$0xff]  ;;  %v11818_v43 = vld [vmem:[#allocation106_spill] sm:$0xff] }
 0x158   : > { %v798_v50 = vadd.f32 %v11800_v8, %v721_v31  ;;  %v8576_v8 = vmul.f32 %v1584_v26, %v8440_v33  ;;  %v11806_v27 = vrot.slane %v7907_v53, %v6899_v1  ;;  %v11808_v18 = vrot.slane %v11807_v59, %v6899_v1  ;;  %v8603_v38 = vpop.permute.xlu1 %1726  ;;  %v11813_v0 = vld [vmem:[#allocation8_spill] sm:$0xff] }
 0x159   : > { %v799_v12 = vadd.f32 %v11803_v16, %v722_v9  ;;  %v11810_v28 = vrot.slane %v11809_v48, %v6888_v62  ;;  %v11811_v31 = vrot.slane %v11809_v48, %v6891_v63  ;;  %v11814_v53 = vcombine.low %v11812_v32, %v11813_v0 }
 0x15a   : > { %v832_v56 = vadd.f32 %v828_v2, %v798_v50  ;;  %v1042_v15 = vmul.f32 %v11806_v27, %v1024_v37  ;;  %v1043_v26 = vmul.f32 %v11808_v18, %v1024_v37  ;;  %v11815_v2 = vld [vmem:[#allocation101_spill] sm:$0xff]  ;;  %v11819_v42 = vrot.slane %v11818_v43, %v6899_v1  ;;  %v11820_v27 = vld [vmem:[#allocation107_spill] sm:$0xff] }
 0x15b   : > { %v833_v40 = vadd.f32 %v829_v39, %v799_v12  ;;  %v8596_v39 = vmul.f32 %v11810_v28, %v1621_v44  ;;  %v8601_v52 = vmul.f32 %v11811_v31, %v1620_v5  ;;  %v11816_v50 = vld [vmem:[#allocation105_spill] sm:$0xff]  ;;  %v11821_v59 = vrot.slane %v11820_v27, %v6899_v1  ;;  %v8617_v5 = vpop.permute.xlu0 %1689  ;;  %v11884_v28 = vld [vmem:[#allocation95_spill] sm:$0xff] }
 0x15c   : > { %v909_v9 = vadd.f32 %v11814_v53, %v832_v56  ;;  %v11817_v16 = vcombine.low %v11815_v2, %v11816_v50  ;;  %v1044_v44 = vmul.f32 %v11819_v42, %v1024_v37  ;;  %v11822_v31 = vrot.slane %v11809_v48, %v6881_v58  ;;  %v11824_v2 = vld [vmem:[#allocation5_spill] sm:$0xff]  ;;  %v11827_v42 = vld [vmem:[#allocation108_spill] sm:$0xff] }
 0x15d   : > { %v1045_v18 = vmul.f32 %v11821_v59, %v1024_v37  ;;  %v11823_v32 = vrot.slane %v11809_v48, %v6899_v1  ;;  %v8636_v53 = vmul.f32 %v1592_v3, %v8440_v33  ;;  %v11825_v50 = vld [vmem:[#allocation17_spill] sm:$0xff]  ;;  %v1669_v48 = vrot.slane %v8596_v39, %v6881_v58  ;;  %v11831_v37 = vld [vmem:[#allocation111_spill] sm:$0xff] }
 0x15e   : > { %v910_v12 = vadd.f32 %v11817_v16, %v833_v40  ;;  %v8626_v40 = vmul.f32 %v11822_v31, %v1623_v34  ;;  %v11826_v16 = vcombine.low %v11824_v2, %v11825_v50  ;;  %v11828_v27 = vld [vmem:[#allocation109_spill] sm:$0xff]  ;;  %v8645_v31 = vmul.f32 %v1596_v17, %v8440_v33 }
 0x15f   : > { %v8631_v0 = vmul.f32 %v11823_v32, %v1622_v21  ;;  %v11829_v59 = vcombine.low %v11827_v42, %v11828_v27  ;;  %v1673_v3 = vrot.slane %v8601_v52, %v6881_v58  ;;  %v11830_v32 = vld [vmem:[#allocation29_spill] sm:$0xff]  ;;  %v11833_v50 = vcombine.low %v8031_v20, %v8037_v14  ;;  %v8659_v33 = vpop.permute.xlu0 %2022  ;;  %v8661_v42 = vpop.permute.xlu1 %1780 }
 0x160   : > { %v943_v43 = vadd.f32 %v11826_v16, %v909_v9  ;;  %v11832_v2 = vcombine.low %v11830_v32, %v11831_v37  ;;  %v1050_v16 = vcombine.low %v1042_v15, %v1043_v26  ;;  %v1051_v17 = vcombine.low %v1044_v44, %v1045_v18 }
 0x161   : > { %v944_v34 = vadd.f32 %v11829_v59, %v910_v12  ;;  %v1661_v27 = vrot.slane %v8626_v40, %v6881_v58  ;;  %v1665_v59 = vrot.slane %v8631_v0, %v6881_v58  ;;  %v11834_v37 = vrot.slane %v8123_v29, %v6899_v1 }
 0x162   : > { %v1020_v9 = vadd.f32 %v11832_v2, %v943_v43  ;;  %v11835_v20 = vrot.slane %v8107_v7, %v6899_v1  ;;  %v11836_v44 = vrot.slane %v8178_v36, %v6899_v1  ;;  %v8683_v29 = vmul.f32 %v1669_v48, %v1656_v22  ;;  %v11839_v36 = vld [vmem:[#allocation26_spill] sm:$0xff] }
 0x163   : > { %v1021_v12 = vadd.f32 %v11833_v50, %v944_v34  ;;  %v1264_v43 = vmul.f32 %v11834_v37, %v1246_v47  ;;  %v11837_v34 = vrot.slane %v8183_v10, %v6899_v1  ;;  %v8679_v2 = vmul.f32 %v1661_v27, %v1656_v22  ;;  %v11843_v27 = vld [vmem:[#allocation36_spill] sm:$0xff] }
 0x164   : > { %v1265_v14 = vmul.f32 %v11835_v20, %v1246_v47  ;;  %v1054_v15 = vadd.f32 %v1050_v16, %v1020_v9  ;;  %v1266_v18 = vmul.f32 %v11836_v44, %v1246_v47  ;;  %v8681_v50 = vmul.f32 %v1665_v59, %v1656_v22  ;;  %v11844_v59 = vld [vmem:[#allocation115_spill] sm:$0xff]  ;;  %v11847_v44 = vld [vmem:[#allocation117_spill] sm:$0xff] }
 0x165   : > { %v1055_v26 = vadd.f32 %v1051_v17, %v1021_v12  ;;  %v1267_v32 = vmul.f32 %v11837_v34, %v1246_v47  ;;  %v8685_v37 = vmul.f32 %v1673_v3, %v1656_v22  ;;  %v11838_v7 = vcombine.low %v8069_v6, %v8099_v61  ;;  %v8706_v3 = vpop.permute.xlu0 %2244  ;;  %v1836_v6 = vpop.permute.xlu1 %1835  ;;  %v11883_v61 = vld [vmem:[#allocation84_spill] sm:$0xff] }
 0x166   : > { %v11840_v12 = vcombine.low %v8102_v46, %v11839_v36  ;;  %v11841_v10 = vrot.slane %v8365_v25, %v6899_v1  ;;  %v11842_v22 = vrot.slane %v8370_v30, %v6899_v1  ;;  %v1695_v46 = vrot.slane %v8626_v40, %v6899_v1  ;;  %v11882_v40 = vld [vmem:[#allocation7_spill] sm:$0xff] }
 0x167   : > { %v1131_v9 = vadd.f32 %v11838_v7, %v1054_v15  ;;  %v1699_v25 = vrot.slane %v8631_v0, %v6899_v1  ;;  %v1703_v17 = vrot.slane %v8596_v39, %v6899_v1  ;;  %v1707_v30 = vrot.slane %v8601_v52, %v6899_v1 }
 0x168   : > { %v1132_v16 = vadd.f32 %v11840_v12, %v1055_v26  ;;  %v8698_v47 = vmul.f32 %v11841_v10, %v8567_v35  ;;  %v8704_v48 = vmul.f32 %v11842_v22, %v8567_v35  ;;  %v11845_v20 = vcombine.low %v11843_v27, %v11844_v59  ;;  %v11846_v26 = vld [vmem:[#allocation116_spill] sm:$0xff]  ;;  %v11853_v27 = vld [vmem:[#allocation87_spill] sm:$0xff] }
 0x169   : > { %v11848_v34 = vcombine.low %v11846_v26, %v11847_v44  ;;  %v1272_v36 = vcombine.low %v1264_v43, %v1265_v14  ;;  %v1273_v12 = vcombine.low %v1266_v18, %v1267_v32  ;;  %v11849_v39 = vrot.slane %v8416_v23, %v6899_v1  ;;  %v2539_v32 = vpop.permute.xlu0 %2538  ;;  %v11860_v44 = vld [vmem:[#allocation88_spill] sm:$0xff] }
 0x16a   : > { %v1165_v15 = vadd.f32 %v11845_v20, %v1131_v9  ;;  %v11850_v52 = vrot.slane %v8431_v13, %v6899_v1  ;;  %v11851_v9 = vcombine.low %v8286_v51, %v8308_v54  ;;  %v11852_v43 = vcombine.low %v8318_v49, %v8321_v11  ;;  %v11856_v49 = vld [vmem:[#allocation54_spill] sm:$0xff]  ;;  %v11858_v20 = vld [vmem:[#allocation61_spill] sm:$0xff] }
 0x16b   : > { %v1166_v7 = vadd.f32 %v11848_v34, %v1132_v16  ;;  %v1488_v0 = vmul.f32 %v11849_v39, %v8567_v35  ;;  %v1494_v23 = vcombine.low %v8698_v47, %v8704_v48  ;;  %v1840_v16 = vpop.permute.xlu1 %1839  ;;  %v8746_v13 = vmul.f32 %v11853_v27, %v8603_v38 }
 0x16c   : > { %v1489_v10 = vmul.f32 %v11850_v52, %v8567_v35  ;;  %v1242_v22 = vadd.f32 %v11851_v9, %v1165_v15  ;;  %v11854_v35 = vld [vmem:[#allocation82_spill] sm:$0xff]  ;;  %v11857_v11 = vrot.slane %v11856_v49, %v6899_v1  ;;  %v11859_v47 = vrot.slane %v11858_v20, %v6899_v1 }
 0x16d   : > { %v1243_v14 = vadd.f32 %v11852_v43, %v1166_v7  ;;  %v11855_v51 = vrot.slane %v11854_v35, %v6888_v62  ;;  %v8766_v34 = vmul.f32 %v11860_v44, %v8603_v38  ;;  %v11861_v7 = vld [vmem:[#allocation62_spill] sm:$0xff]  ;;  %v11863_v43 = vld [vmem:[#allocation83_spill] sm:$0xff]  ;;  %v1711_v56 = vmul.f32 %v1707_v30, %v8617_v5  ;;  %v11892_v30 = vld [vmem:[#allocation97_spill] sm:$0xff] }
 0x16e   : > { %v8757_v59 = vmul.f32 %v11857_v11, %v2539_v32  ;;  %v8762_v48 = vmul.f32 %v11859_v47, %v2539_v32  ;;  %v1276_v15 = vadd.f32 %v1272_v36, %v1242_v22  ;;  %v11862_v39 = vrot.slane %v11861_v7, %v6899_v1  ;;  %v11869_v11 = vld [vmem:[#allocation132_spill] sm:$0xff] }
 0x16f   : > { %v8752_v54 = vmul.f32 %v11855_v51, %v8603_v38  ;;  %v1277_v26 = vadd.f32 %v1273_v12, %v1243_v14  ;;  %v1495_v9 = vcombine.low %v1488_v0, %v1489_v10  ;;  %v11864_v27 = vrot.slane %v11863_v43, %v6888_v62  ;;  %v11865_v51 = vld [vmem:[#allocation59_spill] sm:$0xff]  ;;  %v11868_v14 = vld [vmem:[#allocation134_spill] sm:$0xff] }
 0x170   : > { %v8771_v52 = vmul.f32 %v11862_v39, %v2539_v32  ;;  %v11866_v36 = vrot.slane %v11865_v51, %v6899_v1  ;;  %v11870_v47 = vcombine.low %v11868_v14, %v11869_v11  ;;  %v11871_v39 = vld [vmem:[#allocation133_spill] sm:$0xff]  ;;  %v11872_v0 = vld [vmem:[#allocation135_spill] sm:$0xff]  ;;  %v8793_v43 = vmul.f32 %v1695_v46, %v8617_v5  ;;  %v11874_v14 = vld [vmem:[#allocation22_spill] sm:$0xff] }
 0x171   : > { %v8777_v35 = vmul.f32 %v11864_v27, %v8603_v38  ;;  %v11873_v10 = vcombine.low %v11871_v39, %v11872_v0  ;;  %v1709_v38 = vmul.f32 %v1699_v25, %v8617_v5  ;;  %v2833_v27 = vpop.permute.xlu0 %2832  ;;  %v11876_v46 = vld [vmem:[#allocation136_spill] sm:$0xff]  ;;  %v11877_v25 = vld [vmem:[#allocation137_spill] sm:$0xff]  ;;  %v11879_v0 = vld [vmem:[#allocation138_spill] sm:$0xff]  ;;  %v1843_v22 = vsel %vm1841_vm13, %v1836_v6, %v11882_v40 }
 0x172   : > { %v8782_v12 = vmul.f32 %v11866_v36, %v2539_v32  ;;  %v1353_v44 = vadd.f32 %v11870_v47, %v1276_v15  ;;  %v1710_v36 = vmul.f32 %v1703_v17, %v8617_v5  ;;  %v11875_v15 = vrot.slane %v11874_v14, %v6899_v1 }
 0x173   : > { %v1354_v18 = vadd.f32 %v11873_v10, %v1277_v26  ;;  %v8806_v26 = vpop.permute.xlu1 %1911  ;;  %v11878_v47 = vcombine.low %v11876_v46, %v11877_v25  ;;  %v11880_v10 = vld [vmem:[#allocation139_spill] sm:$0xff]  ;;  %v1774_v21 = vcombine.low %v8766_v34, %v8777_v35  ;;  %v11886_v25 = vld [vmem:[#allocation96_spill] sm:$0xff]  ;;  %v1716_v5 = vcombine.low %v8793_v43, %v1709_v38 }
 0x174   : > { %11867 = vst [vmem:[#allocation60_spill] sm:$0xff] %v8782_v12  ;;  %v8804_v11 = vmul.f32 %v11875_v15, %v2833_v27  ;;  %v11881_v32 = vcombine.low %v11879_v0, %v11880_v10  ;;  %v1844_v15 = vsel %vm1841_vm13, %v11883_v61, %v1836_v6  ;;  %v11889_v0 = vld [vmem:[#allocation24_spill] sm:$0xff]  ;;  %v11891_v6 = vcombine.low %v8502_v41, %v8526_v45  ;;  %v11894_v12 = vld [vmem:[#allocation91_spill] sm:$0xff] }
 0x175   : > { %v1387_v39 = vadd.f32 %v11878_v47, %v1353_v44  ;;  %v11885_v44 = vrot.slane %v11884_v28, %v6899_v1  ;;  %v11888_v47 = vld [vmem:[#allocation25_spill] sm:$0xff]  ;;  %v11893_v35 = vrot.slane %v11892_v30, %v6899_v1  ;;  %v3127_v28 = vpop.permute.xlu0 %3126  ;;  %v1842_v41 = vsel %vm1841_vm13, %v11882_v40, %v1840_v16 }
 0x176   : > { %v1388_v17 = vadd.f32 %v11881_v32, %v1354_v18  ;;  %v11887_v18 = vrot.slane %v11886_v25, %v6899_v1  ;;  %v11890_v10 = vcombine.low %v11888_v47, %v11889_v0  ;;  %v11896_v47 = vrot.slane %v11894_v12, %v6899_v1  ;;  %v11897_v0 = vld [vmem:[#allocation93_spill] sm:$0xff] }
 0x177   : > { %v8827_v46 = vmul.f32 %v11885_v44, %v2833_v27  ;;  %v8844_v44 = vmul.f32 %v11893_v35, %v2833_v27  ;;  %v1945_v43 = vpop.permute.xlu1 %1944  ;;  %v11900_v35 = vld [vmem:[#allocation94_spill] sm:$0xff] }
 0x178   : > { %v8832_v32 = vmul.f32 %v11887_v18, %v2833_v27  ;;  %v1464_v14 = vadd.f32 %v11890_v10, %v1387_v39  ;;  %v1465_v34 = vadd.f32 %v11891_v6, %v1388_v17  ;;  %v11895_v18 = vrot.slane %v11894_v12, %v6881_v58  ;;  %v11898_v10 = vld [vmem:[#allocation18_spill] sm:$0xff] }
 0x179   : > { %v1870_v39 = vmul.f32 %v11896_v47, %v1843_v22  ;;  %v1845_v17 = vsel %vm1841_vm13, %v1840_v16, %v11883_v61  ;;  %v1819_v22 = vmul.f32 %v11897_v0, %v8661_v42  ;;  %v11899_v40 = vrot.slane %v11898_v10, %v6891_v63  ;;  %v11905_v0 = vld [vmem:[#allocation123_spill] sm:$0xff] }
 0x17a   : > { %v1869_v25 = vmul.f32 %v11895_v18, %v1844_v15  ;;  %v1498_v38 = vadd.f32 %v1494_v23, %v1464_v14  ;;  %v1499_v27 = vadd.f32 %v1495_v9, %v1465_v34  ;;  %v1821_v18 = vmul.f32 %v11900_v35, %v8661_v42  ;;  %v11901_v23 = vld [vmem:[#allocation31_spill] sm:$0xff] }
 0x17b   : > { %v1820_v6 = vmul.f32 %v11899_v40, %v8661_v42  ;;  %v11902_v9 = vrot.slane %v11901_v23, %v6899_v1  ;;  %v11903_v61 = vcombine.low %v8570_v4, %v8541_v19  ;;  %v11904_v34 = vcombine.low %v8552_v60, %v8573_v55  ;;  %v11907_v15 = vld [vmem:[#allocation127_spill] sm:$0xff] }
 0x17c   : > { %v11906_v10 = vrot.slane %v11905_v0, %v6899_v1  ;;  %v11908_v35 = vrot.slane %v11907_v15, %v6899_v1  ;;  %v11909_v19 = vrot.slane %v11894_v12, %v6888_v62  ;;  %v11910_v60 = vrot.slane %v11894_v12, %v6891_v63 }
 0x17d   : > { %v8873_v14 = vmul.f32 %v11902_v9, %v3127_v28  ;;  %v1575_v16 = vadd.f32 %v11903_v61, %v1498_v38  ;;  %v1576_v47 = vadd.f32 %v11904_v34, %v1499_v27  ;;  %v1883_v9 = vrot.slane %v1869_v25, %v6881_v58  ;;  %v11911_v38 = vld [vmem:[#allocation118_spill] sm:$0xff]  ;;  %v1949_v34 = vpop.permute.xlu1 %1948 }
 0x17e   : > { %v8884_v40 = vmul.f32 %v11906_v10, %v3127_v28  ;;  %v8889_v45 = vmul.f32 %v11908_v35, %v3127_v28  ;;  %v1871_v4 = vmul.f32 %v11909_v19, %v1842_v41  ;;  %v1872_v55 = vmul.f32 %v11910_v60, %v1845_v17  ;;  %v11915_v19 = vld [vmem:[#allocation19_spill] sm:$0xff] }
 0x17f   : > { %v11912_v27 = vrot.slane %v11911_v38, %v6899_v1  ;;  %v11913_v10 = vcombine.low %v8576_v8, %v8579_v24  ;;  %v11914_v15 = vcombine.low %v8636_v53, %v8645_v31  ;;  %v1887_v41 = vrot.slane %v1870_v39, %v6881_v58 }
 0x180   : > { %v3153_v12 = vcombine.low %v8873_v14, %v8884_v40  ;;  %v1717_v17 = vcombine.low %v1710_v36, %v1711_v56  ;;  %v11917_v24 = vcombine.low %v8679_v2, %v8681_v50  ;;  %v11918_v31 = vcombine.low %v8683_v29, %v8685_v37  ;;  %v11919_v36 = vld [vmem:[#allocation98_spill] sm:$0xff]  ;;  %v11920_v37 = vld [vmem:[#allocation92_spill] sm:$0xff]  ;;  %v3221_v14 = vld [vmem:[%s11204_s3] sm:$0x3] }
 0x181   : > { %v8901_v61 = vmul.f32 %v11912_v27, %v3127_v28  ;;  %v1609_v35 = vadd.f32 %v11913_v10, %v1575_v16  ;;  %v1610_v0 = vadd.f32 %v11914_v15, %v1576_v47  ;;  %v11916_v28 = vrot.slane %v11915_v19, %v6891_v63  ;;  %v1989_v50 = vpop.permute.xlu1 %1988  ;;  %v6262_v40 = vld [vmem:[%s11204_s3 + $0x2] sm:$0x3] }
 0x182   : > { %v1827_v27 = vcombine.low %v1819_v22, %v1820_v6  ;;  %v1917_v56 = vrot.slane %v1869_v25, %v6899_v1  ;;  %v1921_v22 = vrot.slane %v1870_v39, %v6899_v1  ;;  %v1891_v6 = vrot.slane %v1871_v4, %v6881_v58  ;;  %v11921_v39 = vld [vmem:[#allocation103_spill] sm:$0xff] }
 0x183   : > { %v1822_v60 = vmul.f32 %v11916_v28, %v8661_v42  ;;  %v3154_v8 = vcombine.low %v8889_v45, %v8901_v61  ;;  %v1686_v53 = vadd.f32 %v11917_v24, %v1609_v35  ;;  %v1687_v15 = vadd.f32 %v11918_v31, %v1610_v0  ;;  %v11922_v28 = vld [vmem:[#allocation99_spill] sm:$0xff]  ;;  %v6264_v61 = vld [vmem:[%s11204_s3 + $0x4] sm:$0x3] }
 0x184   : > { %v1955_v42 = vsel %vm11415_vm14, %v1945_v43, %v11919_v36  ;;  %v1895_v16 = vrot.slane %v1872_v55, %v6881_v58  ;;  %v1954_v2 = vsel %vm11415_vm14, %v11919_v36, %v1949_v34  ;;  %v1896_v0 = vmul.f32 %v1883_v9, %v11920_v37 }
 0x185   : > { %v1720_v47 = vadd.f32 %v1716_v5, %v1686_v53  ;;  %v1721_v29 = vadd.f32 %v1717_v17, %v1687_v15  ;;  %v1897_v25 = vmul.f32 %v1887_v41, %v11920_v37  ;;  %v1925_v10 = vrot.slane %v1871_v4, %v6899_v1  ;;  %v6239_v5 = vld [vmem:[%s11206_s5 + $0x40] sm:$0xf] }
 0x186   : > { %v1929_v35 = vrot.slane %v1872_v55, %v6899_v1  ;;  %v1956_v19 = vsel %vm11415_vm14, %v11921_v39, %v1945_v43  ;;  %v11923_v24 = vrot.slane %v11922_v28, %v6881_v58  ;;  %v11924_v41 = vcombine.low %v8746_v13, %v8752_v54 }
 0x187   : > { %v1778_v9 = vadd.f32 %v1774_v21, %v1721_v29  ;;  %v1953_v55 = vsel %vm11415_vm14, %v1949_v34, %v11921_v39  ;;  %v11925_v43 = vrot.slane %v11922_v28, %v6899_v1  ;;  %v1898_v53 = vmul.f32 %v1891_v6, %v11920_v37 }
 0x188   : > { %v8945_v31 = vmul.f32 %v11923_v24, %v1955_v42  ;;  %v1777_v4 = vadd.f32 %v11924_v41, %v1720_v47  ;;  %v1899_v15 = vmul.f32 %v1895_v16, %v11920_v37  ;;  %v1930_v36 = vmul.f32 %v1917_v56, %v8806_v26  ;;  %v2056_v42 = vpop.permute.xlu1 %2055 }
 0x189   : > { %v1981_v17 = vmul.f32 %v11925_v43, %v1954_v2  ;;  %v1931_v21 = vmul.f32 %v1921_v22, %v8806_v26  ;;  %v1828_v29 = vcombine.low %v1821_v18, %v1822_v60  ;;  %v11926_v13 = vrot.slane %v11922_v28, %v6891_v63  ;;  %v11928_v43 = vld [vmem:[#allocation110_spill] sm:$0xff] }
 0x18a   : > { %v2074_v34 = vrot.slane %v6239_v5, %v6881_v58  ;;  %v2078_v47 = vrot.slane %v6239_v5, %v6899_v1  ;;  %v1831_v39 = vadd.f32 %v1827_v27, %v1777_v4  ;;  %v11927_v6 = vrot.slane %v11922_v28, %v6888_v62 }
 0x18b   : > { %v1983_v54 = vmul.f32 %v11926_v13, %v1956_v19  ;;  %v2082_v16 = vrot.slane %v6239_v5, %v6888_v62  ;;  %v2086_v56 = vrot.slane %v6239_v5, %v6891_v63  ;;  %v1832_v22 = vadd.f32 %v1828_v29, %v1778_v9 }
 0x18c   : > { %v1982_v2 = vmul.f32 %v11927_v6, %v1953_v55  ;;  %v1904_v37 = vcombine.low %v1896_v0, %v1897_v25  ;;  %v1994_v18 = vrot.slane %v8945_v31, %v6881_v58  ;;  %v1998_v60 = vrot.slane %v1981_v17, %v6881_v58  ;;  %v2058_v4 = vpop.permute.xlu1 %2057 }
 0x18d   : > { %v1905_v19 = vcombine.low %v1898_v53, %v1899_v15  ;;  %v1932_v24 = vmul.f32 %v1925_v10, %v8806_v26  ;;  %v1933_v27 = vmul.f32 %v1929_v35, %v8806_v26  ;;  %v1938_v41 = vcombine.low %v1930_v36, %v1931_v21 }
 0x18e   : > { %v2006_v28 = vrot.slane %v1983_v54, %v6881_v58  ;;  %v2007_v55 = vmul.f32 %v1994_v18, %v1989_v50  ;;  %v2065_v5 = vsel %vm2063_vm15, %v2058_v4, %v11928_v43  ;;  %v2066_v0 = vsel %vm2063_vm15, %v2056_v42, %v2058_v4  ;;  %v11929_v4 = vld [vmem:[#allocation28_spill] sm:$0xff] }
 0x18f   : > { %v1908_v25 = vadd.f32 %v1904_v37, %v1831_v39  ;;  %v2002_v9 = vrot.slane %v1982_v2, %v6881_v58  ;;  %v2091_v53 = vmul.f32 %v2074_v34, %v2066_v0  ;;  %v2092_v15 = vmul.f32 %v2078_v47, %v2065_v5 }
 0x190   : > { %vm2174_vm14 = vcmp.lt.s32.totalorder %v6878_v57, 119  ;;  %v1909_v26 = vadd.f32 %v1905_v19, %v1832_v22  ;;  %v2032_v10 = vrot.slane %v1981_v17, %v6899_v1  ;;  %v2036_v35 = vrot.slane %v1982_v2, %v6899_v1  ;;  %v2062_v6 = vpop.permute.xlu1 %2061 }
 0x191   : > { %v2008_v36 = vmul.f32 %v1998_v60, %v1989_v50  ;;  %v1939_v21 = vcombine.low %v1932_v24, %v1933_v27  ;;  %v2028_v29 = vrot.slane %v8945_v31, %v6899_v1  ;;  %v2105_v13 = vrot.slane %v2091_v53, %v6881_v58  ;;  %v6241_v31 = vld [vmem:[%s11206_s5 + $0x44] sm:$0xf] }
 0x192   : > { %v2109_v39 = vrot.slane %v2092_v15, %v6881_v58  ;;  %v2040_v34 = vrot.slane %v1983_v54, %v6899_v1  ;;  %v2010_v47 = vmul.f32 %v2006_v28, %v1989_v50  ;;  %v2064_v22 = vsel %vm2063_vm15, %v11928_v43, %v2062_v6 }
 0x193   : > { %v2067_v17 = vsel %vm2063_vm15, %v2062_v6, %v2056_v42  ;;  %v1942_v2 = vadd.f32 %v1938_v41, %v1908_v25  ;;  %v2009_v37 = vmul.f32 %v2002_v9, %v1989_v50  ;;  %v2093_v18 = vmul.f32 %v2082_v16, %v2064_v22  ;;  %v11930_v22 = vld [vmem:[#allocation32_spill] sm:$0xff] }
 0x194   : > { %v2094_v60 = vmul.f32 %v2086_v56, %v2067_v17  ;;  %v1943_v19 = vadd.f32 %v1939_v21, %v1909_v26  ;;  %v2042_v24 = vmul.f32 %v2032_v10, %v8659_v33  ;;  %v2043_v54 = vmul.f32 %v2036_v35, %v8659_v33  ;;  %v2134_v16 = vpop.permute.xlu1 %2133 }
 0x195   : > { %v2015_v27 = vcombine.low %v2007_v55, %v2008_v36  ;;  %v2118_v28 = vmul.f32 %v2105_v13, %v11929_v4  ;;  %v2119_v43 = vmul.f32 %v2109_v39, %v11929_v4  ;;  %v2113_v42 = vrot.slane %v2093_v18, %v6881_v58 }
 0x196   : > { %v2117_v50 = vrot.slane %v2094_v60, %v6881_v58  ;;  %v2041_v56 = vmul.f32 %v2028_v29, %v8659_v33  ;;  %v2044_v41 = vmul.f32 %v2040_v34, %v8659_v33  ;;  %v2185_v5 = vrot.slane %v6241_v31, %v6881_v58 }
 0x197   : > { %v2197_v0 = vrot.slane %v6241_v31, %v6891_v63  ;;  %v2016_v25 = vcombine.low %v2009_v37, %v2010_v47  ;;  %v2019_v9 = vadd.f32 %v2015_v27, %v1942_v2  ;;  %v2120_v55 = vmul.f32 %v2113_v42, %v11929_v4  ;;  %v11931_v2 = vld [vmem:[#allocation35_spill] sm:$0xff]  ;;  %v11933_v27 = vld [vmem:[#allocation9_spill] sm:$0xff] }
 0x198   : > { %v2121_v26 = vmul.f32 %v2117_v50, %v11929_v4  ;;  %v2049_v10 = vcombine.low %v2041_v56, %v2042_v24  ;;  %v2050_v35 = vcombine.low %v2043_v54, %v2044_v41  ;;  %v2189_v36 = vrot.slane %v6241_v31, %v6899_v1  ;;  %v2167_v6 = vpop.permute.xlu1 %2166  ;;  %v11937_v50 = vld [vmem:[#allocation38_spill] sm:$0xff]  ;;  %v11938_v41 = vld [vmem:[#allocation20_spill] sm:$0xff] }
 0x199   : > { %v2193_v21 = vrot.slane %v6241_v31, %v6888_v62  ;;  %v2020_v13 = vadd.f32 %v2016_v25, %v1943_v19  ;;  %v2126_v29 = vcombine.low %v2118_v28, %v2119_v43  ;;  %v2139_v33 = vrot.slane %v2091_v53, %v6899_v1  ;;  %v11932_v53 = vld [vmem:[#allocation16_spill] sm:$0xff] }
 0x19a   : > { %v2143_v39 = vrot.slane %v2092_v15, %v6899_v1  ;;  %v2147_v34 = vrot.slane %v2093_v18, %v6899_v1  ;;  %v2151_v47 = vrot.slane %v2094_v60, %v6899_v1  ;;  %v2177_v17 = vsel %vm2174_vm14, %v2167_v6, %v11930_v22  ;;  %v11935_v18 = vld [vmem:[#allocation21_spill] sm:$0xff] }
 0x19b   : > { %v2178_v37 = vsel %vm2174_vm14, %v11931_v2, %v2167_v6  ;;  %v2053_v31 = vadd.f32 %v2049_v10, %v2019_v9  ;;  %v2127_v19 = vcombine.low %v2120_v55, %v2121_v26  ;;  %v2152_v24 = vmul.f32 %v2139_v33, %v2134_v16 }
 0x19c   : > { %v2153_v54 = vmul.f32 %v2143_v39, %v2134_v16  ;;  %v11934_v15 = vrot.slane %v11933_v27, %v6891_v63  ;;  %v11936_v60 = vrot.slane %v11933_v27, %v6881_v58  ;;  %v2202_v43 = vmul.f32 %v2185_v5, %v2177_v17  ;;  %v2171_v10 = vpop.permute.xlu1 %2170 }
 0x19d   : > { %v2205_v42 = vmul.f32 %v2197_v0, %v2178_v37  ;;  %v2322_v56 = vrot.slane %v11937_v50, %v6881_v58  ;;  %v11939_v25 = vrot.slane %v11933_v27, %v6899_v1  ;;  %v2130_v55 = vadd.f32 %v2126_v29, %v2053_v31 }
 0x19e   : > { %v9029_v4 = vmul.f32 %v11934_v15, %v11932_v53  ;;  %v9035_v28 = vmul.f32 %v11936_v60, %v11935_v18  ;;  %v2054_v26 = vadd.f32 %v2050_v35, %v2020_v13  ;;  %v2154_v33 = vmul.f32 %v2147_v34, %v2134_v16 }
 0x19f   : > { %v2301_v9 = vmul.f32 %v11939_v25, %v11938_v41  ;;  %v2155_v39 = vmul.f32 %v2151_v47, %v2134_v16  ;;  %v2175_v6 = vsel %vm2174_vm14, %v2171_v10, %v11931_v2  ;;  %v2176_v5 = vsel %vm2174_vm14, %v11930_v22, %v2171_v10 }
 0x1a0   : > { %v2131_v0 = vadd.f32 %v2127_v19, %v2054_v26  ;;  %v2160_v17 = vcombine.low %v2152_v24, %v2153_v54  ;;  %v2203_v37 = vmul.f32 %v2189_v36, %v2176_v5  ;;  %v2204_v53 = vmul.f32 %v2193_v21, %v2175_v6  ;;  %v2211_v2 = vpop.permute.xlu1 %2210 }
 0x1a1   : > { %v2216_v27 = vrot.slane %v2202_v43, %v6881_v58  ;;  %v2228_v29 = vrot.slane %v2205_v42, %v6881_v58  ;;  %v2250_v35 = vrot.slane %v2202_v43, %v6899_v1  ;;  %v2262_v16 = vrot.slane %v2205_v42, %v6899_v1 }
 0x1a2   : > { %v2220_v13 = vrot.slane %v2203_v37, %v6881_v58  ;;  %v2224_v34 = vrot.slane %v2204_v53, %v6881_v58  ;;  %v2254_v47 = vrot.slane %v2203_v37, %v6899_v1  ;;  %v2258_v22 = vrot.slane %v2204_v53, %v6899_v1 }
 0x1a3   : > { %v2326_v36 = vrot.slane %v9029_v4, %v6881_v58  ;;  %v2161_v21 = vcombine.low %v2154_v33, %v2155_v39  ;;  %v2229_v31 = vmul.f32 %v2216_v27, %v2211_v2  ;;  %v2232_v19 = vmul.f32 %v2228_v29, %v2211_v2 }
 0x1a4   : > { %v2314_v24 = vrot.slane %v9035_v28, %v6881_v58  ;;  %v2264_v54 = vmul.f32 %v2254_v47, %v8706_v3  ;;  %v2230_v15 = vmul.f32 %v2220_v13, %v2211_v2  ;;  %v2231_v18 = vmul.f32 %v2224_v34, %v2211_v2  ;;  %v2309_v39 = vpop.permute.xlu1 %2308 }
 0x1a5   : > { %v2318_v60 = vrot.slane %v2301_v9, %v6881_v58  ;;  %v2164_v43 = vadd.f32 %v2160_v17, %v2130_v55  ;;  %v2165_v42 = vadd.f32 %v2161_v21, %v2131_v0  ;;  %v2265_v41 = vmul.f32 %v2258_v22, %v8706_v3  ;;  %v6249_v55 = vld [vmem:[%s11206_s5 + $0x54] sm:$0xf] }
 0x1a6   : > { %v2263_v25 = vmul.f32 %v2250_v35, %v8706_v3  ;;  %v2266_v26 = vmul.f32 %v2262_v16, %v8706_v3  ;;  %v2237_v10 = vcombine.low %v2229_v31, %v2230_v15  ;;  %v2238_v33 = vcombine.low %v2231_v18, %v2232_v19 }
 0x1a7   : > { %v2327_v6 = vmul.f32 %v2314_v24, %v2309_v39  ;;  %v2328_v5 = vmul.f32 %v2318_v60, %v2309_v39  ;;  %v2329_v37 = vmul.f32 %v2322_v56, %v2309_v39  ;;  %v2330_v53 = vmul.f32 %v2326_v36, %v2309_v39  ;;  %v11940_v24 = vld [vmem:[#allocation39_spill] sm:$0xff] }
 0x1a8   : > { %v2271_v27 = vcombine.low %v2263_v25, %v2264_v54  ;;  %v2241_v29 = vadd.f32 %v2237_v10, %v2164_v43  ;;  %v2242_v13 = vadd.f32 %v2238_v33, %v2165_v42  ;;  %v2272_v0 = vcombine.low %v2265_v41, %v2266_v26  ;;  %v2343_v2 = vpop.permute.xlu1 %2342  ;;  %v11943_v41 = vld [vmem:[#allocation45_spill] sm:$0xff] }
 0x1a9   : > { %v2335_v17 = vcombine.low %v2327_v6, %v2328_v5  ;;  %v2336_v34 = vcombine.low %v2329_v37, %v2330_v53  ;;  %v2348_v3 = vrot.slane %v9035_v28, %v6899_v1  ;;  %v2352_v35 = vrot.slane %v2301_v9, %v6899_v1 }
 0x1aa   : > { %v2275_v16 = vadd.f32 %v2271_v27, %v2241_v29  ;;  %v2356_v56 = vrot.slane %v11937_v50, %v6899_v1  ;;  %v2360_v47 = vrot.slane %v9029_v4, %v6899_v1  ;;  %v2276_v22 = vadd.f32 %v2272_v0, %v2242_v13  ;;  %v11941_v50 = vld [vmem:[#allocation40_spill] sm:$0xff] }
 0x1ab   : > { %v2577_v36 = vrot.slane %v6249_v55, %v6881_v58  ;;  %v2581_v21 = vrot.slane %v6249_v55, %v6899_v1  ;;  %v2361_v31 = vmul.f32 %v2348_v3, %v2343_v2  ;;  %v2362_v19 = vmul.f32 %v2352_v35, %v2343_v2  ;;  %v11942_v4 = vld [vmem:[#allocation44_spill] sm:$0xff] }
 0x1ac   : > { %v2446_v28 = vrot.slane %v11940_v24, %v6899_v1  ;;  %v2585_v9 = vrot.slane %v6249_v55, %v6888_v62  ;;  %v2363_v54 = vmul.f32 %v2356_v56, %v2343_v2  ;;  %v2364_v15 = vmul.f32 %v2360_v47, %v2343_v2  ;;  %v2441_v39 = vpop.permute.xlu1 %2440  ;;  %v11944_v3 = vld [vmem:[#allocation56_spill] sm:$0xff]  ;;  %v11951_v24 = vld [vmem:[#allocation122_spill] sm:$0xff] }
 0x1ad   : > { %v2450_v18 = vrot.slane %v11941_v50, %v6899_v1  ;;  %v2454_v60 = vrot.slane %v11942_v4, %v6899_v1  ;;  %v2339_v43 = vadd.f32 %v2335_v17, %v2275_v16  ;;  %v2369_v42 = vcombine.low %v2361_v31, %v2362_v19  ;;  %v11946_v35 = vld [vmem:[#allocation120_spill] sm:$0xff]  ;;  %v11949_v31 = vld [vmem:[#allocation57_spill] sm:$0xff] }
 0x1ae   : > { %v2458_v25 = vrot.slane %v11943_v41, %v6899_v1  ;;  %v2589_v26 = vrot.slane %v6249_v55, %v6891_v63  ;;  %v2340_v10 = vadd.f32 %v2336_v34, %v2276_v22  ;;  %v2370_v33 = vcombine.low %v2363_v54, %v2364_v15  ;;  %v11945_v34 = vld [vmem:[#allocation119_spill] sm:$0xff] }
 0x1af   : > { %v2373_v6 = vadd.f32 %v2369_v42, %v2339_v43  ;;  %v2459_v5 = vmul.f32 %v2446_v28, %v2441_v39  ;;  %v2460_v37 = vmul.f32 %v2450_v18, %v2441_v39  ;;  %v2461_v53 = vmul.f32 %v2454_v60, %v2441_v39  ;;  %v11948_v22 = vld [vmem:[#allocation55_spill] sm:$0xff] }
 0x1b0   : > { %v2510_v27 = vrot.slane %v11856_v49, %v6881_v58  ;;  %v2514_v29 = vrot.slane %v11858_v20, %v6881_v58  ;;  %v2374_v13 = vadd.f32 %v2370_v33, %v2340_v10  ;;  %v2462_v0 = vmul.f32 %v2458_v25, %v2441_v39  ;;  %v11950_v49 = vld [vmem:[#allocation121_spill] sm:$0xff]  ;;  %v2505_v18 = vpop.permute.xlu1 %2504 }
 0x1b1   : > { %v2518_v17 = vrot.slane %v11861_v7, %v6881_v58  ;;  %v2594_v55 = vmul.f32 %v2577_v36, %v11944_v3  ;;  %v11947_v16 = vcombine.low %v11945_v34, %v11946_v35  ;;  %v2467_v47 = vcombine.low %v2459_v5, %v2460_v37  ;;  %v11953_v7 = vld [vmem:[#allocation58_spill] sm:$0xff]  ;;  %v6255_v35 = vld [vmem:[%s11206_s5 + $0x60] sm:$0xf] }
 0x1b2   : > { %v2595_v2 = vmul.f32 %v2581_v21, %v11948_v22  ;;  %v2596_v19 = vmul.f32 %v2585_v9, %v11949_v31  ;;  %v11952_v28 = vcombine.low %v11950_v49, %v11951_v24  ;;  %v2468_v54 = vcombine.low %v2461_v53, %v2462_v0 }
 0x1b3   : > { %v2437_v56 = vadd.f32 %v11947_v16, %v2373_v6  ;;  %v2522_v15 = vrot.slane %v11865_v51, %v6881_v58  ;;  %v2597_v50 = vmul.f32 %v2589_v26, %v11953_v7  ;;  %v2523_v60 = vmul.f32 %v2510_v27, %v2505_v18  ;;  %v11955_v16 = vld [vmem:[#allocation60_spill] sm:$0xff] }
 0x1b4   : > { %v2438_v20 = vadd.f32 %v11952_v28, %v2374_v13  ;;  %v2524_v43 = vmul.f32 %v2514_v29, %v2505_v18  ;;  %v2525_v42 = vmul.f32 %v2518_v17, %v2505_v18  ;;  %v2608_v21 = vrot.slane %v2594_v55, %v6881_v58  ;;  %v2603_v51 = vpop.permute.xlu1 %2602 }
 0x1b5   : > { %v2471_v36 = vadd.f32 %v2467_v47, %v2437_v56  ;;  %v2526_v41 = vmul.f32 %v2522_v15, %v2505_v18  ;;  %v2612_v9 = vrot.slane %v2595_v2, %v6881_v58  ;;  %v2616_v25 = vrot.slane %v2596_v19, %v6881_v58 }
 0x1b6   : > { %v2472_v4 = vadd.f32 %v2468_v54, %v2438_v20  ;;  %v2531_v10 = vcombine.low %v2523_v60, %v2524_v43  ;;  %v2620_v33 = vrot.slane %v2597_v50, %v6881_v58  ;;  %v2621_v26 = vmul.f32 %v2608_v21, %v2603_v51  ;;  %v11957_v54 = vld [vmem:[#allocation15_spill] sm:$0xff] }
 0x1b7   : > { %v2532_v39 = vcombine.low %v2525_v42, %v2526_v41  ;;  %v2622_v5 = vmul.f32 %v2612_v9, %v2603_v51  ;;  %v2623_v37 = vmul.f32 %v2616_v25, %v2603_v51  ;;  %v2642_v29 = vrot.slane %v2594_v55, %v6899_v1 }
 0x1b8   : > { %v2535_v6 = vadd.f32 %v2531_v10, %v2471_v36  ;;  %v2624_v27 = vmul.f32 %v2620_v33, %v2603_v51  ;;  %v11954_v13 = vcombine.low %v8757_v59, %v8762_v48  ;;  %v2646_v3 = vrot.slane %v2595_v2, %v6899_v1  ;;  %v2637_v49 = vpop.permute.xlu1 %2636  ;;  %v11959_v36 = vld [vmem:[#allocation86_spill] sm:$0xff] }
 0x1b9   : > { %v2536_v53 = vadd.f32 %v2532_v39, %v2472_v4  ;;  %v2629_v17 = vcombine.low %v2621_v26, %v2622_v5  ;;  %v2650_v34 = vrot.slane %v2596_v19, %v6899_v1  ;;  %v11956_v56 = vcombine.low %v8771_v52, %v11955_v16  ;;  %v11958_v52 = vld [vmem:[#allocation85_spill] sm:$0xff]  ;;  %v11961_v39 = vld [vmem:[#allocation22_spill] sm:$0xff]  ;;  %v11968_v16 = vld [vmem:[#allocation100_spill] sm:$0xff] }
 0x1ba   : > { %v2569_v0 = vadd.f32 %v11954_v13, %v2535_v6  ;;  %v2630_v22 = vcombine.low %v2623_v37, %v2624_v27  ;;  %v2654_v55 = vrot.slane %v2597_v50, %v6899_v1  ;;  %v2655_v48 = vmul.f32 %v2642_v29, %v2637_v49  ;;  %v11960_v4 = vld [vmem:[#allocation81_spill] sm:$0xff]  ;;  %v11962_v6 = vld [vmem:[#allocation95_spill] sm:$0xff]  ;;  %v11964_v29 = vld [vmem:[#allocation10_spill] sm:$0xff] }
 0x1bb   : > { %v2570_v47 = vadd.f32 %v11956_v56, %v2536_v53  ;;  %v2656_v24 = vmul.f32 %v2646_v3, %v2637_v49  ;;  %v2657_v28 = vmul.f32 %v2650_v34, %v2637_v49  ;;  %v2871_v2 = vrot.slane %v6255_v35, %v6881_v58  ;;  %v11963_v53 = vld [vmem:[#allocation96_spill] sm:$0xff] }
 0x1bc   : > { %v2633_v31 = vadd.f32 %v2629_v17, %v2569_v0  ;;  %v2883_v19 = vrot.slane %v6255_v35, %v6891_v63  ;;  %v2658_v20 = vmul.f32 %v2654_v55, %v2637_v49  ;;  %v2740_v15 = vrot.slane %v11957_v54, %v6899_v1  ;;  %v2735_v21 = vpop.permute.xlu1 %2734  ;;  %v11965_v0 = vld [vmem:[#allocation34_spill] sm:$0xff]  ;;  %v11966_v17 = vld [vmem:[#allocation124_spill] sm:$0xff]  ;;  %v11970_v55 = vld [vmem:[#allocation125_spill] sm:$0xff] }
 0x1bd   : > { %v2634_v59 = vadd.f32 %v2630_v22, %v2570_v47  ;;  %v2744_v7 = vrot.slane %v11958_v52, %v6899_v1  ;;  %v2748_v50 = vrot.slane %v11959_v36, %v6899_v1  ;;  %v2663_v18 = vcombine.low %v2655_v48, %v2656_v24  ;;  %v11969_v47 = vld [vmem:[#allocation102_spill] sm:$0xff] }
 0x1be   : > { %v2752_v60 = vrot.slane %v11960_v4, %v6899_v1  ;;  %v2875_v43 = vrot.slane %v6255_v35, %v6899_v1  ;;  %v2879_v42 = vrot.slane %v6255_v35, %v6888_v62  ;;  %v2664_v41 = vcombine.low %v2657_v28, %v2658_v20  ;;  %v11973_v28 = vld [vmem:[#allocation13_spill] sm:$0xff] }
 0x1bf   : > { %v2667_v9 = vadd.f32 %v2663_v18, %v2633_v31  ;;  %v2753_v25 = vmul.f32 %v2740_v15, %v2735_v21  ;;  %v2754_v10 = vmul.f32 %v2744_v7, %v2735_v21  ;;  %v2755_v33 = vmul.f32 %v2748_v50, %v2735_v21  ;;  %v11971_v31 = vld [vmem:[#allocation126_spill] sm:$0xff] }
 0x1c0   : > { %v2804_v51 = vrot.slane %v11961_v39, %v6881_v58  ;;  %v2808_v26 = vrot.slane %v11962_v6, %v6881_v58  ;;  %v2668_v5 = vadd.f32 %v2664_v41, %v2634_v59  ;;  %v2756_v37 = vmul.f32 %v2752_v60, %v2735_v21  ;;  %v2799_v54 = vpop.permute.xlu1 %2798 }
 0x1c1   : > { %v2812_v27 = vrot.slane %v11963_v53, %v6881_v58  ;;  %v2888_v13 = vmul.f32 %v2871_v2, %v11964_v29  ;;  %v11967_v3 = vcombine.low %v11965_v0, %v11966_v17  ;;  %v2761_v35 = vcombine.low %v2753_v25, %v2754_v10 }
 0x1c2   : > { %v2889_v56 = vmul.f32 %v2875_v43, %v11968_v16  ;;  %v2890_v22 = vmul.f32 %v2879_v42, %v11969_v47  ;;  %v11972_v49 = vcombine.low %v11970_v55, %v11971_v31  ;;  %v2762_v59 = vcombine.low %v2755_v33, %v2756_v37  ;;  %v11978_v55 = vld [vmem:[#allocation113_spill] sm:$0xff]  ;;  %v11979_v31 = vld [vmem:[#allocation114_spill] sm:$0xff] }
 0x1c3   : > { %v2731_v34 = vadd.f32 %v11967_v3, %v2667_v9  ;;  %v2816_v24 = vrot.slane %v11892_v30, %v6881_v58  ;;  %v2891_v20 = vmul.f32 %v2883_v19, %v11973_v28  ;;  %v2817_v52 = vmul.f32 %v2804_v51, %v2799_v54 }
 0x1c4   : > { %v2732_v48 = vadd.f32 %v11972_v49, %v2668_v5  ;;  %v2818_v7 = vmul.f32 %v2808_v26, %v2799_v54  ;;  %v2819_v36 = vmul.f32 %v2812_v27, %v2799_v54  ;;  %v2902_v18 = vrot.slane %v2888_v13, %v6881_v58  ;;  %v2897_v30 = vpop.permute.xlu1 %2896 }
 0x1c5   : > { %v2765_v2 = vadd.f32 %v2761_v35, %v2731_v34  ;;  %v2820_v50 = vmul.f32 %v2816_v24, %v2799_v54  ;;  %v2906_v4 = vrot.slane %v2889_v56, %v6881_v58  ;;  %v2910_v60 = vrot.slane %v2890_v22, %v6881_v58 }
 0x1c6   : > { %v2766_v15 = vadd.f32 %v2762_v59, %v2732_v48  ;;  %v2825_v43 = vcombine.low %v2817_v52, %v2818_v7  ;;  %v2914_v42 = vrot.slane %v2891_v20, %v6881_v58  ;;  %v2915_v19 = vmul.f32 %v2902_v18, %v2897_v30  ;;  %v11980_v7 = vld [vmem:[#allocation128_spill] sm:$0xff] }
 0x1c7   : > { %v2826_v41 = vcombine.low %v2819_v36, %v2820_v50  ;;  %v2916_v9 = vmul.f32 %v2906_v4, %v2897_v30  ;;  %v2917_v25 = vmul.f32 %v2910_v60, %v2897_v30  ;;  %v2936_v39 = vrot.slane %v2888_v13, %v6899_v1  ;;  %v11981_v36 = vld [vmem:[#allocation129_spill] sm:$0xff]  ;;  %v11983_v60 = vld [vmem:[#allocation123_spill] sm:$0xff] }
 0x1c8   : > { %v2829_v21 = vadd.f32 %v2825_v43, %v2765_v2  ;;  %v2918_v33 = vmul.f32 %v2914_v42, %v2897_v30  ;;  %v11974_v51 = vcombine.low %v8804_v11, %v8827_v46  ;;  %v2940_v5 = vrot.slane %v2889_v56, %v6899_v1  ;;  %v2931_v3 = vpop.permute.xlu1 %2930  ;;  %v11976_v46 = vld [vmem:[#allocation30_spill] sm:$0xff]  ;;  %v11977_v56 = vld [vmem:[#allocation112_spill] sm:$0xff]  ;;  %v11984_v42 = vld [vmem:[#allocation127_spill] sm:$0xff] }
 0x1c9   : > { %v2830_v10 = vadd.f32 %v2826_v41, %v2766_v15  ;;  %v2923_v26 = vcombine.low %v2915_v19, %v2916_v9  ;;  %v2944_v37 = vrot.slane %v2890_v22, %v6899_v1  ;;  %v11975_v53 = vcombine.low %v8832_v32, %v8844_v44  ;;  %v11985_v30 = vld [vmem:[#allocation130_spill] sm:$0xff] }
 0x1ca   : > { %v2863_v6 = vadd.f32 %v11974_v51, %v2829_v21  ;;  %v2924_v29 = vcombine.low %v2917_v25, %v2918_v33  ;;  %v2948_v0 = vrot.slane %v2891_v20, %v6899_v1  ;;  %v2949_v13 = vmul.f32 %v2936_v39, %v2931_v3  ;;  %v11986_v21 = vld [vmem:[#allocation131_spill] sm:$0xff] }
 0x1cb   : > { %v2864_v27 = vadd.f32 %v11975_v53, %v2830_v10  ;;  %v2950_v35 = vmul.f32 %v2940_v5, %v2931_v3  ;;  %v2951_v16 = vmul.f32 %v2944_v37, %v2931_v3  ;;  %v3034_v47 = vrot.slane %v11976_v46, %v6899_v1  ;;  %v11997_v46 = vld [vmem:[#allocation12_spill] sm:$0xff] }
 0x1cc   : > { %v2927_v17 = vadd.f32 %v2923_v26, %v2863_v6  ;;  %v2952_v11 = vmul.f32 %v2948_v0, %v2931_v3  ;;  %v3038_v22 = vrot.slane %v11977_v56, %v6899_v1  ;;  %v3042_v32 = vrot.slane %v11978_v55, %v6899_v1  ;;  %v3029_v59 = vpop.permute.xlu1 %3028  ;;  %v6270_v3 = vld [vmem:[%s11204_s3 + $0xa] sm:$0x3]  ;;  %v9332_v56 = vld [vmem:[%s11206_s5] sm:$0xf] }
 0x1cd   : > { %v2928_v34 = vadd.f32 %v2924_v29, %v2864_v27  ;;  %v2957_v44 = vcombine.low %v2949_v13, %v2950_v35  ;;  %v3046_v49 = vrot.slane %v11979_v31, %v6899_v1  ;;  %v3047_v28 = vmul.f32 %v3034_v47, %v3029_v59  ;;  %v6274_v13 = vld [vmem:[%s11204_s3 + $0xe] sm:$0x3]  ;;  %v6276_v35 = vld [vmem:[%s11204_s3 + $0x10] sm:$0x3] }
 0x1ce   : > { %v2958_v48 = vcombine.low %v2951_v16, %v2952_v11  ;;  %v3048_v20 = vmul.f32 %v3038_v22, %v3029_v59  ;;  %v3049_v2 = vmul.f32 %v3042_v32, %v3029_v59  ;;  %v3098_v52 = vrot.slane %v11901_v23, %v6881_v58  ;;  %v6278_v16 = vld [vmem:[%s11204_s3 + $0x12] sm:$0x3]  ;;  %v9337_v22 = vld [vmem:[%s11206_s5 + $0x48] sm:$0xf] }
 0x1cf   : > { %v2961_v24 = vadd.f32 %v2957_v44, %v2927_v17  ;;  %v3050_v15 = vmul.f32 %v3046_v49, %v3029_v59  ;;  %v11982_v50 = vcombine.low %v11980_v7, %v11981_v36  ;;  %v3102_v43 = vrot.slane %v11983_v60, %v6881_v58  ;;  %v11998_v55 = vld [vmem:[#allocation6_spill] sm:$0xff] }
 0x1d0   : > { %v2962_v54 = vadd.f32 %v2958_v48, %v2928_v34  ;;  %v3055_v4 = vcombine.low %v3047_v28, %v3048_v20  ;;  %v3106_v41 = vrot.slane %v11984_v42, %v6881_v58  ;;  %v11987_v19 = vcombine.low %v11985_v30, %v11986_v21  ;;  %v3093_v33 = vpop.permute.xlu1 %3092  ;;  %v6272_v34 = vld [vmem:[%s11204_s3 + $0xc] sm:$0x3]  ;;  %v9393_v30 = vld [vmem:[%s11206_s5 + $0x4] sm:$0xf] }
 0x1d1   : > { %v3025_v18 = vadd.f32 %v11982_v50, %v2961_v24  ;;  %v3056_v25 = vcombine.low %v3049_v2, %v3050_v15  ;;  %v3110_v23 = vrot.slane %v11911_v38, %v6881_v58  ;;  %v3111_v51 = vmul.f32 %v3098_v52, %v3093_v33  ;;  %v6280_v24 = vld [vmem:[%s11204_s3 + $0x14] sm:$0x3]  ;;  %v9398_v21 = vld [vmem:[%s11206_s5 + $0x4c] sm:$0xf]  ;;  %v6284_v50 = vld [vmem:[%s11204_s3 + $0x18] sm:$0x3] }
 0x1d2   : > { %v3026_v9 = vadd.f32 %v11987_v19, %v2962_v54  ;;  %v3112_v6 = vmul.f32 %v3102_v43, %v3093_v33  ;;  %v3113_v26 = vmul.f32 %v3106_v41, %v3093_v33  ;;  %v4664_v32 = vsub.s32 4, %v11998_v55  ;;  %v6408_v19 = vld [vmem:[%s6594_s17] sm:$0xff] }
 0x1d3   : > { %v3059_v10 = vadd.f32 %v3055_v4, %v3025_v18  ;;  %v3114_v5 = vmul.f32 %v3110_v23, %v3093_v33  ;;  %v4720_v44 = vsub.s32 5, %v11998_v55  ;;  %v3204_v31 = vrot.slane %v9332_v56, %v6899_v1 }
 0x1d4   : > { %v3060_v39 = vadd.f32 %v3056_v25, %v3026_v9  ;;  %v3119_v37 = vcombine.low %v3111_v51, %v3112_v6  ;;  %v3165_v11 = vpop.permute.xlu1 %3164  ;;  %v3208_v36 = vrot.slane %v9332_v56, %v6888_v62  ;;  %v3200_v60 = vrot.slane %v9332_v56, %v6881_v58  ;;  %v6409_v25 = vld [vmem:[%s6594_s17 + $0x8] sm:$0xff]  ;;  %v9420_v51 = vld [vmem:[%s11206_s5 + $0x50] sm:$0xf] }
 0x1d5   : > { %v3120_v53 = vcombine.low %v3113_v26, %v3114_v5  ;;  %v3172_v47 = vrot.slane %v3165_v11, %v11997_v46  ;;  %v3212_v43 = vrot.slane %v9332_v56, %v6891_v63  ;;  %v9658_v46 = vld [vmem:[%s11206_s5 + $0x20] sm:$0xf]  ;;  %v9698_v56 = vld [vmem:[%s11206_s5 + $0x24] sm:$0xf] }
 0x1d6   : > { %v3123_v27 = vadd.f32 %v3119_v37, %v3059_v10  ;;  %v6282_v37 = vld [vmem:[%s11204_s3 + $0x16] sm:$0x3]  ;;  %12014 = vst [vmem:[#allocation65_spill] sm:$0xff] %v9698_v56 }
 0x1d7   : > { %v3124_v29 = vadd.f32 %v3120_v53, %v3060_v39  ;;  %v3173_v49 = vrot.slane %v3172_v47, 6  ;;  %v9415_v39 = vld [vmem:[%s11206_s5 + $0x8] sm:$0xf]  ;;  %v9561_v47 = vld [vmem:[%s11206_s5 + $0x60] sm:$0xf] }
 0x1d8   : > { %v9195_v0 = vadd.f32 %v3153_v12, %v3123_v27  ;;  %v6266_v12 = vld [vmem:[%s11204_s3 + $0x6] sm:$0x3]  ;;  %12010 = vst [vmem:[#allocation52_spill] sm:$0xff] %v9561_v47 }
 0x1d9   : > { %v9200_v38 = vadd.f32 %v3154_v8, %v3124_v29  ;;  %v6268_v8 = vld [vmem:[%s11204_s3 + $0x8] sm:$0x3]  ;;  %v9401_v9 = vadd.f32 %v6408_v19, %v3173_v49  ;;  %v9404_v23 = vadd.f32 %v6409_v25, %v3173_v49  ;;  %v9518_v25 = vld [vmem:[%s11206_s5 + $0x5c] sm:$0xf] }
 0x1da   : > { %3183 = vrot.lane.b32.xlu1 %v9195_v0, %s6476_s18  ;;  %v9206_v17 = vcombine.high %v9195_v0, %v9195_v0  ;;  %3159 = vst [vmem:[%s9208_s16] sm:$0x33] %v9195_v0  ;;  %v4661_v20 = vrot.slane %v9195_v0, %v6881_v58  ;;  %v9364_v54 = vrot.slane %v9195_v0, %v4664_v32  ;;  %12009 = vst [vmem:[#allocation51_spill] sm:$0xff] %v9518_v25 }
 0x1db   : > { %3160 = vst [vmem:[%s9208_s16 + $0x8] sm:$0x33] %v9200_v38  ;;  %v9220_v45 = vcombine.high %v9200_v38, %v9200_v38  ;;  %v4669_v28 = vrot.slane %v9200_v38, %v6881_v58  ;;  %v9361_v2 = vrot.slane %v9200_v38, %v4664_v32  ;;  %v4717_v15 = vrot.slane %v9195_v0, %v6899_v1  ;;  %v9556_v32 = vld [vmem:[%s11206_s5 + $0x18] sm:$0xf] }
 0x1dc   : > { %3185 = vrot.lane.b32.xlu0 %v9206_v17, %s6476_s18  ;;  %12000 = vst [vmem:[#allocation42_spill] sm:$0xff] %v9364_v54  ;;  %v9369_v52 = vrot.slane %v9195_v0, %v4720_v44  ;;  %v4725_v18 = vrot.slane %v9200_v38, %v6899_v1  ;;  %v9380_v4 = vrot.slane %v9200_v38, %v4720_v44 }
 0x1dd   : > { %11999 = vst [vmem:[#allocation41_spill] sm:$0xff] %v9361_v2  ;;  %v9407_v10 = vrot.slane %v4669_v28, %v6881_v58  ;;  %v9410_v33 = vrot.slane %v4661_v20, %v6881_v58  ;;  %v9427_v5 = vrot.slane %v4717_v15, %v6899_v1  ;;  %v9488_v28 = vld [vmem:[%s11206_s5 + $0x58] sm:$0xf] }
 0x1de   : > { %3187 = vrot.lane.b32.xlu1 %v9200_v38, %s6476_s18  ;;  %12001 = vst [vmem:[#allocation53_spill] sm:$0xff] %v9369_v52  ;;  %12002 = vst [vmem:[#allocation46_spill] sm:$0xff] %v9380_v4 }
 0x1df   : > { %12003 = vst [vmem:[#allocation43_spill] sm:$0xff] %v9407_v10  ;;  %12004 = vst [vmem:[#allocation50_spill] sm:$0xff] %v9410_v33 }
 0x1e0   : > { %3189 = vrot.lane.b32.xlu0 %v9220_v45, %s6476_s18  ;;  %s11989_s18 = smov 71   ;;  %12005 = vst [vmem:[#allocation47_spill] sm:$0xff] %v9427_v5  ;;  %12008 = vst [vmem:[#allocation49_spill] sm:$0xff] %v9488_v28 }
 0x1e2   : > { %3224 = vperm.xlu1 %6402, %v3221_v14  }
 0x1e4   : > { %3260 = vperm.xlu0 %6401, %v3221_v14   ;;  %v9438_v14 = vrot.slane %v4725_v18, %v6899_v1  ;;  %v9513_v18 = vld [vmem:[%s11206_s5 + $0x14] sm:$0xf] }
 0x1e6   : > { %3295 = vrot.lane.b32.xlu1 %v9195_v0, %s11988_s14  ;;  %12006 = vst [vmem:[#allocation37_spill] sm:$0xff] %v9438_v14 }
 0x1e8   : > { %3297 = vrot.lane.b32.xlu0 %v9206_v17, %s11988_s14 }
 0x1ea   : > { %3299 = vrot.lane.b32.xlu1 %v9200_v38, %s11988_s14 }
 0x1ec   : > { %3301 = vrot.lane.b32.xlu0 %v9220_v45, %s11988_s14  ;;  %s11990_s14 = smov 65  }
 0x1ee   : > { %3337 = vperm.xlu1 %6402, %v6262_v40  }
 0x1f0   : > { %3373 = vperm.xlu0 %6401, %v6262_v40  }
 0x1f2   : > { %3408 = vrot.lane.b32.xlu1 %v9195_v0, %s11989_s18 }
 0x1f4   : > { %3410 = vrot.lane.b32.xlu0 %v9206_v17, %s11989_s18 }
 0x1f6   : > { %3412 = vrot.lane.b32.xlu1 %v9200_v38, %s11989_s18 }
 0x1f8   : > { %3414 = vrot.lane.b32.xlu0 %v9220_v45, %s11989_s18  ;;  %s11991_s18 = smov 64  }
 0x1fa   : > { %3450 = vperm.xlu1 %6402, %v6264_v61  }
 0x1fc   : > { %3486 = vperm.xlu0 %6401, %v6264_v61  }
 0x1fe   : > { %3521 = vrot.lane.b32.xlu1 %v9195_v0, %s11990_s14 }
 0x200   : > { %3523 = vrot.lane.b32.xlu0 %v9206_v17, %s11990_s14 }
 0x202   : > { %3525 = vrot.lane.b32.xlu1 %v9200_v38, %s11990_s14 }
 0x204   : > { %3527 = vrot.lane.b32.xlu0 %v9220_v45, %s11990_s14  ;;  %s11992_s14 = smov 63  }
 0x206   : > { %3563 = vperm.xlu1 %6402, %v6266_v12  }
 0x208   : > { %3599 = vperm.xlu0 %6401, %v6266_v12  }
 0x20a   : > { %3634 = vrot.lane.b32.xlu1 %v9195_v0, %s11991_s18 }
 0x20c   : > { %3636 = vrot.lane.b32.xlu0 %v9206_v17, %s11991_s18 }
 0x20e   : > { %3638 = vrot.lane.b32.xlu1 %v9200_v38, %s11991_s18 }
 0x210   : > { %3640 = vrot.lane.b32.xlu0 %v9220_v45, %s11991_s18  ;;  %s11993_s18 = smov 57  }
 0x212   : > { %3676 = vperm.xlu1 %6402, %v6268_v8  }
 0x214   : > { %3712 = vperm.xlu0 %6401, %v6268_v8   ;;  %v12015_v8 = vrot.slane %v9337_v22, %v6881_v58 }
 0x216   : > { %3747 = vrot.lane.b32.xlu1 %v9195_v0, %s11992_s14 }
 0x218   : > { %3749 = vrot.lane.b32.xlu0 %v9206_v17, %s11992_s14 }
 0x21a   : > { %3751 = vrot.lane.b32.xlu1 %v9200_v38, %s11992_s14 }
 0x21c   : > { %3753 = vrot.lane.b32.xlu0 %v9220_v45, %s11992_s14  ;;  %s11994_s14 = smov 56  }
 0x21e   : > { %3789 = vperm.xlu1 %6402, %v6270_v3  }
 0x220   : > { %3825 = vperm.xlu0 %6401, %v6270_v3  }
 0x222   : > { %3860 = vrot.lane.b32.xlu1 %v9195_v0, %s11993_s18 }
 0x224   : > { %3862 = vrot.lane.b32.xlu0 %v9206_v17, %s11993_s18 }
 0x226   : > { %3864 = vrot.lane.b32.xlu1 %v9200_v38, %s11993_s18 }
 0x228   : > { %3866 = vrot.lane.b32.xlu0 %v9220_v45, %s11993_s18  ;;  %s11995_s18 = smov 55  }
 0x22a   : > { %3902 = vperm.xlu1 %6402, %v6272_v34  }
 0x22c   : > { %3938 = vperm.xlu0 %6401, %v6272_v34   ;;  %v9455_v34 = vld [vmem:[%s11206_s5 + $0xc] sm:$0xf] }
 0x22e   : > { %3973 = vrot.lane.b32.xlu1 %v9195_v0, %s11994_s14 }
 0x230   : > { %3975 = vrot.lane.b32.xlu0 %v9206_v17, %s11994_s14 }
 0x232   : > { %3977 = vrot.lane.b32.xlu1 %v9200_v38, %s11994_s14 }
 0x234   : > { %3979 = vrot.lane.b32.xlu0 %v9220_v45, %s11994_s14  ;;  %s11996_s14 = smov 9  }
 0x236   : > { %4015 = vperm.xlu1 %6402, %v6274_v13  }
 0x238   : > { %4051 = vperm.xlu0 %6401, %v6274_v13   ;;  %v9460_v13 = vld [vmem:[%s11206_s5 + $0x54] sm:$0xf] }
 0x239   : > { %12007 = vst [vmem:[#allocation48_spill] sm:$0xff] %v9460_v13 }
 0x23a   : > { %4086 = vrot.lane.b32.xlu1 %v9195_v0, %s11995_s18 }
 0x23c   : > { %4088 = vrot.lane.b32.xlu0 %v9206_v17, %s11995_s18 }
 0x23e   : > { %4090 = vrot.lane.b32.xlu1 %v9200_v38, %s11995_s18 }
 0x240   : > { %4092 = vrot.lane.b32.xlu0 %v9220_v45, %s11995_s18  ;;  %s6144_s18 = sshll.u32 %s9208_s16, 4  ;;  %s11157_s18 = int_to_ptr.vmem [resolvable:$true] %s6144_s18 }
 0x242   : > { %4128 = vperm.xlu1 %6402, %v6276_v35  }
 0x244   : > { %4164 = vperm.xlu0 %6401, %v6276_v35  }
 0x246   : > { %4199 = vrot.lane.b32.xlu1 %v9195_v0, %s11996_s14 }
 0x248   : > { %4201 = vrot.lane.b32.xlu0 %v9206_v17, %s11996_s14 }
 0x24a   : > { %4203 = vrot.lane.b32.xlu1 %v9200_v38, %s11996_s14 }
 0x24c   : > { %4205 = vrot.lane.b32.xlu0 %v9220_v45, %s11996_s14  ;;  %v9347_v48 = vpop.permute.xlu1 %3183 }
 0x24e   : > { %4241 = vperm.xlu1 %6402, %v6278_v16   ;;  %v9371_v7 = vpop.permute.xlu0 %3185 }
 0x24f   : > { %v9567_v11 = vsel %vm289_vm0, %v9347_v48, %v9371_v7 }
 0x250   : > { %4277 = vperm.xlu0 %6401, %v6278_v16   ;;  %v9431_v53 = vpop.permute.xlu1 %3187 }
 0x251   : > { %v9592_v16 = vsel %vm289_vm0, %v9371_v7, %v9431_v53  ;;  %v9611_v7 = vld [vmem:[%s11206_s5 + $0x64] sm:$0xf] }
 0x252   : > { %4312 = vrot.lane.b32.xlu1 %v9195_v0, %s6486_s11  ;;  %v3190_v35 = vpop.permute.xlu0 %3189  ;;  %12011 = vst [vmem:[#allocation63_spill] sm:$0xff] %v9611_v7  ;;  %v9643_v19 = vmul.f32 %v3208_v36, %v9592_v16  ;;  %v9663_v36 = vld [vmem:[%s11206_s5 + $0x68] sm:$0xf] }
 0x253   : > { %v9572_v29 = vsel %vm289_vm0, %v3190_v35, %v9347_v48  ;;  %v9597_v12 = vsel %vm289_vm0, %v9431_v53, %v3190_v35  ;;  %v9606_v48 = vld [vmem:[%s11206_s5 + $0x1c] sm:$0xf]  ;;  %12013 = vst [vmem:[#allocation64_spill] sm:$0xff] %v9663_v36  ;;  %vm12145_vm0 = vcmp.lt.s32.totalorder %v6878_v57, 121 }
 0x254   : > { %4314 = vrot.lane.b32.xlu0 %v9206_v17, %s6486_s11  ;;  %v9623_v53 = vmul.f32 %v3200_v60, %v9572_v29 }
 0x256   : > { %4316 = vrot.lane.b32.xlu1 %v9200_v38, %s6486_s11  ;;  %v3230_v44 = vrot.slane %v9623_v53, %v6881_v58  ;;  %v3266_v42 = vrot.slane %v9623_v53, %v6899_v1  ;;  %v12017_v53 = vrot.slane %v9393_v30, %v6891_v63 }
 0x258   : > { %4318 = vrot.lane.b32.xlu0 %v9220_v45, %s6486_s11 }
 0x25a   : > { %4354 = vperm.xlu1 %6402, %v6280_v24  }
 0x25c   : > { %4390 = vperm.xlu0 %6401, %v6280_v24   ;;  %v9483_v24 = vld [vmem:[%s11206_s5 + $0x10] sm:$0xf] }
 0x25e   : > { %4425 = vrot.lane.b32.xlu1 %v9195_v0, %s6487_s10 }
 0x260   : > { %4427 = vrot.lane.b32.xlu0 %v9206_v17, %s6487_s10 }
 0x261   : > { %v9490_v20 = vpop.permute.xlu1 %3224 }
 0x262   : > { %4429 = vrot.lane.b32.xlu1 %v9200_v38, %s6487_s10  ;;  %v3243_v27 = vmul.f32 %v3230_v44, %v9490_v20  ;;  %v9733_v44 = vmul.f32 %v12015_v8, %v9567_v11 }
 0x263   : > { %v9520_v15 = vpop.permute.xlu0 %3260 }
 0x264   : > { %4431 = vrot.lane.b32.xlu0 %v9220_v45, %s6487_s10  ;;  %12016 = vst [vmem:[#allocation66_spill] sm:$0xff] %v9733_v44  ;;  %v3279_v52 = vmul.f32 %v3266_v42, %v9520_v15  ;;  %v12021_v44 = vrot.slane %v9337_v22, %v6899_v1 }
 0x265   : > { %v9543_v26 = vpop.permute.xlu1 %3295 }
 0x266   : > { %4467 = vperm.xlu1 %6402, %v6282_v37  }
 0x267   : > { %v9578_v6 = vpop.permute.xlu0 %3297 }
 0x268   : > { %4503 = vperm.xlu0 %6401, %v6282_v37   ;;  %v9617_v37 = vmul.f32 %v3204_v31, %v9567_v11  ;;  %v9649_v31 = vmul.f32 %v3212_v43, %v9597_v12  ;;  %v3238_v43 = vrot.slane %v9643_v19, %v6881_v58 }
 0x269   : > { %v3300_v35 = vpop.permute.xlu1 %3299 }
 0x26a   : > { %4538 = vrot.lane.b32.xlu1 %v9195_v0, %s12012_s15  ;;  %v3234_v49 = vrot.slane %v9617_v37, %v6881_v58  ;;  %v3242_v40 = vrot.slane %v9649_v31, %v6881_v58  ;;  %v3245_v3 = vmul.f32 %v3238_v43, %v9490_v20  ;;  %v9751_v11 = vsel %vm398_vm1, %v9578_v6, %v3300_v35 }
 0x26b   : > { %v3302_v55 = vpop.permute.xlu0 %3301 }
 0x26c   : > { %4540 = vrot.lane.b32.xlu0 %v9206_v17, %s12012_s15  ;;  %v3244_v60 = vmul.f32 %v3234_v49, %v9490_v20  ;;  %v3246_v59 = vmul.f32 %v3242_v40, %v9490_v20  ;;  %v9725_v4 = vsel %vm398_vm1, %v3300_v35, %v3302_v55  ;;  %v9738_v43 = vsel %vm398_vm1, %v3302_v55, %v9543_v26  ;;  %v6285_v40 = vld [vmem:[%s11204_s3 + $0x1a] sm:$0x3] }
 0x26d   : > { %v9679_v41 = vpop.permute.xlu1 %3337  ;;  %v3270_v49 = vrot.slane %v9617_v37, %v6899_v1  ;;  %v3274_v20 = vrot.slane %v9643_v19, %v6899_v1  ;;  %v3278_v37 = vrot.slane %v9649_v31, %v6899_v1  ;;  %v3332_v35 = vmul.f32 %v12017_v53, %v9725_v4 }
 0x26e   : > { %4542 = vrot.lane.b32.xlu1 %v9200_v38, %s12012_s15  ;;  %v3251_v8 = vcombine.low %v3243_v27, %v3244_v60  ;;  %v9764_v27 = vsel %vm398_vm1, %v9543_v26, %v9578_v6  ;;  %v3252_v60 = vcombine.low %v3245_v3, %v3246_v59  ;;  %v12018_v31 = vrot.slane %v9393_v30, %v6881_v58  ;;  %vm12147_vm1 = vmmov %vm12145_vm0 }
 0x26f   : > { %v9706_v61 = vpop.permute.xlu0 %3373  ;;  %v3280_v19 = vmul.f32 %v3270_v49, %v9520_v15  ;;  %v12019_v59 = vrot.slane %v9393_v30, %v6888_v62  ;;  %v3281_v49 = vmul.f32 %v3274_v20, %v9520_v15  ;;  %v3282_v53 = vmul.f32 %v3278_v37, %v9520_v15 }
 0x270   : > { %4544 = vrot.lane.b32.xlu0 %v9220_v45, %s12012_s15  ;;  %v3329_v5 = vmul.f32 %v12018_v31, %v9738_v43  ;;  %v3253_v3 = vrot.slane %v3251_v8, 6  ;;  %v12020_v31 = vrot.slane %v9393_v30, %v6899_v1  ;;  %v12023_v8 = vrot.slane %v9337_v22, %v6888_v62  ;;  %s6318_s15 = sshll.u32 %s6551_s25, 8  ;;  %s6410_s25 = scalar_lea.vmem %s11157_s18, 256 }
 0x271   : > { %v3409_v14 = vpop.permute.xlu1 %3408  ;;  %v12024_v15 = vrot.slane %v9337_v22, %v6891_v63  ;;  %v3355_v30 = vrot.slane %v3332_v35, %v6881_v58  ;;  %v3254_v37 = vrot.slane %v3252_v60, 6  ;;  %v3391_v22 = vrot.slane %v3332_v35, %v6899_v1  ;;  %p6411_p11 = scmp.ne.s32.totalorder %s11157_s18, %s6410_s25 }
 0x272   : > { %4580 = vperm.xlu1 %6402, %v6284_v50   ;;  %v3330_v6 = vmul.f32 %v12020_v31, %v9764_v27  ;;  %v9802_v42 = vmul.f32 %v12023_v8, %v9597_v12  ;;  %v3287_v31 = vcombine.low %v3279_v52, %v3280_v19  ;;  %v3257_v52 = vadd.f32 %v3253_v3, %v9401_v9 }
 0x273   : > { %v3411_v55 = vpop.permute.xlu0 %3410  ;;  %v9808_v20 = vmul.f32 %v12024_v15, %v9572_v29  ;;  %v3379_v35 = vrot.slane %v3329_v5, %v6899_v1  ;;  %v12025_v9 = vrot.slane %v9415_v39, %v6881_v58  ;;  %p6412_p12 = pnand %p6411_p11, %p6568_p5 }
 0x274   : > { %4616 = vperm.xlu0 %6401, %v6284_v50   ;;  %v3331_v50 = vmul.f32 %v12019_v59, %v9751_v11  ;;  %v9796_v59 = vmul.f32 %v12021_v44, %v9592_v16  ;;  %v3343_v16 = vrot.slane %v3329_v5, %v6881_v58  ;;  %v3347_v60 = vrot.slane %v3330_v6, %v6881_v58 }
 0x275   : > { %v3413_v2 = vpop.permute.xlu1 %3412  ;;  %v9831_v19 = vsel %vm509_vm2, %v3409_v14, %v3411_v55  ;;  %v12026_v5 = vrot.slane %v9415_v39, %v6891_v63  ;;  %v3392_v7 = vmul.f32 %v3379_v35, %v9706_v61  ;;  %p6413_p13 = pneg %p6412_p12 }
 0x276   : > { %4655 = vperm.xlu1 %6402, %v6285_v40   ;;  %12022 = vst [vmem:[#allocation80_spill] sm:$0xff] %v9796_v59  ;;  %v3351_v12 = vrot.slane %v3331_v50, %v6881_v58  ;;  %v3387_v8 = vrot.slane %v3331_v50, %v6899_v1  ;;  %v3359_v50 = vmul.f32 %v3355_v30, %v9679_v41 }
 0x277   : > { %v3415_v26 = vpop.permute.xlu0 %3414 }
 0x278   : > { %4711 = vperm.xlu0 %6401, %v6285_v40   ;;  %v9814_v44 = vsel %vm509_vm2, %v3415_v26, %v3409_v14  ;;  %v9823_v29 = vsel %vm509_vm2, %v3413_v2, %v3415_v26  ;;  %v3288_v40 = vcombine.low %v3281_v49, %v3282_v53  ;;  %v9839_v26 = vsel %vm509_vm2, %v3411_v55, %v3413_v2  ;;  %vm12149_vm2 = vmmov %vm12145_vm0 }
 0x279   : > { %v9816_v10 = vpop.permute.xlu1 %3450  ;;  %v3442_v3 = vmul.f32 %v12025_v9, %v9814_v44  ;;  %v3289_v14 = vrot.slane %v3287_v31, 6  ;;  %v3383_v49 = vrot.slane %v3330_v6, %v6899_v1  ;;  %v3356_v53 = vmul.f32 %v3343_v16, %v9679_v41 }
 0x27a   : > { %4766 = vrot.lane.b32.xlu1 %v9195_v0, %s6489_s13  ;;  %v3445_v30 = vmul.f32 %v12026_v5, %v9823_v29  ;;  %v3358_v55 = vmul.f32 %v3351_v12, %v9679_v41  ;;  %v3394_v54 = vmul.f32 %v3387_v8, %v9706_v61  ;;  %v3395_v9 = vmul.f32 %v3391_v22, %v9706_v61 }
 0x27b   : > { %v9833_v15 = vpop.permute.xlu0 %3486  ;;  %v12027_v31 = vrot.slane %v9415_v39, %v6899_v1  ;;  %v3357_v12 = vmul.f32 %v3347_v60, %v9679_v41  ;;  %v12028_v8 = vrot.slane %v9415_v39, %v6888_v62  ;;  %v3393_v6 = vmul.f32 %v3383_v49, %v9706_v61 }
 0x27c   : > { %4768 = vrot.lane.b32.xlu0 %v9206_v17, %s6489_s13  ;;  %v3365_v36 = vcombine.low %v3358_v55, %v3359_v50  ;;  %v3456_v56 = vrot.slane %v3442_v3, %v6881_v58  ;;  %v3258_v41 = vadd.f32 %v3254_v37, %v9404_v23  ;;  %v3290_v60 = vrot.slane %v3288_v40, 6 }
 0x27d   : > { %v3522_v2 = vpop.permute.xlu1 %3521  ;;  %v3443_v33 = vmul.f32 %v12027_v31, %v9831_v19  ;;  %v3444_v22 = vmul.f32 %v12028_v8, %v9839_v26  ;;  %v6287_v31 = vld [vmem:[%s11204_s3 + $0x1c] sm:$0x3]  ;;  %v3364_v39 = vcombine.low %v3356_v53, %v3357_v12  ;;  %v3468_v8 = vrot.slane %v3445_v30, %v6881_v58 }
 0x27e   : > { %4770 = vrot.lane.b32.xlu1 %v9200_v38, %s6489_s13  ;;  %v3293_v59 = vadd.f32 %v3289_v14, %v3257_v52  ;;  %v3401_v47 = vcombine.low %v3394_v54, %v3395_v9  ;;  %v3492_v23 = vrot.slane %v3442_v3, %v6899_v1  ;;  %v9896_v54 = vld [vmem:[%s11204_s3 + $0x1e] sm:$0x3]  ;;  %v3367_v52 = vrot.slane %v3365_v36, 6 }
 0x27f   : > { %v3524_v5 = vpop.permute.xlu0 %3523  ;;  %v3460_v50 = vrot.slane %v3443_v33, %v6881_v58  ;;  %v3464_v61 = vrot.slane %v3444_v22, %v6881_v58  ;;  %v3500_v49 = vrot.slane %v3444_v22, %v6899_v1  ;;  %v3400_v14 = vcombine.low %v3392_v7, %v3393_v6 }
 0x280   : > { %4772 = vrot.lane.b32.xlu0 %v9220_v45, %s6489_s13  ;;  %v9884_v35 = vsel %vm620_vm3, %v3522_v2, %v3524_v5  ;;  %v3504_v53 = vrot.slane %v3445_v30, %v6899_v1  ;;  %v3469_v55 = vmul.f32 %v3456_v56, %v9816_v10  ;;  %v3366_v9 = vrot.slane %v3364_v39, 6  ;;  %s11155_s13 = scalar_lea.hbm %s11207_s6, %s6318_s15 }
 0x281   : > { %v3526_v16 = vpop.permute.xlu1 %3525  ;;  %v3496_v3 = vrot.slane %v3443_v33, %v6899_v1  ;;  %v3472_v12 = vmul.f32 %v3468_v8, %v9816_v10  ;;  %v12030_v22 = vrot.slane %v9455_v34, %v6899_v1  ;;  %v3470_v28 = vmul.f32 %v3460_v50, %v9816_v10 }
 0x282   : > { %4808 = vperm.xlu1 %6402, %v6287_v31   ;;  %v9891_v37 = vsel %vm620_vm3, %v3524_v5, %v3526_v16  ;;  %v12031_v7 = vrot.slane %v9455_v34, %v6888_v62  ;;  %v3471_v30 = vmul.f32 %v3464_v61, %v9816_v10  ;;  %v3505_v6 = vmul.f32 %v3492_v23, %v9833_v15 }
 0x283   : > { %12029 = vst [vmem:[#allocation14_spill] sm:$0xff] %v9891_v37  ;;  %v3528_v40 = vpop.permute.xlu0 %3527  ;;  %v3556_v5 = vmul.f32 %v12030_v22, %v9884_v35  ;;  %v3507_v39 = vmul.f32 %v3500_v49, %v9833_v15  ;;  %v3477_v50 = vcombine.low %v3469_v55, %v3470_v28  ;;  %v3508_v22 = vmul.f32 %v3504_v53, %v9833_v15 }
 0x284   : > { %4844 = vperm.xlu0 %6401, %v6287_v31   ;;  %v3557_v36 = vmul.f32 %v12031_v7, %v9891_v37  ;;  %v9913_v56 = vsel %vm620_vm3, %v3526_v16, %v3528_v40  ;;  %v9917_v33 = vsel %vm620_vm3, %v3528_v40, %v3522_v2  ;;  %v3506_v31 = vmul.f32 %v3496_v3, %v9833_v15  ;;  %vm12150_vm3 = vmmov %vm12145_vm0 }
 0x285   : > { %v3564_v25 = vpop.permute.xlu1 %3563  ;;  %12032 = vst [vmem:[#allocation77_spill] sm:$0xff] %v9913_v56  ;;  %12033 = vst [vmem:[#allocation78_spill] sm:$0xff] %v9917_v33  ;;  %v12034_v16 = vrot.slane %v9455_v34, %v6881_v58  ;;  %v12035_v40 = vrot.slane %v9455_v34, %v6891_v63  ;;  %v3294_v61 = vadd.f32 %v3290_v60, %v3258_v41  ;;  %v3403_v23 = vrot.slane %v3401_v47, 6 }
 0x286   : > { %4921 = vperm.xlu1 %6402, %v9896_v54   ;;  %v3478_v49 = vcombine.low %v3471_v30, %v3472_v12  ;;  %v3573_v28 = vrot.slane %v3556_v5, %v6881_v58  ;;  %v3402_v15 = vrot.slane %v3400_v14, 6  ;;  %v3577_v53 = vrot.slane %v3557_v36, %v6881_v58 }
 0x287   : > { %v3600_v8 = vpop.permute.xlu0 %3599  ;;  %v3555_v2 = vmul.f32 %v12034_v16, %v9917_v33  ;;  %v3558_v10 = vmul.f32 %v12035_v40, %v9913_v56  ;;  %v3370_v34 = vadd.f32 %v3366_v9, %v3293_v59  ;;  %v3371_v16 = vadd.f32 %v3367_v52, %v3294_v61 }
 0x288   : > { %4879 = vrot.lane.b32.xlu0 %v9195_v0, %s6490_s29  ;;  %v3513_v40 = vcombine.low %v3505_v6, %v3506_v31  ;;  %v3479_v60 = vrot.slane %v3477_v50, 6  ;;  %v3514_v12 = vcombine.low %v3507_v39, %v3508_v22  ;;  %v3480_v14 = vrot.slane %v3478_v49, 6 }
 0x289   : > { %v3635_v55 = vpop.permute.xlu1 %3634  ;;  %v3569_v3 = vrot.slane %v3555_v2, %v6881_v58  ;;  %v3581_v7 = vrot.slane %v3558_v10, %v6881_v58  ;;  %v3605_v41 = vrot.slane %v3555_v2, %v6899_v1  ;;  %v3609_v56 = vrot.slane %v3556_v5, %v6899_v1 }
 0x28a   : > { %4881 = vrot.lane.b32.xlu1 %v9206_v17, %s6490_s29  ;;  %v3583_v37 = vmul.f32 %v3573_v28, %v3564_v25  ;;  %v3613_v52 = vrot.slane %v3557_v36, %v6899_v1  ;;  %v3617_v9 = vrot.slane %v3558_v10, %v6899_v1  ;;  %v3584_v6 = vmul.f32 %v3577_v53, %v3564_v25 }
 0x28b   : > { %v3637_v47 = vpop.permute.xlu0 %3636  ;;  %v3582_v30 = vmul.f32 %v3569_v3, %v3564_v25  ;;  %v3585_v33 = vmul.f32 %v3581_v7, %v3564_v25  ;;  %v12036_v31 = vrot.slane %v9483_v24, %v6899_v1  ;;  %v3406_v5 = vadd.f32 %v3402_v15, %v3370_v34  ;;  %v9964_v25 = vld [vmem:[%s11204_s3 + $0x20] sm:$0x3] }
 0x28c   : > { %4883 = vrot.lane.b32.xlu0 %v9200_v38, %s6490_s29  ;;  %v9947_v13 = vsel %vm731_vm4, %v3635_v55, %v3637_v47  ;;  %v3618_v50 = vmul.f32 %v3605_v41, %v3600_v8  ;;  %v3619_v22 = vmul.f32 %v3609_v56, %v3600_v8  ;;  %v3407_v36 = vadd.f32 %v3403_v23, %v3371_v16 }
 0x28d   : > { %v3639_v59 = vpop.permute.xlu1 %3638  ;;  %v3669_v39 = vmul.f32 %v12036_v31, %v9947_v13  ;;  %v3590_v10 = vcombine.low %v3582_v30, %v3583_v37  ;;  %v3591_v49 = vcombine.low %v3584_v6, %v3585_v33  ;;  %v3483_v15 = vadd.f32 %v3479_v60, %v3406_v5 }
 0x28e   : > { %4885 = vrot.lane.b32.xlu1 %v9220_v45, %s6490_s29  ;;  %v9959_v2 = vsel %vm731_vm4, %v3637_v47, %v3639_v59  ;;  %v3515_v53 = vrot.slane %v3513_v40, 6  ;;  %v3516_v3 = vrot.slane %v3514_v12, 6  ;;  %v3484_v34 = vadd.f32 %v3480_v14, %v3407_v36  ;;  %s6414_s29 = sshll.u32 %s6494_s28, 4  ;;  %s6415_s29 = int_to_ptr.vmem [resolvable:$false] %s6414_s29 }
 0x28f   : > { %v3641_v61 = vpop.permute.xlu0 %3640  ;;  %v3686_v28 = vrot.slane %v3669_v39, %v6881_v58  ;;  %v3620_v41 = vmul.f32 %v3613_v52, %v3600_v8  ;;  %v3621_v47 = vmul.f32 %v3617_v9, %v3600_v8  ;;  %v12037_v23 = vrot.slane %v9483_v24, %v6888_v62  ;;  %s6416_s14 = scalar_lea.vmem %s6415_s29, 512  ;;  %p6417_p0 = scmp.lt.s32.totalorder %s11157_s18, %s6415_s29 }
 0x290   : > { %4957 = vperm.xlu0 %6401, %v9896_v54   ;;  %v3626_v33 = vcombine.low %v3618_v50, %v3619_v22  ;;  %v9977_v54 = vsel %vm731_vm4, %v3639_v59, %v3641_v61  ;;  %v9981_v16 = vsel %vm731_vm4, %v3641_v61, %v3635_v55  ;;  %v3592_v12 = vrot.slane %v3590_v10, 6  ;;  %p6418_p1 = scmp.lt.s32.totalorder %s6416_s14, %s6410_s25 }
 0x291   : > { %v3677_v7 = vpop.permute.xlu1 %3676  ;;  %v3670_v37 = vmul.f32 %v12037_v23, %v9959_v2  ;;  %v3593_v8 = vrot.slane %v3591_v49, 6  ;;  %v3722_v30 = vrot.slane %v3669_v39, %v6899_v1  ;;  %v3519_v52 = vadd.f32 %v3515_v53, %v3483_v15 }
 0x292   : > { %5034 = vperm.xlu1 %6402, %v9964_v25   ;;  %v3696_v40 = vmul.f32 %v3686_v28, %v3677_v7  ;;  %v12038_v59 = vrot.slane %v9483_v24, %v6881_v58  ;;  %v12039_v6 = vrot.slane %v9483_v24, %v6891_v63  ;;  %v3520_v39 = vadd.f32 %v3516_v3, %v3484_v34  ;;  %p6419_p2 = por %p6418_p1, %p6417_p0 }
 0x293   : > { %v3713_v60 = vpop.permute.xlu0 %3712  ;;  %v3690_v14 = vrot.slane %v3670_v37, %v6881_v58  ;;  %v3726_v9 = vrot.slane %v3670_v37, %v6899_v1  ;;  %v3627_v50 = vcombine.low %v3620_v41, %v3621_v47  ;;  %v3596_v53 = vadd.f32 %v3592_v12, %v3519_v52 }
 0x294   : > { %4992 = vrot.lane.b32.xlu0 %v9195_v0, %s6491_s20  ;;  %v3668_v55 = vmul.f32 %v12038_v59, %v9981_v16  ;;  %v3671_v31 = vmul.f32 %v12039_v6, %v9977_v54  ;;  %v3732_v61 = vmul.f32 %v3722_v30, %v3713_v60  ;;  %v3597_v3 = vadd.f32 %v3593_v8, %v3520_v39  ;;  %p6420_p3 = pnand %p6419_p2, %p6413_p13 }
 0x295   : > { %v3748_v5 = vpop.permute.xlu1 %3747  ;;  %v3697_v22 = vmul.f32 %v3690_v14, %v3677_v7  ;;  %v3628_v34 = vrot.slane %v3626_v33, 6  ;;  %v3733_v37 = vmul.f32 %v3726_v9, %v3713_v60  ;;  %v3629_v14 = vrot.slane %v3627_v50, 6  ;;  %v10023_v9 = vld [vmem:[%s11204_s3 + $0x22] sm:$0x3] }
 0x296   : > { %4994 = vrot.lane.b32.xlu1 %v9206_v17, %s6491_s20  ;;  %v3682_v36 = vrot.slane %v3668_v55, %v6881_v58  ;;  %v3694_v10 = vrot.slane %v3671_v31, %v6881_v58  ;;  %v3718_v49 = vrot.slane %v3668_v55, %v6899_v1  ;;  %v3730_v28 = vrot.slane %v3671_v31, %v6899_v1  ;;  %v10028_v31 = vld [vmem:[%s11206_s5 + $0x28] sm:$0xf] }
 0x297   : > { %v3750_v15 = vpop.permute.xlu0 %3749 }
 0x298   : > { %4996 = vrot.lane.b32.xlu0 %v9200_v38, %s6491_s20  ;;  %v3695_v41 = vmul.f32 %v3682_v36, %v3677_v7  ;;  %v3698_v47 = vmul.f32 %v3694_v10, %v3677_v7  ;;  %v3731_v23 = vmul.f32 %v3718_v49, %v3713_v60  ;;  %v3734_v59 = vmul.f32 %v3730_v28, %v3713_v60 }
 0x299   : > { %v3752_v30 = vpop.permute.xlu1 %3751  ;;  %v10008_v55 = vsel %vm842_vm5, %v3748_v5, %v3750_v15  ;;  %v12040_v7 = vrot.slane %v9513_v18, %v6899_v1  ;;  %v3632_v36 = vadd.f32 %v3628_v34, %v3596_v53  ;;  %v3633_v10 = vadd.f32 %v3629_v14, %v3597_v3 }
 0x29a   : > { %v10012_v6 = vsel %vm842_vm5, %v3750_v15, %v3752_v30  ;;  %4998 = vrot.lane.b32.xlu1 %v9220_v45, %s6491_s20  ;;  %v3703_v33 = vcombine.low %v3695_v41, %v3696_v40  ;;  %v3704_v12 = vcombine.low %v3697_v22, %v3698_v47  ;;  %v3739_v8 = vcombine.low %v3731_v23, %v3732_v61 }
 0x29b   : > { %v3782_v52 = vmul.f32 %v12040_v7, %v10008_v55  ;;  %v3754_v60 = vpop.permute.xlu0 %3753  ;;  %v3740_v50 = vcombine.low %v3733_v37, %v3734_v59  ;;  %v12041_v22 = vrot.slane %v9513_v18, %v6888_v62 }
 0x29c   : > { %5070 = vperm.xlu0 %6401, %v9964_v25   ;;  %v3705_v49 = vrot.slane %v3703_v33, 6  ;;  %v3706_v28 = vrot.slane %v3704_v12, 6  ;;  %v3741_v41 = vrot.slane %v3739_v8, 6  ;;  %v10048_v3 = vsel %vm842_vm5, %v3752_v30, %v3754_v60 }
 0x29d   : > { %v3783_v61 = vmul.f32 %v12041_v22, %v10012_v6  ;;  %v3790_v15 = vpop.permute.xlu1 %3789  ;;  %v3799_v47 = vrot.slane %v3782_v52, %v6881_v58  ;;  %v3742_v22 = vrot.slane %v3740_v50, 6  ;;  %v10052_v34 = vsel %vm842_vm5, %v3754_v60, %v3748_v5 }
 0x29e   : > { %5147 = vperm.xlu1 %6402, %v10023_v9   ;;  %v3709_v59 = vadd.f32 %v3705_v49, %v3632_v36  ;;  %v3710_v7 = vadd.f32 %v3706_v28, %v3633_v10  ;;  %v12042_v30 = vrot.slane %v9513_v18, %v6881_v58  ;;  %v12043_v5 = vrot.slane %v9513_v18, %v6891_v63 }
 0x29f   : > { %v3803_v25 = vrot.slane %v3783_v61, %v6881_v58  ;;  %v3826_v53 = vpop.permute.xlu0 %3825  ;;  %v3835_v10 = vrot.slane %v3782_v52, %v6899_v1  ;;  %v3839_v49 = vrot.slane %v3783_v61, %v6899_v1  ;;  %v3809_v28 = vmul.f32 %v3799_v47, %v3790_v15 }
 0x2a0   : > { %5105 = vrot.lane.b32.xlu0 %v9195_v0, %s6492_s9  ;;  %v3745_v12 = vadd.f32 %v3741_v41, %v3709_v59  ;;  %v3746_v8 = vadd.f32 %v3742_v22, %v3710_v7  ;;  %v3781_v50 = vmul.f32 %v12042_v30, %v10052_v34  ;;  %v3784_v60 = vmul.f32 %v12043_v5, %v10048_v3  ;;  %v10071_v0 = vld [vmem:[%s11206_s5 + $0x2c] sm:$0xf] }
 0x2a1   : > { %v3861_v36 = vpop.permute.xlu1 %3860  ;;  %v3810_v41 = vmul.f32 %v3803_v25, %v3790_v15  ;;  %v12044_v52 = vrot.slane %v9398_v21, %v6881_v58  ;;  %v12045_v61 = vrot.slane %v9398_v21, %v6899_v1  ;;  %v3846_v40 = vmul.f32 %v3839_v49, %v3826_v53  ;;  %v6295_v49 = vld [vmem:[%s11204_s3 + $0x24] sm:$0x3] }
 0x2a2   : > { %5107 = vrot.lane.b32.xlu1 %v9206_v17, %s6492_s9  ;;  %v3795_v59 = vrot.slane %v3781_v50, %v6881_v58  ;;  %v3807_v18 = vrot.slane %v3784_v60, %v6881_v58  ;;  %v3831_v7 = vrot.slane %v3781_v50, %v6899_v1  ;;  %v3843_v22 = vrot.slane %v3784_v60, %v6899_v1 }
 0x2a3   : > { %v3863_v30 = vpop.permute.xlu0 %3862  ;;  %v10085_v5 = vmul.f32 %v12044_v52, %v9764_v27  ;;  %v10091_v17 = vmul.f32 %v12045_v61, %v9751_v11  ;;  %v3845_v27 = vmul.f32 %v3835_v10, %v3826_v53 }
 0x2a4   : > { %5109 = vrot.lane.b32.xlu0 %v9200_v38, %s6492_s9  ;;  %v3808_v50 = vmul.f32 %v3795_v59, %v3790_v15  ;;  %v3811_v60 = vmul.f32 %v3807_v18, %v3790_v15  ;;  %v3844_v39 = vmul.f32 %v3831_v7, %v3826_v53  ;;  %v3847_v24 = vmul.f32 %v3843_v22, %v3826_v53 }
 0x2a5   : > { %12046 = vst [vmem:[#allocation72_spill] sm:$0xff] %v10091_v17  ;;  %v3865_v52 = vpop.permute.xlu1 %3864  ;;  %v10101_v11 = vsel %vm953_vm6, %v3861_v36, %v3863_v30  ;;  %v12047_v15 = vrot.slane %v9556_v32, %v6899_v1  ;;  %v12048_v7 = vrot.slane %v9556_v32, %v6888_v62 }
 0x2a6   : > { %v10105_v38 = vsel %vm953_vm6, %v3863_v30, %v3865_v52  ;;  %5111 = vrot.lane.b32.xlu1 %v9220_v45, %s6492_s9  ;;  %v3816_v61 = vcombine.low %v3808_v50, %v3809_v28  ;;  %v3817_v56 = vcombine.low %v3810_v41, %v3811_v60  ;;  %v3852_v59 = vcombine.low %v3844_v39, %v3845_v27  ;;  %v6297_v41 = vld [vmem:[%s11204_s3 + $0x26] sm:$0x3] }
 0x2a7   : > { %v3895_v10 = vmul.f32 %v12047_v15, %v10101_v11  ;;  %v3867_v53 = vpop.permute.xlu0 %3866  ;;  %v3853_v18 = vcombine.low %v3846_v40, %v3847_v24  ;;  %v3896_v22 = vmul.f32 %v12048_v7, %v10105_v38 }
 0x2a8   : > { %5183 = vperm.xlu0 %6401, %v10023_v9   ;;  %v3818_v24 = vrot.slane %v3816_v61, 6  ;;  %v3819_v40 = vrot.slane %v3817_v56, 6  ;;  %v12049_v9 = vrot.slane %v9398_v21, %v6888_v62  ;;  %v3854_v27 = vrot.slane %v3852_v59, 6 }
 0x2a9   : > { %v3903_v30 = vpop.permute.xlu1 %3902  ;;  %v3912_v15 = vrot.slane %v3895_v10, %v6881_v58  ;;  %v3855_v25 = vrot.slane %v3853_v18, 6  ;;  %v3916_v61 = vrot.slane %v3896_v22, %v6881_v58  ;;  %v3952_v50 = vrot.slane %v3896_v22, %v6899_v1 }
 0x2aa   : > { %v10135_v60 = vmul.f32 %v12049_v9, %v9725_v4  ;;  %5248 = vperm.xlu1 %6402, %v6295_v49   ;;  %v3822_v7 = vadd.f32 %v3818_v24, %v3745_v12  ;;  %v3823_v28 = vadd.f32 %v3819_v40, %v3746_v8  ;;  %v12051_v4 = vrot.slane %v9398_v21, %v6891_v63 }
 0x2ab   : > { %v3939_v56 = vpop.permute.xlu0 %3938  ;;  %v10152_v12 = vsel %vm953_vm6, %v3865_v52, %v3867_v53  ;;  %v10156_v8 = vsel %vm953_vm6, %v3867_v53, %v3861_v36  ;;  %v12053_v40 = vrot.slane %v9556_v32, %v6881_v58  ;;  %v12054_v21 = vrot.slane %v9556_v32, %v6891_v63  ;;  %v6299_v32 = vld [vmem:[%s11204_s3 + $0x28] sm:$0x3] }
 0x2ac   : > { %12050 = vst [vmem:[#allocation69_spill] sm:$0xff] %v10135_v60  ;;  %v10148_v59 = vmul.f32 %v12051_v4, %v9738_v43  ;;  %5284 = vperm.xlu0 %6401, %v6295_v49   ;;  %v3858_v18 = vadd.f32 %v3854_v27, %v3822_v7  ;;  %v3859_v24 = vadd.f32 %v3855_v25, %v3823_v28 }
 0x2ad   : > { %v3894_v9 = vmul.f32 %v12053_v40, %v10156_v8  ;;  %v3897_v43 = vmul.f32 %v12054_v21, %v10152_v12  ;;  %v3974_v4 = vpop.permute.xlu1 %3973  ;;  %v3948_v52 = vrot.slane %v3895_v10, %v6899_v1  ;;  %v3922_v36 = vmul.f32 %v3912_v15, %v3903_v30  ;;  %v10190_v10 = vld [vmem:[%s11206_s5 + $0x30] sm:$0xf] }
 0x2ae   : > { %12052 = vst [vmem:[#allocation70_spill] sm:$0xff] %v10148_v59  ;;  %v3923_v53 = vmul.f32 %v3916_v61, %v3903_v30  ;;  %5349 = vperm.xlu1 %6402, %v6297_v41   ;;  %v12055_v61 = vrot.slane %v9420_v51, %v6881_v58  ;;  %v3959_v22 = vmul.f32 %v3952_v50, %v3939_v56  ;;  %v6301_v50 = vld [vmem:[%s11204_s3 + $0x2a] sm:$0x3] }
 0x2af   : > { %v3908_v25 = vrot.slane %v3894_v9, %v6881_v58  ;;  %v3920_v49 = vrot.slane %v3897_v43, %v6881_v58  ;;  %v3944_v28 = vrot.slane %v3894_v9, %v6899_v1  ;;  %v3956_v27 = vrot.slane %v3897_v43, %v6899_v1  ;;  %v3976_v7 = vpop.permute.xlu0 %3975 }
 0x2b0   : > { %v10185_v40 = vmul.f32 %v12055_v61, %v9831_v19  ;;  %5385 = vperm.xlu0 %6401, %v6297_v41   ;;  %v3958_v39 = vmul.f32 %v3948_v52, %v3939_v56  ;;  %v10194_v15 = vsel %vm1064_vm7, %v3974_v4, %v3976_v7 }
 0x2b1   : > { %v3921_v9 = vmul.f32 %v3908_v25, %v3903_v30  ;;  %v3924_v21 = vmul.f32 %v3920_v49, %v3903_v30  ;;  %v3957_v43 = vmul.f32 %v3944_v28, %v3939_v56  ;;  %v3978_v47 = vpop.permute.xlu1 %3977  ;;  %v3960_v45 = vmul.f32 %v3956_v27, %v3939_v56 }
 0x2b2   : > { %12056 = vst [vmem:[#allocation73_spill] sm:$0xff] %v10185_v40  ;;  %v10198_v19 = vsel %vm1064_vm7, %v3976_v7, %v3978_v47  ;;  %5450 = vperm.xlu1 %6402, %v6299_v32   ;;  %v12057_v25 = vrot.slane %v9606_v48, %v6899_v1 }
 0x2b3   : > { %v3929_v41 = vcombine.low %v3921_v9, %v3922_v36  ;;  %v3930_v30 = vcombine.low %v3923_v53, %v3924_v21  ;;  %v3965_v52 = vcombine.low %v3957_v43, %v3958_v39  ;;  %v3980_v28 = vpop.permute.xlu0 %3979  ;;  %v3966_v27 = vcombine.low %v3959_v22, %v3960_v45  ;;  %v6303_v21 = vld [vmem:[%s11204_s3 + $0x2c] sm:$0x3] }
 0x2b4   : > { %v4008_v49 = vmul.f32 %v12057_v25, %v10194_v15  ;;  %v12058_v36 = vrot.slane %v9606_v48, %v6888_v62  ;;  %5486 = vperm.xlu0 %6401, %v6299_v32  }
 0x2b5   : > { %v3931_v7 = vrot.slane %v3929_v41, 6  ;;  %v3932_v61 = vrot.slane %v3930_v30, 6  ;;  %v4016_v9 = vpop.permute.xlu1 %4015  ;;  %v3967_v22 = vrot.slane %v3965_v52, 6  ;;  %v3968_v30 = vrot.slane %v3966_v27, 6 }
 0x2b6   : > { %v4009_v53 = vmul.f32 %v12058_v36, %v10198_v19  ;;  %v4025_v25 = vrot.slane %v4008_v49, %v6881_v58  ;;  %5551 = vperm.xlu1 %6402, %v6301_v50   ;;  %v12059_v52 = vrot.slane %v9420_v51, %v6899_v1 }
 0x2b7   : > { %v3935_v36 = vadd.f32 %v3931_v7, %v3858_v18  ;;  %v3936_v41 = vadd.f32 %v3932_v61, %v3859_v24  ;;  %v4052_v39 = vpop.permute.xlu0 %4051  ;;  %v10238_v18 = vsel %vm1064_vm7, %v3978_v47, %v3980_v28  ;;  %v10242_v24 = vsel %vm1064_vm7, %v3980_v28, %v3974_v4 }
 0x2b8   : > { %v4029_v56 = vrot.slane %v4009_v53, %v6881_v58  ;;  %v10234_v43 = vmul.f32 %v12059_v52, %v9839_v26  ;;  %5587 = vperm.xlu0 %6401, %v6301_v50   ;;  %v12061_v61 = vrot.slane %v9606_v48, %v6881_v58  ;;  %v12062_v26 = vrot.slane %v9606_v48, %v6891_v63  ;;  %v6305_v48 = vld [vmem:[%s11204_s3 + $0x2e] sm:$0x3] }
 0x2b9   : > { %v3971_v27 = vadd.f32 %v3967_v22, %v3935_v36  ;;  %v3972_v7 = vadd.f32 %v3968_v30, %v3936_v41  ;;  %v4087_v32 = vpop.permute.xlu1 %4086  ;;  %v4061_v47 = vrot.slane %v4008_v49, %v6899_v1  ;;  %v4065_v23 = vrot.slane %v4009_v53, %v6899_v1 }
 0x2ba   : > { %12060 = vst [vmem:[#allocation67_spill] sm:$0xff] %v10234_v43  ;;  %v4007_v45 = vmul.f32 %v12061_v61, %v10242_v24  ;;  %v4010_v52 = vmul.f32 %v12062_v26, %v10238_v18  ;;  %v4035_v4 = vmul.f32 %v4025_v25, %v4016_v9  ;;  %v4036_v28 = vmul.f32 %v4029_v56, %v4016_v9 }
 0x2bb   : > { %5652 = vperm.xlu1 %6402, %v6303_v21   ;;  %v4089_v30 = vpop.permute.xlu0 %4088  ;;  %v12063_v53 = vrot.slane %v9420_v51, %v6888_v62  ;;  %v4071_v49 = vmul.f32 %v4061_v47, %v4052_v39  ;;  %v4072_v33 = vmul.f32 %v4065_v23, %v4052_v39  ;;  %v6307_v23 = vld [vmem:[%s11204_s3 + $0x30] sm:$0x3] }
 0x2bc   : > { %v4021_v50 = vrot.slane %v4007_v45, %v6881_v58  ;;  %v4033_v22 = vrot.slane %v4010_v52, %v6881_v58  ;;  %v4057_v36 = vrot.slane %v4007_v45, %v6899_v1  ;;  %v4069_v41 = vrot.slane %v4010_v52, %v6899_v1  ;;  %5688 = vperm.xlu0 %6401, %v6303_v21  }
 0x2bd   : > { %v10269_v25 = vmul.f32 %v12063_v53, %v9823_v29  ;;  %v12065_v45 = vrot.slane %v9420_v51, %v6891_v63  ;;  %v4091_v37 = vpop.permute.xlu1 %4090  ;;  %v10279_v43 = vsel %vm1175_vm8, %v4087_v32, %v4089_v30 }
 0x2be   : > { %v4034_v26 = vmul.f32 %v4021_v50, %v4016_v9  ;;  %v4037_v52 = vmul.f32 %v4033_v22, %v4016_v9  ;;  %v4070_v14 = vmul.f32 %v4057_v36, %v4052_v39  ;;  %v4073_v56 = vmul.f32 %v4069_v41, %v4052_v39  ;;  %v10295_v39 = vld [vmem:[%s11206_s5 + $0x38] sm:$0xf]  ;;  %v6309_v41 = vld [vmem:[%s11204_s3 + $0x32] sm:$0x3] }
 0x2bf   : > { %12064 = vst [vmem:[#allocation11_spill] sm:$0xff] %v10269_v25  ;;  %v10275_v61 = vmul.f32 %v12065_v45, %v9814_v44  ;;  %v10283_v29 = vsel %vm1175_vm8, %v4089_v30, %v4091_v37  ;;  %5753 = vperm.xlu1 %6402, %v6305_v48   ;;  %v12067_v9 = vrot.slane %v9658_v46, %v6899_v1  ;;  %v4093_v47 = vpop.permute.xlu0 %4092 }
 0x2c0   : > { %v4042_v51 = vcombine.low %v4034_v26, %v4035_v4  ;;  %v4043_v44 = vcombine.low %v4036_v28, %v4037_v52  ;;  %v4078_v53 = vcombine.low %v4070_v14, %v4071_v49  ;;  %v4079_v28 = vcombine.low %v4072_v33, %v4073_v56  ;;  %5789 = vperm.xlu0 %6401, %v6305_v48   ;;  %v12069_v26 = vld [vmem:[#allocation48_spill] sm:$0xff]  ;;  %v12072_v4 = vld [vmem:[#allocation14_spill] sm:$0xff] }
 0x2c1   : > { %12066 = vst [vmem:[#allocation74_spill] sm:$0xff] %v10275_v61  ;;  %v4121_v21 = vmul.f32 %v12067_v9, %v10279_v43  ;;  %v12068_v50 = vrot.slane %v9658_v46, %v6888_v62  ;;  %v4129_v45 = vpop.permute.xlu1 %4128  ;;  %v12070_v52 = vrot.slane %v12069_v26, %v6881_v58  ;;  %v12075_v48 = vrot.slane %v12069_v26, %v6888_v62 }
 0x2c2   : > { %v4044_v30 = vrot.slane %v4042_v51, 6  ;;  %v4045_v49 = vrot.slane %v4043_v44, 6  ;;  %v4080_v56 = vrot.slane %v4078_v53, 6  ;;  %v4081_v14 = vrot.slane %v4079_v28, 6 }
 0x2c3   : > { %v4122_v22 = vmul.f32 %v12068_v50, %v10283_v29  ;;  %v10313_v33 = vmul.f32 %v12070_v52, %v9884_v35  ;;  %v4138_v9 = vrot.slane %v4121_v21, %v6881_v58  ;;  %5854 = vperm.xlu1 %6402, %v6307_v23   ;;  %v4165_v44 = vpop.permute.xlu0 %4164  ;;  %v12073_v35 = vrot.slane %v12069_v26, %v6899_v1  ;;  %v12074_v52 = vld [vmem:[#allocation77_spill] sm:$0xff] }
 0x2c4   : > { %v4048_v50 = vadd.f32 %v4044_v30, %v3971_v27  ;;  %v4049_v36 = vadd.f32 %v4045_v49, %v3972_v7  ;;  %v10332_v27 = vmul.f32 %v12075_v48, %v12074_v52  ;;  %v10336_v7 = vsel %vm1175_vm8, %v4091_v37, %v4093_v47  ;;  %5890 = vperm.xlu0 %6401, %v6307_v23  }
 0x2c5   : > { %12071 = vst [vmem:[#allocation75_spill] sm:$0xff] %v10313_v33  ;;  %v4142_v51 = vrot.slane %v4122_v22, %v6881_v58  ;;  %v10326_v53 = vmul.f32 %v12073_v35, %v12072_v4  ;;  %v10340_v28 = vsel %vm1175_vm8, %v4093_v47, %v4087_v32  ;;  %v12076_v4 = vrot.slane %v9658_v46, %v6881_v58  ;;  %v10350_v61 = vpop.permute.xlu1 %4199 }
 0x2c6   : > { %v4084_v30 = vadd.f32 %v4080_v56, %v4048_v50  ;;  %v4085_v49 = vadd.f32 %v4081_v14, %v4049_v36  ;;  %v12077_v48 = vrot.slane %v9658_v46, %v6891_v63  ;;  %v4174_v37 = vrot.slane %v4121_v21, %v6899_v1  ;;  %v6311_v46 = vld [vmem:[%s11204_s3 + $0x34] sm:$0x3] }
 0x2c7   : > { %v4120_v35 = vmul.f32 %v12076_v4, %v10340_v28  ;;  %v4178_v32 = vrot.slane %v4122_v22, %v6899_v1  ;;  %v4148_v47 = vmul.f32 %v4138_v9, %v4129_v45  ;;  %v4149_v23 = vmul.f32 %v4142_v51, %v4129_v45  ;;  %5955 = vperm.xlu1 %6402, %v6309_v41   ;;  %v10358_v4 = vpop.permute.xlu0 %4201  ;;  %v12078_v9 = vld [vmem:[#allocation78_spill] sm:$0xff] }
 0x2c8   : > { %v4123_v52 = vmul.f32 %v12077_v48, %v10336_v7  ;;  %v12079_v51 = vrot.slane %v12069_v26, %v6891_v63  ;;  %5991 = vperm.xlu0 %6401, %v6309_v41   ;;  %v4184_v59 = vmul.f32 %v4174_v37, %v4165_v44 }
 0x2c9   : > { %v4134_v14 = vrot.slane %v4120_v35, %v6881_v58  ;;  %v4170_v56 = vrot.slane %v4120_v35, %v6899_v1  ;;  %v4204_v60 = vpop.permute.xlu1 %4203  ;;  %v4185_v33 = vmul.f32 %v4178_v32, %v4165_v44 }
 0x2ca   : > { %v4146_v36 = vrot.slane %v4123_v52, %v6881_v58  ;;  %v4182_v50 = vrot.slane %v4123_v52, %v6899_v1  ;;  %v10371_v48 = vmul.f32 %v12079_v51, %v12078_v9 }
 0x2cb   : > { %v4147_v52 = vmul.f32 %v4134_v14, %v4129_v45  ;;  %v4183_v40 = vmul.f32 %v4170_v56, %v4165_v44  ;;  %6056 = vperm.xlu1 %6402, %v6311_v46   ;;  %v4206_v14 = vpop.permute.xlu0 %4205 }
 0x2cc   : > { %v4150_v25 = vmul.f32 %v4146_v36, %v4129_v45  ;;  %v4186_v17 = vmul.f32 %v4182_v50, %v4165_v44  ;;  %v12080_v36 = vld [vmem:[#allocation49_spill] sm:$0xff]  ;;  %6092 = vperm.xlu0 %6401, %v6311_v46  }
 0x2cd   : > { %v4155_v26 = vcombine.low %v4147_v52, %v4148_v47  ;;  %v4191_v51 = vcombine.low %v4183_v40, %v4184_v59  ;;  %v12081_v56 = vrot.slane %v12080_v36, %v6881_v58  ;;  %v12082_v59 = vrot.slane %v12080_v36, %v6899_v1  ;;  %v10399_v50 = vpop.permute.xlu1 %4241 }
 0x2ce   : > { %v4156_v9 = vcombine.low %v4149_v23, %v4150_v25  ;;  %v4192_v44 = vcombine.low %v4185_v33, %v4186_v17  ;;  %v12083_v17 = vrot.slane %v12080_v36, %v6888_v62 }
 0x2cf   : > { %v10389_v32 = vmul.f32 %v12081_v56, %v9947_v13  ;;  %v10397_v40 = vmul.f32 %v12082_v59, %v9959_v2  ;;  %v4157_v25 = vrot.slane %v4155_v26, 6  ;;  %v10404_v13 = vld [vmem:[%s11206_s5 + $0x3c] sm:$0xf]  ;;  %v12084_v2 = vrot.slane %v12080_v36, %v6891_v63  ;;  %v10422_v37 = vpop.permute.xlu0 %4277 }
 0x2d0   : > { %v4158_v23 = vrot.slane %v4156_v9, 6  ;;  %v10410_v33 = vmul.f32 %v12083_v17, %v9977_v54  ;;  %v4193_v59 = vrot.slane %v4191_v51, 6  ;;  %v4194_v47 = vrot.slane %v4192_v44, 6 }
 0x2d1   : > { %v10416_v46 = vmul.f32 %v12084_v2, %v9981_v16  ;;  %v4161_v9 = vadd.f32 %v4157_v25, %v4084_v30  ;;  %v10444_v2 = vpop.permute.xlu1 %4312  ;;  %v4209_v30 = vsel %vm1286_vm9, %v10350_v61, %v10358_v4 }
 0x2d2   : > { %v4162_v56 = vadd.f32 %v4158_v23, %v4085_v49  ;;  %v12085_v49 = vld [vmem:[#allocation51_spill] sm:$0xff] }
 0x2d3   : > { %v12086_v51 = vrot.slane %v12085_v49, %v6881_v58  ;;  %v10440_v25 = vadd.f32 %v4193_v59, %v4161_v9  ;;  %v4210_v59 = vsel %vm1286_vm9, %v4206_v14, %v10350_v61  ;;  %v10467_v36 = vpop.permute.xlu0 %4314 }
 0x2d4   : > { %v10442_v23 = vadd.f32 %v4194_v47, %v4162_v56  ;;  %v4207_v56 = vsel %vm1286_vm9, %v4204_v60, %v4206_v14  ;;  %v12089_v47 = vrot.slane %v12085_v49, %v6891_v63 }
 0x2d5   : > { %v10438_v44 = vmul.f32 %v12086_v51, %v10008_v55  ;;  %v12087_v55 = vrot.slane %v12085_v49, %v6899_v1  ;;  %v4317_v61 = vpop.permute.xlu1 %4316 }
 0x2d6   : > { %v10479_v9 = vmul.f32 %v12089_v47, %v10052_v34  ;;  %v4208_v47 = vsel %vm1286_vm9, %v10358_v4, %v4204_v60 }
 0x2d7   : > { %v10456_v51 = vmul.f32 %v12087_v55, %v10012_v6  ;;  %v12088_v6 = vrot.slane %v12085_v49, %v6888_v62 }
 0x2d9   : > { %v10473_v55 = vmul.f32 %v12088_v6, %v10048_v3  ;;  %v12090_v6 = vld [vmem:[#allocation52_spill] sm:$0xff]  ;;  %v12093_v3 = vld [vmem:[#allocation65_spill] sm:$0xff] }
 0x2da   : > { %v12091_v49 = vrot.slane %v12090_v6, %v6881_v58  ;;  %v12092_v54 = vrot.slane %v12090_v6, %v6899_v1  ;;  %v12094_v41 = vrot.slane %v12093_v3, %v6881_v58  ;;  %v12096_v4 = vrot.slane %v12090_v6, %v6888_v62 }
 0x2dc   : > { %v10495_v34 = vmul.f32 %v12091_v49, %v10101_v11  ;;  %v10506_v45 = vmul.f32 %v12092_v54, %v10105_v38  ;;  %v4233_v21 = vmul.f32 %v12094_v41, %v4210_v59  ;;  %v12095_v11 = vrot.slane %v12093_v3, %v6891_v63  ;;  %v4319_v59 = vpop.permute.xlu0 %4318 }
 0x2dd   : > { %v10522_v22 = vmul.f32 %v12096_v4, %v10152_v12  ;;  %v12097_v38 = vrot.slane %v12090_v6, %v6891_v63  ;;  %v12099_v41 = vrot.slane %v12093_v3, %v6899_v1  ;;  %v12100_v12 = vld [vmem:[#allocation63_spill] sm:$0xff] }
 0x2de   : > { %v10514_v49 = vmul.f32 %v12095_v11, %v4207_v56  ;;  %v12101_v4 = vrot.slane %v12100_v12, %v6881_v58  ;;  %v12104_v60 = vrot.slane %v12100_v12, %v6899_v1  ;;  %v4283_v17 = vrot.slane %v4233_v21, %v6899_v1 }
 0x2df   : > { %v10528_v54 = vmul.f32 %v12097_v38, %v10156_v8  ;;  %v4234_v56 = vmul.f32 %v12099_v41, %v4209_v30  ;;  %v12103_v8 = vrot.slane %v12093_v3, %v6888_v62  ;;  %v12108_v16 = vrot.slane %v12100_v12, %v6891_v63 }
 0x2e0   : > { %v10541_v14 = vmul.f32 %v12101_v4, %v10194_v15  ;;  %v10556_v11 = vmul.f32 %v12104_v60, %v10198_v19  ;;  %v10558_v15 = vpop.permute.xlu1 %4354  ;;  %v4247_v4 = vrot.slane %v4233_v21, %v6881_v58  ;;  %v10574_v3 = vpop.permute.xlu0 %4390  ;;  %v4320_v19 = vsel %vm1397_vm10, %v4317_v61, %v4319_v59 }
 0x2e1   : > { %12098 = vst [vmem:[#allocation76_spill] sm:$0xff] %v10528_v54  ;;  %v4235_v6 = vmul.f32 %v12103_v8, %v4208_v47  ;;  %v4259_v8 = vrot.slane %v10514_v49, %v6881_v58  ;;  %v4251_v38 = vrot.slane %v4234_v56, %v6881_v58  ;;  %v12106_v47 = vrot.slane %v12100_v12, %v6888_v62 }
 0x2e2   : > { %12102 = vst [vmem:[#allocation27_spill] sm:$0xff] %v10541_v14  ;;  %12105 = vst [vmem:[#allocation89_spill] sm:$0xff] %v10556_v11  ;;  %v4260_v52 = vmul.f32 %v4247_v4, %v10399_v50  ;;  %v10604_v60 = vmul.f32 %v12108_v16, %v10242_v24  ;;  %v4287_v11 = vrot.slane %v4234_v56, %v6899_v1  ;;  %v12110_v56 = vld [vmem:[#allocation64_spill] sm:$0xff] }
 0x2e3   : > { %v4255_v41 = vrot.slane %v4235_v6, %v6881_v58  ;;  %v10593_v26 = vmul.f32 %v12106_v47, %v10238_v18  ;;  %v4263_v35 = vmul.f32 %v4259_v8, %v10399_v50  ;;  %v4291_v18 = vrot.slane %v4235_v6, %v6899_v1 }
 0x2e4   : > { %v4426_v30 = vpop.permute.xlu1 %4425  ;;  %12109 = vst [vmem:[#allocation90_spill] sm:$0xff] %v10604_v60  ;;  %v4261_v47 = vmul.f32 %v4251_v38, %v10399_v50  ;;  %v4428_v21 = vpop.permute.xlu0 %4427  ;;  %v4295_v4 = vrot.slane %v10514_v49, %v6899_v1  ;;  %v4321_v14 = vsel %vm1397_vm10, %v10467_v36, %v4317_v61  ;;  %v4323_v24 = vsel %vm1397_vm10, %v4319_v59, %v10444_v2 }
 0x2e5   : > { %12107 = vst [vmem:[#allocation33_spill] sm:$0xff] %v10593_v26  ;;  %v4262_v8 = vmul.f32 %v4255_v41, %v10399_v50  ;;  %v12111_v12 = vrot.slane %v12110_v56, %v6881_v58  ;;  %v4297_v49 = vmul.f32 %v4287_v11, %v10422_v37  ;;  %v12113_v50 = vrot.slane %v10028_v31, %v6891_v63 }
 0x2e6   : > { %v4268_v41 = vcombine.low %v4260_v52, %v4261_v47  ;;  %v4296_v59 = vmul.f32 %v4283_v17, %v10422_v37  ;;  %v4322_v16 = vsel %vm1397_vm10, %v10444_v2, %v10467_v36  ;;  %v12114_v11 = vrot.slane %v12110_v56, %v6899_v1 }
 0x2e7   : > { %v10624_v6 = vmul.f32 %v12111_v12, %v10279_v43  ;;  %v4349_v38 = vmul.f32 %v12113_v50, %v4320_v19  ;;  %v4269_v54 = vcombine.low %v4262_v8, %v4263_v35  ;;  %v12116_v52 = vrot.slane %v10028_v31, %v6888_v62 }
 0x2e8   : > { %v4430_v61 = vpop.permute.xlu1 %4429  ;;  %v10641_v12 = vmul.f32 %v12114_v11, %v10283_v29  ;;  %v12117_v17 = vrot.slane %v10028_v31, %v6881_v58  ;;  %v4432_v47 = vpop.permute.xlu0 %4431  ;;  %v4298_v8 = vmul.f32 %v4291_v18, %v10422_v37  ;;  %v4299_v29 = vmul.f32 %v4295_v4, %v10422_v37 }
 0x2e9   : > { %12112 = vst [vmem:[#allocation79_spill] sm:$0xff] %v10624_v6  ;;  %v4348_v35 = vmul.f32 %v12116_v52, %v4321_v14  ;;  %v4372_v52 = vrot.slane %v4349_v38, %v6881_v58  ;;  %v4270_v36 = vrot.slane %v4268_v41, 6  ;;  %v4271_v2 = vrot.slane %v4269_v54, 6 }
 0x2ea   : > { %12115 = vst [vmem:[#allocation71_spill] sm:$0xff] %v10641_v12  ;;  %v4346_v19 = vmul.f32 %v12117_v17, %v4323_v24  ;;  %v12118_v24 = vrot.slane %v10028_v31, %v6899_v1  ;;  %v4304_v43 = vcombine.low %v4296_v59, %v4297_v49  ;;  %v4436_v37 = vsel %vm1508_vm11, %v4432_v47, %v4426_v30 }
 0x2eb   : > { %v4368_v14 = vrot.slane %v4348_v35, %v6881_v58  ;;  %v4404_v41 = vrot.slane %v4348_v35, %v6899_v1  ;;  %v4408_v54 = vrot.slane %v4349_v38, %v6899_v1  ;;  %v4435_v49 = vsel %vm1508_vm11, %v4426_v30, %v4428_v21 }
 0x2ec   : > { %v4347_v11 = vmul.f32 %v12118_v24, %v4322_v16  ;;  %v10663_v17 = vpop.permute.xlu1 %4467  ;;  %v4360_v31 = vrot.slane %v4346_v19, %v6881_v58  ;;  %v10673_v16 = vpop.permute.xlu0 %4503  ;;  %v4305_v24 = vcombine.low %v4298_v8, %v4299_v29  ;;  %v4376_v18 = vmul.f32 %v4372_v52, %v10558_v15 }
 0x2ed   : > { %v4433_v4 = vsel %vm1508_vm11, %v4430_v61, %v4432_v47  ;;  %v12119_v50 = vrot.slane %v10071_v0, %v6881_v58  ;;  %v4274_v8 = vadd.f32 %v4270_v36, %v10440_v25  ;;  %v4275_v35 = vadd.f32 %v4271_v2, %v10442_v23 }
 0x2ee   : > { %v4364_v59 = vrot.slane %v4347_v11, %v6881_v58  ;;  %v4306_v38 = vrot.slane %v4304_v43, 6  ;;  %v4396_v29 = vrot.slane %v4346_v19, %v6899_v1  ;;  %v4373_v30 = vmul.f32 %v4360_v31, %v10558_v15 }
 0x2ef   : > { %v4459_v12 = vmul.f32 %v12119_v50, %v4436_v37  ;;  %v4375_v60 = vmul.f32 %v4368_v14, %v10558_v15  ;;  %v12120_v52 = vrot.slane %v10071_v0, %v6899_v1  ;;  %v4434_v26 = vsel %vm1508_vm11, %v4428_v21, %v4430_v61 }
 0x2f0   : > { %v4539_v6 = vpop.permute.xlu1 %4538  ;;  %v4541_v50 = vpop.permute.xlu0 %4540  ;;  %v4307_v37 = vrot.slane %v4305_v24, 6  ;;  %v4411_v25 = vmul.f32 %v4404_v41, %v10574_v3  ;;  %v4412_v23 = vmul.f32 %v4408_v54, %v10574_v3  ;;  %v12121_v43 = vrot.slane %v10071_v0, %v6891_v63 }
 0x2f1   : > { %v4460_v47 = vmul.f32 %v12120_v52, %v4435_v49  ;;  %v4400_v36 = vrot.slane %v4347_v11, %v6899_v1  ;;  %v4374_v2 = vmul.f32 %v4364_v59, %v10558_v15  ;;  %v4382_v14 = vcombine.low %v4375_v60, %v4376_v18 }
 0x2f2   : > { %v4462_v19 = vmul.f32 %v12121_v43, %v4433_v4  ;;  %v4473_v31 = vrot.slane %v4459_v12, %v6881_v58  ;;  %v12122_v21 = vrot.slane %v12110_v56, %v6888_v62  ;;  %v4310_v24 = vadd.f32 %v4306_v38, %v4274_v8 }
 0x2f3   : > { %v4311_v41 = vadd.f32 %v4307_v37, %v4275_v35  ;;  %v12123_v54 = vrot.slane %v10071_v0, %v6888_v62  ;;  %v4381_v52 = vcombine.low %v4373_v30, %v4374_v2  ;;  %v4409_v11 = vmul.f32 %v4396_v29, %v10574_v3 }
 0x2f4   : > { %v4543_v49 = vpop.permute.xlu1 %4542  ;;  %v10708_v61 = vmul.f32 %v12122_v21, %v10336_v7  ;;  %v4410_v15 = vmul.f32 %v4400_v36, %v10574_v3  ;;  %v4477_v60 = vrot.slane %v4460_v47, %v6881_v58  ;;  %v4545_v18 = vpop.permute.xlu0 %4544  ;;  %v4418_v59 = vcombine.low %v4411_v25, %v4412_v23 }
 0x2f5   : > { %v4461_v4 = vmul.f32 %v12123_v54, %v4434_v26  ;;  %v4485_v43 = vrot.slane %v4462_v19, %v6881_v58  ;;  %v4509_v7 = vrot.slane %v4459_v12, %v6899_v1  ;;  %v4549_v8 = vsel %vm1619_vm12, %v4545_v18, %v4539_v6 }
 0x2f6   : > { %v4384_v35 = vrot.slane %v4382_v14, 6  ;;  %v4513_v0 = vrot.slane %v4460_v47, %v6899_v1  ;;  %v4486_v26 = vmul.f32 %v4473_v31, %v10663_v17  ;;  %v4548_v38 = vsel %vm1619_vm12, %v4539_v6, %v4541_v50 }
 0x2f7   : > { %v4481_v29 = vrot.slane %v4461_v4, %v6881_v58  ;;  %v4547_v30 = vsel %vm1619_vm12, %v4541_v50, %v4543_v49  ;;  %v4546_v12 = vsel %vm1619_vm12, %v4543_v49, %v4545_v18  ;;  %v12124_v37 = vrot.slane %v10190_v10, %v6881_v58 }
 0x2f8   : > { %v4581_v3 = vpop.permute.xlu1 %4580  ;;  %v4383_v23 = vrot.slane %v4381_v52, 6  ;;  %v4517_v47 = vrot.slane %v4461_v4, %v6899_v1  ;;  %v4521_v36 = vrot.slane %v4462_v19, %v6899_v1  ;;  %v4487_v6 = vmul.f32 %v4477_v60, %v10663_v17  ;;  %v4617_v2 = vpop.permute.xlu0 %4616 }
 0x2f9   : > { %v4572_v25 = vmul.f32 %v12124_v37, %v4549_v8  ;;  %v4489_v14 = vmul.f32 %v4485_v43, %v10663_v17  ;;  %v4522_v31 = vmul.f32 %v4509_v7, %v10673_v16  ;;  %v4523_v50 = vmul.f32 %v4513_v0, %v10673_v16 }
 0x2fa   : > { %v12125_v49 = vrot.slane %v10190_v10, %v6899_v1  ;;  %v4417_v54 = vcombine.low %v4409_v11, %v4410_v15  ;;  %v4494_v18 = vcombine.low %v4486_v26, %v4487_v6  ;;  %v12126_v4 = vrot.slane %v10190_v10, %v6888_v62 }
 0x2fb   : > { %v12127_v19 = vrot.slane %v10190_v10, %v6891_v63  ;;  %v12128_v43 = vrot.slane %v12110_v56, %v6891_v63  ;;  %v4388_v0 = vadd.f32 %v4384_v35, %v4311_v41  ;;  %v4586_v11 = vrot.slane %v4572_v25, %v6881_v58 }
 0x2fc   : > { %v4573_v21 = vmul.f32 %v12125_v49, %v4548_v38  ;;  %v4574_v52 = vmul.f32 %v12126_v4, %v4547_v30  ;;  %v4656_v8 = vpop.permute.xlu1 %4655  ;;  %v4488_v38 = vmul.f32 %v4481_v29, %v10663_v17  ;;  %v4387_v26 = vadd.f32 %v4383_v23, %v4310_v24 }
 0x2fd   : > { %v4575_v60 = vmul.f32 %v12127_v19, %v4546_v12  ;;  %v10751_v7 = vmul.f32 %v12128_v43, %v10340_v28  ;;  %v4524_v30 = vmul.f32 %v4517_v47, %v10673_v16  ;;  %v4525_v10 = vmul.f32 %v4521_v36, %v10673_v16  ;;  %v10759_v12 = vpop.permute.xlu0 %4711 }
 0x2fe   : > { %v4420_v37 = vrot.slane %v4418_v59, 6  ;;  %v4495_v6 = vcombine.low %v4488_v38, %v4489_v14  ;;  %v4530_v56 = vcombine.low %v4522_v31, %v4523_v50  ;;  %v4590_v28 = vrot.slane %v4573_v21, %v6881_v58 }
 0x2ff   : > { %v4419_v41 = vrot.slane %v4417_v54, 6  ;;  %v4496_v35 = vrot.slane %v4494_v18, 6  ;;  %v4594_v17 = vrot.slane %v4574_v52, %v6881_v58  ;;  %v4598_v29 = vrot.slane %v4575_v60, %v6881_v58 }
 0x300   : > { %v4767_v49 = vpop.permute.xlu1 %4766  ;;  %v4424_v23 = vadd.f32 %v4420_v37, %v4388_v0  ;;  %v4622_v16 = vrot.slane %v4572_v25, %v6899_v1  ;;  %v4599_v47 = vmul.f32 %v4586_v11, %v4581_v3  ;;  %v4531_v59 = vcombine.low %v4524_v30, %v4525_v10  ;;  %v12129_v37 = vld [vmem:[#allocation50_spill] sm:$0xff] }
 0x301   : > { %v4423_v36 = vadd.f32 %v4419_v41, %v4387_v26  ;;  %v4630_v14 = vrot.slane %v4574_v52, %v6899_v1  ;;  %v4634_v31 = vrot.slane %v4575_v60, %v6899_v1  ;;  %v4769_v50 = vpop.permute.xlu0 %4768  ;;  %v4497_v54 = vrot.slane %v4495_v6, 6 }
 0x302   : > { %v4532_v18 = vrot.slane %v4530_v56, 6  ;;  %v4626_v4 = vrot.slane %v4573_v21, %v6899_v1  ;;  %v4600_v19 = vmul.f32 %v4590_v28, %v4581_v3  ;;  %v4601_v38 = vmul.f32 %v4594_v17, %v4581_v3  ;;  %v12130_v56 = vld [vmem:[#allocation42_spill] sm:$0xff]  ;;  %v12132_v17 = vld [vmem:[#allocation43_spill] sm:$0xff] }
 0x303   : > { %v4500_v43 = vadd.f32 %v4496_v35, %v4423_v36  ;;  %v4602_v15 = vmul.f32 %v4598_v29, %v4581_v3  ;;  %v4776_v0 = vsel %vm1841_vm13, %v4767_v49, %v4769_v50  ;;  %v4635_v26 = vmul.f32 %v4622_v16, %v4617_v2  ;;  %v10781_v3 = vld [vmem:[%s11206_s5 + $0x40] sm:$0xf] }
 0x304   : > { %v4771_v25 = vpop.permute.xlu1 %4770  ;;  %v4607_v11 = vcombine.low %v4599_v47, %v4600_v19  ;;  %v4636_v30 = vmul.f32 %v4626_v4, %v4617_v2  ;;  %v4637_v60 = vmul.f32 %v4630_v14, %v4617_v2  ;;  %v4638_v10 = vmul.f32 %v4634_v31, %v4617_v2  ;;  %v12135_v31 = vld [vmem:[#allocation41_spill] sm:$0xff] }
 0x305   : > { %v4775_v52 = vsel %vm1841_vm13, %v4769_v50, %v4771_v25  ;;  %v4694_v6 = vmul.f32 %v12129_v37, %v4656_v8  ;;  %v12131_v21 = vrot.slane %v12130_v56, %v6881_v58  ;;  %v4773_v41 = vpop.permute.xlu0 %4772  ;;  %v4501_v35 = vadd.f32 %v4497_v54, %v4424_v23 }
 0x306   : > { %v4696_v29 = vmul.f32 %v12132_v17, %v4656_v8  ;;  %v12133_v16 = vrot.slane %v10295_v39, %v6881_v58  ;;  %v12134_v2 = vrot.slane %v10295_v39, %v6899_v1  ;;  %v4608_v14 = vcombine.low %v4601_v38, %v4602_v15 }
 0x307   : > { %v4695_v28 = vmul.f32 %v12131_v21, %v4656_v8  ;;  %v12136_v50 = vrot.slane %v12135_v31, %v6881_v58  ;;  %v4774_v19 = vsel %vm1841_vm13, %v4771_v25, %v4773_v41  ;;  %v4777_v23 = vsel %vm1841_vm13, %v4773_v41, %v4767_v49 }
 0x308   : > { %v4800_v47 = vmul.f32 %v12133_v16, %v4776_v0  ;;  %v4801_v36 = vmul.f32 %v12134_v2, %v4775_v52  ;;  %v4809_v54 = vpop.permute.xlu1 %4808  ;;  %v4609_v37 = vrot.slane %v4607_v11, 6  ;;  %v4643_v56 = vcombine.low %v4635_v26, %v4636_v30 }
 0x309   : > { %v4697_v4 = vmul.f32 %v12136_v50, %v4656_v8  ;;  %v4908_v0 = vrot.slane %v10404_v13, %v6891_v63  ;;  %v4533_v15 = vrot.slane %v4531_v59, 6  ;;  %v4536_v38 = vadd.f32 %v4532_v18, %v4500_v43  ;;  %v4845_v8 = vpop.permute.xlu0 %4844 }
 0x30a   : > { %v4644_v21 = vcombine.low %v4637_v60, %v4638_v10  ;;  %v4702_v17 = vcombine.low %v4694_v6, %v4695_v28  ;;  %v4814_v16 = vrot.slane %v4800_v47, %v6881_v58  ;;  %v4818_v25 = vrot.slane %v4801_v36, %v6881_v58  ;;  %v12139_v10 = vld [vmem:[#allocation47_spill] sm:$0xff]  ;;  %v12140_v28 = vld [vmem:[#allocation53_spill] sm:$0xff] }
 0x30b   : > { %v12137_v49 = vrot.slane %v10295_v39, %v6888_v62  ;;  %v12138_v26 = vrot.slane %v10295_v39, %v6891_v63  ;;  %v4537_v41 = vadd.f32 %v4533_v15, %v4501_v35  ;;  %v4610_v2 = vrot.slane %v4608_v14, 6  ;;  %v12142_v35 = vld [vmem:[#allocation37_spill] sm:$0xff] }
 0x30c   : > { %v4703_v31 = vcombine.low %v4696_v29, %v4697_v4  ;;  %v10809_v59 = vpop.permute.xlu1 %4921  ;;  %v4613_v43 = vadd.f32 %v4609_v37, %v4536_v38  ;;  %v4645_v60 = vrot.slane %v4643_v56, 6  ;;  %v4750_v6 = vmul.f32 %v12139_v10, %v10759_v12  ;;  %v12143_v10 = vld [vmem:[#allocation46_spill] sm:$0xff] }
 0x30d   : > { %v4802_v11 = vmul.f32 %v12137_v49, %v4774_v19  ;;  %v4803_v30 = vmul.f32 %v12138_v26, %v4777_v23  ;;  %v12141_v50 = vrot.slane %v12140_v28, %v6899_v1  ;;  %v4646_v39 = vrot.slane %v4644_v21, 6  ;;  %v4880_v4 = vpop.permute.xlu0 %4879 }
 0x30e   : > { %v4704_v23 = vrot.slane %v4702_v17, 6  ;;  %v4752_v29 = vmul.f32 %v12142_v35, %v10759_v12  ;;  %v4854_v14 = vrot.slane %v4801_v36, %v6899_v1  ;;  %v4827_v56 = vmul.f32 %v4814_v16, %v4809_v54 }
 0x30f   : > { %v4751_v19 = vmul.f32 %v12141_v50, %v10759_v12  ;;  %v4822_v15 = vrot.slane %v4802_v11, %v6881_v58  ;;  %v4826_v37 = vrot.slane %v4803_v30, %v6881_v58  ;;  %v4828_v38 = vmul.f32 %v4818_v25, %v4809_v54 }
 0x310   : > { %v4614_v49 = vadd.f32 %v4610_v2, %v4537_v41  ;;  %v4705_v26 = vrot.slane %v4703_v31, 6  ;;  %v12144_v28 = vrot.slane %v12143_v10, %v6899_v1  ;;  %v4850_v17 = vrot.slane %v4800_v47, %v6899_v1  ;;  %v4882_v50 = vpop.permute.xlu1 %4881 }
 0x311   : > { %v4649_v35 = vadd.f32 %v4645_v60, %v4613_v43  ;;  %v4758_v24 = vcombine.low %v4750_v6, %v4751_v19  ;;  %v4858_v36 = vrot.slane %v4802_v11, %v6899_v1  ;;  %v4889_v18 = vsel %vm12145_vm0, %v4880_v4, %v4882_v50  ;;  %v4884_v10 = vpop.permute.xlu0 %4883 }
 0x312   : > { %v4753_v21 = vmul.f32 %v12144_v28, %v10759_v12  ;;  %v4862_v16 = vrot.slane %v4803_v30, %v6899_v1  ;;  %v4863_v25 = vmul.f32 %v4850_v17, %v4845_v8  ;;  %v4864_v41 = vmul.f32 %v4854_v14, %v4845_v8 }
 0x313   : > { %v12146_v2 = vrot.slane %v10404_v13, %v6881_v58  ;;  %v4829_v12 = vmul.f32 %v4822_v15, %v4809_v54  ;;  %v4830_v28 = vmul.f32 %v4826_v37, %v4809_v54  ;;  %v4835_v47 = vcombine.low %v4827_v56, %v4828_v38 }
 0x314   : > { %v4888_v43 = vsel %vm12147_vm1, %v4882_v50, %v4884_v10  ;;  %v4650_v60 = vadd.f32 %v4646_v39, %v4614_v49  ;;  %v4759_v11 = vcombine.low %v4752_v29, %v4753_v21  ;;  %v12148_v30 = vrot.slane %v10404_v13, %v6899_v1  ;;  %v4886_v14 = vpop.permute.xlu1 %4885 }
 0x315   : > { %v4913_v31 = vmul.f32 %v12146_v2, %v4889_v18  ;;  %v4708_v17 = vadd.f32 %v4704_v23, %v4649_v35  ;;  %v4865_v52 = vmul.f32 %v4858_v36, %v4845_v8  ;;  %v4887_v18 = vsel %vm12149_vm2, %v4884_v10, %v4886_v14  ;;  %v4958_v38 = vpop.permute.xlu0 %4957 }
 0x316   : > { %v4914_v19 = vmul.f32 %v12148_v30, %v4888_v43  ;;  %v4890_v54 = vsel %vm12150_vm3, %v4886_v14, %v4880_v4  ;;  %v4866_v15 = vmul.f32 %v4862_v16, %v4845_v8  ;;  %v4871_v37 = vcombine.low %v4863_v25, %v4864_v41 }
 0x317   : > { %v4927_v6 = vrot.slane %v4913_v31, %v6881_v58  ;;  %v12151_v29 = vrot.slane %v10404_v13, %v6888_v62  ;;  %v4760_v49 = vrot.slane %v4758_v24, 6  ;;  %v4836_v21 = vcombine.low %v4829_v12, %v4830_v28 }
 0x318   : > { %v4931_v39 = vrot.slane %v4914_v19, %v6881_v58  ;;  %v4837_v50 = vrot.slane %v4835_v47, 6  ;;  %v4916_v23 = vmul.f32 %v4908_v0, %v4890_v54  ;;  %v4709_v35 = vadd.f32 %v4705_v26, %v4650_v60  ;;  %v10856_v16 = vpop.permute.xlu1 %5034 }
 0x319   : > { %v4915_v56 = vmul.f32 %v12151_v29, %v4887_v18  ;;  %v4940_v36 = vmul.f32 %v4927_v6, %v10809_v59  ;;  %v4764_v25 = vadd.f32 %v4760_v49, %v4708_v17  ;;  %v4963_v41 = vrot.slane %v4913_v31, %v6899_v1  ;;  %v4993_v26 = vpop.permute.xlu0 %4992  ;;  %v10866_v6 = vld [vmem:[%s11206_s5 + $0x44] sm:$0xf] }
 0x31a   : > { %v4941_v8 = vmul.f32 %v4931_v39, %v10809_v59  ;;  %v4967_v24 = vrot.slane %v4914_v19, %v6899_v1  ;;  %v4939_v2 = vrot.slane %v4916_v23, %v6881_v58  ;;  %v4761_v10 = vrot.slane %v4759_v11, 6 }
 0x31b   : > { %v4935_v4 = vrot.slane %v4915_v56, %v6881_v58  ;;  %v4872_v12 = vcombine.low %v4865_v52, %v4866_v15  ;;  %v4873_v13 = vrot.slane %v4871_v37, 6  ;;  %v4838_v28 = vrot.slane %v4836_v21, 6 }
 0x31c   : > { %v4948_v0 = vcombine.low %v4940_v36, %v4941_v8  ;;  %v4841_v47 = vadd.f32 %v4837_v50, %v4764_v25  ;;  %v4943_v60 = vmul.f32 %v4939_v2, %v10809_v59  ;;  %v4765_v31 = vadd.f32 %v4761_v10, %v4709_v35  ;;  %v4995_v19 = vpop.permute.xlu1 %4994 }
 0x31d   : > { %v4942_v43 = vmul.f32 %v4935_v4, %v10809_v59  ;;  %v4971_v30 = vrot.slane %v4915_v56, %v6899_v1  ;;  %v5017_v52 = vrot.slane %v10781_v3, %v6888_v62  ;;  %v5021_v11 = vrot.slane %v10781_v3, %v6891_v63  ;;  %v4997_v29 = vpop.permute.xlu0 %4996 }
 0x31e   : > { %v4975_v14 = vrot.slane %v4916_v23, %v6899_v1  ;;  %v4976_v17 = vmul.f32 %v4963_v41, %v4958_v38  ;;  %v4977_v18 = vmul.f32 %v4967_v24, %v4958_v38  ;;  %v5002_v59 = vsel %vm2063_vm15, %v4993_v26, %v4995_v19 }
 0x31f   : > { %v4874_v54 = vrot.slane %v4872_v12, 6  ;;  %v4950_v15 = vrot.slane %v4948_v0, 6  ;;  %v12152_v37 = vrot.slane %v10781_v3, %v6881_v58  ;;  %v5122_v56 = vrot.slane %v10866_v6, %v6881_v58 }
 0x320   : > { %v4842_v49 = vadd.f32 %v4838_v28, %v4765_v31  ;;  %v4877_v21 = vadd.f32 %v4873_v13, %v4841_v47  ;;  %v4949_v50 = vcombine.low %v4942_v43, %v4943_v60  ;;  %v5001_v23 = vsel %vm2063_vm15, %v4995_v19, %v4997_v29  ;;  %v4999_v41 = vpop.permute.xlu1 %4998 }
 0x321   : > { %v5026_v39 = vmul.f32 %v12152_v37, %v5002_v59  ;;  %v4978_v35 = vmul.f32 %v4971_v30, %v4958_v38  ;;  %v12153_v4 = vrot.slane %v10781_v3, %v6899_v1  ;;  %v4979_v24 = vmul.f32 %v4975_v14, %v4958_v38  ;;  %v5071_v43 = vpop.permute.xlu0 %5070 }
 0x322   : > { %v4984_v2 = vcombine.low %v4976_v17, %v4977_v18  ;;  %v5000_v10 = vsel %vm2063_vm15, %v4997_v29, %v4999_v41  ;;  %v5003_v12 = vsel %vm2063_vm15, %v4999_v41, %v4993_v26  ;;  %v4954_v13 = vadd.f32 %v4950_v15, %v4877_v21 }
 0x323   : > { %v5040_v36 = vrot.slane %v5026_v39, %v6881_v58  ;;  %v5076_v8 = vrot.slane %v5026_v39, %v6899_v1  ;;  %v5027_v25 = vmul.f32 %v12153_v4, %v5001_v23  ;;  %v5028_v47 = vmul.f32 %v5017_v52, %v5000_v10 }
 0x324   : > { %v4951_v60 = vrot.slane %v4949_v50, 6  ;;  %v5029_v31 = vmul.f32 %v5021_v11, %v5003_v12  ;;  %v10898_v26 = vpop.permute.xlu1 %5147  ;;  %v4878_v18 = vadd.f32 %v4874_v54, %v4842_v49  ;;  %v4985_v59 = vcombine.low %v4978_v35, %v4979_v24 }
 0x325   : > { %v5044_v0 = vrot.slane %v5027_v25, %v6881_v58  ;;  %v5080_v28 = vrot.slane %v5027_v25, %v6899_v1  ;;  %v5053_v3 = vmul.f32 %v5040_v36, %v10856_v16  ;;  %v5089_v30 = vmul.f32 %v5076_v8, %v5071_v43  ;;  %v5106_v21 = vpop.permute.xlu0 %5105 }
 0x326   : > { %v5048_v19 = vrot.slane %v5028_v47, %v6881_v58  ;;  %v5084_v14 = vrot.slane %v5028_v47, %v6899_v1  ;;  %v5052_v15 = vrot.slane %v5029_v31, %v6881_v58  ;;  %v5088_v52 = vrot.slane %v5029_v31, %v6899_v1 }
 0x327   : > { %v5054_v38 = vmul.f32 %v5044_v0, %v10856_v16  ;;  %v5090_v17 = vmul.f32 %v5080_v28, %v5071_v43  ;;  %v4986_v37 = vrot.slane %v4984_v2, 6  ;;  %v6106_v50 = vrot.slane %v10708_v61, %v6899_v1 }
 0x328   : > { %v5055_v11 = vmul.f32 %v5048_v19, %v10856_v16  ;;  %v5091_v29 = vmul.f32 %v5084_v14, %v5071_v43  ;;  %v4955_v23 = vadd.f32 %v4951_v60, %v4878_v18  ;;  %v5056_v36 = vmul.f32 %v5052_v15, %v10856_v16  ;;  %v5108_v35 = vpop.permute.xlu1 %5107 }
 0x329   : > { %v5061_v39 = vcombine.low %v5053_v3, %v5054_v38  ;;  %v5092_v8 = vmul.f32 %v5088_v52, %v5071_v43  ;;  %v4990_v4 = vadd.f32 %v4986_v37, %v4954_v13  ;;  %v5097_v49 = vcombine.low %v5089_v30, %v5090_v17  ;;  %v5110_v16 = vpop.permute.xlu0 %5109 }
 0x32a   : > { %v5126_v25 = vrot.slane %v10866_v6, %v6899_v1  ;;  %v4987_v41 = vrot.slane %v4985_v59, 6  ;;  %v5062_v24 = vcombine.low %v5055_v11, %v5056_v36  ;;  %v5115_v10 = vsel %vm2174_vm14, %v5106_v21, %v5108_v35 }
 0x32b   : > { %v5063_v54 = vrot.slane %v5061_v39, 6  ;;  %v5098_v2 = vcombine.low %v5091_v29, %v5092_v8  ;;  %v6110_v12 = vrot.slane %v10751_v7, %v6899_v1  ;;  %v5139_v28 = vmul.f32 %v5122_v56, %v5115_v10 }
 0x32c   : > { %v5130_v13 = vrot.slane %v10866_v6, %v6888_v62  ;;  %v4991_v47 = vadd.f32 %v4987_v41, %v4955_v23  ;;  %v5064_v43 = vrot.slane %v5062_v24, 6  ;;  %v5114_v60 = vsel %vm2174_vm14, %v5108_v35, %v5110_v16  ;;  %v5112_v14 = vpop.permute.xlu1 %5111  ;;  %v12156_v41 = vld [vmem:[#allocation80_spill] sm:$0xff] }
 0x32d   : > { %v5067_v0 = vadd.f32 %v5063_v54, %v4990_v4  ;;  %v5134_v3 = vrot.slane %v10866_v6, %v6891_v63  ;;  %v5099_v31 = vrot.slane %v5097_v49, 6  ;;  %v5153_v30 = vrot.slane %v5139_v28, %v6881_v58  ;;  %v5184_v52 = vpop.permute.xlu0 %5183  ;;  %v12154_v49 = vld [vmem:[#allocation66_spill] sm:$0xff] }
 0x32e   : > { %v5189_v38 = vrot.slane %v5139_v28, %v6899_v1  ;;  %v5140_v19 = vmul.f32 %v5126_v25, %v5114_v60  ;;  %v5068_v56 = vadd.f32 %v5064_v43, %v4991_v47  ;;  %v5100_v17 = vrot.slane %v5098_v2, 6 }
 0x32f   : > { %v5113_v62 = vsel %vm2174_vm14, %v5110_v16, %v5112_v14  ;;  %v5116_v18 = vsel %vm2174_vm14, %v5112_v14, %v5106_v21  ;;  %v5103_v59 = vadd.f32 %v5099_v31, %v5067_v0  ;;  %v5166_v39 = vmul.f32 %v5153_v30, %v10898_v26 }
 0x330   : > { %v5157_v15 = vrot.slane %v5140_v19, %v6881_v58  ;;  %v5193_v63 = vrot.slane %v5140_v19, %v6899_v1  ;;  %v5141_v6 = vmul.f32 %v5130_v13, %v5113_v62  ;;  %v5104_v37 = vadd.f32 %v5100_v17, %v5068_v56  ;;  %v5249_v21 = vpop.permute.xlu1 %5248 }
 0x331   : > { %v5142_v11 = vmul.f32 %v5134_v3, %v5116_v18  ;;  %v5202_v29 = vmul.f32 %v5189_v38, %v5184_v52  ;;  %v12155_v35 = vrot.slane %v12154_v49, %v6881_v58  ;;  %v12157_v24 = vrot.slane %v12156_v41, %v6881_v58  ;;  %v5285_v13 = vpop.permute.xlu0 %5284 }
 0x332   : > { %v5167_v23 = vmul.f32 %v5157_v15, %v10898_v26  ;;  %v5161_v36 = vrot.slane %v5141_v6, %v6881_v58  ;;  %v5197_v8 = vrot.slane %v5141_v6, %v6899_v1  ;;  %v5203_v57 = vmul.f32 %v5193_v63, %v5184_v52 }
 0x333   : > { %v5165_v4 = vrot.slane %v5142_v11, %v6881_v58  ;;  %v5201_v54 = vrot.slane %v5142_v11, %v6899_v1  ;;  %v5267_v25 = vmul.f32 %v12155_v35, %v5249_v21  ;;  %v5268_v2 = vmul.f32 %v12157_v24, %v5249_v21 }
 0x334   : > { %v5174_v10 = vcombine.low %v5166_v39, %v5167_v23  ;;  %v5168_v0 = vmul.f32 %v5161_v36, %v10898_v26  ;;  %v5204_v28 = vmul.f32 %v5197_v8, %v5184_v52  ;;  %v5210_v16 = vcombine.low %v5202_v29, %v5203_v57  ;;  %v5350_v62 = vpop.permute.xlu1 %5349 }
 0x335   : > { %v5169_v47 = vmul.f32 %v5165_v4, %v10898_v26  ;;  %v5205_v43 = vmul.f32 %v5201_v54, %v5184_v52  ;;  %v12158_v60 = vrot.slane %v9802_v42, %v6881_v58  ;;  %v12159_v31 = vrot.slane %v9808_v20, %v6881_v58  ;;  %v5386_v8 = vpop.permute.xlu0 %5385 }
 0x336   : > { %v5176_v38 = vrot.slane %v5174_v10, 6  ;;  %v5212_v19 = vrot.slane %v5210_v16, 6  ;;  %v5275_v14 = vcombine.low %v5267_v25, %v5268_v2  ;;  %v12160_v56 = vrot.slane %v12154_v49, %v6899_v1 }
 0x337   : > { %v5269_v3 = vmul.f32 %v12158_v60, %v5249_v21  ;;  %v5270_v30 = vmul.f32 %v12159_v31, %v5249_v21  ;;  %v5175_v18 = vcombine.low %v5168_v0, %v5169_v47  ;;  %v5211_v15 = vcombine.low %v5204_v28, %v5205_v43 }
 0x338   : > { %v5303_v17 = vmul.f32 %v12160_v56, %v5285_v13  ;;  %v12161_v63 = vrot.slane %v12156_v41, %v6899_v1  ;;  %v5180_v52 = vadd.f32 %v5176_v38, %v5103_v59  ;;  %v5277_v39 = vrot.slane %v5275_v14, 6  ;;  %v12165_v41 = vld [vmem:[#allocation72_spill] sm:$0xff]  ;;  %v5451_v2 = vpop.permute.xlu1 %5450 }
 0x339   : > { %v5276_v26 = vcombine.low %v5269_v3, %v5270_v30  ;;  %v12162_v11 = vrot.slane %v9802_v42, %v6899_v1  ;;  %v12163_v23 = vrot.slane %v9808_v20, %v6899_v1  ;;  %v5177_v57 = vrot.slane %v5175_v18, 6  ;;  %v12167_v20 = vld [vmem:[#allocation69_spill] sm:$0xff] }
 0x33a   : > { %v5304_v6 = vmul.f32 %v12161_v63, %v5285_v13  ;;  %v5213_v21 = vrot.slane %v5211_v15, 6  ;;  %v5216_v49 = vadd.f32 %v5212_v19, %v5180_v52  ;;  %v12164_v25 = vrot.slane %v10085_v5, %v6881_v58  ;;  %v5487_v19 = vpop.permute.xlu0 %5486  ;;  %v12175_v52 = vld [vmem:[#allocation73_spill] sm:$0xff] }
 0x33b   : > { %v5305_v29 = vmul.f32 %v12162_v11, %v5285_v13  ;;  %v5306_v36 = vmul.f32 %v12163_v23, %v5285_v13  ;;  %v5278_v4 = vrot.slane %v5276_v26, 6  ;;  %v12166_v24 = vrot.slane %v12165_v41, %v6881_v58  ;;  %v12169_v13 = vld [vmem:[#allocation70_spill] sm:$0xff] }
 0x33c   : > { %v5311_v54 = vcombine.low %v5303_v17, %v5304_v6  ;;  %v5368_v59 = vmul.f32 %v12164_v25, %v5350_v62  ;;  %v5181_v10 = vadd.f32 %v5177_v57, %v5104_v37  ;;  %v12168_v28 = vrot.slane %v12167_v20, %v6881_v58  ;;  %v5552_v11 = vpop.permute.xlu1 %5551  ;;  %v12177_v57 = vld [vmem:[#allocation67_spill] sm:$0xff] }
 0x33d   : > { %v5312_v35 = vcombine.low %v5305_v29, %v5306_v36  ;;  %v5369_v42 = vmul.f32 %v12166_v24, %v5350_v62  ;;  %v12170_v47 = vrot.slane %v12169_v13, %v6881_v58  ;;  %v5281_v60 = vadd.f32 %v5277_v39, %v5216_v49  ;;  %v12179_v25 = vld [vmem:[#allocation11_spill] sm:$0xff]  ;;  %v12181_v24 = vld [vmem:[#allocation74_spill] sm:$0xff] }
 0x33e   : > { %v5313_v0 = vrot.slane %v5311_v54, 6  ;;  %v5370_v16 = vmul.f32 %v12168_v28, %v5350_v62  ;;  %v12171_v30 = vrot.slane %v10085_v5, %v6899_v1  ;;  %v5217_v14 = vadd.f32 %v5213_v21, %v5181_v10  ;;  %v5588_v10 = vpop.permute.xlu0 %5587 }
 0x33f   : > { %v5371_v43 = vmul.f32 %v12170_v47, %v5350_v62  ;;  %v5314_v3 = vrot.slane %v5312_v35, 6  ;;  %v5376_v31 = vcombine.low %v5368_v59, %v5369_v42  ;;  %v12172_v37 = vrot.slane %v12165_v41, %v6899_v1 }
 0x340   : > { %v5404_v38 = vmul.f32 %v12171_v30, %v5386_v8  ;;  %v12173_v18 = vrot.slane %v12167_v20, %v6899_v1  ;;  %v5317_v26 = vadd.f32 %v5313_v0, %v5281_v60  ;;  %v12174_v63 = vrot.slane %v12169_v13, %v6899_v1 }
 0x341   : > { %v5377_v56 = vcombine.low %v5370_v16, %v5371_v43  ;;  %v5405_v17 = vmul.f32 %v12172_v37, %v5386_v8  ;;  %v5378_v62 = vrot.slane %v5376_v31, 6  ;;  %v12176_v5 = vrot.slane %v12175_v52, %v6881_v58 }
 0x342   : > { %v5406_v15 = vmul.f32 %v12173_v18, %v5386_v8  ;;  %v5407_v6 = vmul.f32 %v12174_v63, %v5386_v8  ;;  %v5282_v29 = vadd.f32 %v5278_v4, %v5217_v14  ;;  %v12178_v21 = vrot.slane %v12177_v57, %v6881_v58 }
 0x343   : > { %v5469_v39 = vmul.f32 %v12176_v5, %v5451_v2  ;;  %v5379_v23 = vrot.slane %v5377_v56, 6  ;;  %v5412_v36 = vcombine.low %v5404_v38, %v5405_v17  ;;  %v5382_v49 = vadd.f32 %v5378_v62, %v5317_v26  ;;  %v5653_v38 = vpop.permute.xlu1 %5652 }
 0x344   : > { %v5470_v54 = vmul.f32 %v12178_v21, %v5451_v2  ;;  %v5413_v35 = vcombine.low %v5406_v15, %v5407_v6  ;;  %v12180_v59 = vrot.slane %v12179_v25, %v6881_v58  ;;  %v12182_v8 = vrot.slane %v12181_v24, %v6881_v58  ;;  %v12187_v15 = vld [vmem:[#allocation75_spill] sm:$0xff] }
 0x345   : > { %v5318_v0 = vadd.f32 %v5314_v3, %v5282_v29  ;;  %v5414_v20 = vrot.slane %v5412_v36, 6  ;;  %v12183_v28 = vrot.slane %v12175_v52, %v6899_v1  ;;  %v12184_v43 = vrot.slane %v12177_v57, %v6899_v1  ;;  %v5689_v52 = vpop.permute.xlu0 %5688 }
 0x346   : > { %v5471_v41 = vmul.f32 %v12180_v59, %v5451_v2  ;;  %v5472_v42 = vmul.f32 %v12182_v8, %v5451_v2  ;;  %v5477_v4 = vcombine.low %v5469_v39, %v5470_v54  ;;  %v5415_v13 = vrot.slane %v5413_v35, 6 }
 0x347   : > { %v5505_v16 = vmul.f32 %v12183_v28, %v5487_v19  ;;  %v5506_v60 = vmul.f32 %v12184_v43, %v5487_v19  ;;  %v12185_v31 = vrot.slane %v12179_v25, %v6899_v1  ;;  %v5383_v2 = vadd.f32 %v5379_v23, %v5318_v0 }
 0x348   : > { %v5478_v47 = vcombine.low %v5471_v41, %v5472_v42  ;;  %v5418_v14 = vadd.f32 %v5414_v20, %v5382_v49  ;;  %v5479_v3 = vrot.slane %v5477_v4, 6  ;;  %v12186_v56 = vrot.slane %v12181_v24, %v6899_v1 }
 0x349   : > { %v5507_v30 = vmul.f32 %v12185_v31, %v5487_v19  ;;  %v5513_v18 = vcombine.low %v5505_v16, %v5506_v60  ;;  %v12188_v26 = vrot.slane %v12187_v15, %v6881_v58  ;;  %v12189_v63 = vrot.slane %v10326_v53, %v6881_v58  ;;  %v5754_v16 = vpop.permute.xlu1 %5753 }
 0x34a   : > { %v5508_v37 = vmul.f32 %v12186_v56, %v5487_v19  ;;  %v5480_v17 = vrot.slane %v5478_v47, 6  ;;  %v5419_v5 = vadd.f32 %v5415_v13, %v5383_v2  ;;  %v5483_v39 = vadd.f32 %v5479_v3, %v5418_v14 }
 0x34b   : > { %v5570_v62 = vmul.f32 %v12188_v26, %v5552_v11  ;;  %v5571_v6 = vmul.f32 %v12189_v63, %v5552_v11  ;;  %v12190_v23 = vrot.slane %v10332_v27, %v6881_v58  ;;  %v5515_v57 = vrot.slane %v5513_v18, 6 }
 0x34c   : > { %v5514_v29 = vcombine.low %v5507_v30, %v5508_v37  ;;  %v12191_v19 = vrot.slane %v10371_v48, %v6881_v58  ;;  %v12192_v49 = vrot.slane %v12187_v15, %v6899_v1  ;;  %v5484_v25 = vadd.f32 %v5480_v17, %v5419_v5 }
 0x34d   : > { %v5572_v36 = vmul.f32 %v12190_v23, %v5552_v11  ;;  %v5578_v54 = vcombine.low %v5570_v62, %v5571_v6  ;;  %v12193_v41 = vrot.slane %v10326_v53, %v6899_v1  ;;  %v12194_v8 = vrot.slane %v10332_v27, %v6899_v1 }
 0x34e   : > { %v5573_v21 = vmul.f32 %v12191_v19, %v5552_v11  ;;  %v5606_v35 = vmul.f32 %v12192_v49, %v5588_v10  ;;  %v5516_v59 = vrot.slane %v5514_v29, 6  ;;  %v5519_v0 = vadd.f32 %v5515_v57, %v5483_v39 }
 0x34f   : > { %v5607_v24 = vmul.f32 %v12193_v41, %v5588_v10  ;;  %v5608_v42 = vmul.f32 %v12194_v8, %v5588_v10  ;;  %v5580_v4 = vrot.slane %v5578_v54, 6  ;;  %v12195_v11 = vrot.slane %v10371_v48, %v6899_v1  ;;  %v5790_v48 = vpop.permute.xlu0 %5789 }
 0x350   : > { %v5579_v20 = vcombine.low %v5572_v36, %v5573_v21  ;;  %v5520_v13 = vadd.f32 %v5516_v59, %v5484_v25  ;;  %v12196_v43 = vrot.slane %v10389_v32, %v6881_v58  ;;  %v12197_v53 = vrot.slane %v10397_v40, %v6881_v58 }
 0x351   : > { %v5609_v28 = vmul.f32 %v12195_v11, %v5588_v10  ;;  %v5614_v47 = vcombine.low %v5606_v35, %v5607_v24  ;;  %v5584_v30 = vadd.f32 %v5580_v4, %v5519_v0  ;;  %v12198_v14 = vrot.slane %v10410_v33, %v6881_v58  ;;  %v5855_v35 = vpop.permute.xlu1 %5854 }
 0x352   : > { %v5671_v60 = vmul.f32 %v12196_v43, %v5653_v38  ;;  %v5672_v31 = vmul.f32 %v12197_v53, %v5653_v38  ;;  %v5581_v27 = vrot.slane %v5579_v20, 6  ;;  %v12199_v56 = vrot.slane %v10416_v46, %v6881_v58 }
 0x353   : > { %v5615_v2 = vcombine.low %v5608_v42, %v5609_v28  ;;  %v5673_v3 = vmul.f32 %v12198_v14, %v5653_v38  ;;  %v5616_v10 = vrot.slane %v5614_v47, 6  ;;  %v12200_v18 = vrot.slane %v10389_v32, %v6899_v1  ;;  %v5891_v4 = vpop.permute.xlu0 %5890 }
 0x354   : > { %v5674_v37 = vmul.f32 %v12199_v56, %v5653_v38  ;;  %v5679_v17 = vcombine.low %v5671_v60, %v5672_v31  ;;  %v5585_v26 = vadd.f32 %v5581_v27, %v5520_v13  ;;  %v12201_v63 = vrot.slane %v10397_v40, %v6899_v1 }
 0x355   : > { %v5707_v15 = vmul.f32 %v12200_v18, %v5689_v52  ;;  %v5617_v62 = vrot.slane %v5615_v2, 6  ;;  %v12202_v5 = vrot.slane %v10410_v33, %v6899_v1  ;;  %v5620_v29 = vadd.f32 %v5616_v10, %v5584_v30 }
 0x356   : > { %v5708_v6 = vmul.f32 %v12201_v63, %v5689_v52  ;;  %v5680_v23 = vcombine.low %v5673_v3, %v5674_v37  ;;  %v5681_v36 = vrot.slane %v5679_v17, 6  ;;  %v12203_v38 = vrot.slane %v10416_v46, %v6899_v1 }
 0x357   : > { %v5709_v39 = vmul.f32 %v12202_v5, %v5689_v52  ;;  %v5621_v19 = vadd.f32 %v5617_v62, %v5585_v26  ;;  %v12204_v21 = vrot.slane %v10438_v44, %v6881_v58  ;;  %v12205_v40 = vrot.slane %v10456_v51, %v6881_v58 }
 0x358   : > { %v5710_v57 = vmul.f32 %v12203_v38, %v5689_v52  ;;  %v5715_v32 = vcombine.low %v5707_v15, %v5708_v6  ;;  %v5682_v33 = vrot.slane %v5680_v23, 6  ;;  %v5685_v25 = vadd.f32 %v5681_v36, %v5620_v29  ;;  %v5956_v15 = vpop.permute.xlu1 %5955 }
 0x359   : > { %v5772_v54 = vmul.f32 %v12204_v21, %v5754_v16  ;;  %v5773_v49 = vmul.f32 %v12205_v40, %v5754_v16  ;;  %v12206_v41 = vrot.slane %v10473_v55, %v6881_v58  ;;  %v12207_v52 = vrot.slane %v10479_v9, %v6881_v58 }
 0x35a   : > { %v5716_v59 = vcombine.low %v5709_v39, %v5710_v57  ;;  %v5717_v46 = vrot.slane %v5715_v32, 6  ;;  %v12208_v0 = vrot.slane %v10438_v44, %v6899_v1  ;;  %v5686_v11 = vadd.f32 %v5682_v33, %v5621_v19  ;;  %v5992_v19 = vpop.permute.xlu0 %5991  ;;  %v12221_v33 = vld [vmem:[#allocation27_spill] sm:$0xff] }
 0x35b   : > { %v5774_v24 = vmul.f32 %v12206_v41, %v5754_v16  ;;  %v5775_v8 = vmul.f32 %v12207_v52, %v5754_v16  ;;  %v5780_v42 = vcombine.low %v5772_v54, %v5773_v49  ;;  %v12209_v13 = vrot.slane %v10456_v51, %v6899_v1 }
 0x35c   : > { %v5808_v20 = vmul.f32 %v12208_v0, %v5790_v48  ;;  %v5718_v28 = vrot.slane %v5716_v59, 6  ;;  %v12210_v43 = vrot.slane %v10473_v55, %v6899_v1  ;;  %v5721_v53 = vadd.f32 %v5717_v46, %v5685_v25 }
 0x35d   : > { %v5809_v47 = vmul.f32 %v12209_v13, %v5790_v48  ;;  %v5781_v31 = vcombine.low %v5774_v24, %v5775_v8  ;;  %v5782_v27 = vrot.slane %v5780_v42, 6  ;;  %v12211_v16 = vrot.slane %v10479_v9, %v6899_v1  ;;  %v12225_v8 = vld [vmem:[#allocation33_spill] sm:$0xff] }
 0x35e   : > { %v5810_v60 = vmul.f32 %v12210_v43, %v5790_v48  ;;  %v5722_v44 = vadd.f32 %v5718_v28, %v5686_v11  ;;  %v12212_v14 = vrot.slane %v10495_v34, %v6881_v58  ;;  %v12213_v51 = vrot.slane %v10506_v45, %v6881_v58  ;;  %v12227_v11 = vld [vmem:[#allocation90_spill] sm:$0xff] }
 0x35f   : > { %v5811_v30 = vmul.f32 %v12211_v16, %v5790_v48  ;;  %v5816_v2 = vcombine.low %v5808_v20, %v5809_v47  ;;  %v5783_v56 = vrot.slane %v5781_v31, 6  ;;  %v5786_v55 = vadd.f32 %v5782_v27, %v5721_v53  ;;  %v12215_v48 = vld [vmem:[#allocation76_spill] sm:$0xff] }
 0x360   : > { %v5873_v3 = vmul.f32 %v12212_v14, %v5855_v35  ;;  %v5874_v10 = vmul.f32 %v12213_v51, %v5855_v35  ;;  %v12214_v17 = vrot.slane %v10522_v22, %v6881_v58  ;;  %v12216_v26 = vrot.slane %v12215_v48, %v6881_v58 }
 0x361   : > { %v5817_v37 = vcombine.low %v5810_v60, %v5811_v30  ;;  %v5818_v9 = vrot.slane %v5816_v2, 6  ;;  %v12217_v6 = vrot.slane %v10495_v34, %v6899_v1  ;;  %v5787_v39 = vadd.f32 %v5783_v56, %v5722_v44  ;;  %v6057_v60 = vpop.permute.xlu1 %6056  ;;  %v6093_v56 = vpop.permute.xlu0 %6092 }
 0x362   : > { %v5875_v18 = vmul.f32 %v12214_v17, %v5855_v35  ;;  %v5876_v62 = vmul.f32 %v12216_v26, %v5855_v35  ;;  %v5881_v63 = vcombine.low %v5873_v3, %v5874_v10  ;;  %v12218_v23 = vrot.slane %v10506_v45, %v6899_v1  ;;  %v12223_v45 = vld [vmem:[#allocation89_spill] sm:$0xff]  ;;  %v12233_v17 = vld [vmem:[#allocation79_spill] sm:$0xff] }
 0x363   : > { %v5909_v5 = vmul.f32 %v12217_v6, %v5891_v4  ;;  %v5819_v29 = vrot.slane %v5817_v37, 6  ;;  %v12219_v38 = vrot.slane %v10522_v22, %v6899_v1  ;;  %v5822_v32 = vadd.f32 %v5818_v9, %v5786_v55  ;;  %v12235_v9 = vld [vmem:[#allocation71_spill] sm:$0xff] }
 0x364   : > { %v5910_v36 = vmul.f32 %v12218_v23, %v5891_v4  ;;  %v5882_v21 = vcombine.low %v5875_v18, %v5876_v62  ;;  %v5883_v54 = vrot.slane %v5881_v63, 6  ;;  %v12220_v40 = vrot.slane %v12215_v48, %v6899_v1 }
 0x365   : > { %v5911_v57 = vmul.f32 %v12219_v38, %v5891_v4  ;;  %v5823_v34 = vadd.f32 %v5819_v29, %v5787_v39  ;;  %v12222_v25 = vrot.slane %v12221_v33, %v6881_v58  ;;  %v12224_v41 = vrot.slane %v12223_v45, %v6881_v58 }
 0x366   : > { %v5912_v49 = vmul.f32 %v12220_v40, %v5891_v4  ;;  %v5917_v35 = vcombine.low %v5909_v5, %v5910_v36  ;;  %v5884_v22 = vrot.slane %v5882_v21, 6  ;;  %v5887_v46 = vadd.f32 %v5883_v54, %v5822_v32 }
 0x367   : > { %v5974_v59 = vmul.f32 %v12222_v25, %v5956_v15  ;;  %v5975_v24 = vmul.f32 %v12224_v41, %v5956_v15  ;;  %v12226_v42 = vrot.slane %v12225_v8, %v6881_v58  ;;  %v12228_v4 = vrot.slane %v12227_v11, %v6881_v58 }
 0x368   : > { %v5918_v52 = vcombine.low %v5911_v57, %v5912_v49  ;;  %v5919_v20 = vrot.slane %v5917_v35, 6  ;;  %v12229_v47 = vrot.slane %v12221_v33, %v6899_v1  ;;  %v5888_v53 = vadd.f32 %v5884_v22, %v5823_v34 }
 0x369   : > { %v5976_v0 = vmul.f32 %v12226_v42, %v5956_v15  ;;  %v5977_v28 = vmul.f32 %v12228_v4, %v5956_v15  ;;  %v5982_v13 = vcombine.low %v5974_v59, %v5975_v24  ;;  %v12230_v27 = vrot.slane %v12223_v45, %v6899_v1 }
 0x36a   : > { %v6010_v43 = vmul.f32 %v12229_v47, %v5992_v19  ;;  %v5920_v31 = vrot.slane %v5918_v52, 6  ;;  %v12231_v30 = vrot.slane %v12225_v8, %v6899_v1  ;;  %v5923_v2 = vadd.f32 %v5919_v20, %v5887_v46 }
 0x36b   : > { %v6011_v16 = vmul.f32 %v12230_v27, %v5992_v19  ;;  %v5983_v14 = vcombine.low %v5976_v0, %v5977_v28  ;;  %v5984_v3 = vrot.slane %v5982_v13, 6  ;;  %v12232_v51 = vrot.slane %v12227_v11, %v6899_v1 }
 0x36c   : > { %v6012_v44 = vmul.f32 %v12231_v30, %v5992_v19  ;;  %v5924_v55 = vadd.f32 %v5920_v31, %v5888_v53  ;;  %v12234_v18 = vrot.slane %v12233_v17, %v6881_v58  ;;  %v12236_v48 = vrot.slane %v12235_v9, %v6881_v58 }
 0x36d   : > { %v6013_v10 = vmul.f32 %v12232_v51, %v5992_v19  ;;  %v6018_v37 = vcombine.low %v6010_v43, %v6011_v16  ;;  %v5985_v62 = vrot.slane %v5983_v14, 6  ;;  %v5988_v63 = vadd.f32 %v5984_v3, %v5923_v2 }
 0x36e   : > { %v6075_v15 = vmul.f32 %v12234_v18, %v6057_v60  ;;  %v6076_v26 = vmul.f32 %v12236_v48, %v6057_v60  ;;  %v12237_v5 = vrot.slane %v10708_v61, %v6881_v58  ;;  %v12238_v23 = vrot.slane %v10751_v7, %v6881_v58 }
 0x36f   : > { %v6019_v6 = vcombine.low %v6012_v44, %v6013_v10  ;;  %v6020_v29 = vrot.slane %v6018_v37, 6  ;;  %v12239_v57 = vrot.slane %v12233_v17, %v6899_v1  ;;  %v5989_v32 = vadd.f32 %v5985_v62, %v5924_v55 }
 0x370   : > { %v6077_v39 = vmul.f32 %v12237_v5, %v6057_v60  ;;  %v6078_v36 = vmul.f32 %v12238_v23, %v6057_v60  ;;  %v6083_v38 = vcombine.low %v6075_v15, %v6076_v26  ;;  %v12240_v54 = vrot.slane %v12235_v9, %v6899_v1 }
 0x371   : > { %v6111_v19 = vmul.f32 %v12239_v57, %v6093_v56  ;;  %v6021_v21 = vrot.slane %v6019_v6, 6  ;;  %v6113_v49 = vmul.f32 %v6106_v50, %v6093_v56  ;;  %v6024_v34 = vadd.f32 %v6020_v29, %v5988_v63 }
 0x372   : > { %v6112_v40 = vmul.f32 %v12240_v54, %v6093_v56  ;;  %v6084_v58 = vcombine.low %v6077_v39, %v6078_v36  ;;  %v6085_v35 = vrot.slane %v6083_v38, 6  ;;  %v6114_v33 = vmul.f32 %v6110_v12, %v6093_v56 }
 0x373   : > { %v6025_v25 = vadd.f32 %v6021_v21, %v5989_v32 }
 0x374   : > { %v6119_v59 = vcombine.low %v6111_v19, %v6112_v40  ;;  %v6086_v45 = vrot.slane %v6084_v58, 6  ;;  %v6089_v41 = vadd.f32 %v6085_v35, %v6024_v34  ;;  %v6120_v24 = vcombine.low %v6113_v49, %v6114_v33 }
 0x376   : > { %v6121_v22 = vrot.slane %v6119_v59, 6  ;;  %v6090_v61 = vadd.f32 %v6086_v45, %v6025_v25  ;;  %v6122_v50 = vrot.slane %v6120_v24, 6 }
 0x378   : > { %v6125_v46 = vadd.f32 %v6121_v22, %v6089_v41  ;;  %v6126_v52 = vadd.f32 %v6122_v50, %v6090_v61 }
 0x37a   : > { %6127 = vst [vmem:[%s9208_s16] sm:$0xcc] %v6125_v46  ;;  %6128 = vst [vmem:[%s9208_s16 + $0x8] sm:$0xcc] %v6126_v52 }
 0x37b   : > { %6423 = shalt.err (!%p6420_p3)
}
 0x37c   : > { %s6424_s16 = scalar_lea.hbm %s11155_s13, 256  ;;  %s6428_s20 = scalar_lea.hbm %s11207_s6, 512 }
 0x37d   : > { %p6425_p4 = scmp.ne.s32.totalorder %s11155_s13, %s6424_s16  ;;  %p6429_p9 = scmp.lt.u32.totalorder %s11155_s13, %s11207_s6 }
 0x37e   : > { %p6430_p10 = scmp.lt.u32.totalorder %s6428_s20, %s6424_s16  ;;  %p6432_p12 = scmp.lt.u32.totalorder %s6424_s16, %s11155_s13 }
 0x37f   : > { %p6426_p7 = pnand %p6425_p4, %p6568_p5 }
 0x380   : > { %p6431_p11 = por %p6430_p10, %p6429_p9 }
 0x381   : > { %p6427_p8 = pneg %p6426_p7 }
 0x382   : > { %p6433_p13 = por %p6432_p12, %p6431_p11 }
 0x384   : > { %p6434_p0 = pnand %p6433_p13, %p6427_p8 }
 0x386   : > { %6437 = shalt.err (!%p6434_p0)
}
 0x387   : > { %6319 = dma.vmem_to_hbm [thread:$0]  (%p6568_p5), %s11157_s18, 256, %s11155_s13, %s6130_s12  }
 0x388 PF: > { %p6325_p1 = scmp.ge.s32.totalorder %s6472_s24, 2  ;;  %s6156_s9 = sand.u32 1, %s6460_s21  }
 0x389   : > { %s6157_s10 = scalar_lea.sflag [#allocation3], %s6156_s9 }
 0x38a   : > { %p6322_p2 = pnand %p6325_p1, %p6572_p6 }
 0x38c   : > { %6455 = dma.done.wait (!%p6322_p2), %s6157_s10, 256  }
 0x38d   : > { %6457 = vsyncadd (!%p6322_p2), %s6157_s10, 4294967040  ;;  %p16_p3 = scmp.ge.s32.totalorder %s6555_s27, 4   ;;  %s12242_s21 = smov %s6464_s22 }
 0x38e   : > { %s12243_s22 = smov %s6468_s23  ;;  %s12244_s23 = smov %s6566_s30 }
 0x38f   : > { %s12245_s24 = smov %s6555_s27  ;;  %18 = sbr.rel (!%p16_p3) target bundleno = 3 (0x3), region = 156 }
 0x396   :  { %6162 = vsyncpa [#allocation3], 1 }
 0x397   :  { %6164 = vsyncpa [#allocation3 + $0x1], 1 }

</bundles_post_ra>
